<compile_context>
chip_gen: v5e
topology: v5e:2x2
jax: 0.10.0
libtpu: 0.0.40
codegen_flags: <defaults>
</compile_context>

<pallas_src>
import jax
import jax.numpy as jnp
from jax import lax
from jax.experimental import pallas as pl
from jax.experimental.pallas import tpu as pltpu

_EPS = 1e-5  # torch BatchNorm2d default


# ------------------------------ Pallas kernel --------------------------------

def _matching_fused_kernel(x1_ref, w1_ref, b1_ref, w2_ref, b2_ref, o_ref, s_ref):
    """Fused MatchingModule forward for one batch element.

    x1_ref : (1, H*W, Kp)     bf16  im2col'd input (tap order kh,kw,ci; K zero-padded)
    w1_ref : (Kp, C)          bf16  stage-1 weight, BN1 scale folded, K zero-padded
    b1_ref : (1, C)           f32   stage-1 folded bias
    w2_ref : (9C, C)          bf16  stage-2 weights K-stacked per output phase:
                                      rows [0 :1C] = W11               (phase 0,0)
                                      rows [1C:3C] = W10 ; W12         (phase 0,1)
                                      rows [3C:5C] = W21 ; W01         (phase 1,0)
                                      rows [5C:9C] = W20;W22;W02;W00   (phase 1,1)
    b2_ref : (1, C)           f32   stage-2 folded bias
    o_ref  : (1, H, 2, W, 2C) f32   phase-packed output:
                                      o[0,r,pr,c,pc*C:(pc+1)*C] = out[2r+pr, 2c+pc]
    s_ref  : (H*W + 2W, 4C)   bf16  tap slab, lane blocks [a1 | a0 | b0 | b1]:
                                      a0 = y1[r,c]    a1 = y1[r,c+1]
                                      b0 = y1[r+1,c]  b1 = y1[r+1,c+1]
    """
    H = o_ref.shape[1]
    W = o_ref.shape[3]
    C = w2_ref.shape[1]
    HW = H * W
    f32 = jnp.float32
    bf16 = jnp.bfloat16

    # ---- stage 1: 3x3 conv (+BN+ReLU) as ONE (HW,Kp) x (Kp,C) MXU matmul -----
    y1 = jnp.dot(x1_ref[0], w1_ref[...], preferred_element_type=f32)
    y1 = jnp.maximum(y1 + b1_ref[...], 0.0).astype(bf16)                  # (HW, C)

    # ---- build the tap slab [a1 | a0 | b0 | b1]; each tap written ONCE -------
    s_ref[0:HW, C:2 * C] = y1                                             # a0
    # Zero rows stand for the implicit bottom padding row of the stage-1 output.
    # Written every step: scratch is per-core and the "parallel" batch axis may
    # be split across cores, so a program_id==0 guard would be unsafe.  It is
    # only 2*W rows (a handful of vreg stores).
    s_ref[HW:HW + 2 * W, C:2 * C] = jnp.zeros((2 * W, C), bf16)

    # Flat rows on the last image column wrap into the next image row when read
    # at +1, so the +1-shifted taps are masked there (implicit right padding
    # column of the stage-1 output).  Explicit bf16 zeros (no f32 promotion).
    col = lax.broadcasted_iota(jnp.int32, (HW, 1), 0) % W
    last_col = col == (W - 1)
    zero = jnp.zeros((HW, C), bf16)

    # TODO(synk): the two +1-row reads below are sublane-misaligned (one
    # relayout copy each, done exactly once per step); they could move to the
    # XLU via pltpu.roll if profiling shows the vld-path relayout matters.
    s_ref[0:HW, 0:C] = jnp.where(last_col, zero,
                                 s_ref[1:HW + 1, C:2 * C])                # a1
    s_ref[0:HW, 2 * C:3 * C] = s_ref[W:W + HW, C:2 * C]                   # b0 (aligned)
    s_ref[0:HW, 3 * C:4 * C] = jnp.where(last_col, zero,
                                         s_ref[W + 1:W + 1 + HW, C:2 * C])  # b1

    # ---- stage 2: transposed conv (k=3, s=2, p=1) as 4 deep-K matmuls --------
    #   out[2r,   2c  ] = a0@W11
    #   out[2r,   2c+1] = a1@W10 + a0@W12
    #   out[2r+1, 2c  ] = a0@W21 + b0@W01
    #   out[2r+1, 2c+1] = a1@W20 + a0@W22 + b0@W02 + b1@W00
    # Taps are concatenated along K so the MXU accumulates internally; the
    # bias+ReLU epilogue is applied to the dot value and stored exactly once.
    bias2 = b2_ref[...]                                                   # (1, C)

    def phase(pr, pc, l_lo, l_hi, k_lo, k_hi):
        y = jnp.dot(s_ref[0:HW, l_lo:l_hi], w2_ref[k_lo:k_hi, :],
                    preferred_element_type=f32)
        y = jnp.maximum(y + bias2, 0.0).reshape(H, W, C)
        o_ref[0, :, pr, :, pc * C:(pc + 1) * C] = y.astype(o_ref.dtype)

    phase(0, 0, C, 2 * C, 0, C)            # a0
    phase(0, 1, 0, 2 * C, C, 3 * C)        # a1 | a0
    phase(1, 0, C, 3 * C, 3 * C, 5 * C)    # a0 | b0
    phase(1, 1, 0, 4 * C, 5 * C, 9 * C)    # a1 | a0 | b0 | b1


# ----------------------------- folding / wrapper ------------------------------

def _fold_params(params):
    """Fold conv bias + inference BatchNorm into the weights (per-output-channel
    scale) and a single f32 bias, arranged in the layouts the kernel consumes."""
    s1 = params["bn1_gamma"] * lax.rsqrt(params["bn1_var"] + _EPS)
    b1 = params["bn1_beta"] + s1 * (params["b1"] - params["bn1_mean"])
    # Conv2d weight OIHW -> HWIO, BN scale folded into the output channel.
    w1 = jnp.transpose(params["w1"], (2, 3, 1, 0)) * s1                 # (3,3,Cin,C)

    s2 = params["bn2_gamma"] * lax.rsqrt(params["bn2_var"] + _EPS)
    b2 = params["bn2_beta"] + s2 * (params["b2"] - params["bn2_mean"])
    # ConvTranspose2d weight (Cin, Cout, kh, kw) -> (kh, kw, Cin, Cout), NOT
    # flipped: the phase decomposition uses the taps in scatter orientation.
    w2 = jnp.transpose(params["w2"], (2, 3, 0, 1)) * s2                 # (3,3,C,C)

    return {
        "w1": w1.astype(jnp.bfloat16),
        "b1": b1.astype(jnp.float32),
        "w2": w2.astype(jnp.bfloat16),
        "b2": b2.astype(jnp.float32),
    }


def _vmem_limit_bytes():
    """Per-generation scoped-VMEM limit: ~3/4 of physical VMEM (≈48 MiB on
    v7x, ≈96 MiB on v5e/v6e); conservative 48 MiB if the query is unavailable."""
    cap = 64 << 20
    try:
        cap = int(pltpu.get_tpu_info().vmem_capacity_bytes)
    except Exception:
        pass
    return int(cap * 3 // 4)


def _forward_folded(x_nchw, folded, output_size):
    N, Cin, H, W = x_nchw.shape
    C = folded["b1"].shape[0]
    Hout, Wout = output_size
    k, st, p = 3, 2, 1
    op_h = Hout - ((H - 1) * st - 2 * p + k)
    op_w = Wout - ((W - 1) * st - 2 * p + k)
    assert 0 <= op_h < st and 0 <= op_w < st, "invalid output_size"
    # Layout-free (HW,C)->(H,W,C) reshape and W-strided phase store need W % 8 == 0.
    assert W % 8 == 0, "W must be a multiple of 8"

    # NCHW -> NHWC bf16, im2col for the 3x3/pad-1 stage-1 conv (Cin is tiny, so
    # the 9-tap concat is cheap and turns stage 1 into ONE matmul).  K is
    # zero-padded to a full lane multiple for lane-dense x1 loads.
    x = jnp.transpose(x_nchw, (0, 2, 3, 1)).astype(jnp.bfloat16)
    x_pad = jnp.pad(x, ((0, 0), (1, 1), (1, 1), (0, 0)))
    cols = [x_pad[:, ki:ki + H, kj:kj + W, :]
            for ki in range(3) for kj in range(3)]
    K0 = 9 * Cin
    Kp = -(-K0 // 128) * 128
    x1 = jnp.concatenate(cols, axis=-1).reshape(N, H * W, K0)
    x1 = jnp.pad(x1, ((0, 0), (0, 0), (0, Kp - K0)))

    w1 = jnp.pad(folded["w1"].reshape(K0, C), ((0, Kp - K0), (0, 0)))
    b1 = folded["b1"].reshape(1, C)
    b2 = folded["b2"].reshape(1, C)

    # Stage-2 weights K-stacked per output phase, matching the kernel's
    # [a1 | a0 | b0 | b1] tap slab (scatter orientation, no spatial flip).
    w2 = folded["w2"]                                                   # (3,3,C,C)
    w2s = jnp.concatenate(
        [w2[1, 1],                                                      # (0,0): a0
         w2[1, 0], w2[1, 2],                                            # (0,1): a1, a0
         w2[2, 1], w2[0, 1],                                            # (1,0): a0, b0
         w2[2, 0], w2[2, 2], w2[0, 2], w2[0, 0]],                       # (1,1): a1,a0,b0,b1
        axis=0)                                                         # (9C, C)

    out5 = pl.pallas_call(
        _matching_fused_kernel,
        out_shape=jax.ShapeDtypeStruct((N, H, 2, W, 2 * C), jnp.float32),
        grid=(N,),
        in_specs=[
            pl.BlockSpec((1, H * W, Kp), lambda n: (n, 0, 0)),
            pl.BlockSpec((Kp, C), lambda n: (0, 0)),
            pl.BlockSpec((1, C), lambda n: (0, 0)),
            pl.BlockSpec((9 * C, C), lambda n: (0, 0)),
            pl.BlockSpec((1, C), lambda n: (0, 0)),
        ],
        out_specs=pl.BlockSpec((1, H, 2, W, 2 * C),
                               lambda n: (n, 0, 0, 0, 0)),
        scratch_shapes=[
            pltpu.VMEM((H * W + 2 * W, 4 * C), jnp.bfloat16),   # tap slab
        ],
        compiler_params=pltpu.CompilerParams(
            dimension_semantics=("parallel",),
            vmem_limit_bytes=_vmem_limit_bytes(),
        ),
    )(x1, w1, b1, w2s, b2)

    # (N, H, 2, W, 2, C) phase-packed == (N, 2H, 2W, C) row-major: free reshape.
    y2 = out5.reshape(N, 2 * H, 2 * W, C)[:, :Hout, :Wout, :]
    return jnp.transpose(y2, (0, 3, 1, 2))                  # NHWC -> NCHW


def matching_module_forward(x_nchw, params, output_size):
    return _forward_folded(x_nchw, _fold_params(params), output_size)


# --------------------------------- params ------------------------------------

def init_params(key, channels):
    ks = jax.random.split(key, 12)

    def u(k, shape, s=0.1):
        return jax.random.uniform(k, shape, jnp.float32, -s, s)

    p = {}
    # nn.Conv2d(channels, 256, 3, stride=1, padding=1): weight (256, C, 3, 3)
    p["w1"] = u(ks[0], (256, channels, 3, 3))
    p["b1"] = u(ks[1], (256,))
    p["bn1_gamma"] = 1.0 + u(ks[2], (256,))
    p["bn1_beta"] = u(ks[3], (256,))
    p["bn1_mean"] = u(ks[4], (256,))
    p["bn1_var"] = 1.0 + u(ks[5], (256,))
    # ConvTranspose2d(256, 256, 3, stride=2, padding=1): weight (Cin, Cout, 3, 3)
    p["w2"] = u(ks[6], (256, 256, 3, 3), 0.05)
    p["b2"] = u(ks[7], (256,))
    p["bn2_gamma"] = 1.0 + u(ks[8], (256,))
    p["bn2_beta"] = u(ks[9], (256,))
    p["bn2_mean"] = u(ks[10], (256,))
    p["bn2_var"] = 1.0 + u(ks[11], (256,))
    return p


# ------------------------------- references ----------------------------------

def reference_folded(x_nchw, folded, output_size):
    """Mixed-precision reference using the exact folded bf16 operands the kernel
    consumes (differs from the kernel only in f32 accumulation order)."""
    Hout, Wout = output_size
    H, W = x_nchw.shape[2:4]
    k, st, p = 3, 2, 1
    op_h = Hout - ((H - 1) * st - 2 * p + k)
    op_w = Wout - ((W - 1) * st - 2 * p + k)
    dn = ("NHWC", "HWIO", "NHWC")

    x = jnp.transpose(x_nchw, (0, 2, 3, 1)).astype(jnp.bfloat16)
    y = lax.conv_general_dilated(x, folded["w1"], (1, 1), ((1, 1), (1, 1)),
                                 dimension_numbers=dn,
                                 preferred_element_type=jnp.float32)
    y = jnp.maximum(y + folded["b1"], 0.0).astype(jnp.bfloat16)

    # transposed conv == dilated conv with the spatially flipped (kh,kw,ci,co) weight
    w2_hwio = jnp.flip(folded["w2"], axis=(0, 1))
    y = lax.conv_general_dilated(
        y, w2_hwio, (1, 1),
        ((k - 1 - p, k - 1 - p + op_h), (k - 1 - p, k - 1 - p + op_w)),
        lhs_dilation=(st, st), dimension_numbers=dn,
        preferred_element_type=jnp.float32)
    y = jnp.maximum(y + folded["b2"], 0.0)
    return jnp.transpose(y, (0, 3, 1, 2))


def reference_f32(x_nchw, params, output_size):
    """Unfolded pure-f32 reference following the PyTorch module (inference BN)."""
    x = jnp.transpose(x_nchw, (0, 2, 3, 1))
    dn = ("NHWC", "HWIO", "NHWC")
    w1 = jnp.transpose(params["w1"], (2, 3, 1, 0))
    y = lax.conv_general_dilated(x, w1, (1, 1), ((1, 1), (1, 1)),
                                 dimension_numbers=dn) + params["b1"]
    y = (y - params["bn1_mean"]) * lax.rsqrt(params["bn1_var"] + _EPS) \
        * params["bn1_gamma"] + params["bn1_beta"]
    y = jnp.maximum(y, 0.0)

    H, W = x.shape[1:3]
    Hout, Wout = output_size
    k, st, p = 3, 2, 1
    op_h = Hout - ((H - 1) * st - 2 * p + k)
    op_w = Wout - ((W - 1) * st - 2 * p + k)
    w2 = jnp.transpose(jnp.flip(params["w2"], axis=(2, 3)), (2, 3, 0, 1))
    y = lax.conv_general_dilated(
        y, w2, (1, 1),
        ((k - 1 - p, k - 1 - p + op_h), (k - 1 - p, k - 1 - p + op_w)),
        lhs_dilation=(st, st), dimension_numbers=dn) + params["b2"]
    y = (y - params["bn2_mean"]) * lax.rsqrt(params["bn2_var"] + _EPS) \
        * params["bn2_gamma"] + params["bn2_beta"]
    y = jnp.maximum(y, 0.0)
    return jnp.transpose(y, (0, 3, 1, 2))


# ----------------------------------- main -------------------------------------

if __name__ == "__main__":
    key = jax.random.PRNGKey(0)
    k_x, k_p = jax.random.split(key)

    channels = 4
    N, H, W = 2, 16, 16
    output_size = (32, 32)

    x = jax.random.normal(k_x, (N, channels, H, W), jnp.float32)
    params = init_params(k_p, channels)

    out = matching_module_forward(x, params, output_size)
    out = jax.block_until_ready(out)
    assert out.shape == (N, 256, output_size[0], output_size[1]), out.shape

    # Tight check: same folded bf16 operands, only f32 accumulation order differs.
    ref_m = reference_folded(x, _fold_params(params), output_size)
    err_m = float(jnp.max(jnp.abs(out - ref_m)))
    assert jnp.allclose(out, ref_m, rtol=5e-3, atol=5e-3), err_m

    # Sanity check against the unfolded full-f32 reference (bf16-level tolerance).
    ref_f = reference_f32(x, params, output_size)
    err_f = float(jnp.max(jnp.abs(out - ref_f)))
    assert jnp.allclose(out, ref_f, rtol=5e-2, atol=5e-2), err_f

    print("KERNEL_OK")
</pallas_src>

<mosaic_0001>
module attributes {stable_mosaic.version = 11 : i64} {
  func.func @_matching_fused_kernel(%arg0: i32, %arg1: memref<1x256x128xbf16, #tpu.memory_space<vmem>>, %arg2: memref<128x256xbf16, #tpu.memory_space<vmem>>, %arg3: memref<1x256xf32, #tpu.memory_space<vmem>>, %arg4: memref<2304x256xbf16, #tpu.memory_space<vmem>>, %arg5: memref<1x256xf32, #tpu.memory_space<vmem>>, %arg6: memref<1x16x2x16x512xf32, #tpu.memory_space<vmem>>, %arg7: memref<288x1024xbf16, #tpu.memory_space<vmem>>) attributes {dimension_semantics = [#tpu.dimension_semantics<parallel>], iteration_bounds = array<i64: 2>, scalar_prefetch = 0 : i64, scratch_operands = 1 : i64, tpu.core_type = #tpu.core_type<tc>, window_params = [{transform_indices = @transform_0, window_bounds = array<i64: 1, 256, 128>}, {pipeline_mode = #tpu.pipeline_mode<synchronous>, transform_indices = @transform_1, window_bounds = array<i64: 128, 256>}, {pipeline_mode = #tpu.pipeline_mode<synchronous>, transform_indices = @transform_2, window_bounds = array<i64: 1, 256>}, {pipeline_mode = #tpu.pipeline_mode<synchronous>, transform_indices = @transform_3, window_bounds = array<i64: 2304, 256>}, {pipeline_mode = #tpu.pipeline_mode<synchronous>, transform_indices = @transform_4, window_bounds = array<i64: 1, 256>}, {transform_indices = @transform_5, window_bounds = array<i64: 1, 16, 2, 16, 512>}]} {
    %c0 = arith.constant 0 : index
    %c0_0 = arith.constant 0 : index
    %c0_1 = arith.constant 0 : index
    %0 = vector.load %arg1[%c0, %c0_0, %c0_1] : memref<1x256x128xbf16, #tpu.memory_space<vmem>>, vector<1x256x128xbf16>
    %1 = vector.shape_cast %0 : vector<1x256x128xbf16> to vector<256x128xbf16>
    %c0_2 = arith.constant 0 : index
    %c0_3 = arith.constant 0 : index
    %2 = vector.load %arg2[%c0_2, %c0_3] : memref<128x256xbf16, #tpu.memory_space<vmem>>, vector<128x256xbf16>
    %cst = arith.constant dense<0.000000e+00> : vector<256x256xf32>
    %3 = tpu.matmul %1, %2, %cst {dimension_numbers = #tpu.dot_dimension_numbers<[1], [0], [0], [1], [0, 0, 1, 1], [], []>} : vector<256x128xbf16>, vector<128x256xbf16>, vector<256x256xf32> -> vector<256x256xf32>
    %c0_4 = arith.constant 0 : index
    %c0_5 = arith.constant 0 : index
    %4 = vector.load %arg3[%c0_4, %c0_5] : memref<1x256xf32, #tpu.memory_space<vmem>>, vector<1x256xf32>
    %5 = vector.broadcast %4 : vector<1x256xf32> to vector<256x256xf32>
    %6 = arith.addf %3, %5 : vector<256x256xf32>
    %cst_6 = arith.constant 0.000000e+00 : f32
    %7 = vector.broadcast %cst_6 : f32 to vector<256x256xf32>
    %8 = arith.maximumf %6, %7 : vector<256x256xf32>
    %9 = arith.truncf %8 : vector<256x256xf32> to vector<256x256xbf16>
    %c0_7 = arith.constant 0 : index
    %c256 = arith.constant 256 : index
    %10 = vector.load %arg7[%c0_7, %c256] : memref<288x1024xbf16, #tpu.memory_space<vmem>>, vector<256x256xbf16>
    tpu.vector_store %arg7[%c0_7, %c256], %9 {strides = array<i32>} : memref<288x1024xbf16, #tpu.memory_space<vmem>>, vector<256x256xbf16>,
    %cst_8 = arith.constant 0.000000e+00 : bf16
    %11 = vector.broadcast %cst_8 : bf16 to vector<32x256xbf16>
    %c256_9 = arith.constant 256 : index
    %c256_10 = arith.constant 256 : index
    %12 = vector.load %arg7[%c256_9, %c256_10] : memref<288x1024xbf16, #tpu.memory_space<vmem>>, vector<32x256xbf16>
    tpu.vector_store %arg7[%c256_9, %c256_10], %11 {strides = array<i32>} : memref<288x1024xbf16, #tpu.memory_space<vmem>>, vector<32x256xbf16>,
    %13 = tpu.iota {dimensions = array<i32: 0>} : vector<256x1xi32>
    %c16_i32 = arith.constant 16 : i32
    %c0_i32 = arith.constant 0 : i32
    %14 = arith.cmpi eq, %c16_i32, %c0_i32 : i32
    %c1_i32 = arith.constant 1 : i32
    %15 = arith.select %14, %c1_i32, %c16_i32 : i32
    %16 = vector.broadcast %15 : i32 to vector<256x1xi32>
    %17 = arith.remsi %13, %16 : vector<256x1xi32>
    %c0_i32_11 = arith.constant 0 : i32
    %18 = vector.broadcast %c0_i32_11 : i32 to vector<256x1xi32>
    %19 = arith.cmpi ne, %17, %18 : vector<256x1xi32>
    %c0_i32_12 = arith.constant 0 : i32
    %20 = vector.broadcast %c0_i32_12 : i32 to vector<256x1xi32>
    %21 = arith.cmpi slt, %17, %20 : vector<256x1xi32>
    %c0_i32_13 = arith.constant 0 : i32
    %22 = arith.cmpi slt, %15, %c0_i32_13 : i32
    %23 = vector.broadcast %22 : i1 to vector<256x1xi1>
    %24 = vector.broadcast %23 : vector<256x1xi1> to vector<256x1xi1>
    %25 = arith.xori %21, %24 : vector<256x1xi1>
    %26 = arith.andi %25, %19 : vector<256x1xi1>
    %27 = vector.broadcast %15 : i32 to vector<256x1xi32>
    %28 = arith.addi %17, %27 : vector<256x1xi32>
    %29 = arith.select %26, %28, %17 : vector<256x1xi1>, vector<256x1xi32>
    %c15_i32 = arith.constant 15 : i32
    %30 = vector.broadcast %c15_i32 : i32 to vector<256x1xi32>
    %31 = arith.cmpi eq, %29, %30 : vector<256x1xi32>
    %cst_14 = arith.constant 0.000000e+00 : bf16
    %32 = vector.broadcast %cst_14 : bf16 to vector<256x256xbf16>
    %c1 = arith.constant 1 : index
    %c256_15 = arith.constant 256 : index
    %33 = vector.load %arg7[%c1, %c256_15] : memref<288x1024xbf16, #tpu.memory_space<vmem>>, vector<256x256xbf16>
    %34 = vector.shape_cast %31 : vector<256x1xi1> to vector<256x1xi1>
    %35 = vector.broadcast %34 : vector<256x1xi1> to vector<256x256xi1>
    %36 = arith.select %35, %32, %33 : vector<256x256xi1>, vector<256x256xbf16>
    %c0_16 = arith.constant 0 : index
    %c0_17 = arith.constant 0 : index
    %37 = vector.load %arg7[%c0_16, %c0_17] : memref<288x1024xbf16, #tpu.memory_space<vmem>>, vector<256x256xbf16>
    tpu.vector_store %arg7[%c0_16, %c0_17], %36 {strides = array<i32>} : memref<288x1024xbf16, #tpu.memory_space<vmem>>, vector<256x256xbf16>,
    %c16 = arith.constant 16 : index
    %c256_18 = arith.constant 256 : index
    %38 = vector.load %arg7[%c16, %c256_18] : memref<288x1024xbf16, #tpu.memory_space<vmem>>, vector<256x256xbf16>
    %c0_19 = arith.constant 0 : index
    %c512 = arith.constant 512 : index
    %39 = vector.load %arg7[%c0_19, %c512] : memref<288x1024xbf16, #tpu.memory_space<vmem>>, vector<256x256xbf16>
    tpu.vector_store %arg7[%c0_19, %c512], %38 {strides = array<i32>} : memref<288x1024xbf16, #tpu.memory_space<vmem>>, vector<256x256xbf16>,
    %c17 = arith.constant 17 : index
    %c256_20 = arith.constant 256 : index
    %40 = vector.load %arg7[%c17, %c256_20] : memref<288x1024xbf16, #tpu.memory_space<vmem>>, vector<256x256xbf16>
    %41 = vector.shape_cast %31 : vector<256x1xi1> to vector<256x1xi1>
    %42 = vector.broadcast %41 : vector<256x1xi1> to vector<256x256xi1>
    %43 = arith.select %42, %32, %40 : vector<256x256xi1>, vector<256x256xbf16>
    %c0_21 = arith.constant 0 : index
    %c768 = arith.constant 768 : index
    %44 = vector.load %arg7[%c0_21, %c768] : memref<288x1024xbf16, #tpu.memory_space<vmem>>, vector<256x256xbf16>
    tpu.vector_store %arg7[%c0_21, %c768], %43 {strides = array<i32>} : memref<288x1024xbf16, #tpu.memory_space<vmem>>, vector<256x256xbf16>,
    %c0_22 = arith.constant 0 : index
    %c0_23 = arith.constant 0 : index
    %45 = vector.load %arg5[%c0_22, %c0_23] : memref<1x256xf32, #tpu.memory_space<vmem>>, vector<1x256xf32>
    %c0_24 = arith.constant 0 : index
    %c256_25 = arith.constant 256 : index
    %46 = vector.load %arg7[%c0_24, %c256_25] : memref<288x1024xbf16, #tpu.memory_space<vmem>>, vector<256x256xbf16>
    %c0_26 = arith.constant 0 : index
    %c0_27 = arith.constant 0 : index
    %47 = vector.load %arg4[%c0_26, %c0_27] : memref<2304x256xbf16, #tpu.memory_space<vmem>>, vector<256x256xbf16>
    %cst_28 = arith.constant dense<0.000000e+00> : vector<256x256xf32>
    %48 = tpu.matmul %46, %47, %cst_28 {dimension_numbers = #tpu.dot_dimension_numbers<[1], [0], [0], [1], [0, 0, 1, 1], [], []>} : vector<256x256xbf16>, vector<256x256xbf16>, vector<256x256xf32> -> vector<256x256xf32>
    %49 = vector.broadcast %45 : vector<1x256xf32> to vector<256x256xf32>
    %50 = arith.addf %48, %49 : vector<256x256xf32>
    %cst_29 = arith.constant 0.000000e+00 : f32
    %51 = vector.broadcast %cst_29 : f32 to vector<256x256xf32>
    %52 = arith.maximumf %50, %51 : vector<256x256xf32>
    %53 = vector.shape_cast %52 : vector<256x256xf32> to vector<16x16x256xf32>
    %c0_30 = arith.constant 0 : index
    %c0_31 = arith.constant 0 : index
    %c0_32 = arith.constant 0 : index
    %c0_33 = arith.constant 0 : index
    %c0_34 = arith.constant 0 : index
    %54 = vector.load %arg6[%c0_30, %c0_31, %c0_32, %c0_33, %c0_34] : memref<1x16x2x16x512xf32, #tpu.memory_space<vmem>>, vector<1x16x1x16x256xf32>
    %55 = vector.shape_cast %54 : vector<1x16x1x16x256xf32> to vector<16x16x256xf32>
    %56 = vector.shape_cast %53 : vector<16x16x256xf32> to vector<1x16x1x16x256xf32>
    tpu.vector_store %arg6[%c0_30, %c0_31, %c0_32, %c0_33, %c0_34], %56 {strides = array<i32>} : memref<1x16x2x16x512xf32, #tpu.memory_space<vmem>>, vector<1x16x1x16x256xf32>,
    %c0_35 = arith.constant 0 : index
    %c0_36 = arith.constant 0 : index
    %57 = vector.load %arg7[%c0_35, %c0_36] : memref<288x1024xbf16, #tpu.memory_space<vmem>>, vector<256x512xbf16>
    %c256_37 = arith.constant 256 : index
    %c0_38 = arith.constant 0 : index
    %58 = vector.load %arg4[%c256_37, %c0_38] : memref<2304x256xbf16, #tpu.memory_space<vmem>>, vector<512x256xbf16>
    %cst_39 = arith.constant dense<0.000000e+00> : vector<256x256xf32>
    %59 = tpu.matmul %57, %58, %cst_39 {dimension_numbers = #tpu.dot_dimension_numbers<[1], [0], [0], [1], [0, 0, 1, 1], [], []>} : vector<256x512xbf16>, vector<512x256xbf16>, vector<256x256xf32> -> vector<256x256xf32>
    %60 = vector.broadcast %45 : vector<1x256xf32> to vector<256x256xf32>
    %61 = arith.addf %59, %60 : vector<256x256xf32>
    %cst_40 = arith.constant 0.000000e+00 : f32
    %62 = vector.broadcast %cst_40 : f32 to vector<256x256xf32>
    %63 = arith.maximumf %61, %62 : vector<256x256xf32>
    %64 = vector.shape_cast %63 : vector<256x256xf32> to vector<16x16x256xf32>
    %c0_41 = arith.constant 0 : index
    %c0_42 = arith.constant 0 : index
    %c0_43 = arith.constant 0 : index
    %c0_44 = arith.constant 0 : index
    %c256_45 = arith.constant 256 : index
    %65 = vector.load %arg6[%c0_41, %c0_42, %c0_43, %c0_44, %c256_45] : memref<1x16x2x16x512xf32, #tpu.memory_space<vmem>>, vector<1x16x1x16x256xf32>
    %66 = vector.shape_cast %65 : vector<1x16x1x16x256xf32> to vector<16x16x256xf32>
    %67 = vector.shape_cast %64 : vector<16x16x256xf32> to vector<1x16x1x16x256xf32>
    tpu.vector_store %arg6[%c0_41, %c0_42, %c0_43, %c0_44, %c256_45], %67 {strides = array<i32>} : memref<1x16x2x16x512xf32, #tpu.memory_space<vmem>>, vector<1x16x1x16x256xf32>,
    %c0_46 = arith.constant 0 : index
    %c256_47 = arith.constant 256 : index
    %68 = vector.load %arg7[%c0_46, %c256_47] : memref<288x1024xbf16, #tpu.memory_space<vmem>>, vector<256x512xbf16>
    %c768_48 = arith.constant 768 : index
    %c0_49 = arith.constant 0 : index
    %69 = vector.load %arg4[%c768_48, %c0_49] : memref<2304x256xbf16, #tpu.memory_space<vmem>>, vector<512x256xbf16>
    %cst_50 = arith.constant dense<0.000000e+00> : vector<256x256xf32>
    %70 = tpu.matmul %68, %69, %cst_50 {dimension_numbers = #tpu.dot_dimension_numbers<[1], [0], [0], [1], [0, 0, 1, 1], [], []>} : vector<256x512xbf16>, vector<512x256xbf16>, vector<256x256xf32> -> vector<256x256xf32>
    %71 = vector.broadcast %45 : vector<1x256xf32> to vector<256x256xf32>
    %72 = arith.addf %70, %71 : vector<256x256xf32>
    %cst_51 = arith.constant 0.000000e+00 : f32
    %73 = vector.broadcast %cst_51 : f32 to vector<256x256xf32>
    %74 = arith.maximumf %72, %73 : vector<256x256xf32>
    %75 = vector.shape_cast %74 : vector<256x256xf32> to vector<16x16x256xf32>
    %c0_52 = arith.constant 0 : index
    %c0_53 = arith.constant 0 : index
    %c1_54 = arith.constant 1 : index
    %c0_55 = arith.constant 0 : index
    %c0_56 = arith.constant 0 : index
    %76 = vector.load %arg6[%c0_52, %c0_53, %c1_54, %c0_55, %c0_56] : memref<1x16x2x16x512xf32, #tpu.memory_space<vmem>>, vector<1x16x1x16x256xf32>
    %77 = vector.shape_cast %76 : vector<1x16x1x16x256xf32> to vector<16x16x256xf32>
    %78 = vector.shape_cast %75 : vector<16x16x256xf32> to vector<1x16x1x16x256xf32>
    tpu.vector_store %arg6[%c0_52, %c0_53, %c1_54, %c0_55, %c0_56], %78 {strides = array<i32>} : memref<1x16x2x16x512xf32, #tpu.memory_space<vmem>>, vector<1x16x1x16x256xf32>,
    %c0_57 = arith.constant 0 : index
    %c0_58 = arith.constant 0 : index
    %79 = vector.load %arg7[%c0_57, %c0_58] : memref<288x1024xbf16, #tpu.memory_space<vmem>>, vector<256x1024xbf16>
    %c1280 = arith.constant 1280 : index
    %c0_59 = arith.constant 0 : index
    %80 = vector.load %arg4[%c1280, %c0_59] : memref<2304x256xbf16, #tpu.memory_space<vmem>>, vector<1024x256xbf16>
    %cst_60 = arith.constant dense<0.000000e+00> : vector<256x256xf32>
    %81 = tpu.matmul %79, %80, %cst_60 {dimension_numbers = #tpu.dot_dimension_numbers<[1], [0], [0], [1], [0, 0, 1, 1], [], []>} : vector<256x1024xbf16>, vector<1024x256xbf16>, vector<256x256xf32> -> vector<256x256xf32>
    %82 = vector.broadcast %45 : vector<1x256xf32> to vector<256x256xf32>
    %83 = arith.addf %81, %82 : vector<256x256xf32>
    %cst_61 = arith.constant 0.000000e+00 : f32
    %84 = vector.broadcast %cst_61 : f32 to vector<256x256xf32>
    %85 = arith.maximumf %83, %84 : vector<256x256xf32>
    %86 = vector.shape_cast %85 : vector<256x256xf32> to vector<16x16x256xf32>
    %c0_62 = arith.constant 0 : index
    %c0_63 = arith.constant 0 : index
    %c1_64 = arith.constant 1 : index
    %c0_65 = arith.constant 0 : index
    %c256_66 = arith.constant 256 : index
    %87 = vector.load %arg6[%c0_62, %c0_63, %c1_64, %c0_65, %c256_66] : memref<1x16x2x16x512xf32, #tpu.memory_space<vmem>>, vector<1x16x1x16x256xf32>
    %88 = vector.shape_cast %87 : vector<1x16x1x16x256xf32> to vector<16x16x256xf32>
    %89 = vector.shape_cast %86 : vector<16x16x256xf32> to vector<1x16x1x16x256xf32>
    tpu.vector_store %arg6[%c0_62, %c0_63, %c1_64, %c0_65, %c256_66], %89 {strides = array<i32>} : memref<1x16x2x16x512xf32, #tpu.memory_space<vmem>>, vector<1x16x1x16x256xf32>,
    return
  }
  func.func @transform_0(%arg0: i32) -> (i32, i32, i32) {
    %c0_i32 = arith.constant 0 : i32
    %c0_i32_0 = arith.constant 0 : i32
    %c0_i32_1 = arith.constant 0 : i32
    return %arg0, %c0_i32, %c0_i32_0 : i32, i32, i32
  }
  func.func @transform_1(%arg0: i32) -> (i32, i32) {
    %c0_i32 = arith.constant 0 : i32
    %c0_i32_0 = arith.constant 0 : i32
    %c0_i32_1 = arith.constant 0 : i32
    return %c0_i32, %c0_i32_0 : i32, i32
  }
  func.func @transform_2(%arg0: i32) -> (i32, i32) {
    %c0_i32 = arith.constant 0 : i32
    %c0_i32_0 = arith.constant 0 : i32
    %c0_i32_1 = arith.constant 0 : i32
    return %c0_i32, %c0_i32_0 : i32, i32
  }
  func.func @transform_3(%arg0: i32) -> (i32, i32) {
    %c0_i32 = arith.constant 0 : i32
    %c0_i32_0 = arith.constant 0 : i32
    %c0_i32_1 = arith.constant 0 : i32
    return %c0_i32, %c0_i32_0 : i32, i32
  }
  func.func @transform_4(%arg0: i32) -> (i32, i32) {
    %c0_i32 = arith.constant 0 : i32
    %c0_i32_0 = arith.constant 0 : i32
    %c0_i32_1 = arith.constant 0 : i32
    return %c0_i32, %c0_i32_0 : i32, i32
  }
  func.func @transform_5(%arg0: i32) -> (i32, i32, i32, i32, i32) {
    %c0_i32 = arith.constant 0 : i32
    %c0_i32_0 = arith.constant 0 : i32
    %c0_i32_1 = arith.constant 0 : i32
    %c0_i32_2 = arith.constant 0 : i32
    %c0_i32_3 = arith.constant 0 : i32
    return %arg0, %c0_i32, %c0_i32_0, %c0_i32_1, %c0_i32_2 : i32, i32, i32, i32, i32
  }
}

</mosaic_0001>

<bundles_post_ra>
// kernel: tpu_custom_call.1
= control target key start
LH: loop header
LB: loop body
LE: loop exit
PB: predicated region body
PF: predicated region fallthrough
CT: control target
= control target key end

     0   :  { %10 = vsyncpa [#allocation4], 0  ;;  %s17715_s0 = inlined_call_operand.hbm [shape: bf16[2,256,128], index: 0, kind: input, shape index: {}]   ;;  %s17716_s1 = inlined_call_operand.hbm [shape: bf16[128,256], index: 1, kind: input, shape index: {}]   ;;  %s17717_s2 = inlined_call_operand.hbm [shape: f32[1,256], index: 2, kind: input, shape index: {}]   ;;  %s17718_s3 = inlined_call_operand.hbm [shape: bf16[2304,256], index: 3, kind: input, shape index: {}]   ;;  %s17719_s4 = inlined_call_operand.hbm [shape: f32[1,256], index: 4, kind: input, shape index: {}]   ;;  %s17720_s5 = inlined_call_operand.hbm [shape: f32[2,16,2,16,512], index: 5, kind: output, shape index: {}]  }
   0x1   :  { %12 = vsyncpa [#allocation4 + $0x1], 0 }
   0x2   :  { %13 = vsyncpa [#allocation7], 0 }
   0x3   :  { %14 = vsyncpa [#allocation10], 0 }
   0x4   :  { %15 = vsyncpa [#allocation5], 0 }
   0x5   :  { %17 = vsyncpa [#allocation5 + $0x1], 0  ;;  %s13833_s18 = smov 0   ;;  %s13835_s19 = smov 0  }
   0x6   :  { %s13837_s20 = smov 0   ;;  %s13839_s21 = smov 0  }
   0x7 LB: > { %s13854_s22 = sadd.s32 4294967295, %s13789_s21   ;;  %s10229_s23 = sadd.s32 4294967294, %s13789_s21   ;;  %s13789_s21 = sphi %s13839_s21, %s18779_s21   ;;  %s13785_s20 = sphi %s13837_s20, %s18778_s20   ;;  %s13781_s19 = sphi %s13835_s19, %s18777_s19   ;;  %s13777_s18 = sphi %s13833_s18, %s18776_s18  }
   0x8   : > { %p43_p0 = scmp.ne.s32.totalorder %s13781_s19, %s13777_s18  ;;  %p44_p1 = scmp.eq.s32.totalorder %s13854_s22, 0 }
   0x9   : > { %p151_p2 = scmp.eq.s32.totalorder %s13854_s22, 1  ;;  %p157_p3 = scmp.eq.s32.totalorder %s10229_s23, 1 }
   0xa   : > { %p13863_p4 = por %p44_p1, %p43_p0  ;;  %p10230_p5 = scmp.ge.s32.totalorder %s13789_s21, 1 }
   0xb   : > { %p13868_p6 = por %p157_p3, %p43_p0  ;;  %p164_p7 = scmp.lt.s32.totalorder %s13789_s21, 3 }
   0xc   : > { %s175_s28 = sshll.u32 %s17716_s1, 4  ;;  %s13791_s30 = smov [#allocation6]   ;;  %s176_s28 = int_to_ptr.hbm [resolvable:$true] %s175_s28 }
   0xd   : > { %p13876_p8 = pnand %p10230_p5, %p164_p7  ;;  %s177_s6 = sshll.u32 %s13791_s30, 4  ;;  %s178_s6 = int_to_ptr.vmem [resolvable:$true] %s177_s6 }
   0xe   : > { %s201_s10 = sshll.u32 %s17718_s3, 4  ;;  %s13792_s11 = smov 128   ;;  %s202_s10 = int_to_ptr.hbm [resolvable:$true] %s201_s10 }
   0xf   : > { %p13457_p9 = pneg %p13876_p8  ;;  %s13793_s12 = smov 8  }
  0x10   : > { %s13794_s13 = smov [#allocation9]   ;;  %s190_s17 = sshll.u32 %s17717_s2, 4  ;;  %s191_s17 = int_to_ptr.hbm [resolvable:$true] %s190_s17 }
  0x11   : > { %p13884_p10 = pnand %p13457_p9, %p44_p1  ;;  %s203_s14 = sshll.u32 %s13794_s13, 4  ;;  %s204_s14 = int_to_ptr.vmem [resolvable:$true] %s203_s14 }
  0x12   : > { %s216_s27 = sshll.u32 %s17719_s4, 4  ;;  %s13907_s9 = sadd.s32 1, %s13789_s21   ;;  %s217_s27 = int_to_ptr.hbm [resolvable:$true] %s216_s27 }
  0x13   : > { %13460 = dma.hbm_to_vmem [thread:$0]  (!%p13884_p10), %s176_s28, 2048, %s178_s6, [#allocation7], %s13792_s11, %s13792_s11, %s13793_s12  }
  0x14   : > { %13466 = dma.hbm_to_vmem [thread:$0]  (!%p13884_p10), %s202_s10, 36864, %s204_s14, [#allocation10], %s13792_s11, %s13792_s11, %s13793_s12  }
  0x15   : > { %s13795_s28 = smov [#allocation8]   ;;  %s13796_s6 = smov [#allocation11]  }
  0x16   : > { %s192_s30 = sshll.u32 %s13795_s28, 4  ;;  %s218_s8 = sshll.u32 %s13796_s6, 4  ;;  %s193_s30 = int_to_ptr.vmem [resolvable:$true] %s192_s30  ;;  %s219_s8 = int_to_ptr.vmem [resolvable:$true] %s218_s8 }
  0x17   : > { %13463 = dma.hbm_to_vmem [thread:$0]  (!%p13884_p10), %s191_s17, 32, %s193_s30, [#allocation7]  }
  0x18   : > { %13469 = dma.hbm_to_vmem [thread:$0]  (!%p13884_p10), %s217_s27, 32, %s219_s8, [#allocation10]  }
  0x19   : > { %s30_s10 = sadd.s32 1, %s13785_s20  ;;  %s27_s11 = ssub.s32 %s13789_s21, %s13907_s9 }
  0x1a   : > { %p37_p12 = scmp.ne.s32.totalorder %s13785_s20, %s13781_s19  ;;  %p28_p13 = scmp.eq.s32.totalorder %s27_s11, 0 }
  0x1b   : > { %p38_p0 = scmp.eq.s32.totalorder %s13789_s21, 0  ;;  %p13482_p5 = scmp.lt.s32.totalorder %s13789_s21, 2 }
  0x1c   : > { %p13917_p3 = por %p151_p2, %p37_p12  ;;  %s229_s14 = sand.u32 1, %s13785_s20  }
  0x1d   : > { %s13923_s13 = scalar_select %p28_p13, %s13785_s20, %s30_s10  }
  0x1e   : > { %p39_p7 = por %p38_p0, %p37_p12  ;;  %s10236_s7 = sshll.u32 %s229_s14, 7 }
  0x1f   : > { %s12811_s15 = sshll.u32 %s13789_s21, 7  ;;  %s233_s26 = scalar_lea.vmem [#allocation3], %s10236_s7 }
  0x20   : > { %s238_s23 = scalar_lea.hbm %s17715_s0, %s12811_s15  ;;  %s241_s27 = sshll.u32 %s233_s26, 4  ;;  %s242_s27 = int_to_ptr.vmem [resolvable:$true] %s241_s27 }
  0x21   : > { %s239_s28 = sshll.u32 %s238_s23, 4  ;;  %p13930_p2 = pnand %p13482_p5, %p39_p7  ;;  %s240_s28 = int_to_ptr.hbm [resolvable:$true] %s239_s28 }
  0x22   : > { %s230_s6 = scalar_lea.sflag [#allocation4], %s229_s14  ;;  %s13685_s8 = sshra.s32 %s240_s28, 4  ;;  %s13686_s8 = int_to_ptr.hbm [resolvable:$true] %s13685_s8 }
  0x23   : > { %s13687_s10 = scalar_lea.hbm %s13686_s8, 128  ;;  %p13689_p10 = pneg %p13930_p2 }
  0x24   : > { %p13688_p9 = scmp.ne.s32.totalorder %s13686_s8, %s13687_s10  ;;  %s13692_s15 = scalar_lea.hbm %s17715_s0, 256 }
  0x25   : > { %p13693_p0 = scmp.lt.s32.totalorder %s13686_s8, %s17715_s0  ;;  %p13694_p5 = scmp.lt.s32.totalorder %s13692_s15, %s13687_s10 }
  0x26   : > { %p13690_p12 = pnand %p13689_p10, %p13688_p9 }
  0x27   : > { %p13695_p7 = por %p13694_p5, %p13693_p0 }
  0x28   : > { %p13691_p13 = pneg %p13690_p12 }
  0x2a   : > { %p13696_p11 = pnand %p13695_p7, %p13691_p13 }
  0x2c   : > { %13699 = shalt.err (!%p13696_p11)
}
  0x2d   : > { %s13797_s14 = smov 64   ;;  %s13798_s23 = smov 4  }
  0x2e   : > { %13473 = dma.hbm_to_vmem [thread:$0]  (!%p13930_p2), %s240_s28, 2048, %s242_s27, %s230_s6, %s13797_s14, %s13797_s14, %s13798_s23  }
  0x2f   : > { %253 = sbr.rel (%p13876_p8) target bundleno = 2716 (0xa9c), region = 40 }
  0x34   : > { %s13947_s26 = sand.u32 1, %s13781_s19  }
  0x35   : > { %s10240_s11 = sshll.u32 %s13947_s26, 7  ;;  %s256_s8 = scalar_lea.sflag [#allocation4], %s13947_s26 }
  0x36   : > { %s13951_s10 = scalar_lea.vmem [#allocation3], %s10240_s11 }
  0x37   : > { %13760 = dma.done.wait (%p13863_p4), %s256_s8, 2048  }
  0x38   : > { %13762 = vsyncadd (%p13863_p4), %s256_s8, 4294965248 }
  0x39   : > { %13764 = dma.done.wait (%p44_p1), [#allocation7], 2080  }
  0x3a   : > { %13766 = vsyncadd (%p44_p1), [#allocation7], 4294965216 }
  0x3b   : > { %13768 = dma.done.wait (%p44_p1), [#allocation10], 36896  }
  0x3c   : > { %13770 = vsyncadd (%p44_p1), [#allocation10], 4294930400  ;;  %v13799_v0 = vmov 0   ;;  %v10368_v1 = vld [vmem:[#allocation6 + $0x70] sm:$0xf]  ;;  %v12812_v55 = vld [vmem:[%s13951_s10] sm:$0xff] }
  0x3d   : > { %849 = vst [vmem:[#allocation2 + $0x468] sm:$0xff] %v13799_v0  ;;  %v12843_v2 = vld [vmem:[#allocation6 + $0x74] sm:$0xf0]  ;;  %v12842_v3 = vld [vmem:[#allocation6 + $0x74] sm:$0xf]  ;;  %v12820_v56 = vld [vmem:[%s13951_s10 + $0x40] sm:$0xff] }
  0x3e   : > { %846 = vst [vmem:[#allocation2 + $0x408] sm:$0xff] %v13799_v0  ;;  %v10369_v4 = vor.u32 %v12843_v2, %v10368_v1  ;;  %v10370_v5 = vld [vmem:[#allocation6 + $0x78] sm:$0xf0]  ;;  %v10360_v6 = vld [vmem:[#allocation6 + $0x60] sm:$0xf]  ;;  %vm13800_vm0 = vmmov 0  }
  0x3f   : > { %848 = vst [vmem:[#allocation2 + $0x448] sm:$0xff] %v13799_v0  ;;  %v12841_v7 = vld [vmem:[#allocation6 + $0x64] sm:$0xf0]  ;;  %v10373_v8 = vor.u32 %v12842_v3, %v10370_v5  ;;  %v12840_v9 = vld [vmem:[#allocation6 + $0x64] sm:$0xf]  ;;  %vm1396_vm1 = vmpackc.low %vm13800_vm0, %vm13800_vm0  ;;  %s10245_s24 = sshll.u32 %s13947_s26, 11 }
  0x40   : > { %2467 = vst [vmem:[#allocation2 + $0x3d0] sm:$0xff] %v13799_v0  ;;  %v10362_v10 = vld [vmem:[#allocation6 + $0x68] sm:$0xf0]  ;;  %540 = vmatpush.bf16.msra.mxu0 %v10369_v4  ;;  %v10361_v11 = vor.u32 %v12841_v7, %v10360_v6  ;;  %13421 = vmatpush.bf16.msra.mxu2 %v10369_v4  ;;  %v10352_v13 = vld [vmem:[#allocation6 + $0x50] sm:$0xf]  ;;  %s15072_s29 = scalar_lea.vmem [#allocation12], %s10245_s24 }
  0x41   : > { %2468 = vst [vmem:[#allocation2 + $0x3f0] sm:$0xff] %v13799_v0  ;;  %629 = vmatpush.bf16.msra.mxu1 %v10373_v8  ;;  %v10365_v12 = vor.u32 %v12840_v9, %v10362_v10  ;;  %13429 = vmatpush.bf16.msra.mxu3 %v10373_v8  ;;  %v12839_v14 = vld [vmem:[#allocation6 + $0x54] sm:$0xf0]  ;;  %v12838_v15 = vld [vmem:[#allocation6 + $0x54] sm:$0xf]  ;;  %v12813_v6 = vld [vmem:[%s13951_s10 + $0x8] sm:$0xff] }
  0x42   : > { %v10354_v16 = vld [vmem:[#allocation6 + $0x58] sm:$0xf0]  ;;  %v10353_v17 = vor.u32 %v12839_v14, %v10352_v13  ;;  %v10344_v19 = vld [vmem:[#allocation6 + $0x40] sm:$0xf]  ;;  %v12837_v20 = vld [vmem:[#allocation6 + $0x44] sm:$0xf0] }
  0x43   : > { %v10357_v18 = vor.u32 %v12838_v15, %v10354_v16  ;;  %v12836_v21 = vld [vmem:[#allocation6 + $0x44] sm:$0xf]  ;;  %v10346_v22 = vld [vmem:[#allocation6 + $0x48] sm:$0xf0]  ;;  %v10345_v23 = vor.u32 %v12837_v20, %v10344_v19  ;;  %v10336_v25 = vld [vmem:[#allocation6 + $0x30] sm:$0xf] }
  0x44   : > { %541 = vmatpush.bf16.msra.mxu0 %v10361_v11  ;;  %13422 = vmatpush.bf16.msra.mxu2 %v10361_v11  ;;  %v10349_v24 = vor.u32 %v12836_v21, %v10346_v22  ;;  %v12835_v26 = vld [vmem:[#allocation6 + $0x34] sm:$0xf0]  ;;  %v12834_v27 = vld [vmem:[#allocation6 + $0x34] sm:$0xf]  ;;  %v10338_v28 = vld [vmem:[#allocation6 + $0x38] sm:$0xf0] }
  0x45   : > { %630 = vmatpush.bf16.msra.mxu1 %v10365_v12  ;;  %13430 = vmatpush.bf16.msra.mxu3 %v10365_v12  ;;  %v10337_v29 = vor.u32 %v12835_v26, %v10336_v25  ;;  %v10341_v30 = vor.u32 %v12834_v27, %v10338_v28  ;;  %v10328_v31 = vld [vmem:[#allocation6 + $0x20] sm:$0xf]  ;;  %v12833_v32 = vld [vmem:[#allocation6 + $0x24] sm:$0xf0]  ;;  %v12832_v33 = vld [vmem:[#allocation6 + $0x24] sm:$0xf] }
  0x46   : > { %v10330_v34 = vld [vmem:[#allocation6 + $0x28] sm:$0xf0]  ;;  %v10329_v35 = vor.u32 %v12833_v32, %v10328_v31  ;;  %v10320_v37 = vld [vmem:[#allocation6 + $0x10] sm:$0xf]  ;;  %v12831_v38 = vld [vmem:[#allocation6 + $0x14] sm:$0xf0] }
  0x47   : > { %v10333_v36 = vor.u32 %v12832_v33, %v10330_v34  ;;  %v12830_v39 = vld [vmem:[#allocation6 + $0x14] sm:$0xf]  ;;  %v10322_v40 = vld [vmem:[#allocation6 + $0x18] sm:$0xf0]  ;;  %v10321_v41 = vor.u32 %v12831_v38, %v10320_v37  ;;  %v10312_v43 = vld [vmem:[#allocation6] sm:$0xf] }
  0x48   : > { %542 = vmatpush.bf16.msra.mxu0 %v10353_v17  ;;  %13423 = vmatpush.bf16.msra.mxu2 %v10353_v17  ;;  %v10325_v42 = vor.u32 %v12830_v39, %v10322_v40  ;;  %v12829_v44 = vld [vmem:[#allocation6 + $0x4] sm:$0xf0]  ;;  %v12828_v45 = vld [vmem:[#allocation6 + $0x4] sm:$0xf]  ;;  %v10314_v46 = vld [vmem:[#allocation6 + $0x8] sm:$0xf0] }
  0x49   : > { %631 = vmatpush.bf16.msra.mxu1 %v10357_v18  ;;  %13431 = vmatpush.bf16.msra.mxu3 %v10357_v18  ;;  %v10560_v47 = vld [vmem:[#allocation9 + $0x70] sm:$0xf]  ;;  %v12891_v48 = vld [vmem:[#allocation9 + $0x74] sm:$0xf0]  ;;  %v10313_v51 = vor.u32 %v12829_v44, %v10312_v43  ;;  %v10317_v52 = vor.u32 %v12828_v45, %v10314_v46  ;;  %v12890_v57 = vld [vmem:[#allocation9 + $0x74] sm:$0xf] }
  0x4a   : > { %v10624_v49 = vld [vmem:[#allocation9 + $0xf0] sm:$0xf]  ;;  %v12907_v50 = vld [vmem:[#allocation9 + $0xf4] sm:$0xf0]  ;;  %v10561_v53 = vor.u32 %v12891_v48, %v10560_v47  ;;  %v10562_v58 = vld [vmem:[#allocation9 + $0x78] sm:$0xf0] }
  0x4b   : > { %v10625_v54 = vor.u32 %v12907_v50, %v10624_v49  ;;  %v12906_v59 = vld [vmem:[#allocation9 + $0xf4] sm:$0xf]  ;;  %v10565_v60 = vor.u32 %v12890_v57, %v10562_v58  ;;  %v10626_v61 = vld [vmem:[#allocation9 + $0xf8] sm:$0xf0]  ;;  %v10552_v62 = vld [vmem:[#allocation9 + $0x60] sm:$0xf] }
  0x4c   : > { %543 = vmatpush.bf16.msra.mxu0 %v10345_v23  ;;  %13424 = vmatpush.bf16.msra.mxu2 %v10345_v23  ;;  %v10629_v63 = vor.u32 %v12906_v59, %v10626_v61  ;;  %v12889_v1 = vld [vmem:[#allocation9 + $0x64] sm:$0xf0]  ;;  %v10616_v2 = vld [vmem:[#allocation9 + $0xe0] sm:$0xf]  ;;  %v12888_v8 = vld [vmem:[#allocation9 + $0x64] sm:$0xf] }
  0x4d   : > { %632 = vmatpush.bf16.msra.mxu1 %v10349_v24  ;;  %13432 = vmatpush.bf16.msra.mxu3 %v10349_v24  ;;  %v12905_v3 = vld [vmem:[#allocation9 + $0xe4] sm:$0xf0]  ;;  %v10553_v4 = vor.u32 %v12889_v1, %v10552_v62  ;;  %v10554_v9 = vld [vmem:[#allocation9 + $0x68] sm:$0xf0]  ;;  %v12904_v10 = vld [vmem:[#allocation9 + $0xe4] sm:$0xf] }
  0x4e   : > { %v10617_v5 = vor.u32 %v12905_v3, %v10616_v2  ;;  %v12821_v7 = vld [vmem:[%s13951_s10 + $0x48] sm:$0xff]  ;;  %v10557_v11 = vor.u32 %v12888_v8, %v10554_v9  ;;  %v10544_v13 = vld [vmem:[#allocation9 + $0x50] sm:$0xf]  ;;  %v12887_v15 = vld [vmem:[#allocation9 + $0x54] sm:$0xf0]  ;;  %s13420_s27 = sshll.u32 %s13854_s22, 11 }
  0x4f   : > { %v10618_v12 = vld [vmem:[#allocation9 + $0xe8] sm:$0xf0]  ;;  %v10608_v16 = vld [vmem:[#allocation9 + $0xd0] sm:$0xf]  ;;  %v12903_v17 = vld [vmem:[#allocation9 + $0xd4] sm:$0xf0]  ;;  %v10545_v18 = vor.u32 %v12887_v15, %v10544_v13  ;;  %v850_v13 = vlaneseq  ;;  %s10114_s6 = scalar_lea.hbm %s17720_s5, %s13420_s27 }
  0x50   : > { %544 = vmatpush.bf16.msra.mxu0 %v10337_v29  ;;  %13425 = vmatpush.bf16.msra.mxu2 %v10337_v29  ;;  %v10621_v14 = vor.u32 %v12904_v10, %v10618_v12  ;;  %v10609_v19 = vor.u32 %v12903_v17, %v10608_v16  ;;  %v12814_v20 = vld [vmem:[%s13951_s10 + $0x10] sm:$0xff]  ;;  %v10546_v23 = vld [vmem:[#allocation9 + $0x58] sm:$0xf0]  ;;  %v10536_v27 = vld [vmem:[#allocation9 + $0x40] sm:$0xf]  ;;  %s10115_s7 = sshll.u32 %s15072_s29, 4  ;;  %s10116_s7 = int_to_ptr.vmem [resolvable:$true] %s10115_s7 }
  0x51   : > { %633 = vmatpush.bf16.msra.mxu1 %v10341_v30  ;;  %13433 = vmatpush.bf16.msra.mxu3 %v10341_v30  ;;  %v12822_v21 = vld [vmem:[%s13951_s10 + $0x50] sm:$0xff]  ;;  %v10610_v26 = vld [vmem:[#allocation9 + $0xd8] sm:$0xf0]  ;;  %v12885_v29 = vld [vmem:[#allocation9 + $0x44] sm:$0xf0]  ;;  %v13984_v16 = vshrl.u32 %v850_v13, 7 }
  0x52   : > { %v12886_v22 = vld [vmem:[#allocation9 + $0x54] sm:$0xf]  ;;  %v10600_v30 = vld [vmem:[#allocation9 + $0xc0] sm:$0xf]  ;;  %v12901_v31 = vld [vmem:[#allocation9 + $0xc4] sm:$0xf0]  ;;  %v10537_v32 = vor.u32 %v12885_v29, %v10536_v27 }
  0x53   : > { %v12902_v24 = vld [vmem:[#allocation9 + $0xd4] sm:$0xf]  ;;  %v10549_v25 = vor.u32 %v12886_v22, %v10546_v23  ;;  %v10601_v33 = vor.u32 %v12901_v31, %v10600_v30  ;;  %v10538_v37 = vld [vmem:[#allocation9 + $0x48] sm:$0xf0]  ;;  %v12900_v38 = vld [vmem:[#allocation9 + $0xc4] sm:$0xf] }
  0x54   : > { %545 = vmatpush.bf16.msra.mxu0 %v10329_v35  ;;  %13426 = vmatpush.bf16.msra.mxu2 %v10329_v35  ;;  %v10613_v28 = vor.u32 %v12902_v24, %v10610_v26  ;;  %v12815_v34 = vld [vmem:[%s13951_s10 + $0x18] sm:$0xff]  ;;  %v10602_v40 = vld [vmem:[#allocation9 + $0xc8] sm:$0xf0]  ;;  %v10592_v44 = vld [vmem:[#allocation9 + $0xb0] sm:$0xf]  ;;  %v852_v17 = vadd.s32 8, %v13984_v16 }
  0x55   : > { %634 = vmatpush.bf16.msra.mxu1 %v10333_v36  ;;  %13434 = vmatpush.bf16.msra.mxu3 %v10333_v36  ;;  %v12823_v35 = vld [vmem:[%s13951_s10 + $0x58] sm:$0xff]  ;;  %v12884_v36 = vld [vmem:[#allocation9 + $0x44] sm:$0xf]  ;;  %v12881_v57 = vld [vmem:[#allocation9 + $0x24] sm:$0xf0]  ;;  %v1428_v22 = vsel %vm1396_vm1, 65537, %v13799_v0 }
  0x56   : > { %v10541_v39 = vor.u32 %v12884_v36, %v10538_v37  ;;  %v12883_v43 = vld [vmem:[#allocation9 + $0x34] sm:$0xf0]  ;;  %v12816_v48 = vld [vmem:[%s13951_s10 + $0x20] sm:$0xff]  ;;  %v12882_v50 = vld [vmem:[#allocation9 + $0x34] sm:$0xf]  ;;  %v866_v23 = vadd.s32 120, %v13984_v16 }
  0x57   : > { %v12899_v45 = vld [vmem:[#allocation9 + $0xb4] sm:$0xf0]  ;;  %v12824_v49 = vld [vmem:[%s13951_s10 + $0x60] sm:$0xff]  ;;  %v12897_v59 = vld [vmem:[#allocation9 + $0xa4] sm:$0xf0]  ;;  %v1464_v31 = vshrl.u32 %v1428_v22, 16 }
  0x58   : > { %546 = vmatpush.bf16.msra.mxu0 %v10321_v41  ;;  %13427 = vmatpush.bf16.msra.mxu2 %v10321_v41  ;;  %v10528_v41 = vld [vmem:[#allocation9 + $0x30] sm:$0xf]  ;;  %v10593_v47 = vor.u32 %v12899_v45, %v10592_v44  ;;  %v10584_v58 = vld [vmem:[#allocation9 + $0xa0] sm:$0xf]  ;;  %v12817_v62 = vld [vmem:[%s13951_s10 + $0x28] sm:$0xff]  ;;  %v992_v30 = vand.u32 15, %v866_v23 }
  0x59   : > { %635 = vmatpush.bf16.msra.mxu1 %v10325_v42  ;;  %13435 = vmatpush.bf16.msra.mxu3 %v10325_v42  ;;  %v10605_v42 = vor.u32 %v12900_v38, %v10602_v40  ;;  %v10529_v46 = vor.u32 %v12883_v43, %v10528_v41  ;;  %v10585_v61 = vor.u32 %v12897_v59, %v10584_v58  ;;  %v12880_v1 = vld [vmem:[#allocation9 + $0x24] sm:$0xf]  ;;  %v10522_v2 = vld [vmem:[#allocation9 + $0x28] sm:$0xf0]  ;;  %v12879_v8 = vld [vmem:[#allocation9 + $0x14] sm:$0xf0] }
  0x5a   : > { %v12896_v3 = vld [vmem:[#allocation9 + $0xa4] sm:$0xf]  ;;  %v10576_v9 = vld [vmem:[#allocation9 + $0x90] sm:$0xf]  ;;  %v12895_v10 = vld [vmem:[#allocation9 + $0x94] sm:$0xf0] }
  0x5b   : > { %v10577_v12 = vor.u32 %v12895_v10, %v10576_v9  ;;  %v12826_v15 = vld [vmem:[%s13951_s10 + $0x70] sm:$0xff]  ;;  %vm13999_vm4 = vcmp.eq.s32.totalorder %v992_v30, 15  ;;  %v10568_v36 = vld [vmem:[#allocation9 + $0x80] sm:$0xf]  ;;  %v12876_v40 = vld [vmem:[#allocation9 + $0x4] sm:$0xf] }
  0x5c   : > { %547 = vmatpush.bf16.msra.mxu0 %v10313_v51  ;;  %13428 = vmatpush.bf16.msra.mxu2 %v10313_v51  ;;  %v10530_v51 = vld [vmem:[#allocation9 + $0x38] sm:$0xf0]  ;;  %v12878_v24 = vld [vmem:[#allocation9 + $0x14] sm:$0xf]  ;;  %v1466_v41 = vrot.slane %v1464_v31, 7  ;;  %vm1411_vm5 = vmpackc.low %vm13999_vm4, %vm13999_vm4  ;;  %v854_v23 = vadd.s32 24, %v13984_v16 }
  0x5d   : > { %636 = vmatpush.bf16.msra.mxu1 %v10317_v52  ;;  %13436 = vmatpush.bf16.msra.mxu3 %v10317_v52  ;;  %v12898_v52 = vld [vmem:[#allocation9 + $0xb4] sm:$0xf]  ;;  %v10506_v44 = vld [vmem:[#allocation9 + $0x8] sm:$0xf0]  ;;  %v12892_v45 = vld [vmem:[#allocation9 + $0x84] sm:$0xf] }
  0x5e   : > { %v12894_v26 = vld [vmem:[#allocation9 + $0x94] sm:$0xf]  ;;  %vm1460_vm6 = vsmask.f32 256  ;;  %vm1461_vm7 = vsmask.f32 4368 }
  0x5f   : > { %548 = vmatmul.bf16.vlgmr.msra.gmra.mxu0 %v12812_v55  ;;  %588 = vmatmul.bf16.vlgmr.msra.gmra.mxu2 %v12820_v56  ;;  %vm14028_vm8 = vmor %vm1460_vm6, %vm1461_vm7  ;;  %vm2014_vm1 = vsmask.f32 3328  ;;  %s10117_s15 = sshll.u32 %s10114_s6, 4  ;;  %s10103_s22 = scalar_lea.sflag [#allocation5], %s13947_s26  ;;  %s10118_s15 = int_to_ptr.hbm [resolvable:$true] %s10117_s15 }
  0x60   : > { %3313 = vmatpush.bf16.msrb.mxu2 %v10561_v53  ;;  %637 = vmatmul.bf16.vlgmr.msra.gmra.mxu1 %v12812_v55  ;;  %v10533_v53 = vor.u32 %v12882_v50, %v10530_v51  ;;  %v10520_v55 = vld [vmem:[#allocation9 + $0x20] sm:$0xf]  ;;  %s13729_s16 = sshra.s32 %s10118_s15, 4  ;;  %s13735_s11 = scalar_lea.hbm %s17720_s5, 4096  ;;  %s13730_s16 = int_to_ptr.hbm [resolvable:$true] %s13729_s16 }
  0x61   : > { %3402 = vmatpush.bf16.msrb.mxu3 %v10625_v54  ;;  %3491 = vmatpush.bf16.msrb.mxu0 %v10565_v60  ;;  %v10594_v54 = vld [vmem:[#allocation9 + $0xb8] sm:$0xf0]  ;;  %v10521_v60 = vor.u32 %v12881_v57, %v10520_v55  ;;  %s13731_s17 = scalar_lea.hbm %s13730_s16, 2048  ;;  %p13736_p11 = scmp.lt.s32.totalorder %s13730_s16, %s17720_s5 }
  0x62   : > { %677 = vmatmul.bf16.vlgmr.msra.gmra.mxu3 %v12820_v56  ;;  %3580 = vmatpush.bf16.msrb.mxu1 %v10629_v63  ;;  %v10597_v56 = vor.u32 %v12898_v52, %v10594_v54  ;;  %v12825_v63 = vld [vmem:[%s13951_s10 + $0x68] sm:$0xff]  ;;  %v358_v54 = vld [vmem:[#allocation8] sm:$0x3]  ;;  %p13732_p1 = scmp.ne.s32.totalorder %s13730_s16, %s13731_s17  ;;  %p13737_p2 = scmp.lt.s32.totalorder %s13735_s11, %s13731_s17 }
  0x63   : > { %v14014_v58 = vperm.slane %v358_v54, 0  ;;  %v14016_v59 = vperm.slane %v358_v54, 1 }
  0x64   : > { %3314 = vmatpush.bf16.msrb.mxu2 %v10553_v4  ;;  %v10525_v4 = vor.u32 %v12880_v1, %v10522_v2  ;;  %v14023_v1 = vunpack.c.l.b16 %v13799_v0  ;;  %v14026_v2 = vunpack.c.h.b16 %v13799_v0  ;;  %p13733_p4 = pnand %p13732_p1, %p13917_p3  ;;  %p13738_p9 = por %p13737_p2, %p13736_p11 }
  0x65   : > { %3403 = vmatpush.bf16.msrb.mxu3 %v10617_v5  ;;  %3492 = vmatpush.bf16.msrb.mxu0 %v10557_v11  ;;  %v10586_v5 = vld [vmem:[#allocation9 + $0xa8] sm:$0xf0] }
  0x66   : > { %3581 = vmatpush.bf16.msrb.mxu1 %v10621_v14  ;;  %v12818_v14 = vld [vmem:[%s13951_s10 + $0x30] sm:$0xff]  ;;  %18008 = vst [vmem:[#allocation18_spill] sm:$0xff] %v14023_v1  ;;  %p13734_p8 = pneg %p13733_p4 }
  0x67   : > { %18009 = vst [vmem:[#allocation19_spill] sm:$0xff] %v14026_v2 }
  0x68   : > { %3315 = vmatpush.bf16.msrb.mxu2 %v10545_v18  ;;  %v894_v18 = vand.u32 15, %v852_v17  ;;  %p13739_p10 = pnand %p13738_p9, %p13734_p8 }
  0x69   : > { %3404 = vmatpush.bf16.msrb.mxu3 %v10609_v19  ;;  %3493 = vmatpush.bf16.msrb.mxu0 %v10549_v25  ;;  %v10514_v25 = vld [vmem:[#allocation9 + $0x18] sm:$0xf0] }
  0x6a   : > { %3582 = vmatpush.bf16.msrb.mxu1 %v10613_v28  ;;  %vm13987_vm2 = vcmp.eq.s32.totalorder %v894_v18, 15  ;;  %v10517_v27 = vor.u32 %v12878_v24, %v10514_v25  ;;  %v10578_v28 = vld [vmem:[#allocation9 + $0x98] sm:$0xf0] }
  0x6b   : > { %vm1397_vm3 = vmpackc.low %vm13987_vm2, %vm13987_vm2  ;;  %v10581_v29 = vor.u32 %v12894_v26, %v10578_v28  ;;  %vm2015_vm2 = vsmask.f32 7440 }
  0x6c   : > { %3316 = vmatpush.bf16.msrb.mxu2 %v10537_v32  ;;  %v1429_v32 = vsel %vm1397_vm3, 65537, %v13799_v0  ;;  %vm14105_vm4 = vmor %vm2014_vm1, %vm2015_vm2 }
  0x6d   : > { %3405 = vmatpush.bf16.msrb.mxu3 %v10601_v33  ;;  %3494 = vmatpush.bf16.msrb.mxu0 %v10541_v39  ;;  %v1472_v37 = vshrl.u32 %v1429_v32, 16  ;;  %v12893_v39 = vld [vmem:[#allocation9 + $0x84] sm:$0xf0] }
  0x6e   : > { %3583 = vmatpush.bf16.msrb.mxu1 %v10605_v42  ;;  %v1467_v42 = vshll.u32 %v1428_v22, 16  ;;  %v10569_v43 = vor.u32 %v12893_v39, %v10568_v36 }
  0x6f   : > { %553 = vmatmul.bf16.gmra.mxu0 %v12813_v6  ;;  %593 = vmatmul.bf16.gmra.mxu2 %v12821_v7  ;;  %v1474_v52 = vrot.slane %v1472_v37, 7 }
  0x70   : > { %642 = vmatmul.bf16.gmra.mxu1 %v12813_v6  ;;  %3317 = vmatpush.bf16.msrb.mxu2 %v10529_v46  ;;  %v10512_v6 = vld [vmem:[#allocation9 + $0x10] sm:$0xf]  ;;  %v1443_v46 = vsel %vm1411_vm5, 65537, %v13799_v0  ;;  %v14007_v55 = vor.u32 %v1467_v42, %v1466_v41 }
  0x71   : > { %3406 = vmatpush.bf16.msrb.mxu3 %v10593_v47  ;;  %3495 = vmatpush.bf16.msrb.mxu0 %v10533_v53  ;;  %v10513_v11 = vor.u32 %v12879_v8, %v10512_v6  ;;  %v10509_v47 = vor.u32 %v12876_v40, %v10506_v44  ;;  %v1601_v50 = vshll.u32 %v1443_v46, 16  ;;  %v1475_v53 = vshll.u32 %v1429_v32, 16  ;;  %v10944_v42 = vld [vmem:[#allocation9 + $0x170] sm:$0xf] }
  0x72   : > { %682 = vmatmul.bf16.gmra.mxu3 %v12821_v7  ;;  %3584 = vmatpush.bf16.msrb.mxu1 %v10597_v56  ;;  %v10589_v7 = vor.u32 %v12896_v3, %v10586_v5  ;;  %v868_v5 = vadd.s32 136, %v13984_v16 }
  0x74   : > { %3318 = vmatpush.bf16.msrb.mxu2 %v10521_v60  ;;  %v14018_v60 = vrot.slane %v1466_v41, 4  ;;  %v908_v41 = vand.u32 15, %v854_v23 }
  0x75   : > { %3407 = vmatpush.bf16.msrb.mxu3 %v10585_v61  ;;  %3496 = vmatpush.bf16.msrb.mxu0 %v10525_v4  ;;  %v1477_v61 = vor.u32 %v1475_v53, %v1474_v52 }
  0x76   : > { %3585 = vmatpush.bf16.msrb.mxu1 %v10589_v7  ;;  %vm14092_vm3 = vcmp.eq.s32.totalorder %v908_v41, 15 }
  0x77   : > { %v1478_v8 = vsel %vm14028_vm8, %v14018_v60, %v1477_v61  ;;  %vm1399_vm7 = vmpackc.low %vm14092_vm3, %vm14092_vm3 }
  0x78   : > { %3319 = vmatpush.bf16.msrb.mxu2 %v10513_v11  ;;  %v1758_v18 = vunpack.c.h.b16 %v1478_v8 }
  0x79   : > { %3408 = vmatpush.bf16.msrb.mxu3 %v10577_v12  ;;  %3497 = vmatpush.bf16.msrb.mxu0 %v10517_v27 }
  0x7a   : > { %3586 = vmatpush.bf16.msrb.mxu1 %v10581_v29  ;;  %vm14072_vm14 = vcmp.ne.s32.totalorder %v1758_v18, %v14026_v2 }
  0x7d   : > { %3409 = vmatpush.bf16.msrb.mxu3 %v10569_v43  ;;  %3498 = vmatpush.bf16.msrb.mxu0 %v10509_v47 }
  0x7f   : > { %558 = vmatmul.bf16.gmra.mxu0 %v12814_v20  ;;  %598 = vmatmul.bf16.gmra.mxu2 %v12822_v21 }
  0x80   : > { %647 = vmatmul.bf16.gmra.mxu1 %v12814_v20  ;;  %v12819_v20 = vld [vmem:[%s13951_s10 + $0x38] sm:$0xff] }
  0x82   : > { %687 = vmatmul.bf16.gmra.mxu3 %v12822_v21  ;;  %v12827_v21 = vld [vmem:[%s13951_s10 + $0x78] sm:$0xff] }
  0x8f   : > { %563 = vmatmul.bf16.gmra.mxu0 %v12815_v34  ;;  %603 = vmatmul.bf16.gmra.mxu2 %v12823_v35 }
  0x90   : > { %652 = vmatmul.bf16.gmra.mxu1 %v12815_v34  ;;  %v10504_v34 = vld [vmem:[#allocation9] sm:$0xf] }
  0x92   : > { %692 = vmatmul.bf16.gmra.mxu3 %v12823_v35  ;;  %v12877_v35 = vld [vmem:[#allocation9 + $0x4] sm:$0xf0] }
  0x93   : > { %v10505_v38 = vor.u32 %v12877_v35, %v10504_v34 }
  0x95   : > { %3320 = vmatpush.bf16.msrb.mxu2 %v10505_v38 }
  0x9f   : > { %568 = vmatmul.bf16.gmra.mxu0 %v12816_v48  ;;  %608 = vmatmul.bf16.gmra.mxu2 %v12824_v49 }
  0xa0   : > { %657 = vmatmul.bf16.gmra.mxu1 %v12816_v48  ;;  %v10570_v48 = vld [vmem:[#allocation9 + $0x88] sm:$0xf0] }
  0xa1   : > { %v10573_v51 = vor.u32 %v12892_v45, %v10570_v48  ;;  %v12987_v45 = vld [vmem:[#allocation9 + $0x174] sm:$0xf0] }
  0xa2   : > { %697 = vmatmul.bf16.gmra.mxu3 %v12824_v49  ;;  %v1598_v49 = vshrl.u32 %v1443_v46, 16  ;;  %v11008_v46 = vld [vmem:[#allocation9 + $0x1f0] sm:$0xf] }
  0xa3   : > { %3587 = vmatpush.bf16.msrb.mxu1 %v10573_v51 }
  0xa4   : > { %v14009_v56 = vrot.slane %v1598_v49, 7  ;;  %v10945_v49 = vor.u32 %v12987_v45, %v10944_v42 }
  0xa6   : > { %v14012_v57 = vor.u32 %v1601_v50, %v14009_v56  ;;  %v13003_v50 = vld [vmem:[#allocation9 + $0x1f4] sm:$0xf0]  ;;  %4565 = vmatpush.bf16.msra.mxu2 %v10945_v49 }
  0xa7   : > { %v11009_v53 = vor.u32 %v13003_v50, %v11008_v46 }
  0xa8   : > { %18007 = vst [vmem:[#allocation17_spill] sm:$0xff] %v14012_v57 }
  0xa9   : > { %4654 = vmatpush.bf16.msra.mxu3 %v11009_v53 }
  0xaf   : > { %573 = vmatmul.bf16.gmra.mxu0 %v12817_v62  ;;  %613 = vmatmul.bf16.gmra.mxu2 %v12825_v63 }
  0xb0   : > { %662 = vmatmul.bf16.gmra.mxu1 %v12817_v62  ;;  %v1750_v62 = vunpack.c.l.b16 %v14007_v55 }
  0xb2   : > { %702 = vmatmul.bf16.gmra.mxu3 %v12825_v63  ;;  %v1751_v63 = vunpack.c.h.b16 %v14007_v55  ;;  %vm14039_vm9 = vcmp.ne.s32.totalorder %v1750_v62, %v14023_v1 }
  0xb4   : > { %vm14044_vm10 = vcmp.ne.s32.totalorder %v1751_v63, %v14026_v2 }
  0xb5   : > { %vm1756_vm11 = vmpackc.low %vm14044_vm10, %vm14039_vm9 }
  0xbf   : > { %578 = vmatmul.bf16.gmra.mxu0 %v12818_v14  ;;  %618 = vmatmul.bf16.gmra.mxu2 %v12826_v15 }
  0xc0   : > { %667 = vmatmul.bf16.gmra.mxu1 %v12818_v14  ;;  %v1757_v14 = vunpack.c.l.b16 %v1478_v8  ;;  %v18024_v8 = vmov 0 }
  0xc1   : > { %v18025_v8 = vsel %vm14105_vm4, 4294967295, %v18024_v8 }
  0xc2   : > { %707 = vmatmul.bf16.gmra.mxu3 %v12826_v15  ;;  %v1006_v15 = vand.u32 15, %v868_v5  ;;  %vm14060_vm12 = vcmp.ne.s32.totalorder %v1757_v14, %v14023_v1  ;;  %18026 = vst [vmem:[#allocation20_spill] sm:$0xff] %v18025_v8 }
  0xc3   : > { %vm1763_vm0 = vmpackc.low %vm14072_vm14, %vm14060_vm12 }
  0xc4   : > { %vm14065_vm13 = vcmp.eq.s32.totalorder %v1006_v15, 15  ;;  %v11136_v15 = vld [vmem:[#allocation9 + $0x2f0] sm:$0xf] }
  0xc5   : > { %vm1413_vm15 = vmpackc.low %vm14065_vm13, %vm14065_vm13 }
  0xc6   : > { %v1445_v62 = vsel %vm1413_vm15, 65537, %v13799_v0 }
  0xcf   : > { %583 = vmatmul.bf16.gmra.mxu0 %v12819_v20  ;;  %623 = vmatmul.bf16.gmra.mxu2 %v12827_v21 }
  0xd0   : > { %672 = vmatmul.bf16.gmra.mxu1 %v12819_v20  ;;  %v1479_v20 = vrot.slane %v1474_v52, 4 }
  0xd2   : > { %712 = vmatmul.bf16.gmra.mxu3 %v12827_v21  ;;  %v1487_v37 = vsel %vm14028_vm8, %v1479_v20, %v14007_v55  ;;  %v1616_v20 = vshrl.u32 %v1445_v62, 16 }
  0xd3   : > { %v1764_v47 = vunpack.c.l.b16 %v1487_v37  ;;  %v1765_v48 = vunpack.c.h.b16 %v1487_v37 }
  0xd4   : > { %v14134_v37 = vrot.slane %v1616_v20, 7 }
  0xd5   : > { %vm14110_vm5 = vcmp.ne.s32.totalorder %v1764_v47, %v14023_v1  ;;  %vm14115_vm6 = vcmp.ne.s32.totalorder %v1765_v48, %v14026_v2 }
  0xd6   : > { %vm1770_vm13 = vmpackc.low %vm14115_vm6, %vm14110_vm5 }
  0xdc   : > { %v549_v4 = vpop.f32.mrf.mxu0 }
  0xdd   : > { %v550_v6 = vadd.f32 %v549_v4, %v14014_v58  ;;  %v638_v7 = vpop.f32.mrf.mxu1 }
  0xde   : > { %v639_v9 = vadd.f32 %v638_v7, %v14016_v59 }
  0xdf   : > { %v718_v12 = vmax.f32 %v550_v6, 0.0 }
  0xe0   : > { %v719_v13 = vmax.f32 %v639_v9, 0.0 }
  0xe2   : > { %v782_v17 = vpack.c.bf16 %v719_v13, %v718_v12  ;;  %v589_v19 = vpop.f32.mrf.mxu2 }
  0xe3   : > { %v590_v21 = vadd.f32 %v589_v19, %v14014_v58 }
  0xe4   : > { %814 = vst [vmem:[#allocation2 + $0x8] sm:$0xff] %v782_v17  ;;  %v1981_v24 = vsel %vm1756_vm11, 0, %v782_v17  ;;  %v551_v25 = vpop.f32.mrf.mxu0  ;;  %v1605_v17 = vrot.slane %v14009_v56, 4 }
  0xe5   : > { %v678_v22 = vpop.f32.mrf.mxu3  ;;  %v2018_v29 = vshrl.u32 %v1981_v24, 16  ;;  %v2021_v30 = vshll.u32 %v1981_v24, 16  ;;  %v552_v31 = vadd.f32 %v551_v25, %v14014_v58  ;;  %v640_v32 = vpop.f32.mrf.mxu1  ;;  %v750_v33 = vmax.f32 %v590_v21, 0.0  ;;  %v11072_v25 = vld [vmem:[#allocation9 + $0x270] sm:$0xf] }
  0xe6   : > { %v679_v27 = vadd.f32 %v678_v22, %v14016_v59  ;;  %v641_v34 = vadd.f32 %v640_v32, %v14016_v59  ;;  %v14132_v32 = vsel %vm1399_vm7, 65537, %v13799_v0 }
  0xe7   : > { %v2020_v38 = vrot.slane %v2018_v29, 4  ;;  %v2023_v39 = vrot.slane %v2021_v30, 5  ;;  %v720_v40 = vmax.f32 %v552_v31, 0.0  ;;  %v13019_v30 = vld [vmem:[#allocation9 + $0x274] sm:$0xf0]  ;;  %v1619_v31 = vshll.u32 %v1445_v62, 16 }
  0xe8   : > { %v751_v36 = vmax.f32 %v679_v27, 0.0  ;;  %v721_v43 = vmax.f32 %v641_v34, 0.0  ;;  %v11073_v41 = vor.u32 %v13019_v30, %v11072_v25  ;;  %v1490_v48 = vshrl.u32 %v14132_v32, 16 }
  0xe9   : > { %v2024_v54 = vor.u32 %v2023_v39, %v2020_v38  ;;  %v1613_v39 = vsel %vm14028_vm8, %v1605_v17, %v14007_v55  ;;  %v1493_v62 = vshll.u32 %v14132_v32, 16 }
  0xea   : > { %v798_v44 = vpack.c.bf16 %v751_v36, %v750_v33  ;;  %v783_v51 = vpack.c.bf16 %v721_v43, %v720_v40  ;;  %v591_v52 = vpop.f32.mrf.mxu2  ;;  %4743 = vmatpush.bf16.msra.mxu0 %v11073_v41  ;;  %v1862_v50 = vunpack.c.l.b16 %v1613_v39 }
  0xeb   : > { %v592_v6 = vadd.f32 %v591_v52, %v14014_v58  ;;  %v2025_v21 = vrot.slane %v2024_v54, 4  ;;  %v12844_v20 = vld [vmem:[#allocation2 + $0xc] sm:$0xf] }
  0xec   : > { %830 = vst [vmem:[#allocation2 + $0x208] sm:$0xff] %v798_v44  ;;  %v1982_v4 = vsel %vm1763_vm0, 0, %v783_v51  ;;  %v554_v5 = vpop.f32.mrf.mxu0  ;;  %vm14166_vm9 = vcmp.ne.s32.totalorder %v1862_v50, %v14023_v1 }
  0xed   : > { %2451 = vst [vmem:[#allocation2 + $0x1d0] sm:$0xff] %v798_v44  ;;  %v680_v61 = vpop.f32.mrf.mxu3  ;;  %v2027_v9 = vshll.u32 %v1982_v4, 16  ;;  %v2031_v12 = vshrl.u32 %v1982_v4, 16  ;;  %v643_v13 = vpop.f32.mrf.mxu1  ;;  %v555_v18 = vadd.f32 %v554_v5, %v14014_v58  ;;  %v752_v24 = vmax.f32 %v592_v6, 0.0 }
  0xee   : > { %815 = vst [vmem:[#allocation2 + $0x28] sm:$0xff] %v783_v51  ;;  %v681_v7 = vadd.f32 %v680_v61, %v14016_v59  ;;  %v644_v19 = vadd.f32 %v643_v13, %v14016_v59  ;;  %v1621_v51 = vor.u32 %v1619_v31, %v14134_v37  ;;  %v1863_v61 = vunpack.c.h.b16 %v1613_v39 }
  0xef   : > { %v2029_v22 = vrot.slane %v2027_v9, 5  ;;  %v2033_v23 = vrot.slane %v2031_v12, 4  ;;  %v722_v27 = vmax.f32 %v555_v18, 0.0  ;;  %v14163_v9 = vrot.slane %v1490_v48, 7  ;;  %v10376_v12 = vld [vmem:[#allocation2 + $0x8] sm:$0xf] }
  0xf0   : > { %v723_v28 = vmax.f32 %v644_v19, 0.0  ;;  %v753_v29 = vmax.f32 %v681_v7, 0.0  ;;  %v1622_v17 = vsel %vm14028_vm8, %v14018_v60, %v1621_v51  ;;  %vm14175_vm10 = vcmp.ne.s32.totalorder %v1863_v61, %v14026_v2 }
  0xf1   : > { %v2030_v56 = vsel %vm14105_vm4, %v2025_v21, %v2029_v22  ;;  %v2034_v33 = vor.u32 %v2033_v23, %v2029_v22  ;;  %v1869_v39 = vunpack.c.l.b16 %v1622_v17 }
  0xf2   : > { %2373 = vst [vmem:[#allocation2] sm:$0xff] %v2030_v56  ;;  %v784_v34 = vpack.c.bf16 %v723_v28, %v722_v27  ;;  %v799_v36 = vpack.c.bf16 %v753_v29, %v752_v24  ;;  %v594_v38 = vpop.f32.mrf.mxu2 }
  0xf3   : > { %v2035_v49 = vrot.slane %v2034_v33, 4  ;;  %v595_v4 = vadd.f32 %v594_v38, %v14014_v58  ;;  %v870_v38 = vadd.s32 152, %v13984_v16  ;;  %vm14202_vm12 = vcmp.ne.s32.totalorder %v1869_v39, %v14023_v1 }
  0xf4   : > { %816 = vst [vmem:[#allocation2 + $0x48] sm:$0xff] %v784_v34  ;;  %v1983_v42 = vsel %vm1770_vm13, 0, %v784_v34  ;;  %v2502_v43 = vsel %vm1756_vm11, 0, %v784_v34  ;;  %v556_v44 = vpop.f32.mrf.mxu0  ;;  %vm17725_vm11 = vmpackc.low %vm14175_vm10, %vm14166_vm9 }
  0xf5   : > { %v683_v40 = vpop.f32.mrf.mxu3  ;;  %v2037_v45 = vshll.u32 %v1983_v42, 16  ;;  %v2041_v46 = vshrl.u32 %v1983_v42, 16  ;;  %2437 = vst [vmem:[#allocation2 + $0x10] sm:$0xff] %v784_v34  ;;  %v645_v47 = vpop.f32.mrf.mxu1  ;;  %v2536_v10 = vshrl.u32 %v2502_v43, 16  ;;  %v2539_v53 = vshll.u32 %v2502_v43, 16 }
  0xf6   : > { %831 = vst [vmem:[#allocation2 + $0x228] sm:$0xff] %v799_v36  ;;  %v12845_v54 = vld [vmem:[#allocation2 + $0x24] sm:$0xf0]  ;;  %v10378_v63 = vld [vmem:[#allocation2 + $0x28] sm:$0xf0]  ;;  %v557_v7 = vadd.f32 %v556_v44, %v14014_v58  ;;  %v646_v18 = vadd.f32 %v645_v47, %v14016_v59  ;;  %v754_v30 = vmax.f32 %v595_v4, 0.0  ;;  %v684_v56 = vadd.f32 %v683_v40, %v14016_v59 }
  0xf7   : > { %v14151_v52 = vrot.slane %v2037_v45, 5  ;;  %v14153_v11 = vrot.slane %v2041_v46, 4  ;;  %v10377_v19 = vor.u32 %v12845_v54, %v10376_v12  ;;  %v2538_v22 = vrot.slane %v2536_v10, 4 }
  0xf8   : > { %v2541_v23 = vrot.slane %v2539_v53, 5  ;;  %v724_v24 = vmax.f32 %v557_v7, 0.0  ;;  %v10381_v25 = vor.u32 %v12844_v20, %v10378_v63  ;;  %v725_v29 = vmax.f32 %v646_v18, 0.0 }
  0xf9   : > { %v2040_v5 = vsel %vm14105_vm4, %v2035_v49, %v14151_v52  ;;  %3321 = vmatmul.bf16.vlgmr.msrb.gmra.mxu2 %v10377_v19  ;;  %3499 = vmatmul.bf16.vlgmr.msrb.gmra.mxu0 %v10377_v19  ;;  %v755_v42 = vmax.f32 %v684_v56, 0.0  ;;  %v1870_v47 = vunpack.c.h.b16 %v1622_v17  ;;  %v1020_v53 = vand.u32 15, %v870_v38 }
  0xfa   : > { %2374 = vst [vmem:[#allocation2 + $0x20] sm:$0xff] %v2040_v5  ;;  %v596_v21 = vpop.f32.mrf.mxu2  ;;  %3410 = vmatmul.bf16.vlgmr.msrb.gmra.mxu3 %v10381_v25  ;;  %3588 = vmatmul.bf16.vlgmr.msrb.gmra.mxu1 %v10381_v25  ;;  %v785_v41 = vpack.c.bf16 %v725_v29, %v724_v24  ;;  %v2542_v44 = vor.u32 %v2541_v23, %v2538_v22  ;;  %v1623_v20 = vrot.slane %v14134_v37, 4  ;;  %v856_v22 = vadd.s32 40, %v13984_v16  ;;  %v13035_v25 = vld [vmem:[#allocation9 + $0x2f4] sm:$0xf0] }
  0xfb   : > { %v597_v34 = vadd.f32 %v596_v21, %v14014_v58  ;;  %v800_v49 = vpack.c.bf16 %v755_v42, %v754_v30  ;;  %vm14207_vm14 = vcmp.ne.s32.totalorder %v1870_v47, %v14026_v2  ;;  %v1495_v12 = vor.u32 %v1493_v62, %v14163_v9 }
  0xfc   : > { %v559_v31 = vpop.f32.mrf.mxu0  ;;  %817 = vst [vmem:[#allocation2 + $0x68] sm:$0xff] %v785_v41  ;;  %v2503_v48 = vsel %vm1763_vm0, 0, %v785_v41  ;;  %v2543_v54 = vrot.slane %v2542_v44, 4  ;;  %vm14214_vm15 = vcmp.eq.s32.totalorder %v1020_v53, 15  ;;  %vm17723_vm0 = vmpackc.low %vm14207_vm14, %vm14202_vm12  ;;  %v1631_v30 = vsel %vm14028_vm8, %v1623_v20, %v14007_v55  ;;  %v12846_v53 = vld [vmem:[#allocation2 + $0x4c] sm:$0xf] }
  0xfd   : > { %v685_v27 = vpop.f32.mrf.mxu3  ;;  %v560_v32 = vadd.f32 %v559_v31, %v14014_v58  ;;  %v648_v33 = vpop.f32.mrf.mxu1  ;;  %v756_v40 = vmax.f32 %v597_v34, 0.0  ;;  %2438 = vst [vmem:[#allocation2 + $0x30] sm:$0xff] %v785_v41  ;;  %v2545_v51 = vshll.u32 %v2503_v48, 16  ;;  %v2549_v10 = vshrl.u32 %v2503_v48, 16  ;;  %vm1415_vm1 = vmpackc.low %vm14214_vm15, %vm14214_vm15  ;;  %v10384_v48 = vld [vmem:[#allocation2 + $0x48] sm:$0xf] }
  0xfe   : > { %v686_v36 = vadd.f32 %v685_v27, %v14016_v59  ;;  %v649_v43 = vadd.f32 %v648_v33, %v14016_v59  ;;  %832 = vst [vmem:[#allocation2 + $0x248] sm:$0xff] %v800_v49  ;;  %v14199_v26 = vsel %vm17725_vm11, 0, %v800_v49  ;;  %v1496_v23 = vsel %vm14028_vm8, %v14018_v60, %v1495_v12  ;;  %v14274_v12 = vld [vmem:[#allocation2 + $0x468] sm:$0xff] }
  0xff   : > { %v726_v45 = vmax.f32 %v560_v32, 0.0  ;;  %18035 = vst [vmem:[#allocation21_spill] sm:$0xff] %v14199_v26  ;;  %v2547_v61 = vrot.slane %v2545_v51, 5  ;;  %v2551_v63 = vrot.slane %v2549_v10, 4  ;;  %v1771_v32 = vunpack.c.l.b16 %v1496_v23 }
 0x100   : > { %v757_v46 = vmax.f32 %v686_v36, 0.0  ;;  %v727_v50 = vmax.f32 %v649_v43, 0.0  ;;  %2453 = vst [vmem:[#allocation2 + $0x210] sm:$0xff] %v800_v49  ;;  %v1772_v33 = vunpack.c.h.b16 %v1496_v23  ;;  %v1447_v34 = vsel %vm1415_vm1, 65537, %v13799_v0 }
 0x101   : > { %v2548_v17 = vsel %vm14105_vm4, %v2543_v54, %v2547_v61  ;;  %v2552_v19 = vor.u32 %v2551_v63, %v2547_v61  ;;  %v922_v36 = vand.u32 15, %v856_v22  ;;  %v11137_v41 = vor.u32 %v13035_v25, %v11136_v15 }
 0x102   : > { %v786_v35 = vpack.c.bf16 %v727_v50, %v726_v45  ;;  %v801_v4 = vpack.c.bf16 %v757_v46, %v756_v40  ;;  %2891 = vst [vmem:[#allocation2 + $0x18] sm:$0xff] %v2548_v17  ;;  %v1876_v44 = vunpack.c.l.b16 %v1631_v30  ;;  %v599_v40 = vpop.f32.mrf.mxu2  ;;  %v1877_v46 = vunpack.c.h.b16 %v1631_v30 }
 0x103   : > { %v2553_v29 = vrot.slane %v2552_v19, 4  ;;  %v12847_v43 = vld [vmem:[#allocation2 + $0x64] sm:$0xf0]  ;;  %v10386_v45 = vld [vmem:[#allocation2 + $0x68] sm:$0xf0]  ;;  %v1497_v47 = vrot.slane %v14163_v9, 4  ;;  %4832 = vmatpush.bf16.msra.mxu1 %v11137_v41  ;;  %vm14259_vm3 = vcmp.ne.s32.totalorder %v1771_v32, %v14023_v1  ;;  %vm14264_vm5 = vcmp.ne.s32.totalorder %v1772_v33, %v14026_v2 }
 0x104   : > { %818 = vst [vmem:[#allocation2 + $0x88] sm:$0xff] %v786_v35  ;;  %v2504_v62 = vsel %vm1770_vm13, 0, %v786_v35  ;;  %v561_v21 = vpop.f32.mrf.mxu0  ;;  %v14240_v14 = vsel %vm17723_vm0, 0, %v801_v4  ;;  %v1634_v0 = vshrl.u32 %v1447_v34, 16  ;;  %vm1272_vm2 = vcmp.eq.s32.totalorder %v922_v36, 15  ;;  %vm17722_vm15 = vmpackc.low %vm14264_vm5, %vm14259_vm3 }
 0x105   : > { %2439 = vst [vmem:[#allocation2 + $0x50] sm:$0xff] %v786_v35  ;;  %v2555_v37 = vshll.u32 %v2504_v62, 16  ;;  %v2559_v24 = vshrl.u32 %v2504_v62, 16  ;;  %v650_v27 = vpop.f32.mrf.mxu1  ;;  %v562_v42 = vadd.f32 %v561_v21, %v14014_v58  ;;  %v688_v49 = vpop.f32.mrf.mxu3  ;;  %v10385_v10 = vor.u32 %v12847_v43, %v10384_v48  ;;  %vm1401_vm6 = vmpackc.low %vm1272_vm2, %vm1272_vm2 }
 0x106   : > { %833 = vst [vmem:[#allocation2 + $0x268] sm:$0xff] %v801_v4  ;;  %v651_v51 = vadd.f32 %v650_v27, %v14016_v59  ;;  %v10389_v9 = vor.u32 %v12846_v53, %v10386_v45  ;;  %v600_v61 = vadd.f32 %v599_v40, %v14014_v58  ;;  %vm14270_vm7 = vcmp.ne.s32.totalorder %v1876_v44, %v14023_v1 }
 0x107   : > { %18042 = vst [vmem:[#allocation22_spill] sm:$0xff] %v14240_v14  ;;  %v14245_v56 = vrot.slane %v2555_v37, 5  ;;  %v14247_v31 = vrot.slane %v2559_v24, 4  ;;  %v728_v50 = vmax.f32 %v562_v42, 0.0  ;;  %v18049_v63 = vmov 0 }
 0x108   : > { %v18050_v63 = vsel %vm14270_vm7, 4294967295, %v18049_v63  ;;  %v729_v4 = vmax.f32 %v651_v51, 0.0  ;;  %v1433_v17 = vsel %vm1401_vm6, 65537, %v14274_v12  ;;  %v689_v18 = vadd.f32 %v688_v49, %v14016_v59 }
 0x109   : > { %18043 = vst [vmem:[#allocation23_spill] sm:$0xff] %v14245_v56  ;;  %v2558_v38 = vsel %vm14105_vm4, %v2553_v29, %v14245_v56  ;;  %3326 = vmatmul.bf16.gmra.mxu2 %v10385_v10  ;;  %3504 = vmatmul.bf16.gmra.mxu0 %v10385_v10  ;;  %vm14279_vm13 = vcmp.ne.s32.totalorder %v1877_v46, %v14026_v2  ;;  %v18051_v20 = vmov 0  ;;  %v1637_v21 = vshll.u32 %v1447_v34, 16 }
 0x10a   : > { %18044 = vst [vmem:[#allocation24_spill] sm:$0xff] %v14247_v31  ;;  %v18052_v20 = vsel %vm14279_vm13, 4294967295, %v18051_v20  ;;  %v1505_v62 = vsel %vm14028_vm8, %v1497_v47, %v14007_v55  ;;  %3415 = vmatmul.bf16.gmra.mxu3 %v10389_v9  ;;  %3593 = vmatmul.bf16.gmra.mxu1 %v10389_v9  ;;  %v758_v22 = vmax.f32 %v600_v61, 0.0  ;;  %v14286_v23 = vrot.slane %v1634_v0, 7  ;;  %vm17721_vm1 = vmpackc.low %vm14279_vm13, %vm14270_vm7  ;;  %v601_v0 = vpop.f32.mrf.mxu2  ;;  %v10992_v31 = vld [vmem:[#allocation9 + $0x1d0] sm:$0xf] }
 0x10b   : > { %2892 = vst [vmem:[#allocation2 + $0x38] sm:$0xff] %v2558_v38  ;;  %v787_v37 = vpack.c.bf16 %v729_v4, %v728_v50  ;;  %v1508_v24 = vshrl.u32 %v1433_v17, 16  ;;  %v759_v15 = vmax.f32 %v689_v18, 0.0  ;;  %v1778_v32 = vunpack.c.l.b16 %v1505_v62 }
 0x10c   : > { %v564_v19 = vpop.f32.mrf.mxu0  ;;  %v1779_v33 = vunpack.c.h.b16 %v1505_v62  ;;  %v1639_v36 = vor.u32 %v1637_v21, %v14286_v23  ;;  %v1511_v41 = vshll.u32 %v1433_v17, 16  ;;  %v18055_v45 = vmov 0 }
 0x10d   : > { %v653_v25 = vpop.f32.mrf.mxu1  ;;  %v565_v27 = vadd.f32 %v564_v19, %v14014_v58  ;;  %819 = vst [vmem:[#allocation2 + $0xa8] sm:$0xff] %v787_v37  ;;  %v14298_v29 = vsel %vm17722_vm15, 0, %v787_v37  ;;  %v802_v30 = vpack.c.bf16 %v759_v15, %v758_v22  ;;  %v14306_v38 = vrot.slane %v1508_v24, 7  ;;  %v690_v49 = vpop.f32.mrf.mxu3 }
 0x10e   : > { %18053 = vst [vmem:[#allocation25_spill] sm:$0xff] %v14298_v29  ;;  %v654_v34 = vadd.f32 %v653_v25, %v14016_v59  ;;  %vm14316_vm2 = vcmp.ne.s32.totalorder %v1778_v32, %v14023_v1  ;;  %vm14321_vm6 = vcmp.ne.s32.totalorder %v1779_v33, %v14026_v2  ;;  %v1640_v46 = vsel %vm14028_vm8, %v14018_v60, %v1639_v36  ;;  %v12999_v29 = vld [vmem:[#allocation9 + $0x1d4] sm:$0xf0] }
 0x10f   : > { %834 = vst [vmem:[#allocation2 + $0x288] sm:$0xff] %v802_v30  ;;  %v14313_v42 = vsel %vm17721_vm1, 0, %v802_v30  ;;  %v730_v43 = vmax.f32 %v565_v27, 0.0  ;;  %v18056_v45 = vsel %vm14316_vm2, 4294967295, %v18055_v45  ;;  %v1513_v47 = vor.u32 %v1511_v41, %v14306_v38  ;;  %vm17724_vm1 = vmpackc.low %vm14321_vm6, %vm14316_vm2 }
 0x110   : > { %18054 = vst [vmem:[#allocation26_spill] sm:$0xff] %v14313_v42  ;;  %v731_v44 = vmax.f32 %v654_v34, 0.0  ;;  %v1883_v50 = vunpack.c.l.b16 %v1640_v46  ;;  %v602_v51 = vadd.f32 %v601_v0, %v14014_v58  ;;  %v1884_v10 = vunpack.c.h.b16 %v1640_v46 }
 0x111   : > { %2455 = vst [vmem:[#allocation2 + $0x250] sm:$0xff] %v802_v30  ;;  %v1514_v53 = vsel %vm14028_vm8, %v14018_v60, %v1513_v47  ;;  %v691_v61 = vadd.f32 %v690_v49, %v14016_v59  ;;  %v18060_v21 = vmov 0  ;;  %v18062_v22 = vmov 0 }
 0x112   : > { %v788_v48 = vpack.c.bf16 %v731_v44, %v730_v43  ;;  %v1785_v18 = vunpack.c.l.b16 %v1514_v53  ;;  %v1786_v19 = vunpack.c.h.b16 %v1514_v53  ;;  %v760_v62 = vmax.f32 %v602_v51, 0.0  ;;  %v10392_v43 = vld [vmem:[#allocation2 + $0x88] sm:$0xf]  ;;  %v10936_v51 = vld [vmem:[#allocation9 + $0x160] sm:$0xf] }
 0x113   : > { %vm14346_vm15 = vcmp.ne.s32.totalorder %v1883_v50, %v14023_v1  ;;  %vm14351_vm0 = vcmp.ne.s32.totalorder %v1884_v10, %v14026_v2  ;;  %v761_v37 = vmax.f32 %v691_v61, 0.0  ;;  %v872_v24 = vadd.s32 168, %v13984_v16  ;;  %v12985_v10 = vld [vmem:[#allocation9 + $0x164] sm:$0xf0] }
 0x114   : > { %820 = vst [vmem:[#allocation2 + $0xc8] sm:$0xff] %v788_v48  ;;  %v14342_v9 = vsel %vm17724_vm1, 0, %v788_v48  ;;  %v566_v4 = vpop.f32.mrf.mxu0  ;;  %v18061_v21 = vsel %vm14346_vm15, 4294967295, %v18060_v21  ;;  %v18063_v22 = vsel %vm14351_vm0, 4294967295, %v18062_v22  ;;  %v1641_v15 = vrot.slane %v14286_v23, 4  ;;  %vm17734_vm1 = vmpackc.low %vm14351_vm0, %vm14346_vm15 }
 0x115   : > { %18059 = vst [vmem:[#allocation27_spill] sm:$0xff] %v14342_v9  ;;  %v655_v17 = vpop.f32.mrf.mxu1  ;;  %v567_v25 = vadd.f32 %v566_v4, %v14014_v58  ;;  %v803_v30 = vpack.c.bf16 %v761_v37, %v760_v62  ;;  %v1034_v32 = vand.u32 15, %v872_v24  ;;  %v858_v33 = vadd.s32 56, %v13984_v16  ;;  %v12849_v44 = vld [vmem:[#allocation2 + $0xa4] sm:$0xf0]  ;;  %v604_v37 = vpop.f32.mrf.mxu2 }
 0x116   : > { %2441 = vst [vmem:[#allocation2 + $0x90] sm:$0xff] %v788_v48  ;;  %v656_v27 = vadd.f32 %v655_v17, %v14016_v59  ;;  %vm14365_vm11 = vcmp.ne.s32.totalorder %v1785_v18, %v14023_v1  ;;  %v18064_v34 = vmov 0  ;;  %vm14370_vm4 = vcmp.ne.s32.totalorder %v1786_v19, %v14026_v2  ;;  %v10394_v46 = vld [vmem:[#allocation2 + $0xa8] sm:$0xf0]  ;;  %v11000_v19 = vld [vmem:[#allocation9 + $0x1e0] sm:$0xf] }
 0x117   : > { %v18065_v34 = vsel %vm14365_vm11, 4294967295, %v18064_v34  ;;  %v18066_v23 = vmov 0  ;;  %v732_v36 = vmax.f32 %v567_v25, 0.0  ;;  %835 = vst [vmem:[#allocation2 + $0x2a8] sm:$0xff] %v803_v30  ;;  %vm1288_vm7 = vcmp.eq.s32.totalorder %v1034_v32, 15  ;;  %vm17733_vm2 = vmpackc.low %vm14370_vm4, %vm14365_vm11  ;;  %v693_v25 = vpop.f32.mrf.mxu3 }
 0x118   : > { %v18067_v23 = vsel %vm14370_vm4, 4294967295, %v18066_v23  ;;  %v733_v41 = vmax.f32 %v656_v27, 0.0  ;;  %v14379_v47 = vsel %vm17734_vm1, 0, %v803_v30  ;;  %v936_v0 = vand.u32 15, %v858_v33  ;;  %v12848_v48 = vld [vmem:[#allocation2 + $0x8c] sm:$0xf]  ;;  %vm1417_vm13 = vmpackc.low %vm1288_vm7, %vm1288_vm7 }
 0x119   : > { %18068 = vst [vmem:[#allocation28_spill] sm:$0xff] %v14379_v47  ;;  %v1649_v49 = vsel %vm14028_vm8, %v1641_v15, %v14007_v55  ;;  %v1449_v53 = vsel %vm1417_vm13, 65537, %v14274_v12  ;;  %v10393_v4 = vor.u32 %v12849_v44, %v10392_v43  ;;  %v10397_v17 = vor.u32 %v12848_v48, %v10394_v46  ;;  %v13001_v62 = vld [vmem:[#allocation9 + $0x1e4] sm:$0xf0]  ;;  %v12983_v9 = vld [vmem:[#allocation9 + $0x154] sm:$0xf0] }
 0x11a   : > { %v789_v50 = vpack.c.bf16 %v733_v41, %v732_v36  ;;  %vm14389_vm15 = vcmp.eq.s32.totalorder %v936_v0, 15  ;;  %v1652_v18 = vshrl.u32 %v1449_v53, 16  ;;  %v10937_v15 = vor.u32 %v12985_v10, %v10936_v51 }
 0x11b   : > { %vm1403_vm7 = vmpackc.low %vm14389_vm15, %vm14389_vm15  ;;  %3331 = vmatmul.bf16.gmra.mxu2 %v10393_v4  ;;  %3420 = vmatmul.bf16.gmra.mxu3 %v10397_v17  ;;  %v1890_v27 = vunpack.c.l.b16 %v1649_v49  ;;  %v1891_v30 = vunpack.c.h.b16 %v1649_v49  ;;  %v11001_v33 = vor.u32 %v13001_v62, %v11000_v19  ;;  %v605_v36 = vadd.f32 %v604_v37, %v14014_v58 }
 0x11c   : > { %821 = vst [vmem:[#allocation2 + $0xe8] sm:$0xff] %v789_v50  ;;  %v14401_v24 = vsel %vm17733_vm2, 0, %v789_v50  ;;  %3509 = vmatmul.bf16.gmra.mxu0 %v10393_v4  ;;  %3598 = vmatmul.bf16.gmra.mxu1 %v10397_v17  ;;  %v1435_v32 = vsel %vm1403_vm7, 65537, %v14274_v12  ;;  %v14405_v41 = vrot.slane %v1652_v18, 7  ;;  %v1655_v43 = vshll.u32 %v1449_v53, 16  ;;  %v569_v10 = vpop.f32.mrf.mxu0 }
 0x11d   : > { %18071 = vst [vmem:[#allocation29_spill] sm:$0xff] %v14401_v24  ;;  %4566 = vmatpush.bf16.msra.mxu2 %v10937_v15  ;;  %v694_v44 = vadd.f32 %v693_v25, %v14016_v59  ;;  %v1515_v46 = vrot.slane %v14306_v38, 4  ;;  %4655 = vmatpush.bf16.msra.mxu3 %v11001_v33  ;;  %v762_v0 = vmax.f32 %v605_v36, 0.0  ;;  %vm14410_vm13 = vcmp.ne.s32.totalorder %v1890_v27, %v14023_v1  ;;  %v658_v4 = vpop.f32.mrf.mxu1  ;;  %v11064_v33 = vld [vmem:[#allocation9 + $0x260] sm:$0xf] }
 0x11e   : > { %v18072_v48 = vmov 0  ;;  %vm14415_vm15 = vcmp.ne.s32.totalorder %v1891_v30, %v14026_v2  ;;  %v18074_v49 = vmov 0  ;;  %v1526_v50 = vshrl.u32 %v1435_v32, 16  ;;  %v13017_v36 = vld [vmem:[#allocation9 + $0x264] sm:$0xf0] }
 0x11f   : > { %v18073_v48 = vsel %vm14410_vm13, 4294967295, %v18072_v48  ;;  %v18075_v49 = vsel %vm14415_vm15, 4294967295, %v18074_v49  ;;  %v763_v51 = vmax.f32 %v694_v44, 0.0  ;;  %v1657_v53 = vor.u32 %v1655_v43, %v14405_v41  ;;  %vm17732_vm7 = vmpackc.low %vm14415_vm15, %vm14410_vm13 }
 0x120   : > { %v1523_v38 = vsel %vm14028_vm8, %v1515_v46, %v14007_v55  ;;  %v570_v17 = vadd.f32 %v569_v10, %v14014_v58  ;;  %v14428_v18 = vrot.slane %v1526_v50, 7  ;;  %v1529_v19 = vshll.u32 %v1435_v32, 16  ;;  %v695_v50 = vpop.f32.mrf.mxu3 }
 0x121   : > { %v804_v61 = vpack.c.bf16 %v763_v51, %v762_v0  ;;  %v659_v37 = vadd.f32 %v658_v4, %v14016_v59  ;;  %v1792_v15 = vunpack.c.l.b16 %v1523_v38  ;;  %v1793_v25 = vunpack.c.h.b16 %v1523_v38  ;;  %v606_v0 = vpop.f32.mrf.mxu2 }
 0x122   : > { %v1658_v27 = vsel %vm14028_vm8, %v14018_v60, %v1657_v53  ;;  %v734_v30 = vmax.f32 %v570_v17, 0.0  ;;  %v1531_v32 = vor.u32 %v1529_v19, %v14428_v18  ;;  %v18077_v51 = vmov 0 }
 0x123   : > { %836 = vst [vmem:[#allocation2 + $0x2c8] sm:$0xff] %v804_v61  ;;  %v14435_v62 = vsel %vm17732_vm7, 0, %v804_v61  ;;  %v1897_v43 = vunpack.c.l.b16 %v1658_v27  ;;  %v1898_v44 = vunpack.c.h.b16 %v1658_v27  ;;  %v735_v46 = vmax.f32 %v659_v37, 0.0 }
 0x124   : > { %18076 = vst [vmem:[#allocation30_spill] sm:$0xff] %v14435_v62  ;;  %vm14443_vm7 = vcmp.ne.s32.totalorder %v1792_v15, %v14023_v1  ;;  %vm14448_vm2 = vcmp.ne.s32.totalorder %v1793_v25, %v14026_v2  ;;  %v18079_v10 = vmov 0  ;;  %v1532_v4 = vsel %vm14028_vm8, %v14018_v60, %v1531_v32  ;;  %v11128_v15 = vld [vmem:[#allocation9 + $0x2e0] sm:$0xf]  ;;  %v13033_v25 = vld [vmem:[#allocation9 + $0x2e4] sm:$0xf0]  ;;  %v571_v27 = vpop.f32.mrf.mxu0 }
 0x125   : > { %2457 = vst [vmem:[#allocation2 + $0x290] sm:$0xff] %v804_v61  ;;  %v18078_v51 = vsel %vm14443_vm7, 4294967295, %v18077_v51  ;;  %v18080_v10 = vsel %vm14448_vm2, 4294967295, %v18079_v10  ;;  %v790_v53 = vpack.c.bf16 %v735_v46, %v734_v30  ;;  %v11065_v61 = vor.u32 %v13017_v36, %v11064_v33  ;;  %vm17737_vm1 = vmpackc.low %vm14448_vm2, %vm14443_vm7 }
 0x126   : > { %v607_v38 = vadd.f32 %v606_v0, %v14014_v58  ;;  %v696_v17 = vadd.f32 %v695_v50, %v14016_v59  ;;  %vm14462_vm13 = vcmp.ne.s32.totalorder %v1897_v43, %v14023_v1  ;;  %v18081_v19 = vmov 0  ;;  %v660_v43 = vpop.f32.mrf.mxu1 }
 0x127   : > { %v18082_v19 = vsel %vm14462_vm13, 4294967295, %v18081_v19  ;;  %vm14467_vm15 = vcmp.ne.s32.totalorder %v1898_v44, %v14026_v2  ;;  %v18083_v37 = vmov 0  ;;  %822 = vst [vmem:[#allocation2 + $0x108] sm:$0xff] %v790_v53  ;;  %4744 = vmatpush.bf16.msra.mxu0 %v11065_v61  ;;  %v14476_v30 = vsel %vm17737_vm1, 0, %v790_v53 }
 0x128   : > { %v18084_v37 = vsel %vm14467_vm15, 4294967295, %v18083_v37  ;;  %18085 = vst [vmem:[#allocation31_spill] sm:$0xff] %v14476_v30  ;;  %v764_v32 = vmax.f32 %v607_v38, 0.0  ;;  %v765_v33 = vmax.f32 %v696_v17, 0.0  ;;  %v874_v36 = vadd.s32 184, %v13984_v16  ;;  %vm17741_vm1 = vmpackc.low %vm14467_vm15, %vm14462_vm13  ;;  %v698_v38 = vpop.f32.mrf.mxu3 }
 0x129   : > { %2443 = vst [vmem:[#allocation2 + $0xd0] sm:$0xff] %v790_v53  ;;  %v1799_v44 = vunpack.c.l.b16 %v1532_v4  ;;  %v1800_v46 = vunpack.c.h.b16 %v1532_v4  ;;  %v1659_v0 = vrot.slane %v14405_v41, 4  ;;  %v11129_v39 = vor.u32 %v13033_v25, %v11128_v15 }
 0x12a   : > { %v805_v50 = vpack.c.bf16 %v765_v33, %v764_v32  ;;  %v1048_v61 = vand.u32 15, %v874_v36  ;;  %v572_v6 = vadd.f32 %v571_v27, %v14014_v58  ;;  %v661_v53 = vadd.f32 %v660_v43, %v14016_v59  ;;  %v12851_v27 = vld [vmem:[#allocation2 + $0xe4] sm:$0xf0]  ;;  %v10402_v32 = vld [vmem:[#allocation2 + $0xe8] sm:$0xf0]  ;;  %v609_v33 = vpop.f32.mrf.mxu2 }
 0x12b   : > { %4833 = vmatpush.bf16.msra.mxu1 %v11129_v39  ;;  %v1667_v4 = vsel %vm14028_vm8, %v1659_v0, %v14007_v55  ;;  %vm14501_vm2 = vcmp.ne.s32.totalorder %v1799_v44, %v14023_v1  ;;  %v18089_v15 = vmov 0  ;;  %vm14506_vm11 = vcmp.ne.s32.totalorder %v1800_v46, %v14026_v2  ;;  %v10400_v44 = vld [vmem:[#allocation2 + $0xc8] sm:$0xf]  ;;  %v12850_v0 = vld [vmem:[#allocation2 + $0xcc] sm:$0xf] }
 0x12c   : > { %837 = vst [vmem:[#allocation2 + $0x2e8] sm:$0xff] %v805_v50  ;;  %vm14486_vm7 = vcmp.eq.s32.totalorder %v1048_v61, 15  ;;  %v14495_v41 = vsel %vm17741_vm1, 0, %v805_v50  ;;  %v736_v17 = vmax.f32 %v572_v6, 0.0  ;;  %v18090_v15 = vsel %vm14501_vm2, 4294967295, %v18089_v15  ;;  %vm17748_vm13 = vmpackc.low %vm14506_vm11, %vm14501_vm2  ;;  %v574_v47 = vpop.f32.mrf.mxu0 }
 0x12d   : > { %18088 = vst [vmem:[#allocation32_spill] sm:$0xff] %v14495_v41  ;;  %v18091_v25 = vmov 0  ;;  %vm1419_vm1 = vmpackc.low %vm14486_vm7, %vm14486_vm7  ;;  %v737_v39 = vmax.f32 %v661_v53, 0.0  ;;  %v1904_v36 = vunpack.c.l.b16 %v1667_v4  ;;  %v860_v43 = vadd.s32 72, %v13984_v16 }
 0x12e   : > { %v18092_v25 = vsel %vm14506_vm11, 4294967295, %v18091_v25  ;;  %v1451_v46 = vsel %vm1419_vm1, 65537, %v14274_v12  ;;  %v10401_v50 = vor.u32 %v12851_v27, %v10400_v44  ;;  %v10405_v61 = vor.u32 %v12850_v0, %v10402_v32  ;;  %v663_v42 = vpop.f32.mrf.mxu1  ;;  %v10408_v56 = vld [vmem:[#allocation2 + $0x108] sm:$0xf] }
 0x12f   : > { %v791_v6 = vpack.c.bf16 %v737_v39, %v736_v17  ;;  %v610_v53 = vadd.f32 %v609_v33, %v14014_v58  ;;  %v1905_v41 = vunpack.c.h.b16 %v1667_v4  ;;  %v1533_v62 = vrot.slane %v14428_v18, 4 }
 0x130   : > { %v950_v17 = vand.u32 15, %v860_v43  ;;  %3336 = vmatmul.bf16.gmra.mxu2 %v10401_v50  ;;  %3425 = vmatmul.bf16.gmra.mxu3 %v10405_v61  ;;  %v1670_v27 = vshrl.u32 %v1451_v46, 16  ;;  %v699_v18 = vadd.f32 %v698_v38, %v14016_v59  ;;  %vm14530_vm7 = vcmp.ne.s32.totalorder %v1904_v36, %v14023_v1 }
 0x131   : > { %823 = vst [vmem:[#allocation2 + $0x128] sm:$0xff] %v791_v6  ;;  %v14526_v39 = vsel %vm17748_vm13, 0, %v791_v6  ;;  %3514 = vmatmul.bf16.gmra.mxu0 %v10401_v50  ;;  %3603 = vmatmul.bf16.gmra.mxu1 %v10405_v61  ;;  %v766_v4 = vmax.f32 %v610_v53, 0.0  ;;  %v18094_v32 = vmov 0  ;;  %v575_v33 = vadd.f32 %v574_v47, %v14014_v58 }
 0x132   : > { %18093 = vst [vmem:[#allocation33_spill] sm:$0xff] %v14526_v39  ;;  %vm1276_vm1 = vcmp.eq.s32.totalorder %v950_v17, 15  ;;  %v18095_v32 = vsel %vm14530_vm7, 4294967295, %v18094_v32  ;;  %v664_v6 = vadd.f32 %v663_v42, %v14016_v59  ;;  %vm14537_vm13 = vcmp.ne.s32.totalorder %v1905_v41, %v14026_v2 }
 0x133   : > { %vm1405_vm15 = vmpackc.low %vm1276_vm1, %vm1276_vm1  ;;  %v18096_v43 = vmov 0  ;;  %v1541_v44 = vsel %vm14028_vm8, %v1533_v62, %v14007_v55  ;;  %v767_v36 = vmax.f32 %v699_v18, 0.0  ;;  %v14545_v61 = vrot.slane %v1670_v27, 7 }
 0x134   : > { %v18097_v43 = vsel %vm14537_vm13, 4294967295, %v18096_v43  ;;  %v1437_v0 = vsel %vm1405_vm15, 65537, %v14274_v12  ;;  %v1673_v53 = vshll.u32 %v1451_v46, 16  ;;  %vm17751_vm1 = vmpackc.low %vm14537_vm13, %vm14530_vm7  ;;  %v1806_v42 = vunpack.c.l.b16 %v1541_v44 }
 0x135   : > { %v1544_v50 = vshrl.u32 %v1437_v0, 16  ;;  %v806_v38 = vpack.c.bf16 %v767_v36, %v766_v4  ;;  %v1807_v47 = vunpack.c.h.b16 %v1541_v44  ;;  %v738_v41 = vmax.f32 %v575_v33, 0.0  ;;  %v611_v44 = vpop.f32.mrf.mxu2 }
 0x136   : > { %v739_v17 = vmax.f32 %v664_v6, 0.0  ;;  %v1547_v62 = vshll.u32 %v1437_v0, 16  ;;  %v1675_v27 = vor.u32 %v1673_v53, %v14545_v61  ;;  %vm14562_vm15 = vcmp.ne.s32.totalorder %v1806_v42, %v14023_v1  ;;  %v665_v30 = vpop.f32.mrf.mxu1 }
 0x137   : > { %v14551_v39 = vrot.slane %v1544_v50, 7  ;;  %838 = vst [vmem:[#allocation2 + $0x308] sm:$0xff] %v806_v38  ;;  %v14558_v46 = vsel %vm17751_vm1, 0, %v806_v38  ;;  %v18099_v18 = vmov 0  ;;  %vm14567_vm2 = vcmp.ne.s32.totalorder %v1807_v47, %v14026_v2 }
 0x138   : > { %18098 = vst [vmem:[#allocation34_spill] sm:$0xff] %v14558_v46  ;;  %v792_v4 = vpack.c.bf16 %v739_v17, %v738_v41  ;;  %v18100_v18 = vsel %vm14562_vm15, 4294967295, %v18099_v18  ;;  %v18102_v33 = vmov 0  ;;  %vm17755_vm1 = vmpackc.low %vm14567_vm2, %vm14562_vm15  ;;  %v1676_v0 = vsel %vm14028_vm8, %v14018_v60, %v1675_v27  ;;  %v576_v41 = vpop.f32.mrf.mxu0 }
 0x139   : > { %2459 = vst [vmem:[#allocation2 + $0x2d0] sm:$0xff] %v806_v38  ;;  %v18103_v33 = vsel %vm14567_vm2, 4294967295, %v18102_v33  ;;  %v1549_v6 = vor.u32 %v1547_v62, %v14551_v39  ;;  %v612_v50 = vadd.f32 %v611_v44, %v14014_v58  ;;  %v700_v38 = vpop.f32.mrf.mxu3  ;;  %v1911_v42 = vunpack.c.l.b16 %v1676_v0 }
 0x13a   : > { %18101 = vst [vmem:[#allocation35_spill] sm:$0xff] %v18100_v18  ;;  %v14584_v36 = vsel %vm17755_vm1, 0, %v792_v4  ;;  %v1912_v47 = vunpack.c.h.b16 %v1676_v0  ;;  %v701_v46 = vadd.f32 %v700_v38, %v14016_v59  ;;  %v876_v14 = vadd.s32 200, %v13984_v16  ;;  %v10410_v38 = vld [vmem:[#allocation2 + $0x128] sm:$0xf0] }
 0x13b   : > { %824 = vst [vmem:[#allocation2 + $0x148] sm:$0xff] %v792_v4  ;;  %v1550_v53 = vsel %vm14028_vm8, %v14018_v60, %v1549_v6  ;;  %v768_v27 = vmax.f32 %v612_v50, 0.0  ;;  %vm14594_vm1 = vcmp.ne.s32.totalorder %v1911_v42, %v14023_v1  ;;  %v18105_v44 = vmov 0 }
 0x13c   : > { %2445 = vst [vmem:[#allocation2 + $0x110] sm:$0xff] %v792_v4  ;;  %v1813_v17 = vunpack.c.l.b16 %v1550_v53  ;;  %v1814_v62 = vunpack.c.h.b16 %v1550_v53  ;;  %v577_v4 = vadd.f32 %v576_v41, %v14014_v58  ;;  %v18106_v44 = vsel %vm14594_vm1, 4294967295, %v18105_v44  ;;  %v12853_v53 = vld [vmem:[#allocation2 + $0x124] sm:$0xf0]  ;;  %v10928_v41 = vld [vmem:[#allocation9 + $0x150] sm:$0xf] }
 0x13d   : > { %18104 = vst [vmem:[#allocation36_spill] sm:$0xff] %v14584_v36  ;;  %vm14599_vm15 = vcmp.ne.s32.totalorder %v1912_v47, %v14026_v2  ;;  %v18108_v6 = vmov 0  ;;  %v1677_v0 = vrot.slane %v14545_v61, 4  ;;  %v769_v50 = vmax.f32 %v701_v46, 0.0 }
 0x13e   : > { %18107 = vst [vmem:[#allocation37_spill] sm:$0xff] %v18106_v44  ;;  %v18109_v6 = vsel %vm14599_vm15, 4294967295, %v18108_v6  ;;  %v1062_v36 = vand.u32 15, %v876_v14  ;;  %v740_v24 = vmax.f32 %v577_v4, 0.0  ;;  %v666_v26 = vadd.f32 %v665_v30, %v14016_v59  ;;  %v12852_v14 = vld [vmem:[#allocation2 + $0x10c] sm:$0xf]  ;;  %vm17772_vm13 = vmpackc.low %vm14599_vm15, %vm14594_vm1 }
 0x13f   : > { %18110 = vst [vmem:[#allocation38_spill] sm:$0xff] %v18109_v6  ;;  %vm14606_vm2 = vcmp.ne.s32.totalorder %v1813_v17, %v14023_v1  ;;  %v18111_v42 = vmov 0  ;;  %vm14611_vm7 = vcmp.ne.s32.totalorder %v1814_v62, %v14026_v2  ;;  %v18114_v47 = vmov 0 }
 0x140   : > { %v18112_v42 = vsel %vm14606_vm2, 4294967295, %v18111_v42  ;;  %v18115_v47 = vsel %vm14611_vm7, 4294967295, %v18114_v47  ;;  %v807_v61 = vpack.c.bf16 %v769_v50, %v768_v27  ;;  %v862_v46 = vadd.s32 88, %v13984_v16 }
 0x141   : > { %18113 = vst [vmem:[#allocation39_spill] sm:$0xff] %v18112_v42  ;;  %vm1292_vm11 = vcmp.eq.s32.totalorder %v1062_v36, 15  ;;  %v741_v30 = vmax.f32 %v666_v26, 0.0  ;;  %v10409_v17 = vor.u32 %v12853_v53, %v10408_v56  ;;  %v10413_v4 = vor.u32 %v12852_v14, %v10410_v38  ;;  %v579_v38 = vpop.f32.mrf.mxu0 }
 0x142   : > { %18116 = vst [vmem:[#allocation40_spill] sm:$0xff] %v18115_v47  ;;  %vm1421_vm4 = vmpackc.low %vm1292_vm11, %vm1292_vm11  ;;  %v14625_v62 = vsel %vm17772_vm13, 0, %v807_v61  ;;  %v964_v27 = vand.u32 15, %v862_v46  ;;  %v10929_v50 = vor.u32 %v12983_v9, %v10928_v41  ;;  %v1685_v26 = vsel %vm14028_vm8, %v1677_v0, %v14007_v55  ;;  %v614_v9 = vpop.f32.mrf.mxu2  ;;  %v703_v0 = vpop.f32.mrf.mxu3 }
 0x143   : > { %839 = vst [vmem:[#allocation2 + $0x328] sm:$0xff] %v807_v61  ;;  %v1453_v57 = vsel %vm1421_vm4, 65537, %v14274_v12  ;;  %v793_v18 = vpack.c.bf16 %v741_v30, %v740_v24  ;;  %3341 = vmatmul.bf16.gmra.mxu2 %v10409_v17  ;;  %3430 = vmatmul.bf16.gmra.mxu3 %v10413_v4  ;;  %vm17771_vm11 = vmpackc.low %vm14611_vm7, %vm14606_vm2  ;;  %v10993_v36 = vor.u32 %v12999_v29, %v10992_v31  ;;  %v1918_v41 = vunpack.c.l.b16 %v1685_v26  ;;  %v668_v30 = vpop.f32.mrf.mxu1 }
 0x144   : > { %18117 = vst [vmem:[#allocation41_spill] sm:$0xff] %v14625_v62  ;;  %vm14635_vm1 = vcmp.eq.s32.totalorder %v964_v27, 15  ;;  %3519 = vmatmul.bf16.gmra.mxu0 %v10409_v17  ;;  %3608 = vmatmul.bf16.gmra.mxu1 %v10413_v4  ;;  %v1688_v53 = vshrl.u32 %v1453_v57, 16  ;;  %v1919_v61 = vunpack.c.h.b16 %v1685_v26  ;;  %v1551_v46 = vrot.slane %v14551_v39, 4 }
 0x145   : > { %825 = vst [vmem:[#allocation2 + $0x168] sm:$0xff] %v793_v18  ;;  %vm1407_vm4 = vmpackc.low %vm14635_vm1, %vm14635_vm1  ;;  %v14647_v24 = vsel %vm17771_vm11, 0, %v793_v18  ;;  %4567 = vmatpush.bf16.msra.mxu2 %v10929_v50  ;;  %4656 = vmatpush.bf16.msra.mxu3 %v10993_v36  ;;  %v615_v14 = vadd.f32 %v614_v9, %v14014_v58  ;;  %v704_v4 = vadd.f32 %v703_v0, %v14016_v59  ;;  %v1691_v31 = vshll.u32 %v1453_v57, 16 }
 0x146   : > { %18120 = vst [vmem:[#allocation42_spill] sm:$0xff] %v14647_v24  ;;  %v1439_v17 = vsel %vm1407_vm4, 65537, %v14274_v12  ;;  %v580_v18 = vadd.f32 %v579_v38, %v14014_v58  ;;  %v14654_v50 = vrot.slane %v1688_v53, 7  ;;  %v669_v56 = vadd.f32 %v668_v30, %v14016_v59  ;;  %v11120_v24 = vld [vmem:[#allocation9 + $0x2d0] sm:$0xf] }
 0x147   : > { %v770_v27 = vmax.f32 %v615_v14, 0.0  ;;  %v771_v29 = vmax.f32 %v704_v4, 0.0  ;;  %vm14658_vm1 = vcmp.ne.s32.totalorder %v1918_v41, %v14023_v1  ;;  %v18121_v39 = vmov 0 }
 0x148   : > { %v18122_v39 = vsel %vm14658_vm1, 4294967295, %v18121_v39  ;;  %vm14663_vm11 = vcmp.ne.s32.totalorder %v1919_v61, %v14026_v2  ;;  %v18124_v26 = vmov 0  ;;  %v1559_v9 = vsel %vm14028_vm8, %v1551_v46, %v14007_v55 }
 0x149   : > { %18123 = vst [vmem:[#allocation43_spill] sm:$0xff] %v18122_v39  ;;  %v18125_v26 = vsel %vm14663_vm11, 4294967295, %v18124_v26  ;;  %v1562_v36 = vshrl.u32 %v1439_v17, 16  ;;  %v808_v0 = vpack.c.bf16 %v771_v29, %v770_v27  ;;  %v742_v57 = vmax.f32 %v580_v18, 0.0  ;;  %vm17774_vm4 = vmpackc.low %vm14663_vm11, %vm14658_vm1  ;;  %v581_v39 = vpop.f32.mrf.mxu0 }
 0x14a   : > { %18126 = vst [vmem:[#allocation44_spill] sm:$0xff] %v18125_v26  ;;  %v743_v53 = vmax.f32 %v669_v56, 0.0  ;;  %v1820_v38 = vunpack.c.l.b16 %v1559_v9  ;;  %v1821_v41 = vunpack.c.h.b16 %v1559_v9  ;;  %v1693_v61 = vor.u32 %v1691_v31, %v14654_v50  ;;  %v616_v27 = vpop.f32.mrf.mxu2  ;;  %v705_v18 = vpop.f32.mrf.mxu3  ;;  %v11056_v9 = vld [vmem:[#allocation9 + $0x250] sm:$0xf] }
 0x14b   : > { %840 = vst [vmem:[#allocation2 + $0x348] sm:$0xff] %v808_v0  ;;  %v14675_v14 = vrot.slane %v1562_v36, 7  ;;  %v1565_v30 = vshll.u32 %v1439_v17, 16  ;;  %v14682_v46 = vsel %vm17774_vm4, 0, %v808_v0  ;;  %v18128_v29 = vmov 0 }
 0x14c   : > { %18127 = vst [vmem:[#allocation45_spill] sm:$0xff] %v14682_v46  ;;  %v794_v4 = vpack.c.bf16 %v743_v53, %v742_v57  ;;  %vm14685_vm13 = vcmp.ne.s32.totalorder %v1820_v38, %v14023_v1  ;;  %vm14690_vm2 = vcmp.ne.s32.totalorder %v1821_v41, %v14026_v2  ;;  %v18131_v17 = vmov 0  ;;  %v13015_v36 = vld [vmem:[#allocation9 + $0x254] sm:$0xf0]  ;;  %v12855_v47 = vld [vmem:[#allocation2 + $0x164] sm:$0xf0] }
 0x14d   : > { %2461 = vst [vmem:[#allocation2 + $0x310] sm:$0xff] %v808_v0  ;;  %v18129_v29 = vsel %vm14685_vm13, 4294967295, %v18128_v29  ;;  %v18132_v17 = vsel %vm14690_vm2, 4294967295, %v18131_v17  ;;  %v1694_v31 = vsel %vm14028_vm8, %v14018_v60, %v1693_v61  ;;  %v1567_v56 = vor.u32 %v1565_v30, %v14675_v14  ;;  %vm17782_vm4 = vmpackc.low %vm14690_vm2, %vm14685_vm13  ;;  %v10418_v6 = vld [vmem:[#allocation2 + $0x168] sm:$0xf0] }
 0x14e   : > { %826 = vst [vmem:[#allocation2 + $0x188] sm:$0xff] %v794_v4  ;;  %v864_v0 = vadd.s32 104, %v13984_v16  ;;  %v1925_v57 = vunpack.c.l.b16 %v1694_v31  ;;  %v1926_v53 = vunpack.c.h.b16 %v1694_v31  ;;  %v14708_v38 = vsel %vm17782_vm4, 0, %v794_v4  ;;  %v13031_v31 = vld [vmem:[#allocation9 + $0x2d4] sm:$0xf0] }
 0x14f   : > { %18130 = vst [vmem:[#allocation46_spill] sm:$0xff] %v18129_v29  ;;  %v11057_v41 = vor.u32 %v13015_v36, %v11056_v9  ;;  %v1568_v61 = vsel %vm14028_vm8, %v14018_v60, %v1567_v56  ;;  %v617_v46 = vadd.f32 %v616_v27, %v14014_v58  ;;  %v706_v62 = vadd.f32 %v705_v18, %v14016_v59  ;;  %v12865_v27 = vld [vmem:[#allocation2 + $0x2a4] sm:$0xf0] }
 0x150   : > { %18133 = vst [vmem:[#allocation47_spill] sm:$0xff] %v18132_v17  ;;  %v978_v30 = vand.u32 15, %v864_v0  ;;  %v670_v17 = vpop.f32.mrf.mxu1  ;;  %vm14716_vm1 = vcmp.ne.s32.totalorder %v1925_v57, %v14023_v1  ;;  %v878_v9 = vadd.s32 216, %v13984_v16  ;;  %vm14723_vm4 = vcmp.ne.s32.totalorder %v1926_v53, %v14026_v2 }
 0x151   : > { %2447 = vst [vmem:[#allocation2 + $0x150] sm:$0xff] %v794_v4  ;;  %4745 = vmatpush.bf16.msra.mxu0 %v11057_v41  ;;  %v1695_v4 = vrot.slane %v14654_v50, 4  ;;  %v1827_v18 = vunpack.c.l.b16 %v1568_v61  ;;  %v1828_v0 = vunpack.c.h.b16 %v1568_v61  ;;  %v772_v41 = vmax.f32 %v617_v46, 0.0 }
 0x152   : > { %18134 = vst [vmem:[#allocation48_spill] sm:$0xff] %v14708_v38  ;;  %v619_v56 = vpop.f32.mrf.mxu2  ;;  %v708_v36 = vpop.f32.mrf.mxu3  ;;  %v773_v38 = vmax.f32 %v706_v62, 0.0  ;;  %v1076_v26 = vand.u32 15, %v878_v9  ;;  %v11121_v57 = vor.u32 %v13031_v31, %v11120_v24  ;;  %v582_v42 = vadd.f32 %v581_v39, %v14014_v58  ;;  %v10416_v24 = vld [vmem:[#allocation2 + $0x148] sm:$0xf] }
 0x153   : > { %vm14728_vm13 = vcmp.eq.s32.totalorder %v978_v30, 15  ;;  %v671_v44 = vadd.f32 %v670_v17, %v14016_v59  ;;  %vm14738_vm7 = vcmp.ne.s32.totalorder %v1827_v18, %v14023_v1  ;;  %v18141_v39 = vmov 0  ;;  %v12854_v30 = vld [vmem:[#allocation2 + $0x14c] sm:$0xf] }
 0x154   : > { %v809_v53 = vpack.c.bf16 %v773_v38, %v772_v41  ;;  %vm1294_vm11 = vcmp.eq.s32.totalorder %v1076_v26, 15  ;;  %4834 = vmatpush.bf16.msra.mxu1 %v11121_v57  ;;  %v744_v62 = vmax.f32 %v582_v42, 0.0  ;;  %v18142_v39 = vsel %vm14738_vm7, 4294967295, %v18141_v39  ;;  %vm1409_vm2 = vmpackc.low %vm14728_vm13, %vm14728_vm13 }
 0x155   : > { %18143 = vst [vmem:[#allocation49_spill] sm:$0xff] %v18142_v39  ;;  %v1703_v46 = vsel %vm14028_vm8, %v1695_v4, %v14007_v55  ;;  %vm1423_vm15 = vmpackc.low %vm1294_vm11, %vm1294_vm11  ;;  %v745_v17 = vmax.f32 %v671_v44, 0.0  ;;  %v10417_v61 = vor.u32 %v12855_v47, %v10416_v24  ;;  %vm14749_vm0 = vcmp.ne.s32.totalorder %v1828_v0, %v14026_v2 }
 0x156   : > { %v18144_v42 = vmov 0  ;;  %841 = vst [vmem:[#allocation2 + $0x368] sm:$0xff] %v809_v53  ;;  %v1455_v26 = vsel %vm1423_vm15, 65537, %v14274_v12  ;;  %vm18146_vm11 = vmpackc.low %vm14723_vm4, %vm14716_vm1  ;;  %v10421_v47 = vor.u32 %v12854_v30, %v10418_v6  ;;  %v620_v9 = vadd.f32 %v619_v56, %v14014_v58  ;;  %v584_v30 = vpop.f32.mrf.mxu0 }
 0x157   : > { %v18145_v42 = vsel %vm14749_vm0, 4294967295, %v18144_v42  ;;  %v14759_v44 = vsel %vm18146_vm11, 0, %v809_v53  ;;  %v1706_v38 = vshrl.u32 %v1455_v26, 16  ;;  %3346 = vmatmul.bf16.gmra.mxu2 %v10417_v61  ;;  %3524 = vmatmul.bf16.gmra.mxu0 %v10417_v61  ;;  %v1709_v31 = vshll.u32 %v1455_v26, 16  ;;  %vm17800_vm13 = vmpackc.low %vm14749_vm0, %vm14738_vm7 }
 0x158   : > { %18147 = vst [vmem:[#allocation50_spill] sm:$0xff] %v14759_v44  ;;  %v795_v4 = vpack.c.bf16 %v745_v17, %v744_v62  ;;  %3435 = vmatmul.bf16.gmra.mxu3 %v10421_v47  ;;  %3613 = vmatmul.bf16.gmra.mxu1 %v10421_v47  ;;  %v1441_v18 = vsel %vm1409_vm2, 65537, %v14274_v12  ;;  %v1932_v0 = vunpack.c.l.b16 %v1703_v46  ;;  %v1933_v41 = vunpack.c.h.b16 %v1703_v46 }
 0x159   : > { %v14767_v57 = vrot.slane %v1706_v38, 7  ;;  %v709_v56 = vadd.f32 %v708_v36, %v14016_v59  ;;  %v1569_v62 = vrot.slane %v14675_v14, 4  ;;  %v774_v24 = vmax.f32 %v620_v9, 0.0  ;;  %v673_v36 = vpop.f32.mrf.mxu1 }
 0x15a   : > { %827 = vst [vmem:[#allocation2 + $0x1a8] sm:$0xff] %v795_v4  ;;  %v14774_v6 = vsel %vm17800_vm13, 0, %v795_v4  ;;  %v621_v50 = vpop.f32.mrf.mxu2  ;;  %v710_v53 = vpop.f32.mrf.mxu3  ;;  %v1580_v17 = vshrl.u32 %v1441_v18, 16  ;;  %vm14780_vm2 = vcmp.ne.s32.totalorder %v1932_v0, %v14023_v1  ;;  %v18149_v26 = vmov 0 }
 0x15b   : > { %18148 = vst [vmem:[#allocation51_spill] sm:$0xff] %v14774_v6  ;;  %v1711_v46 = vor.u32 %v1709_v31, %v14767_v57  ;;  %v775_v61 = vmax.f32 %v709_v56, 0.0  ;;  %v18150_v26 = vsel %vm14780_vm2, 4294967295, %v18149_v26  ;;  %vm14785_vm15 = vcmp.ne.s32.totalorder %v1933_v41, %v14026_v2 }
 0x15c   : > { %18151 = vst [vmem:[#allocation52_spill] sm:$0xff] %v18150_v26  ;;  %v18152_v47 = vmov 0  ;;  %v1583_v38 = vshll.u32 %v1441_v18, 16  ;;  %v1577_v14 = vsel %vm14028_vm8, %v1569_v62, %v14007_v55  ;;  %v14792_v31 = vrot.slane %v1580_v17, 7  ;;  %vm17798_vm11 = vmpackc.low %vm14785_vm15, %vm14780_vm2 }
 0x15d   : > { %v18153_v47 = vsel %vm14785_vm15, 4294967295, %v18152_v47  ;;  %v810_v4 = vpack.c.bf16 %v775_v61, %v774_v24  ;;  %v1712_v9 = vsel %vm14028_vm8, %v14018_v60, %v1711_v46  ;;  %v585_v0 = vadd.f32 %v584_v30, %v14014_v58  ;;  %vm18162_vm2 = vmpackc.low %vm14175_vm10, %vm14166_vm9 }
 0x15e   : > { %18154 = vst [vmem:[#allocation53_spill] sm:$0xff] %v18153_v47  ;;  %v1834_v41 = vunpack.c.l.b16 %v1577_v14  ;;  %v1835_v56 = vunpack.c.h.b16 %v1577_v14  ;;  %v1585_v62 = vor.u32 %v1583_v38, %v14792_v31  ;;  %v1939_v24 = vunpack.c.l.b16 %v1712_v9  ;;  %v586_v14 = vpop.f32.mrf.mxu0  ;;  %v13533_v47 = vld [vmem:[#allocation2 + $0x208] sm:$0xff] }
 0x15f   : > { %842 = vst [vmem:[#allocation2 + $0x388] sm:$0xff] %v810_v4  ;;  %v14807_v18 = vsel %vm17798_vm11, 0, %v810_v4  ;;  %v1940_v17 = vunpack.c.h.b16 %v1712_v9  ;;  %v746_v61 = vmax.f32 %v585_v0, 0.0  ;;  %v674_v46 = vadd.f32 %v673_v36, %v14016_v59 }
 0x160   : > { %18155 = vst [vmem:[#allocation54_spill] sm:$0xff] %v14807_v18  ;;  %v622_v30 = vadd.f32 %v621_v50, %v14014_v58  ;;  %v711_v26 = vadd.f32 %v710_v53, %v14016_v59  ;;  %vm14818_vm11 = vcmp.ne.s32.totalorder %v1834_v41, %v14023_v1  ;;  %v18156_v18 = vmov 0 }
 0x161   : > { %2463 = vst [vmem:[#allocation2 + $0x350] sm:$0xff] %v810_v4  ;;  %v18157_v18 = vsel %vm14818_vm11, 4294967295, %v18156_v18  ;;  %vm14823_vm13 = vcmp.ne.s32.totalorder %v1835_v56, %v14026_v2  ;;  %v18159_v38 = vmov 0  ;;  %v1586_v50 = vsel %vm14028_vm8, %v14018_v60, %v1585_v62  ;;  %v675_v0 = vpop.f32.mrf.mxu1  ;;  %v12857_v41 = vld [vmem:[#allocation2 + $0x1a4] sm:$0xf0] }
 0x162   : > { %v14812_v44 = vpop.f32.mrf.mxu2  ;;  %v14814_v6 = vpop.f32.mrf.mxu3  ;;  %18158 = vst [vmem:[#allocation55_spill] sm:$0xff] %v18157_v18  ;;  %v18160_v38 = vsel %vm14823_vm13, 4294967295, %v18159_v38  ;;  %v747_v36 = vmax.f32 %v674_v46, 0.0  ;;  %v776_v4 = vmax.f32 %v622_v30, 0.0  ;;  %v777_v9 = vmax.f32 %v711_v26, 0.0  ;;  %vm17807_vm0 = vmpackc.low %vm14823_vm13, %vm14818_vm11 }
 0x163   : > { %18161 = vst [vmem:[#allocation56_spill] sm:$0xff] %v18160_v38  ;;  %v880_v53 = vadd.s32 232, %v13984_v16  ;;  %v1997_v56 = vsel %vm18162_vm2, 0, %v13533_v47  ;;  %vm14837_vm15 = vcmp.ne.s32.totalorder %v1939_v24, %v14023_v1  ;;  %v18163_v39 = vmov 0  ;;  %v10424_v46 = vld [vmem:[#allocation2 + $0x188] sm:$0xf] }
 0x164   : > { %v18164_v39 = vsel %vm14837_vm15, 4294967295, %v18163_v39  ;;  %vm14842_vm7 = vcmp.ne.s32.totalorder %v1940_v17, %v14026_v2  ;;  %v18166_v62 = vmov 0  ;;  %v14846_v26 = vpack.c.bf16 %v747_v36, %v746_v61 }
 0x165   : > { %18165 = vst [vmem:[#allocation57_spill] sm:$0xff] %v18164_v39  ;;  %v18167_v62 = vsel %vm14842_vm7, 4294967295, %v18166_v62  ;;  %v1841_v13 = vunpack.c.l.b16 %v1586_v50  ;;  %v811_v28 = vpack.c.bf16 %v777_v9, %v776_v4  ;;  %v1090_v47 = vand.u32 15, %v880_v53  ;;  %vm17817_vm9 = vmpackc.low %vm14842_vm7, %vm14837_vm15  ;;  %v12856_v53 = vld [vmem:[#allocation2 + $0x18c] sm:$0xf] }
 0x166   : > { %18168 = vst [vmem:[#allocation58_spill] sm:$0xff] %v18167_v62  ;;  %v587_v24 = vadd.f32 %v586_v14, %v14014_v58  ;;  %v1842_v30 = vunpack.c.h.b16 %v1586_v50  ;;  %v14860_v17 = vsel %vm17807_vm0, 0, %v14846_v26  ;;  %v676_v61 = vadd.f32 %v675_v0, %v14016_v59  ;;  %v10426_v0 = vld [vmem:[#allocation2 + $0x1a8] sm:$0xf0]  ;;  %v10984_v39 = vld [vmem:[#allocation9 + $0x1c0] sm:$0xf] }
 0x167   : > { %18169 = vst [vmem:[#allocation59_spill] sm:$0xff] %v14846_v26  ;;  %v10425_v36 = vor.u32 %v12857_v41, %v10424_v46  ;;  %v1713_v50 = vrot.slane %v14767_v57, 4  ;;  %vm1296_vm10 = vcmp.eq.s32.totalorder %v1090_v47, 15  ;;  %v14874_v14 = vsel %vm17817_vm9, 0, %v811_v28  ;;  %v12981_v46 = vld [vmem:[#allocation9 + $0x144] sm:$0xf0] }
 0x168   : > { %828 = vst [vmem:[#allocation2 + $0x1c8] sm:$0xff] %v14846_v26  ;;  %v748_v4 = vmax.f32 %v587_v24, 0.0  ;;  %v2177_v9 = vshll.u32 %v1997_v56, 16  ;;  %vm1425_vm2 = vmpackc.low %vm1296_vm10, %vm1296_vm10  ;;  %vm14877_vm0 = vcmp.ne.s32.totalorder %v1841_v13, %v14023_v1  ;;  %v18172_v41 = vmov 0  ;;  %v10920_v24 = vld [vmem:[#allocation9 + $0x140] sm:$0xf] }
 0x169   : > { %18170 = vst [vmem:[#allocation60_spill] sm:$0xff] %v14860_v17  ;;  %3351 = vmatmul.bf16.gmra.mxu2 %v10425_v36  ;;  %3529 = vmatmul.bf16.gmra.mxu0 %v10425_v36  ;;  %v18173_v41 = vsel %vm14877_vm0, 4294967295, %v18172_v41  ;;  %vm14882_vm11 = vcmp.ne.s32.totalorder %v1842_v30, %v14026_v2  ;;  %v18175_v57 = vmov 0  ;;  %v749_v47 = vmax.f32 %v676_v61, 0.0  ;;  %v12997_v62 = vld [vmem:[#allocation9 + $0x1c4] sm:$0xf0] }
 0x16a   : > { %2449 = vst [vmem:[#allocation2 + $0x190] sm:$0xff] %v14846_v26  ;;  %v18176_v57 = vsel %vm14882_vm11, 4294967295, %v18175_v57  ;;  %v626_v36 = vpop.f32.mrf.mxu2  ;;  %v2181_v13 = vshrl.u32 %v1997_v56, 16  ;;  %v1721_v18 = vsel %vm14028_vm8, %v1713_v50, %v14007_v55  ;;  %v10429_v38 = vor.u32 %v12856_v53, %v10426_v0  ;;  %vm17816_vm10 = vmpackc.low %vm14882_vm11, %vm14877_vm0 }
 0x16b   : > { %843 = vst [vmem:[#allocation2 + $0x3a8] sm:$0xff] %v811_v28  ;;  %v1457_v28 = vsel %vm1425_vm2, 65537, %v14274_v12  ;;  %v797_v30 = vpack.c.bf16 %v749_v47, %v748_v4  ;;  %v10921_v61 = vor.u32 %v12981_v46, %v10920_v24  ;;  %v10985_v50 = vor.u32 %v12997_v62, %v10984_v39  ;;  %v11048_v46 = vld [vmem:[#allocation9 + $0x240] sm:$0xf]  ;;  %v13534_v62 = vld [vmem:[#allocation2 + $0x228] sm:$0xff]  ;;  %vm18181_vm2 = vmpackc.low %vm14207_vm14, %vm14202_vm12 }
 0x16c   : > { %18171 = vst [vmem:[#allocation61_spill] sm:$0xff] %v14874_v14  ;;  %v715_v14 = vpop.f32.mrf.mxu3  ;;  %v1724_v17 = vshrl.u32 %v1457_v28, 16  ;;  %v1727_v26 = vshll.u32 %v1457_v28, 16  ;;  %3440 = vmatmul.bf16.gmra.mxu3 %v10429_v38  ;;  %3618 = vmatmul.bf16.gmra.mxu1 %v10429_v38  ;;  %v1946_v4 = vunpack.c.l.b16 %v1721_v18  ;;  %v1947_v53 = vunpack.c.h.b16 %v1721_v18  ;;  %vm18188_vm12 = vmpackc.low %vm14264_vm5, %vm14259_vm3 }
 0x16d   : > { %18174 = vst [vmem:[#allocation62_spill] sm:$0xff] %v18173_v41  ;;  %v14901_v56 = vsel %vm17816_vm10, 0, %v797_v30  ;;  %4568 = vmatpush.bf16.msra.mxu2 %v10921_v61  ;;  %v14904_v28 = vrot.slane %v2177_v9, 5  ;;  %4657 = vmatpush.bf16.msra.mxu3 %v10985_v50  ;;  %v625_v47 = vadd.f32 %v14812_v44, %v14014_v58  ;;  %v714_v24 = vadd.f32 %v14814_v6, %v14016_v59  ;;  %v11112_v9 = vld [vmem:[#allocation9 + $0x2c0] sm:$0xf] }
 0x16e   : > { %18177 = vst [vmem:[#allocation63_spill] sm:$0xff] %v18176_v57  ;;  %v14894_v12 = vrot.slane %v1724_v17, 7  ;;  %v2183_v17 = vrot.slane %v2181_v13, 4  ;;  %v1998_v44 = vsel %vm18181_vm2, 0, %v13534_v62  ;;  %v13029_v6 = vld [vmem:[#allocation9 + $0x2c4] sm:$0xf0]  ;;  %vm14927_vm10 = vcmp.ne.s32.totalorder %v1946_v4, %v14023_v1 }
 0x16f   : > { %829 = vst [vmem:[#allocation2 + $0x1e8] sm:$0xff] %v797_v30  ;;  %v13013_v30 = vld [vmem:[#allocation9 + $0x244] sm:$0xf0]  ;;  %v18182_v50 = vmov 0  ;;  %vm14932_vm9 = vcmp.ne.s32.totalorder %v1947_v53, %v14026_v2  ;;  %v779_v5 = vmax.f32 %v714_v24, 0.0  ;;  %vm18189_vm14 = vnez %v18056_v45 }
 0x170   : > { %18178 = vst [vmem:[#allocation64_spill] sm:$0xff] %v14894_v12  ;;  %v1729_v0 = vor.u32 %v1727_v26, %v14894_v12  ;;  %v778_v26 = vmax.f32 %v625_v47, 0.0  ;;  %v18183_v50 = vsel %vm14927_vm10, 4294967295, %v18182_v50  ;;  %v11049_v7 = vor.u32 %v13013_v30, %v11048_v46  ;;  %v13535_v62 = vld [vmem:[#allocation2 + $0x68] sm:$0xff]  ;;  %vm18190_vm2 = vmpackc.low %vm14321_vm6, %vm18189_vm14 }
 0x171   : > { %18179 = vst [vmem:[#allocation65_spill] sm:$0xff] %v14901_v56  ;;  %v2184_v47 = vor.u32 %v2183_v17, %v14904_v28  ;;  %v1984_v56 = vsel %vm18188_vm12, 0, %v13535_v62  ;;  %v13536_v4 = vld [vmem:[#allocation2 + $0x88] sm:$0xff]  ;;  %v11113_v46 = vor.u32 %v13029_v6, %v11112_v9  ;;  %v627_v17 = vadd.f32 %v626_v36, %v14014_v58  ;;  %vm17822_vm6 = vmpackc.low %vm14932_vm9, %vm14927_vm10 }
 0x172   : > { %18180 = vst [vmem:[#allocation66_spill] sm:$0xff] %v14904_v28  ;;  %v1730_v39 = vsel %vm14028_vm8, %v14018_v60, %v1729_v0  ;;  %v18185_v0 = vmov 0  ;;  %v1985_v53 = vsel %vm18190_vm2, 0, %v13536_v4  ;;  %v812_v24 = vpack.c.bf16 %v779_v5, %v778_v26  ;;  %4746 = vmatpush.bf16.msra.mxu0 %v11049_v7  ;;  %v13537_v28 = vld [vmem:[#allocation2 + $0x248] sm:$0xff] }
 0x173   : > { %18184 = vst [vmem:[#allocation67_spill] sm:$0xff] %v18183_v50  ;;  %v18186_v0 = vsel %vm14932_vm9, 4294967295, %v18185_v0  ;;  %v1953_v12 = vunpack.c.l.b16 %v1730_v39  ;;  %v1954_v41 = vunpack.c.h.b16 %v1730_v39  ;;  %v2187_v30 = vshll.u32 %v1998_v44, 16  ;;  %4835 = vmatpush.bf16.msra.mxu1 %v11113_v46  ;;  %v13027_v50 = vld [vmem:[#allocation9 + $0x2b4] sm:$0xf0] }
 0x174   : > { %18187 = vst [vmem:[#allocation68_spill] sm:$0xff] %v18186_v0  ;;  %v2191_v54 = vshrl.u32 %v1998_v44, 16  ;;  %vm18191_vm3 = vnez %v18052_v20  ;;  %vm18192_vm5 = vnez %v18050_v63  ;;  %v716_v45 = vadd.f32 %v715_v14, %v14016_v59 }
 0x175   : > { %vm18193_vm12 = vmpackc.low %vm18191_vm3, %vm18192_vm5  ;;  %v2047_v40 = vshll.u32 %v1984_v56, 16  ;;  %v2051_v39 = vshrl.u32 %v1984_v56, 16  ;;  %844 = vst [vmem:[#allocation2 + $0x3c8] sm:$0xff] %v812_v24  ;;  %v14963_v58 = vsel %vm17822_vm6, 0, %v812_v24  ;;  %v2057_v63 = vshll.u32 %v1985_v53, 16 }
 0x176   : > { %v14913_v18 = vpop.f32.mrf.mxu0  ;;  %v1999_v35 = vsel %vm18193_vm12, 0, %v13537_v28  ;;  %18194 = vst [vmem:[#allocation69_spill] sm:$0xff] %v14963_v58  ;;  %v2061_v20 = vshrl.u32 %v1985_v53, 16  ;;  %v780_v36 = vmax.f32 %v627_v17, 0.0  ;;  %v781_v28 = vmax.f32 %v716_v45, 0.0 }
 0x177   : > { %v14915_v38 = vpop.f32.mrf.mxu1  ;;  %v2201_v26 = vshrl.u32 %v1999_v35, 16  ;;  %2465 = vst [vmem:[#allocation2 + $0x390] sm:$0xff] %v812_v24  ;;  %v2197_v44 = vshll.u32 %v1999_v35, 16  ;;  %vm14966_vm14 = vcmp.ne.s32.totalorder %v1953_v12, %v14023_v1  ;;  %v18195_v59 = vmov 0  ;;  %v12859_v62 = vld [vmem:[#allocation2 + $0x1e4] sm:$0xf0] }
 0x178   : > { %v18196_v59 = vsel %vm14966_vm14, 4294967295, %v18195_v59  ;;  %vm14971_vm2 = vcmp.ne.s32.totalorder %v1954_v41, %v14026_v2  ;;  %v18198_v14 = vmov 0  ;;  %v14977_v6 = vrot.slane %v2184_v47, 4  ;;  %v10432_v17 = vld [vmem:[#allocation2 + $0x1c8] sm:$0xf] }
 0x179   : > { %18197 = vst [vmem:[#allocation70_spill] sm:$0xff] %v18196_v59  ;;  %v18199_v14 = vsel %vm14971_vm2, 4294967295, %v18198_v14  ;;  %v14979_v5 = vrot.slane %v2187_v30, 5  ;;  %v14981_v7 = vrot.slane %v2191_v54, 4  ;;  %v14987_v53 = vrot.slane %v2047_v40, 5  ;;  %vm17827_vm3 = vmpackc.low %vm14971_vm2, %vm14966_vm14  ;;  %v13538_v40 = vld [vmem:[#allocation2 + $0x268] sm:$0xff] }
 0x17a   : > { %18200 = vst [vmem:[#allocation71_spill] sm:$0xff] %v18199_v14  ;;  %v14989_v41 = vrot.slane %v2051_v39, 4  ;;  %v14991_v24 = vrot.slane %v2201_v26, 4  ;;  %v14993_v46 = vpack.c.bf16 %v781_v28, %v780_v36  ;;  %v14995_v47 = vrot.slane %v2057_v63, 5  ;;  %v10434_v54 = vld [vmem:[#allocation2 + $0x1e8] sm:$0xf0] }
 0x17b   : > { %v14997_v30 = vrot.slane %v2061_v20, 4  ;;  %v2923_v35 = vld [vmem:[#allocation11] sm:$0x3]  ;;  %v15003_v45 = vrot.slane %v2197_v44, 5  ;;  %vm18202_vm5 = vnez %v18063_v22  ;;  %vm18203_vm12 = vnez %v18061_v21  ;;  %v12858_v20 = vld [vmem:[#allocation2 + $0x1cc] sm:$0xf] }
 0x17c   : > { %v14922_v13 = vpop.f32.mrf.mxu2  ;;  %18201 = vst [vmem:[#allocation72_spill] sm:$0xff] %v14993_v46  ;;  %vm18204_vm6 = vmpackc.low %vm18202_vm5, %vm18203_vm12  ;;  %v15017_v26 = vsel %vm17827_vm3, 0, %v14993_v46  ;;  %v10433_v63 = vor.u32 %v12859_v62, %v10432_v17  ;;  %v10912_v36 = vld [vmem:[#allocation9 + $0x130] sm:$0xf]  ;;  %v12979_v28 = vld [vmem:[#allocation9 + $0x134] sm:$0xf0]  ;;  %v18206_v22 = vor.u32 %v14153_v11, %v14151_v52  ;;  %v10437_v44 = vor.u32 %v12858_v20, %v10434_v54 }
 0x17d   : > { %v14924_v61 = vpop.f32.mrf.mxu3  ;;  %v2000_v39 = vsel %vm18204_vm6, 0, %v13538_v40  ;;  %845 = vst [vmem:[#allocation2 + $0x3e8] sm:$0xff] %v14993_v46  ;;  %v15024_v40 = vperm.slane %v2923_v35, 1  ;;  %v10976_v58 = vld [vmem:[#allocation9 + $0x1b0] sm:$0xf]  ;;  %v2204_v62 = vor.u32 %v14991_v24, %v15003_v45  ;;  %v13539_v52 = vld [vmem:[#allocation2 + $0xa8] sm:$0xff]  ;;  %vm18208_vm6 = vnez %v18067_v23 }
 0x17e   : > { %v3502_v56 = vpop.f32.mrf.mxu0  ;;  %18205 = vst [vmem:[#allocation73_spill] sm:$0xff] %v15017_v26  ;;  %v15022_v21 = vrot.slane %v18206_v22, 4  ;;  %3356 = vmatmul.bf16.gmra.mxu2 %v10433_v63  ;;  %3534 = vmatmul.bf16.gmra.mxu0 %v10433_v63  ;;  %v12995_v59 = vld [vmem:[#allocation9 + $0x1b4] sm:$0xf0]  ;;  %vm18209_vm5 = vnez %v18065_v34  ;;  %v11040_v54 = vld [vmem:[#allocation9 + $0x230] sm:$0xf]  ;;  %vm18211_vm3 = vnez %v18075_v49  ;;  %vm18212_vm14 = vnez %v18073_v48 }
 0x17f   : > { %v14975_v9 = vpop.f32.mrf.mxu1  ;;  %18207 = vst [vmem:[#allocation74_spill] sm:$0xff] %v15024_v40  ;;  %vm18210_vm12 = vmpackc.low %vm18208_vm6, %vm18209_vm5  ;;  %v13011_v63 = vld [vmem:[#allocation9 + $0x234] sm:$0xf0]  ;;  %v2207_v20 = vshll.u32 %v2000_v39, 16  ;;  %v2211_v22 = vshrl.u32 %v2000_v39, 16  ;;  %v13540_v46 = vld [vmem:[#allocation2 + $0x288] sm:$0xff]  ;;  %3445 = vmatmul.bf16.gmra.mxu3 %v10437_v44  ;;  %3623 = vmatmul.bf16.gmra.mxu1 %v10437_v44  ;;  %v3501_v23 = vadd.f32 %v14913_v18, %v15024_v40  ;;  %v10913_v26 = vor.u32 %v12979_v28, %v10912_v36 }
 0x180   : > { %v1986_v11 = vsel %vm18210_vm12, 0, %v13539_v52  ;;  %vm18213_vm2 = vmpackc.low %vm18211_vm3, %vm18212_vm14  ;;  %v10977_v17 = vor.u32 %v12995_v59, %v10976_v58  ;;  %v15047_v14 = vperm.slane %v2923_v35, 0  ;;  %v3503_v39 = vadd.f32 %v3502_v56, %v15024_v40  ;;  %v11104_v49 = vld [vmem:[#allocation9 + $0x2b0] sm:$0xf]  ;;  %v13541_v18 = vld [vmem:[#allocation2 + $0xc8] sm:$0xff] }
 0x181   : > { %v15042_v24 = vsel %vm18213_vm2, 0, %v13540_v46  ;;  %v2420_v46 = vld [vmem:[#allocation2 + $0x228] sm:$0xff]  ;;  %v2067_v57 = vshll.u32 %v1986_v11, 16  ;;  %v2071_v2 = vshrl.u32 %v1986_v11, 16  ;;  %v3590_v44 = vadd.f32 %v14915_v38, %v3501_v23  ;;  %4569 = vmatpush.bf16.msra.mxu2 %v10913_v26 }
 0x182   : > { %v11041_v1 = vor.u32 %v13011_v63, %v11040_v54  ;;  %2452 = vst [vmem:[#allocation2 + $0x1f0] sm:$0xff] %v2420_v46  ;;  %vm18214_vm14 = vnez %v18080_v10  ;;  %vm18215_vm2 = vnez %v18078_v51  ;;  %4658 = vmatpush.bf16.msra.mxu3 %v10977_v17  ;;  %v3323_v59 = vadd.f32 %v14922_v13, %v15047_v14 }
 0x183   : > { %vm18216_vm3 = vmpackc.low %vm18214_vm14, %vm18215_vm2  ;;  %v3592_v56 = vadd.f32 %v14975_v9, %v3503_v39  ;;  %v15061_v35 = vrot.slane %v2207_v20, 5  ;;  %v3670_v36 = vmax.f32 %v3590_v44, 0.0  ;;  %v11105_v10 = vor.u32 %v13027_v50, %v11104_v49  ;;  %v10440_v49 = vld [vmem:[#allocation2 + $0x208] sm:$0xf] }
 0x184   : > { %v14983_v4 = vpop.f32.mrf.mxu2  ;;  %v1987_v58 = vsel %vm18216_vm3, 0, %v13541_v18  ;;  %4747 = vmatpush.bf16.msra.mxu0 %v11041_v1  ;;  %v2217_v28 = vshll.u32 %v15042_v24, 16  ;;  %v3412_v26 = vadd.f32 %v14924_v61, %v3323_v59  ;;  %v15067_v13 = vrot.slane %v2211_v22, 4 }
 0x185   : > { %v14985_v12 = vpop.f32.mrf.mxu3  ;;  %v3325_v38 = vadd.f32 %v14983_v4, %v15047_v14  ;;  %v3672_v17 = vmax.f32 %v3592_v56, 0.0  ;;  %v2221_v9 = vshrl.u32 %v15042_v24, 16  ;;  %v2077_v54 = vshll.u32 %v1987_v58, 16  ;;  %3734 = vst [vmem:[%s15072_s29 + $0x8] sm:$0xff] %v3670_v36  ;;  %4836 = vmatpush.bf16.msra.mxu1 %v11105_v10  ;;  %v12860_v10 = vld [vmem:[#allocation2 + $0x20c] sm:$0xf] }
 0x186   : > { %v3505_v34 = vpop.f32.mrf.mxu0  ;;  %v15075_v50 = vrot.slane %v2067_v57, 5  ;;  %v2073_v61 = vrot.slane %v2071_v2, 4  ;;  %v3669_v4 = vmax.f32 %v3412_v26, 0.0  ;;  %v15078_v63 = vrot.slane %v2204_v62, 4  ;;  %v12861_v62 = vld [vmem:[#allocation2 + $0x224] sm:$0xf0] }
 0x187   : > { %v3594_v52 = vpop.f32.mrf.mxu1  ;;  %v3506_v51 = vadd.f32 %v3505_v34, %v15024_v40  ;;  %v3414_v11 = vadd.f32 %v14985_v12, %v3325_v38  ;;  %3736 = vst [vmem:[%s15072_s29 + $0x28] sm:$0xff] %v3672_v17  ;;  %v2081_v20 = vshrl.u32 %v1987_v58, 16  ;;  %v2194_v39 = vor.u32 %v14981_v7, %v14979_v5  ;;  %v13542_v38 = vld [vmem:[#allocation2 + $0x2a8] sm:$0xff] }
 0x188   : > { %v18217_v57 = vor.u32 %v14997_v30, %v14995_v47  ;;  %v15088_v2 = vrot.slane %v2217_v28, 5  ;;  %3733 = vst [vmem:[%s15072_s29] sm:$0xff] %v3669_v4  ;;  %v15092_v18 = vrot.slane %v2221_v9, 4  ;;  %v15094_v58 = vrot.slane %v2077_v54, 5  ;;  %v13543_v26 = vld [vmem:[#allocation2 + $0xe8] sm:$0xff] }
 0x189   : > { %v3595_v1 = vadd.f32 %v3594_v52, %v3506_v51  ;;  %v3671_v12 = vmax.f32 %v3414_v11, 0.0  ;;  %v2214_v59 = vor.u32 %v15067_v13, %v15061_v35  ;;  %v2074_v56 = vor.u32 %v2073_v61, %v15075_v50  ;;  %v10442_v51 = vld [vmem:[#allocation2 + $0x228] sm:$0xf0] }
 0x18a   : > { %v15086_v52 = vrot.slane %v18217_v57, 4  ;;  %vm18218_vm6 = vnez %v18084_v37  ;;  %vm18219_vm5 = vnez %v18082_v19  ;;  %vm18221_vm14 = vnez %v18092_v25 }
 0x18b   : > { %v3674_v22 = vmax.f32 %v3595_v1, 0.0  ;;  %3735 = vst [vmem:[%s15072_s29 + $0x20] sm:$0xff] %v3671_v12  ;;  %vm18220_vm12 = vmpackc.low %vm18218_vm6, %vm18219_vm5  ;;  %vm18222_vm2 = vnez %v18090_v15  ;;  %v10441_v37 = vor.u32 %v12861_v62, %v10440_v49  ;;  %v18224_v19 = vor.u32 %v14989_v41, %v14987_v53  ;;  %v12993_v62 = vld [vmem:[#allocation9 + $0x1a4] sm:$0xf0] }
 0x18c   : > { %v3327_v48 = vpop.f32.mrf.mxu2  ;;  %v15106_v36 = vsel %vm18220_vm12, 0, %v13542_v38  ;;  %vm18223_vm3 = vmpackc.low %vm18221_vm14, %vm18222_vm2  ;;  %vm18225_vm6 = vnez %v18025_v8  ;;  %v10445_v61 = vor.u32 %v12860_v10, %v10442_v51  ;;  %v11096_v38 = vld [vmem:[#allocation9 + $0x2a0] sm:$0xf]  ;;  %vm18226_vm5 = vnez %v18097_v43 }
 0x18d   : > { %v3416_v0 = vpop.f32.mrf.mxu3  ;;  %v3328_v24 = vadd.f32 %v3327_v48, %v15047_v14  ;;  %3738 = vst [vmem:[%s15072_s29 + $0x88] sm:$0xff] %v3674_v22  ;;  %v15116_v17 = vsel %vm18223_vm3, 0, %v13543_v26  ;;  %v2055_v11 = vrot.slane %v18224_v19, 4  ;;  %v2050_v1 = vsel %vm18225_vm6, %v15022_v21, %v14987_v53  ;;  %v13544_v19 = vld [vmem:[#allocation2 + $0x2c8] sm:$0xff] }
 0x18e   : > { %v3507_v23 = vpop.f32.mrf.mxu0  ;;  %v2227_v15 = vshll.u32 %v15106_v36, 16  ;;  %v2231_v25 = vshrl.u32 %v15106_v36, 16  ;;  %3361 = vmatmul.bf16.gmra.mxu2 %v10441_v37  ;;  %3539 = vmatmul.bf16.gmra.mxu0 %v10441_v37  ;;  %2375 = vst [vmem:[#allocation2 + $0x40] sm:$0xff] %v2050_v1  ;;  %v2087_v4 = vshll.u32 %v15116_v17, 16  ;;  %v2070_v53 = vsel %vm18225_vm6, %v15086_v52, %v15075_v50  ;;  %v10968_v52 = vld [vmem:[#allocation9 + $0x1a0] sm:$0xf] }
 0x18f   : > { %v3596_v34 = vpop.f32.mrf.mxu1  ;;  %v3508_v46 = vadd.f32 %v3507_v23, %v15024_v40  ;;  %v3417_v7 = vadd.f32 %v3416_v0, %v3328_v24  ;;  %v15109_v0 = vrot.slane %v2081_v20, 4  ;;  %v2060_v41 = vsel %vm18225_vm6, %v2055_v11, %v14995_v47  ;;  %3450 = vmatmul.bf16.gmra.mxu3 %v10445_v61  ;;  %3628 = vmatmul.bf16.gmra.mxu1 %v10445_v61  ;;  %v10904_v24 = vld [vmem:[#allocation9 + $0x120] sm:$0xf]  ;;  %v12977_v23 = vld [vmem:[#allocation9 + $0x124] sm:$0xf0] }
 0x190   : > { %v15136_v21 = vrot.slane %v2194_v39, 4  ;;  %v2224_v20 = vor.u32 %v15092_v18, %v15088_v2  ;;  %v2091_v49 = vshrl.u32 %v15116_v17, 16  ;;  %v10905_v39 = vor.u32 %v12977_v23, %v10904_v24  ;;  %2376 = vst [vmem:[#allocation2 + $0x60] sm:$0xff] %v2060_v41  ;;  %v13545_v11 = vld [vmem:[#allocation2 + $0x108] sm:$0xff] }
 0x191   : > { %v3597_v28 = vadd.f32 %v3596_v34, %v3508_v46  ;;  %v3673_v13 = vmax.f32 %v3417_v7, 0.0  ;;  %v2075_v34 = vrot.slane %v2074_v56, 4  ;;  %v2084_v57 = vor.u32 %v15109_v0, %v15094_v58  ;;  %v11032_v7 = vld [vmem:[#allocation9 + $0x220] sm:$0xf]  ;;  %v13025_v0 = vld [vmem:[#allocation9 + $0x2a4] sm:$0xf0] }
 0x192   : > { %v2190_v10 = vsel %vm18225_vm6, %v14977_v6, %v14979_v5  ;;  %4570 = vmatpush.bf16.msra.mxu2 %v10905_v39  ;;  %v2200_v26 = vsel %vm18225_vm6, %v15136_v21, %v15003_v45  ;;  %v15158_v17 = vrot.slane %v2214_v59, 4  ;;  %v2089_v37 = vrot.slane %v2087_v4, 5  ;;  %2377 = vst [vmem:[#allocation2 + $0x80] sm:$0xff] %v2070_v53  ;;  %v18230_v45 = vld [vmem:[#allocation35_spill] sm:$0xff]  ;;  %v10448_v21 = vld [vmem:[#allocation2 + $0x248] sm:$0xf] }
 0x193   : > { %v3676_v9 = vmax.f32 %v3597_v28, 0.0  ;;  %3737 = vst [vmem:[%s15072_s29 + $0x80] sm:$0xff] %v3673_v13  ;;  %v2080_v56 = vsel %vm18225_vm6, %v2075_v34, %v15094_v58  ;;  %vm18227_vm12 = vnez %v18095_v32  ;;  %v11097_v58 = vor.u32 %v13025_v0, %v11096_v38  ;;  %v13546_v24 = vld [vmem:[#allocation2 + $0x2e8] sm:$0xff] }
 0x194   : > { %v3329_v44 = vpop.f32.mrf.mxu2  ;;  %vm18228_vm14 = vmpackc.low %vm18226_vm5, %vm18227_vm12  ;;  %vm18229_vm2 = vnez %v18103_v33  ;;  %vm18231_vm3 = vnez %v18230_v45  ;;  %2378 = vst [vmem:[#allocation2 + $0xa0] sm:$0xff] %v2080_v56  ;;  %v2210_v32 = vsel %vm18225_vm6, %v15078_v63, %v15061_v35  ;;  %v2085_v43 = vrot.slane %v2084_v57, 4  ;;  %v18233_v23 = vld [vmem:[#allocation38_spill] sm:$0xff] }
 0x195   : > { %v3418_v48 = vpop.f32.mrf.mxu3  ;;  %v3330_v30 = vadd.f32 %v3329_v44, %v15047_v14  ;;  %3740 = vst [vmem:[%s15072_s29 + $0xa8] sm:$0xff] %v3676_v9  ;;  %v15165_v6 = vsel %vm18228_vm14, 0, %v13544_v19  ;;  %vm18232_vm10 = vmpackc.low %vm18229_vm2, %vm18231_vm3  ;;  %v2093_v9 = vrot.slane %v2091_v49, 4  ;;  %4837 = vmatpush.bf16.msra.mxu1 %v11097_v58  ;;  %v2220_v33 = vsel %vm18225_vm6, %v15158_v17, %v15088_v2  ;;  %v13547_v56 = vld [vmem:[#allocation2 + $0x128] sm:$0xff] }
 0x196   : > { %v1989_v59 = vsel %vm18232_vm10, 0, %v13545_v11  ;;  %2389 = vst [vmem:[#allocation2 + $0x200] sm:$0xff] %v2190_v10  ;;  %v15182_v1 = vrot.slane %v2227_v15, 5  ;;  %v2233_v61 = vrot.slane %v2231_v25, 4  ;;  %v2237_v41 = vshll.u32 %v15165_v6, 16  ;;  %v18238_v10 = vld [vmem:[#allocation40_spill] sm:$0xff] }
 0x197   : > { %v3419_v54 = vadd.f32 %v3418_v48, %v3330_v30  ;;  %v10969_v48 = vor.u32 %v12993_v62, %v10968_v52  ;;  %v13009_v30 = vld [vmem:[#allocation9 + $0x224] sm:$0xf0]  ;;  %v15188_v35 = vrot.slane %v2224_v20, 4  ;;  %v2097_v63 = vshll.u32 %v1989_v59, 16  ;;  %2390 = vst [vmem:[#allocation2 + $0x220] sm:$0xff] %v2200_v26 }
 0x198   : > { %v11033_v28 = vor.u32 %v13009_v30, %v11032_v7  ;;  %v2090_v53 = vsel %vm18225_vm6, %v2085_v43, %v2089_v37  ;;  %v2101_v2 = vshrl.u32 %v1989_v59, 16  ;;  %v2094_v25 = vor.u32 %v2093_v9, %v2089_v37  ;;  %v18235_v20 = vld [vmem:[#allocation37_spill] sm:$0xff]  ;;  %v12862_v52 = vld [vmem:[#allocation2 + $0x24c] sm:$0xf]  ;;  %2391 = vst [vmem:[#allocation2 + $0x240] sm:$0xff] %v2210_v32  ;;  %v18243_v43 = vld [vmem:[#allocation44_spill] sm:$0xff] }
 0x199   : > { %v3675_v12 = vmax.f32 %v3419_v54, 0.0  ;;  %v3510_v47 = vpop.f32.mrf.mxu0  ;;  %v3599_v22 = vpop.f32.mrf.mxu1  ;;  %4659 = vmatpush.bf16.msra.mxu3 %v10969_v48  ;;  %2379 = vst [vmem:[#allocation2 + $0xc0] sm:$0xff] %v2090_v53  ;;  %vm18234_vm10 = vnez %v18233_v23  ;;  %vm18236_vm5 = vnez %v18235_v20  ;;  %v2234_v49 = vor.u32 %v2233_v61, %v15182_v1  ;;  %v10450_v62 = vld [vmem:[#allocation2 + $0x268] sm:$0xf0]  ;;  %v18245_v9 = vld [vmem:[#allocation43_spill] sm:$0xff] }
 0x19a   : > { %v3511_v50 = vadd.f32 %v3510_v47, %v15024_v40  ;;  %4748 = vmatpush.bf16.msra.mxu0 %v11033_v28  ;;  %v12863_v47 = vld [vmem:[#allocation2 + $0x264] sm:$0xf0]  ;;  %vm18237_vm12 = vmpackc.low %vm18234_vm10, %vm18236_vm5  ;;  %v2241_v39 = vshrl.u32 %v15165_v6, 16  ;;  %v2230_v7 = vsel %vm18225_vm6, %v15188_v35, %v15182_v1  ;;  %v2103_v30 = vrot.slane %v2101_v2, 4  ;;  %2392 = vst [vmem:[#allocation2 + $0x260] sm:$0xff] %v2220_v33 }
 0x19b   : > { %3739 = vst [vmem:[%s15072_s29 + $0xa0] sm:$0xff] %v3675_v12  ;;  %v2004_v34 = vsel %vm18237_vm12, 0, %v13546_v24  ;;  %v10449_v48 = vor.u32 %v12863_v47, %v10448_v21  ;;  %vm18239_vm14 = vnez %v18238_v10  ;;  %v10453_v17 = vor.u32 %v12862_v52, %v10450_v62  ;;  %v13548_v32 = vld [vmem:[#allocation2 + $0x308] sm:$0xff]  ;;  %v18248_v21 = vld [vmem:[#allocation47_spill] sm:$0xff] }
 0x19c   : > { %v3600_v51 = vadd.f32 %v3599_v22, %v3511_v50  ;;  %v15201_v50 = vrot.slane %v2237_v41, 5  ;;  %v2247_v38 = vshll.u32 %v2004_v34, 16  ;;  %v2251_v26 = vshrl.u32 %v2004_v34, 16  ;;  %2393 = vst [vmem:[#allocation2 + $0x280] sm:$0xff] %v2230_v7  ;;  %v2408_v53 = vld [vmem:[#allocation2 + $0xa8] sm:$0xff] }
 0x19d   : > { %v2095_v19 = vrot.slane %v2094_v25, 4  ;;  %v2235_v6 = vrot.slane %v2234_v49, 4  ;;  %vm18244_vm10 = vnez %v18243_v43  ;;  %vm18246_vm5 = vnez %v18245_v9  ;;  %v13549_v2 = vld [vmem:[#allocation2 + $0x148] sm:$0xff]  ;;  %2440 = vst [vmem:[#allocation2 + $0x70] sm:$0xff] %v2408_v53 }
 0x19e   : > { %v3332_v46 = vpop.f32.mrf.mxu2  ;;  %v3421_v44 = vpop.f32.mrf.mxu3  ;;  %v3678_v13 = vmax.f32 %v3600_v51, 0.0  ;;  %v18240_v51 = vld [vmem:[#allocation39_spill] sm:$0xff]  ;;  %3366 = vmatmul.bf16.gmra.mxu2 %v10449_v48  ;;  %3544 = vmatmul.bf16.gmra.mxu0 %v10449_v48  ;;  %vm18247_vm12 = vmpackc.low %vm18244_vm10, %vm18246_vm5  ;;  %v18250_v47 = vld [vmem:[#allocation46_spill] sm:$0xff]  ;;  %v1587_v62 = vrot.slane %v14792_v31, 4 }
 0x19f   : > { %v3333_v18 = vadd.f32 %v3332_v46, %v15047_v14  ;;  %vm18241_vm2 = vnez %v18240_v51  ;;  %3455 = vmatmul.bf16.gmra.mxu3 %v10453_v17  ;;  %3633 = vmatmul.bf16.gmra.mxu1 %v10453_v17  ;;  %v2240_v41 = vsel %vm18225_vm6, %v2235_v6, %v15201_v50  ;;  %vm18253_vm10 = vmpackc.low %vm14723_vm4, %vm14716_vm1  ;;  %v10456_v51 = vld [vmem:[#allocation2 + $0x288] sm:$0xf]  ;;  %vm18254_vm1 = vnez %v18145_v42 }
 0x1a0   : > { %3742 = vst [vmem:[%s15072_s29 + $0x108] sm:$0xff] %v3678_v13  ;;  %vm18242_vm3 = vmpackc.low %vm18239_vm14, %vm18241_vm2  ;;  %vm18249_vm14 = vnez %v18248_v21  ;;  %vm18251_vm2 = vnez %v18250_v47  ;;  %v13551_v6 = vld [vmem:[#allocation2 + $0x168] sm:$0xff]  ;;  %v10457_v43 = vor.u32 %v12865_v27, %v10456_v51  ;;  %v18260_v47 = vld [vmem:[#allocation52_spill] sm:$0xff] }
 0x1a1   : > { %v3422_v5 = vadd.f32 %v3421_v44, %v3333_v18  ;;  %v3512_v4 = vpop.f32.mrf.mxu0  ;;  %v3601_v12 = vpop.f32.mrf.mxu1  ;;  %v2099_v44 = vrot.slane %v2097_v63, 5  ;;  %v1990_v28 = vsel %vm18242_vm3, 0, %v13547_v56  ;;  %v2249_v63 = vrot.slane %v2247_v38, 5  ;;  %vm18252_vm3 = vmpackc.low %vm18249_vm14, %vm18251_vm2  ;;  %2394 = vst [vmem:[#allocation2 + $0x2a0] sm:$0xff] %v2240_v41  ;;  %v2410_v38 = vld [vmem:[#allocation2 + $0xe8] sm:$0xff] }
 0x1a2   : > { %v3513_v15 = vadd.f32 %v3512_v4, %v15024_v40  ;;  %v2107_v58 = vshll.u32 %v1990_v28, 16  ;;  %v2111_v13 = vshrl.u32 %v1990_v28, 16  ;;  %v2253_v4 = vrot.slane %v2251_v26, 4  ;;  %2442 = vst [vmem:[#allocation2 + $0xb0] sm:$0xff] %v2410_v38  ;;  %v18258_v21 = vld [vmem:[#allocation53_spill] sm:$0xff]  ;;  %v18264_v38 = vld [vmem:[#allocation55_spill] sm:$0xff] }
 0x1a3   : > { %v3677_v54 = vmax.f32 %v3422_v5, 0.0  ;;  %v2243_v5 = vrot.slane %v2241_v39, 4  ;;  %v2100_v59 = vsel %vm18225_vm6, %v2095_v19, %v2099_v44  ;;  %v2104_v35 = vor.u32 %v2103_v30, %v2099_v44 }
 0x1a4   : > { %v3602_v46 = vadd.f32 %v3601_v12, %v3513_v15  ;;  %2380 = vst [vmem:[#allocation2 + $0xe0] sm:$0xff] %v2100_v59  ;;  %v1991_v15 = vsel %vm18252_vm3, 0, %v13549_v2  ;;  %v2109_v25 = vrot.slane %v2107_v58, 5  ;;  %v2113_v20 = vrot.slane %v2111_v13, 4  ;;  %v13552_v2 = vld [vmem:[#allocation2 + $0x348] sm:$0xff] }
 0x1a5   : > { %3741 = vst [vmem:[%s15072_s29 + $0x100] sm:$0xff] %v3677_v54  ;;  %v2005_v54 = vsel %vm18247_vm12, 0, %v13548_v32  ;;  %v2254_v49 = vor.u32 %v2253_v4, %v2249_v63  ;;  %v2117_v39 = vshll.u32 %v1991_v15, 16  ;;  %v2121_v10 = vshrl.u32 %v1991_v15, 16 }
 0x1a6   : > { %v3334_v22 = vpop.f32.mrf.mxu2  ;;  %v3423_v36 = vpop.f32.mrf.mxu3  ;;  %v3680_v0 = vmax.f32 %v3602_v46, 0.0  ;;  %v2257_v24 = vshll.u32 %v2005_v54, 16  ;;  %v13550_v46 = vld [vmem:[#allocation2 + $0x328] sm:$0xff]  ;;  %v2114_v56 = vor.u32 %v2113_v20, %v2109_v25  ;;  %v882_v32 = vadd.s32 248, %v13984_v16  ;;  %v10960_v20 = vld [vmem:[#allocation9 + $0x190] sm:$0xf] }
 0x1a7   : > { %v3335_v57 = vadd.f32 %v3334_v22, %v15047_v14  ;;  %v15248_v26 = vrot.slane %v2117_v39, 5  ;;  %v2255_v19 = vrot.slane %v2254_v49, 4  ;;  %vm18259_vm12 = vnez %v18258_v21 }
 0x1a8   : > { %3744 = vst [vmem:[%s15072_s29 + $0x128] sm:$0xff] %v3680_v0  ;;  %v15242_v48 = vrot.slane %v2257_v24, 5  ;;  %v2115_v4 = vrot.slane %v2114_v56, 4  ;;  %vm18261_vm14 = vnez %v18260_v47  ;;  %v1595_v49 = vsel %vm14028_vm8, %v1587_v62, %v14007_v55 }
 0x1a9   : > { %v3424_v18 = vadd.f32 %v3423_v36, %v3335_v57  ;;  %v2244_v36 = vor.u32 %v2243_v5, %v15201_v50  ;;  %v2105_v57 = vrot.slane %v2104_v35, 4  ;;  %v15239_v50 = vsel %vm18253_vm10, 0, %v13550_v46  ;;  %v18255_v5 = vld [vmem:[#allocation49_spill] sm:$0xff]  ;;  %vm18262_vm2 = vmpackc.low %vm18259_vm12, %vm18261_vm14  ;;  %v13007_v46 = vld [vmem:[#allocation9 + $0x214] sm:$0xf0] }
 0x1aa   : > { %v2267_v17 = vshll.u32 %v15239_v50, 16  ;;  %vm18256_vm4 = vnez %v18255_v5  ;;  %v2271_v41 = vshrl.u32 %v15239_v50, 16  ;;  %v15271_v15 = vsel %vm18262_vm2, 0, %v13552_v2  ;;  %v11088_v50 = vld [vmem:[#allocation9 + $0x290] sm:$0xf] }
 0x1ab   : > { %v3679_v37 = vmax.f32 %v3424_v18, 0.0  ;;  %v2245_v44 = vrot.slane %v2244_v36, 4  ;;  %v2261_v18 = vshrl.u32 %v2005_v54, 16  ;;  %v2110_v30 = vsel %vm18225_vm6, %v2105_v57, %v2109_v25  ;;  %vm18257_vm5 = vmpackc.low %vm18254_vm1, %vm18256_vm4  ;;  %v10896_v36 = vld [vmem:[#allocation9 + $0x110] sm:$0xf] }
 0x1ac   : > { %2381 = vst [vmem:[#allocation2 + $0x100] sm:$0xff] %v2110_v30  ;;  %v1992_v58 = vsel %vm18257_vm5, 0, %v13551_v6  ;;  %v12975_v25 = vld [vmem:[#allocation9 + $0x114] sm:$0xf0]  ;;  %v2120_v24 = vsel %vm18225_vm6, %v2115_v4, %v15248_v26  ;;  %v11024_v57 = vld [vmem:[#allocation9 + $0x210] sm:$0xf]  ;;  %vm18265_vm3 = vnez %v18264_v38  ;;  %vm18272_vm4 = vmpackc.low %vm14842_vm7, %vm14837_vm15 }
 0x1ad   : > { %3743 = vst [vmem:[%s15072_s29 + $0x120] sm:$0xff] %v3679_v37  ;;  %v2250_v54 = vsel %vm18225_vm6, %v2245_v44, %v2249_v63  ;;  %v2127_v63 = vshll.u32 %v1992_v58, 16  ;;  %v2131_v53 = vshrl.u32 %v1992_v58, 16  ;;  %v13023_v44 = vld [vmem:[#allocation9 + $0x294] sm:$0xf0]  ;;  %vm18266_vm10 = vmpackc.low %vm14823_vm13, %vm18265_vm3  ;;  %v11025_v31 = vor.u32 %v13007_v46, %v11024_v57 }
 0x1ae   : > { %v3515_v11 = vpop.f32.mrf.mxu0  ;;  %v3604_v45 = vpop.f32.mrf.mxu1  ;;  %2395 = vst [vmem:[#allocation2 + $0x2c0] sm:$0xff] %v2250_v54  ;;  %3371 = vmatmul.bf16.gmra.mxu2 %v10457_v43  ;;  %3549 = vmatmul.bf16.gmra.mxu0 %v10457_v43  ;;  %v11089_v27 = vor.u32 %v13023_v44, %v11088_v50  ;;  %v1848_v58 = vunpack.c.l.b16 %v1595_v49  ;;  %v2412_v54 = vld [vmem:[#allocation2 + $0x128] sm:$0xff]  ;;  %vm18281_vm7 = vmpackc.low %vm14882_vm11, %vm14877_vm0 }
 0x1af   : > { %v3516_v33 = vadd.f32 %v3515_v11, %v15024_v40  ;;  %v12864_v11 = vld [vmem:[#allocation2 + $0x28c] sm:$0xf]  ;;  %2382 = vst [vmem:[#allocation2 + $0x120] sm:$0xff] %v2120_v24  ;;  %4749 = vmatpush.bf16.msra.mxu0 %v11025_v31  ;;  %v18276_v24 = vld [vmem:[#allocation19_spill] sm:$0xff] }
 0x1b0   : > { %4838 = vmatpush.bf16.msra.mxu1 %v11089_v27  ;;  %2444 = vst [vmem:[#allocation2 + $0xf0] sm:$0xff] %v2412_v54 }
 0x1b1   : > { %v3605_v22 = vadd.f32 %v3604_v45, %v3516_v33  ;;  %v10458_v45 = vld [vmem:[#allocation2 + $0x2a8] sm:$0xf0]  ;;  %v2263_v33 = vrot.slane %v2261_v18, 4  ;;  %v2273_v18 = vrot.slane %v2271_v41, 4  ;;  %v10464_v41 = vld [vmem:[#allocation2 + $0x2c8] sm:$0xf] }
 0x1b2   : > { %v10461_v35 = vor.u32 %v12864_v11, %v10458_v45  ;;  %v1849_v11 = vunpack.c.h.b16 %v1595_v49 }
 0x1b3   : > { %v3337_v1 = vpop.f32.mrf.mxu2  ;;  %v3426_v61 = vpop.f32.mrf.mxu3  ;;  %v3682_v34 = vmax.f32 %v3605_v22, 0.0  ;;  %v1104_v22 = vand.u32 15, %v882_v32  ;;  %v2264_v62 = vor.u32 %v2263_v33, %v15242_v48  ;;  %v18269_v33 = vld [vmem:[#allocation17_spill] sm:$0xff] }
 0x1b4   : > { %v3338_v12 = vadd.f32 %v3337_v1, %v15047_v14  ;;  %v2123_v1 = vrot.slane %v2121_v10, 4  ;;  %3460 = vmatmul.bf16.gmra.mxu3 %v10461_v35  ;;  %3638 = vmatmul.bf16.gmra.mxu1 %v10461_v35  ;;  %v12867_v35 = vld [vmem:[#allocation2 + $0x2e4] sm:$0xf0]  ;;  %vm15335_vm12 = vcmp.ne.s32.totalorder %v1849_v11, %v18276_v24 }
 0x1b5   : > { %3746 = vst [vmem:[%s15072_s29 + $0x188] sm:$0xff] %v3682_v34  ;;  %v12991_v34 = vld [vmem:[#allocation9 + $0x194] sm:$0xf0]  ;;  %vm15290_vm1 = vcmp.eq.s32.totalorder %v1104_v22, 15  ;;  %v2265_v45 = vrot.slane %v2264_v62, 4 }
 0x1b6   : > { %v3427_v23 = vadd.f32 %v3426_v61, %v3338_v12  ;;  %v3517_v7 = vpop.f32.mrf.mxu0  ;;  %v3606_v28 = vpop.f32.mrf.mxu1  ;;  %v2260_v61 = vsel %vm18225_vm6, %v2255_v19, %v15242_v48  ;;  %v15264_v12 = vrot.slane %v2267_v17, 5  ;;  %v2124_v39 = vor.u32 %v2123_v1, %v15248_v26  ;;  %vm1427_vm13 = vmpackc.low %vm15290_vm1, %vm15290_vm1 }
 0x1b7   : > { %v3518_v29 = vadd.f32 %v3517_v7, %v15024_v40  ;;  %2396 = vst [vmem:[#allocation2 + $0x2e0] sm:$0xff] %v2260_v61  ;;  %v13553_v7 = vld [vmem:[#allocation2 + $0x188] sm:$0xff]  ;;  %v2133_v26 = vrot.slane %v2131_v53, 4  ;;  %v2277_v17 = vshll.u32 %v15271_v15, 16  ;;  %v15307_v1 = vsel %vm14028_vm8, %v14018_v60, %v18269_v33 }
 0x1b8   : > { %v3681_v52 = vmax.f32 %v3427_v23, 0.0  ;;  %v10897_v23 = vor.u32 %v12975_v25, %v10896_v36  ;;  %v1993_v56 = vsel %vm18266_vm10, 0, %v13553_v7  ;;  %v2274_v48 = vor.u32 %v2273_v18, %v15264_v12  ;;  %v13554_v53 = vld [vmem:[#allocation2 + $0x368] sm:$0xff] }
 0x1b9   : > { %v3607_v59 = vadd.f32 %v3606_v28, %v3518_v29  ;;  %v2129_v29 = vrot.slane %v2127_v63, 5  ;;  %v2137_v19 = vshll.u32 %v1993_v56, 16  ;;  %v2141_v6 = vshrl.u32 %v1993_v56, 16  ;;  %v18273_v36 = vld [vmem:[#allocation18_spill] sm:$0xff] }
 0x1ba   : > { %3745 = vst [vmem:[%s15072_s29 + $0x180] sm:$0xff] %v3681_v52  ;;  %v10961_v52 = vor.u32 %v12991_v34, %v10960_v20  ;;  %4571 = vmatpush.bf16.msra.mxu2 %v10897_v23  ;;  %v15309_v61 = vrot.slane %v2277_v17, 5  ;;  %v2008_v47 = vsel %vm18272_vm4, 0, %v13554_v53  ;;  %vm15330_vm5 = vcmp.ne.s32.totalorder %v1848_v58, %v18273_v36  ;;  %v12866_v20 = vld [vmem:[#allocation2 + $0x2cc] sm:$0xf]  ;;  %v18286_v58 = vld [vmem:[#allocation64_spill] sm:$0xff] }
 0x1bb   : > { %v3339_v0 = vpop.f32.mrf.mxu2  ;;  %v3428_v13 = vpop.f32.mrf.mxu3  ;;  %v3684_v42 = vmax.f32 %v3607_v59, 0.0  ;;  %v2281_v59 = vshrl.u32 %v15271_v15, 16  ;;  %v15312_v4 = vrot.slane %v2137_v19, 5  ;;  %v15314_v63 = vrot.slane %v2141_v6, 4  ;;  %v13555_v15 = vld [vmem:[#allocation2 + $0x468] sm:$0xff]  ;;  %vm1854_vm0 = vmpackc.low %vm15335_vm12, %vm15330_vm5  ;;  %v18283_v6 = vld [vmem:[#allocation67_spill] sm:$0xff] }
 0x1bc   : > { %v3340_v37 = vadd.f32 %v3339_v0, %v15047_v14  ;;  %4660 = vmatpush.bf16.msra.mxu3 %v10961_v52  ;;  %v15326_v22 = vsel %vm1427_vm13, 65537, %v13555_v15  ;;  %v10466_v34 = vld [vmem:[#allocation2 + $0x2e8] sm:$0xf0]  ;;  %v10465_v18 = vor.u32 %v12867_v35, %v10464_v41  ;;  %v2270_v30 = vsel %vm18225_vm6, %v2265_v45, %v15264_v12 }
 0x1bd   : > { %3748 = vst [vmem:[%s15072_s29 + $0x1a8] sm:$0xff] %v3684_v42  ;;  %v2134_v42 = vor.u32 %v2133_v26, %v2129_v29  ;;  %v13556_v52 = vld [vmem:[#allocation2 + $0x1a8] sm:$0xff]  ;;  %v2287_v38 = vshll.u32 %v2008_v47, 16  ;;  %v2291_v56 = vshrl.u32 %v2008_v47, 16  ;;  %v1742_v27 = vshrl.u32 %v15326_v22, 16 }
 0x1be   : > { %v3429_v9 = vadd.f32 %v3428_v13, %v3340_v37  ;;  %v2125_v37 = vrot.slane %v2124_v39, 4  ;;  %v2275_v39 = vrot.slane %v2274_v48, 4  ;;  %v1994_v44 = vsel %vm18281_vm7, 0, %v13556_v52  ;;  %2397 = vst [vmem:[#allocation2 + $0x300] sm:$0xff] %v2270_v30  ;;  %3376 = vmatmul.bf16.gmra.mxu2 %v10465_v18  ;;  %3554 = vmatmul.bf16.gmra.mxu0 %v10465_v18  ;;  %v12874_v23 = vld [vmem:[#allocation2 + $0x3cc] sm:$0xf] }
 0x1bf   : > { %v10469_v62 = vor.u32 %v12866_v20, %v10466_v34  ;;  %v2135_v28 = vrot.slane %v2134_v42, 4  ;;  %v1856_v12 = vunpack.c.h.b16 %v15307_v1  ;;  %v2283_v26 = vrot.slane %v2281_v59, 4  ;;  %v2414_v34 = vld [vmem:[#allocation2 + $0x168] sm:$0xff] }
 0x1c0   : > { %v3683_v16 = vmax.f32 %v3429_v9, 0.0  ;;  %v2130_v9 = vsel %vm18225_vm6, %v2125_v37, %v2129_v29  ;;  %v2280_v31 = vsel %vm18225_vm6, %v2275_v39, %v15309_v61  ;;  %v2147_v17 = vshll.u32 %v1994_v44, 16  ;;  %v13557_v37 = vld [vmem:[#allocation2 + $0x388] sm:$0xff]  ;;  %2446 = vst [vmem:[#allocation2 + $0x130] sm:$0xff] %v2414_v34 }
 0x1c1   : > { %v3520_v10 = vpop.f32.mrf.mxu0  ;;  %v3609_v51 = vpop.f32.mrf.mxu1  ;;  %2383 = vst [vmem:[#allocation2 + $0x140] sm:$0xff] %v2130_v9  ;;  %vm18284_vm15 = vnez %v18283_v6  ;;  %v1731_v11 = vrot.slane %v18286_v58, 4  ;;  %v2140_v59 = vsel %vm18225_vm6, %v2135_v28, %v15312_v4  ;;  %v2289_v33 = vrot.slane %v2287_v38, 5  ;;  %v2422_v38 = vld [vmem:[#allocation2 + $0x268] sm:$0xff] }
 0x1c2   : > { %3747 = vst [vmem:[%s15072_s29 + $0x1a0] sm:$0xff] %v3683_v16  ;;  %v3521_v0 = vadd.f32 %v3520_v10, %v15024_v40  ;;  %vm18285_vm11 = vmpackc.low %vm14932_vm9, %vm18284_vm15  ;;  %v15377_v42 = vrot.slane %v1742_v27, 7  ;;  %v1745_v41 = vshll.u32 %v15326_v22, 16  ;;  %v2149_v53 = vrot.slane %v2147_v17, 5  ;;  %v18294_v17 = vld [vmem:[#allocation70_spill] sm:$0xff] }
 0x1c3   : > { %2398 = vst [vmem:[#allocation2 + $0x320] sm:$0xff] %v2280_v31  ;;  %v1739_v47 = vsel %vm14028_vm8, %v1731_v11, %v14007_v55  ;;  %vm15391_vm14 = vcmp.ne.s32.totalorder %v1856_v12, %v18276_v24  ;;  %v2424_v31 = vld [vmem:[#allocation2 + $0x2a8] sm:$0xff]  ;;  %vm18295_vm10 = vnez %v18294_v17 }
 0x1c4   : > { %v3610_v5 = vadd.f32 %v3609_v51, %v3521_v0  ;;  %v1855_v0 = vunpack.c.l.b16 %v15307_v1  ;;  %3465 = vmatmul.bf16.gmra.mxu3 %v10469_v62  ;;  %3643 = vmatmul.bf16.gmra.mxu1 %v10469_v62  ;;  %2384 = vst [vmem:[#allocation2 + $0x160] sm:$0xff] %v2140_v59  ;;  %v2293_v1 = vrot.slane %v2291_v56, 4  ;;  %v1747_v52 = vor.u32 %v1745_v41, %v15377_v42  ;;  %v13558_v62 = vld [vmem:[#allocation2 + $0x1e8] sm:$0xff] }
 0x1c5   : > { %v1960_v50 = vunpack.c.l.b16 %v1739_v47  ;;  %v13559_v12 = vld [vmem:[#allocation2 + $0x3a8] sm:$0xff]  ;;  %2454 = vst [vmem:[#allocation2 + $0x230] sm:$0xff] %v2422_v38 }
 0x1c6   : > { %v3686_v13 = vmax.f32 %v3610_v5, 0.0  ;;  %v3342_v32 = vpop.f32.mrf.mxu2  ;;  %v3431_v43 = vpop.f32.mrf.mxu3  ;;  %v2009_v5 = vsel %vm18285_vm11, 0, %v13557_v37  ;;  %vm15386_vm9 = vcmp.ne.s32.totalorder %v1855_v0, %v18273_v36  ;;  %v1748_v28 = vsel %vm14028_vm8, %v14018_v60, %v1747_v52  ;;  %v12868_v6 = vld [vmem:[#allocation2 + $0x30c] sm:$0xf]  ;;  %2456 = vst [vmem:[#allocation2 + $0x270] sm:$0xff] %v2424_v31 }
 0x1c7   : > { %v3343_v16 = vadd.f32 %v3342_v32, %v15047_v14  ;;  %v2151_v32 = vshrl.u32 %v1994_v44, 16  ;;  %v2301_v2 = vshrl.u32 %v2009_v5, 16  ;;  %vm1861_vm2 = vmpackc.low %vm15391_vm14, %vm15386_vm9  ;;  %vm15425_vm13 = vcmp.ne.s32.totalorder %v1960_v50, %v18273_v36  ;;  %v12989_v34 = vld [vmem:[#allocation9 + $0x184] sm:$0xf0] }
 0x1c8   : > { %3750 = vst [vmem:[%s15072_s29 + $0x208] sm:$0xff] %v3686_v13  ;;  %v2144_v13 = vor.u32 %v15314_v63, %v15312_v4  ;;  %v2297_v4 = vshll.u32 %v2009_v5, 16  ;;  %v10474_v5 = vld [vmem:[#allocation2 + $0x328] sm:$0xf0]  ;;  %v1968_v59 = vunpack.c.h.b16 %v1748_v28 }
 0x1c9   : > { %v3432_v57 = vadd.f32 %v3431_v43, %v3343_v16  ;;  %v3522_v49 = vpop.f32.mrf.mxu0  ;;  %v3611_v51 = vpop.f32.mrf.mxu1  ;;  %v18287_v43 = vld [vmem:[#allocation59_spill] sm:$0xff]  ;;  %v2284_v16 = vor.u32 %v2283_v26, %v15309_v61  ;;  %v2153_v61 = vrot.slane %v2151_v32, 4  ;;  %v15403_v44 = vrot.slane %v2301_v2, 4  ;;  %v2416_v38 = vld [vmem:[#allocation2 + $0x1a8] sm:$0xff] }
 0x1ca   : > { %v3523_v7 = vadd.f32 %v3522_v49, %v15024_v40  ;;  %v1995_v9 = vsel %vm1854_vm0, 0, %v18287_v43  ;;  %v2294_v49 = vor.u32 %v2293_v1, %v2289_v33  ;;  %v15396_v46 = vrot.slane %v2297_v4, 5  ;;  %v18292_v26 = vld [vmem:[#allocation71_spill] sm:$0xff]  ;;  %v10888_v4 = vld [vmem:[#allocation9 + $0x100] sm:$0xf]  ;;  %2448 = vst [vmem:[#allocation2 + $0x170] sm:$0xff] %v2416_v38 }
 0x1cb   : > { %v3685_v10 = vmax.f32 %v3432_v57, 0.0  ;;  %v2157_v21 = vshll.u32 %v1995_v9, 16  ;;  %v2145_v57 = vrot.slane %v2144_v13, 4  ;;  %v2161_v39 = vshrl.u32 %v1995_v9, 16 }
 0x1cc   : > { %v3612_v29 = vadd.f32 %v3611_v51, %v3523_v7  ;;  %v2285_v55 = vrot.slane %v2284_v16, 4  ;;  %v1961_v7 = vunpack.c.h.b16 %v1739_v47  ;;  %v2154_v56 = vor.u32 %v2153_v61, %v2149_v53  ;;  %v12869_v51 = vld [vmem:[#allocation2 + $0x324] sm:$0xf0] }
 0x1cd   : > { %3749 = vst [vmem:[%s15072_s29 + $0x200] sm:$0xff] %v3685_v10  ;;  %v15405_v18 = vrot.slane %v2157_v21, 5  ;;  %v2150_v30 = vsel %vm18225_vm6, %v2145_v57, %v2149_v53  ;;  %v10472_v10 = vld [vmem:[#allocation2 + $0x308] sm:$0xf]  ;;  %v15409_v27 = vrot.slane %v2161_v39, 4  ;;  %v2295_v0 = vrot.slane %v2294_v49, 4 }
 0x1ce   : > { %v3688_v48 = vmax.f32 %v3612_v29, 0.0  ;;  %v3344_v45 = vpop.f32.mrf.mxu2  ;;  %v3433_v35 = vpop.f32.mrf.mxu3  ;;  %2385 = vst [vmem:[#allocation2 + $0x180] sm:$0xff] %v2150_v30  ;;  %v1996_v29 = vsel %vm1861_vm2, 0, %v13558_v62  ;;  %vm18293_vm3 = vnez %v18292_v26  ;;  %vm15430_vm4 = vcmp.ne.s32.totalorder %v1961_v7, %v18276_v24  ;;  %v10952_v53 = vld [vmem:[#allocation9 + $0x180] sm:$0xf]  ;;  %v13560_v49 = vld [vmem:[#allocation2 + $0x3c8] sm:$0xff] }
 0x1cf   : > { %v3345_v54 = vadd.f32 %v3344_v45, %v15047_v14  ;;  %vm18296_vm1 = vmpackc.low %vm18293_vm3, %vm18295_vm10  ;;  %v10473_v60 = vor.u32 %v12869_v51, %v10472_v10  ;;  %v2290_v58 = vsel %vm18225_vm6, %v2285_v55, %v2289_v33  ;;  %v2300_v11 = vsel %vm18225_vm6, %v2295_v0, %v15396_v46  ;;  %v13005_v26 = vld [vmem:[#allocation9 + $0x204] sm:$0xf0] }
 0x1d0   : > { %3752 = vst [vmem:[%s15072_s29 + $0x228] sm:$0xff] %v3688_v48  ;;  %v2010_v37 = vsel %vm18296_vm1, 0, %v13559_v12  ;;  %v2167_v48 = vshll.u32 %v1996_v29, 16  ;;  %v1967_v45 = vunpack.c.l.b16 %v1748_v28  ;;  %v2171_v13 = vshrl.u32 %v1996_v29, 16  ;;  %vm1966_vm8 = vmpackc.low %vm15430_vm4, %vm15425_vm13  ;;  %v18307_v29 = vld [vmem:[#allocation72_spill] sm:$0xff] }
 0x1d1   : > { %v3434_v63 = vadd.f32 %v3433_v35, %v3345_v54  ;;  %2399 = vst [vmem:[#allocation2 + $0x340] sm:$0xff] %v2290_v58  ;;  %3381 = vmatmul.bf16.gmra.mxu2 %v10473_v60  ;;  %v10477_v32 = vor.u32 %v12868_v6, %v10474_v5  ;;  %3559 = vmatmul.bf16.gmra.mxu0 %v10473_v60  ;;  %v2155_v43 = vrot.slane %v2154_v56, 4  ;;  %v2307_v54 = vshll.u32 %v2010_v37, 16  ;;  %v11016_v12 = vld [vmem:[#allocation9 + $0x200] sm:$0xf] }
 0x1d2   : > { %v2304_v9 = vor.u32 %v15403_v44, %v15396_v46  ;;  %v2311_v1 = vshrl.u32 %v2010_v37, 16  ;;  %2400 = vst [vmem:[#allocation2 + $0x360] sm:$0xff] %v2300_v11  ;;  %v2164_v41 = vor.u32 %v15409_v27, %v15405_v18  ;;  %v2169_v21 = vrot.slane %v2167_v48, 5  ;;  %v10480_v58 = vld [vmem:[#allocation2 + $0x348] sm:$0xf] }
 0x1d3   : > { %v3687_v20 = vmax.f32 %v3434_v63, 0.0  ;;  %v12973_v63 = vld [vmem:[#allocation9 + $0x104] sm:$0xf0]  ;;  %v2160_v2 = vsel %vm18225_vm6, %v2155_v43, %v15405_v18  ;;  %vm15452_vm7 = vcmp.ne.s32.totalorder %v1967_v45, %v18273_v36  ;;  %v18301_v47 = vmov 0 }
 0x1d4   : > { %v3525_v33 = vpop.f32.mrf.mxu0  ;;  %3470 = vmatmul.bf16.gmra.mxu3 %v10477_v32  ;;  %3648 = vmatmul.bf16.gmra.mxu1 %v10477_v32  ;;  %v18302_v47 = vsel %vm15452_vm7, 4294967295, %v18301_v47  ;;  %vm15457_vm15 = vcmp.ne.s32.totalorder %v1968_v59, %v18276_v24  ;;  %v18304_v61 = vmov 0  ;;  %2386 = vst [vmem:[#allocation2 + $0x1a0] sm:$0xff] %v2160_v2  ;;  %v2173_v57 = vrot.slane %v2171_v13, 4  ;;  %v2426_v18 = vld [vmem:[#allocation2 + $0x2e8] sm:$0xff] }
 0x1d5   : > { %3751 = vst [vmem:[%s15072_s29 + $0x220] sm:$0xff] %v3687_v20  ;;  %v3526_v35 = vadd.f32 %v3525_v33, %v15024_v40  ;;  %v3614_v16 = vpop.f32.mrf.mxu1  ;;  %v18305_v61 = vsel %vm15457_vm15, 4294967295, %v18304_v61  ;;  %v10889_v20 = vor.u32 %v12973_v63, %v10888_v4  ;;  %v15466_v39 = vsel %vm1966_vm8, 0, %v13560_v49  ;;  %vm1973_vm11 = vmpackc.low %vm15457_vm15, %vm15452_vm7  ;;  %v12871_v11 = vld [vmem:[#allocation2 + $0x364] sm:$0xf0] }
 0x1d6   : > { %18303 = vst [vmem:[#allocation35_spill] sm:$0xff] %v18302_v47  ;;  %v10953_v55 = vor.u32 %v12989_v34, %v10952_v53  ;;  %v2309_v46 = vrot.slane %v2307_v54, 5  ;;  %v2313_v50 = vrot.slane %v2311_v1, 4  ;;  %v2317_v7 = vshll.u32 %v15466_v39, 16  ;;  %v10482_v54 = vld [vmem:[#allocation2 + $0x368] sm:$0xf0] }
 0x1d7   : > { %18306 = vst [vmem:[#allocation38_spill] sm:$0xff] %v18305_v61  ;;  %v3615_v52 = vadd.f32 %v3614_v16, %v3526_v35  ;;  %4572 = vmatpush.bf16.msra.mxu2 %v10889_v20  ;;  %v2305_v56 = vrot.slane %v2304_v9, 4  ;;  %v2165_v10 = vrot.slane %v2164_v41, 4  ;;  %v2174_v51 = vor.u32 %v2173_v57, %v2169_v21  ;;  %v12870_v9 = vld [vmem:[#allocation2 + $0x34c] sm:$0xf] }
 0x1d8   : > { %4661 = vmatpush.bf16.msra.mxu3 %v10953_v55  ;;  %2458 = vst [vmem:[#allocation2 + $0x2b0] sm:$0xff] %v2426_v18  ;;  %v2314_v62 = vor.u32 %v2313_v50, %v2309_v46  ;;  %v2012_v28 = vsel %vm1973_vm11, 0, %v18307_v29  ;;  %v11017_v6 = vor.u32 %v13005_v26, %v11016_v12  ;;  %v2319_v60 = vrot.slane %v2317_v7, 5  ;;  %v18308_v35 = vld [vmem:[#allocation66_spill] sm:$0xff]  ;;  %v11080_v2 = vld [vmem:[#allocation9 + $0x280] sm:$0xf] }
 0x1d9   : > { %v3690_v44 = vmax.f32 %v3615_v52, 0.0  ;;  %v2170_v5 = vsel %vm18225_vm6, %v2165_v10, %v2169_v21  ;;  %v2321_v45 = vshrl.u32 %v15466_v39, 16  ;;  %v2175_v32 = vrot.slane %v2174_v51, 4  ;;  %v13021_v21 = vld [vmem:[#allocation9 + $0x284] sm:$0xf0] }
 0x1da   : > { %v3347_v30 = vpop.f32.mrf.mxu2  ;;  %2387 = vst [vmem:[#allocation2 + $0x1c0] sm:$0xff] %v2170_v5  ;;  %4750 = vmatpush.bf16.msra.mxu0 %v11017_v6  ;;  %v2327_v43 = vshll.u32 %v2012_v28, 16  ;;  %v2315_v1 = vrot.slane %v2314_v62, 4  ;;  %v10481_v33 = vor.u32 %v12871_v11, %v10480_v58  ;;  %v2310_v4 = vsel %vm18225_vm6, %v2305_v56, %v2309_v46  ;;  %v2428_v10 = vld [vmem:[#allocation2 + $0x328] sm:$0xff] }
 0x1db   : > { %3754 = vst [vmem:[%s15072_s29 + $0x288] sm:$0xff] %v3690_v44  ;;  %v3348_v31 = vadd.f32 %v3347_v30, %v15047_v14  ;;  %v3436_v27 = vpop.f32.mrf.mxu3  ;;  %v2180_v16 = vsel %vm18225_vm6, %v2175_v32, %v18308_v35  ;;  %v2331_v63 = vshrl.u32 %v2012_v28, 16  ;;  %v10485_v34 = vor.u32 %v12870_v9, %v10482_v54  ;;  %v2418_v51 = vld [vmem:[#allocation2 + $0x1e8] sm:$0xff]  ;;  %v10946_v35 = vld [vmem:[#allocation9 + $0x178] sm:$0xf0] }
 0x1dc   : > { %v3527_v0 = vpop.f32.mrf.mxu0  ;;  %2388 = vst [vmem:[#allocation2 + $0x1e0] sm:$0xff] %v2180_v16  ;;  %v2320_v20 = vsel %vm18225_vm6, %v2315_v1, %v2319_v60  ;;  %v11081_v49 = vor.u32 %v13021_v21, %v11080_v2  ;;  %v2323_v52 = vrot.slane %v2321_v45, 4  ;;  %v1749_v46 = vrot.slane %v15377_v42, 4  ;;  %v12873_v12 = vld [vmem:[#allocation2 + $0x3a4] sm:$0xf0] }
 0x1dd   : > { %v3437_v17 = vadd.f32 %v3436_v27, %v3348_v31  ;;  %v3528_v37 = vadd.f32 %v3527_v0, %v15024_v40  ;;  %v3616_v48 = vpop.f32.mrf.mxu1  ;;  %2401 = vst [vmem:[#allocation2 + $0x380] sm:$0xff] %v2310_v4  ;;  %v2329_v50 = vrot.slane %v2327_v43, 5  ;;  %v2333_v44 = vrot.slane %v2331_v63, 4  ;;  %v1331_v27 = vld [vmem:[#allocation2 + $0x408] sm:$0x11] }
 0x1de   : > { %2402 = vst [vmem:[#allocation2 + $0x3a0] sm:$0xff] %v2320_v20  ;;  %4839 = vmatpush.bf16.msra.mxu1 %v11081_v49  ;;  %v1974_v7 = vunpack.c.l.b16 %v1749_v46  ;;  %v1975_v30 = vunpack.c.h.b16 %v1749_v46  ;;  %v2324_v38 = vor.u32 %v2323_v52, %v2319_v60  ;;  %v18309_v42 = vmov 0  ;;  %v10488_v0 = vld [vmem:[#allocation2 + $0x388] sm:$0xf]  ;;  %v10490_v5 = vld [vmem:[#allocation2 + $0x3a8] sm:$0xf0] }
 0x1df   : > { %v3689_v59 = vmax.f32 %v3437_v17, 0.0  ;;  %v3617_v13 = vadd.f32 %v3616_v48, %v3528_v37  ;;  %2460 = vst [vmem:[#allocation2 + $0x2f0] sm:$0xff] %v2428_v10  ;;  %v2334_v31 = vor.u32 %v2333_v44, %v2329_v50  ;;  %v10489_v58 = vor.u32 %v12873_v12, %v10488_v0  ;;  %v13002_v16 = vld [vmem:[#allocation9 + $0x1f4] sm:$0xf]  ;;  %v11010_v2 = vld [vmem:[#allocation9 + $0x1f8] sm:$0xf0] }
 0x1e0   : > { %vm1978_vm3 = vcmp.ne.s32.totalorder %v1974_v7, %v18273_v36  ;;  %vm1979_vm10 = vcmp.ne.s32.totalorder %v1975_v30, %v18276_v24  ;;  %2450 = vst [vmem:[#allocation2 + $0x1b0] sm:$0xff] %v2418_v51  ;;  %v2325_v29 = vrot.slane %v2324_v38, 4  ;;  %v12872_v24 = vld [vmem:[#allocation2 + $0x38c] sm:$0xf]  ;;  %v11013_v21 = vor.u32 %v13002_v16, %v11010_v2  ;;  %v10496_v44 = vld [vmem:[#allocation2 + $0x3c8] sm:$0xf] }
 0x1e1   : > { %3753 = vst [vmem:[%s15072_s29 + $0x280] sm:$0xff] %v3689_v59  ;;  %v3692_v41 = vmax.f32 %v3617_v13, 0.0  ;;  %3386 = vmatmul.bf16.gmra.mxu2 %v10481_v33  ;;  %3564 = vmatmul.bf16.gmra.mxu0 %v10481_v33  ;;  %vm15500_vm1 = vmpackc.low %vm1979_vm10, %vm1978_vm3  ;;  %v2335_v37 = vrot.slane %v2334_v31, 4  ;;  %v10493_v32 = vor.u32 %v12872_v24, %v10490_v5  ;;  %v13018_v7 = vld [vmem:[#allocation9 + $0x274] sm:$0xf] }
 0x1e2   : > { %v3349_v53 = vpop.f32.mrf.mxu2  ;;  %v18310_v42 = vsel %vm15500_vm1, 4294967295, %v18309_v42  ;;  %v2013_v28 = vsel %vm15500_vm1, 0, %v1331_v27  ;;  %v2330_v48 = vsel %vm18225_vm6, %v2325_v29, %v2329_v50  ;;  %5010 = vmatpush.bf16.msrb.mxu3 %v11013_v21  ;;  %v11074_v30 = vld [vmem:[#allocation9 + $0x278] sm:$0xf0]  ;;  %v10498_v10 = vld [vmem:[#allocation2 + $0x3e8] sm:$0xf0] }
 0x1e3   : > { %3756 = vst [vmem:[%s15072_s29 + $0x2a8] sm:$0xff] %v3692_v41  ;;  %v3350_v57 = vadd.f32 %v3349_v53, %v15047_v14  ;;  %v3438_v39 = vpop.f32.mrf.mxu3  ;;  %v2337_v36 = vshll.u32 %v2013_v28, 16  ;;  %v12986_v41 = vld [vmem:[#allocation9 + $0x174] sm:$0xf]  ;;  %v11077_v25 = vor.u32 %v13018_v7, %v11074_v30  ;;  %v18312_v28 = vld [vmem:[#allocation25_spill] sm:$0xff] }
 0x1e4   : > { %3475 = vmatmul.bf16.gmra.mxu3 %v10485_v34  ;;  %3653 = vmatmul.bf16.gmra.mxu1 %v10485_v34  ;;  %18311 = vst [vmem:[#allocation37_spill] sm:$0xff] %v18310_v42  ;;  %v10949_v53 = vor.u32 %v12986_v41, %v10946_v35  ;;  %v2565_v0 = vshll.u32 %v18312_v28, 16  ;;  %v11138_v24 = vld [vmem:[#allocation9 + $0x2f8] sm:$0xf0]  ;;  %v2432_v41 = vld [vmem:[#allocation2 + $0x3a8] sm:$0xff] }
 0x1e5   : > { %v3439_v55 = vadd.f32 %v3438_v39, %v3350_v57  ;;  %v2339_v60 = vrot.slane %v2337_v36, 5  ;;  %2403 = vst [vmem:[#allocation2 + $0x3c0] sm:$0xff] %v2330_v48  ;;  %v13561_v57 = vld [vmem:[#allocation2 + $0x208] sm:$0xff]  ;;  %5099 = vmatpush.bf16.msrb.mxu0 %v11077_v25  ;;  %v10501_v36 = vor.u32 %v12874_v23, %v10498_v10  ;;  %v10632_v23 = vld [vmem:[#allocation2] sm:$0xf] }
 0x1e6   : > { %v3530_v56 = vpop.f32.mrf.mxu0  ;;  %4921 = vmatpush.bf16.msrb.mxu2 %v10949_v53  ;;  %v2516_v49 = vsel %vm1854_vm0, 0, %v13561_v57  ;;  %v2430_v39 = vld [vmem:[#allocation2 + $0x368] sm:$0xff]  ;;  %v15533_v48 = vrot.slane %v2565_v0, 5  ;;  %2464 = vst [vmem:[#allocation2 + $0x370] sm:$0xff] %v2432_v41 }
 0x1e7   : > { %v3691_v18 = vmax.f32 %v3439_v55, 0.0  ;;  %v3531_v62 = vadd.f32 %v3530_v56, %v15024_v40  ;;  %v2340_v13 = vsel %vm18225_vm6, %v2335_v37, %v2339_v60  ;;  %2462 = vst [vmem:[#allocation2 + $0x330] sm:$0xff] %v2430_v39  ;;  %v2675_v55 = vshll.u32 %v2516_v49, 16  ;;  %v12911_v7 = vld [vmem:[#allocation2 + $0x24] sm:$0xf0] }
 0x1e8   : > { %2404 = vst [vmem:[#allocation2 + $0x3e0] sm:$0xff] %v2340_v13  ;;  %v2679_v46 = vshrl.u32 %v2516_v49, 16  ;;  %v2569_v60 = vshrl.u32 %v18312_v28, 16  ;;  %v12949_v47 = vld [vmem:[#allocation2 + $0x28c] sm:$0xf] }
 0x1e9   : > { %3755 = vst [vmem:[%s15072_s29 + $0x2a0] sm:$0xff] %v3691_v18  ;;  %v3619_v26 = vpop.f32.mrf.mxu1  ;;  %v12875_v18 = vld [vmem:[#allocation2 + $0x3e4] sm:$0xf0]  ;;  %v15522_v27 = vrot.slane %v2675_v55, 5 }
 0x1ea   : > { %v3620_v6 = vadd.f32 %v3619_v26, %v3531_v62  ;;  %v10497_v31 = vor.u32 %v12875_v18, %v10496_v44  ;;  %v2681_v62 = vrot.slane %v2679_v46, 4  ;;  %v13562_v26 = vld [vmem:[#allocation2 + $0x228] sm:$0xff]  ;;  %v2571_v16 = vrot.slane %v2569_v60, 4  ;;  %v12910_v18 = vld [vmem:[#allocation2 + $0x1c] sm:$0xf0] }
 0x1ec   : > { %v3352_v17 = vpop.f32.mrf.mxu2  ;;  %v3694_v45 = vmax.f32 %v3620_v6, 0.0  ;;  %v13034_v6 = vld [vmem:[#allocation9 + $0x2f4] sm:$0xf]  ;;  %v2682_v5 = vor.u32 %v2681_v62, %v15522_v27  ;;  %v10640_v62 = vld [vmem:[#allocation2 + $0x8] sm:$0xf] }
 0x1ed   : > { %v3353_v59 = vadd.f32 %v3352_v17, %v15047_v14  ;;  %v2517_v17 = vsel %vm1861_vm2, 0, %v13562_v26  ;;  %v18318_v26 = vld [vmem:[#allocation29_spill] sm:$0xff] }
 0x1ee   : > { %v3532_v11 = vpop.f32.mrf.mxu0  ;;  %3758 = vst [vmem:[%s15072_s29 + $0x308] sm:$0xff] %v3694_v45  ;;  %v2685_v45 = vshll.u32 %v2517_v17, 16  ;;  %v2689_v13 = vshrl.u32 %v2517_v17, 16  ;;  %v15543_v35 = vrot.slane %v2682_v5, 4  ;;  %v2585_v17 = vshll.u32 %v18318_v26, 16 }
 0x1ef   : > { %v3533_v43 = vadd.f32 %v3532_v11, %v15024_v40  ;;  %v3441_v9 = vpop.f32.mrf.mxu3  ;;  %v11141_v11 = vor.u32 %v13034_v6, %v11138_v24  ;;  %v12908_v6 = vld [vmem:[#allocation2 + $0x4] sm:$0xf]  ;;  %v12909_v24 = vld [vmem:[#allocation2 + $0xc] sm:$0xf] }
 0x1f0   : > { %v3442_v54 = vadd.f32 %v3441_v9, %v3353_v59  ;;  %v15551_v57 = vrot.slane %v2685_v45, 5  ;;  %v15553_v49 = vrot.slane %v2689_v13, 4 }
 0x1f1   : > { %3391 = vmatmul.bf16.gmra.mxu2 %v10489_v58  ;;  %3569 = vmatmul.bf16.gmra.mxu0 %v10489_v58  ;;  %v3621_v1 = vpop.f32.mrf.mxu1 }
 0x1f2   : > { %v3693_v4 = vmax.f32 %v3442_v54, 0.0  ;;  %v3622_v63 = vadd.f32 %v3621_v1, %v3533_v43  ;;  %5188 = vmatpush.bf16.msrb.mxu1 %v11141_v11  ;;  %v18314_v43 = vld [vmem:[#allocation23_spill] sm:$0xff]  ;;  %v2688_v10 = vsel %vm18225_vm6, %v15543_v35, %v15551_v57 }
 0x1f3   : > { %2905 = vst [vmem:[#allocation2 + $0x1d8] sm:$0xff] %v2688_v10 }
 0x1f4   : > { %3480 = vmatmul.bf16.gmra.mxu3 %v10493_v32  ;;  %3658 = vmatmul.bf16.gmra.mxu1 %v10493_v32  ;;  %v3354_v33 = vpop.f32.mrf.mxu2  ;;  %3757 = vst [vmem:[%s15072_s29 + $0x300] sm:$0xff] %v3693_v4  ;;  %v3696_v20 = vmax.f32 %v3622_v63, 0.0  ;;  %v18313_v32 = vld [vmem:[#allocation24_spill] sm:$0xff]  ;;  %v18316_v4 = vld [vmem:[#allocation27_spill] sm:$0xff] }
 0x1f5   : > { %v3355_v34 = vadd.f32 %v3354_v33, %v15047_v14  ;;  %v18315_v9 = vor.u32 %v18313_v32, %v18314_v43  ;;  %v2575_v63 = vshll.u32 %v18316_v4, 16  ;;  %v2579_v2 = vshrl.u32 %v18316_v4, 16  ;;  %v10938_v4 = vld [vmem:[#allocation9 + $0x168] sm:$0xf0] }
 0x1f6   : > { %3760 = vst [vmem:[%s15072_s29 + $0x328] sm:$0xff] %v3696_v20  ;;  %v2692_v32 = vor.u32 %v15553_v49, %v15551_v57 }
 0x1f7   : > { %v3443_v52 = vpop.f32.mrf.mxu3  ;;  %v15540_v54 = vrot.slane %v18315_v9, 4  ;;  %v15559_v30 = vrot.slane %v2575_v63, 5  ;;  %v2589_v9 = vshrl.u32 %v18318_v26, 16 }
 0x1f8   : > { %v3444_v50 = vadd.f32 %v3443_v52, %v3355_v34  ;;  %v18317_v52 = vld [vmem:[#allocation21_spill] sm:$0xff] }
 0x1f9   : > { %v2568_v34 = vsel %vm18225_vm6, %v15540_v54, %v15533_v48  ;;  %v2695_v55 = vshll.u32 %v18317_v52, 16  ;;  %v2699_v46 = vshrl.u32 %v18317_v52, 16  ;;  %v13000_v52 = vld [vmem:[#allocation9 + $0x1e4] sm:$0xf] }
 0x1fa   : > { %v3695_v38 = vmax.f32 %v3444_v50, 0.0  ;;  %v2572_v50 = vor.u32 %v2571_v16, %v15533_v48  ;;  %v12984_v16 = vld [vmem:[#allocation9 + $0x164] sm:$0xf]  ;;  %2893 = vst [vmem:[#allocation2 + $0x58] sm:$0xff] %v2568_v34 }
 0x1fb   : > { %v3535_v56 = vpop.f32.mrf.mxu0  ;;  %v2701_v45 = vrot.slane %v2699_v46, 4  ;;  %v15588_v43 = vrot.slane %v2695_v55, 5  ;;  %v11002_v55 = vld [vmem:[#allocation9 + $0x1e8] sm:$0xf0]  ;;  %v18320_v46 = vld [vmem:[#allocation31_spill] sm:$0xff] }
 0x1fc   : > { %v3536_v51 = vadd.f32 %v3535_v56, %v15024_v40  ;;  %3759 = vst [vmem:[%s15072_s29 + $0x320] sm:$0xff] %v3695_v38  ;;  %v3624_v29 = vpop.f32.mrf.mxu1  ;;  %v2581_v38 = vrot.slane %v2579_v2, 4  ;;  %v2573_v5 = vrot.slane %v2572_v50, 4  ;;  %v2595_v50 = vshll.u32 %v18320_v46, 16 }
 0x1fd   : > { %v2702_v63 = vor.u32 %v2701_v45, %v15588_v43  ;;  %v11066_v45 = vld [vmem:[#allocation9 + $0x268] sm:$0xf0] }
 0x1fe   : > { %v3625_v12 = vadd.f32 %v3624_v29, %v3536_v51  ;;  %v10642_v29 = vld [vmem:[#allocation2 + $0x28] sm:$0xf0] }
 0x1ff   : > { %v15613_v54 = vrot.slane %v2702_v63, 4 }
 0x200   : > { %v3698_v37 = vmax.f32 %v3625_v12, 0.0  ;;  %v15568_v12 = vor.u32 %v12910_v18, %v10632_v23  ;;  %v15606_v23 = vrot.slane %v2692_v32, 4  ;;  %v10650_v32 = vld [vmem:[#allocation2 + $0x60] sm:$0xf0] }
 0x201   : > { %3396 = vmatmul.bf16.gmra.mxu2 %v10497_v31  ;;  %3574 = vmatmul.bf16.gmra.mxu0 %v10497_v31  ;;  %v3357_v58 = vpop.f32.mrf.mxu2  ;;  %v10634_v31 = vld [vmem:[#allocation2 + $0x20] sm:$0xf0] }
 0x202   : > { %3762 = vst [vmem:[%s15072_s29 + $0x388] sm:$0xff] %v3698_v37  ;;  %v3358_v22 = vadd.f32 %v3357_v58, %v15047_v14  ;;  %v3446_v15 = vpop.f32.mrf.mxu3  ;;  %v15574_v11 = vor.u32 %v12908_v6, %v10634_v31  ;;  %v2698_v34 = vsel %vm18225_vm6, %v15606_v23, %v15588_v43  ;;  %v10656_v6 = vld [vmem:[#allocation2 + $0x48] sm:$0xf]  ;;  %v12982_v23 = vld [vmem:[#allocation9 + $0x154] sm:$0xf] }
 0x203   : > { %v3537_v59 = vpop.f32.mrf.mxu0  ;;  %2906 = vst [vmem:[#allocation2 + $0x1f8] sm:$0xff] %v2698_v34  ;;  %v10930_v34 = vld [vmem:[#allocation9 + $0x158] sm:$0xf0] }
 0x204   : > { %3485 = vmatmul.bf16.gmra.mxu3 %v10501_v36  ;;  %3663 = vmatmul.bf16.gmra.mxu1 %v10501_v36  ;;  %v3447_v1 = vadd.f32 %v3446_v15, %v3358_v22  ;;  %v3538_v33 = vadd.f32 %v3537_v59, %v15024_v40  ;;  %v3626_v53 = vpop.f32.mrf.mxu1  ;;  %v15570_v36 = vor.u32 %v12911_v7, %v10640_v62 }
 0x205   : > { %v15577_v22 = vor.u32 %v12909_v24, %v10642_v29  ;;  %v2582_v15 = vor.u32 %v2581_v38, %v15559_v30  ;;  %v2578_v59 = vsel %vm18225_vm6, %v2573_v5, %v15559_v30  ;;  %v11005_v7 = vor.u32 %v13000_v52, %v11002_v55  ;;  %v2434_v30 = vld [vmem:[#allocation2 + $0x3e8] sm:$0xff] }
 0x206   : > { %v3697_v21 = vmax.f32 %v3447_v1, 0.0  ;;  %v3627_v20 = vadd.f32 %v3626_v53, %v3538_v33  ;;  %v15591_v33 = vrot.slane %v2585_v17, 5  ;;  %v18319_v53 = vld [vmem:[#allocation22_spill] sm:$0xff]  ;;  %v2591_v38 = vrot.slane %v2589_v9, 4  ;;  %2466 = vst [vmem:[#allocation2 + $0x3b0] sm:$0xff] %v2434_v30 }
 0x207   : > { %v2705_v2 = vshll.u32 %v18319_v53, 16  ;;  %5011 = vmatpush.bf16.msrb.mxu3 %v11005_v7  ;;  %2894 = vst [vmem:[#allocation2 + $0x78] sm:$0xff] %v2578_v59  ;;  %v2709_v29 = vshrl.u32 %v18319_v53, 16  ;;  %v12915_v24 = vld [vmem:[#allocation2 + $0x64] sm:$0xf0] }
 0x208   : > { %3761 = vst [vmem:[%s15072_s29 + $0x380] sm:$0xff] %v3697_v21  ;;  %v3700_v39 = vmax.f32 %v3627_v20, 0.0  ;;  %v15597_v21 = vrot.slane %v2582_v15, 4  ;;  %v2592_v26 = vor.u32 %v2591_v38, %v15591_v33  ;;  %v10658_v9 = vld [vmem:[#allocation2 + $0x68] sm:$0xf0]  ;;  %v15631_v63 = vor.u32 %v12915_v24, %v10656_v6  ;;  %v18321_v53 = vld [vmem:[#allocation33_spill] sm:$0xff] }
 0x209   : > { %v3359_v44 = vpop.f32.mrf.mxu2  ;;  %v15619_v62 = vrot.slane %v2705_v2, 5  ;;  %v2605_v2 = vshll.u32 %v18321_v53, 16  ;;  %v2609_v30 = vshrl.u32 %v18321_v53, 16  ;;  %v18323_v24 = vld [vmem:[#allocation28_spill] sm:$0xff] }
 0x20a   : > { %3764 = vst [vmem:[%s15072_s29 + $0x3a8] sm:$0xff] %v3700_v39  ;;  %v3360_v56 = vadd.f32 %v3359_v44, %v15047_v14  ;;  %v3448_v25 = vpop.f32.mrf.mxu3  ;;  %v10941_v39 = vor.u32 %v12984_v16, %v10938_v4  ;;  %v2588_v48 = vsel %vm18225_vm6, %v15597_v21, %v15591_v33  ;;  %v2593_v52 = vrot.slane %v2592_v26, 4  ;;  %v18324_v53 = vld [vmem:[#allocation36_spill] sm:$0xff]  ;;  %v10672_v33 = vld [vmem:[#allocation2 + $0x88] sm:$0xf] }
 0x20b   : > { %v3540_v51 = vpop.f32.mrf.mxu0  ;;  %2895 = vst [vmem:[#allocation2 + $0x98] sm:$0xff] %v2588_v48 }
 0x20c   : > { %v3449_v28 = vadd.f32 %v3448_v25, %v3360_v56  ;;  %v3541_v0 = vadd.f32 %v3540_v51, %v15024_v40  ;;  %v3629_v37 = vpop.f32.mrf.mxu1  ;;  %4922 = vmatpush.bf16.msrb.mxu2 %v10941_v39  ;;  %v2599_v25 = vshrl.u32 %v18320_v46, 16  ;;  %v12913_v39 = vld [vmem:[#allocation2 + $0x4c] sm:$0xf] }
 0x20e   : > { %v3699_v60 = vmax.f32 %v3449_v28, 0.0  ;;  %v3630_v58 = vadd.f32 %v3629_v37, %v3541_v0  ;;  %v15622_v28 = vrot.slane %v2595_v50, 5  ;;  %v12914_v37 = vld [vmem:[#allocation2 + $0x5c] sm:$0xf0]  ;;  %v2601_v5 = vrot.slane %v2599_v25, 4 }
 0x20f   : > { %v13032_v25 = vld [vmem:[#allocation9 + $0x2e4] sm:$0xf] }
 0x210   : > { %3763 = vst [vmem:[%s15072_s29 + $0x3a0] sm:$0xff] %v3699_v60  ;;  %v3702_v13 = vmax.f32 %v3630_v58, 0.0  ;;  %v13016_v58 = vld [vmem:[#allocation9 + $0x264] sm:$0xf]  ;;  %v2602_v7 = vor.u32 %v2601_v5, %v15622_v28  ;;  %v2598_v38 = vsel %vm18225_vm6, %v2593_v52, %v15622_v28  ;;  %v2725_v5 = vshll.u32 %v18323_v24, 16 }
 0x211   : > { %4573 = vmatmul.bf16.vlgmr.msra.gmra.mxu2 %v15568_v12  ;;  %4751 = vmatmul.bf16.vlgmr.msra.gmra.mxu0 %v15570_v36  ;;  %v3362_v1 = vpop.f32.mrf.mxu2  ;;  %2896 = vst [vmem:[#allocation2 + $0xb8] sm:$0xff] %v2598_v38  ;;  %v10666_v38 = vld [vmem:[#allocation2 + $0xa0] sm:$0xf0] }
 0x212   : > { %3766 = vst [vmem:[%s15072_s29 + $0x408] sm:$0xff] %v3702_v13  ;;  %v3363_v41 = vadd.f32 %v3362_v1, %v15047_v14  ;;  %v3451_v20 = vpop.f32.mrf.mxu3  ;;  %v10648_v13 = vld [vmem:[#allocation2 + $0x40] sm:$0xf]  ;;  %v11069_v1 = vor.u32 %v13016_v58, %v11066_v45  ;;  %v2603_v58 = vrot.slane %v2602_v7, 4  ;;  %v15670_v52 = vrot.slane %v2725_v5, 5 }
 0x213   : > { %v3542_v49 = vpop.f32.mrf.mxu0  ;;  %v15629_v4 = vor.u32 %v12914_v37, %v10648_v13  ;;  %v2607_v37 = vrot.slane %v2605_v2, 5  ;;  %v2615_v2 = vshll.u32 %v18324_v53, 16 }
 0x214   : > { %4662 = vmatmul.bf16.vlgmr.msra.gmra.mxu3 %v15574_v11  ;;  %4840 = vmatmul.bf16.vlgmr.msra.gmra.mxu1 %v15577_v22  ;;  %v3452_v44 = vadd.f32 %v3451_v20, %v3363_v41  ;;  %v3543_v18 = vadd.f32 %v3542_v49, %v15024_v40  ;;  %v3631_v56 = vpop.f32.mrf.mxu1  ;;  %v12912_v49 = vld [vmem:[#allocation2 + $0x44] sm:$0xf] }
 0x215   : > { %5100 = vmatpush.bf16.msrb.mxu0 %v11069_v1  ;;  %v15635_v50 = vor.u32 %v12912_v49, %v10650_v32  ;;  %v2617_v48 = vrot.slane %v2615_v2, 5 }
 0x216   : > { %v3701_v51 = vmax.f32 %v3452_v44, 0.0  ;;  %v3632_v31 = vadd.f32 %v3631_v56, %v3543_v18  ;;  %v15638_v44 = vor.u32 %v12913_v39, %v10658_v9  ;;  %v2711_v18 = vrot.slane %v2709_v29, 4 }
 0x217   : > { %v2708_v9 = vsel %vm18225_vm6, %v15613_v54, %v15619_v62  ;;  %v2608_v39 = vsel %vm18225_vm6, %v2603_v58, %v2607_v37 }
 0x218   : > { %3765 = vst [vmem:[%s15072_s29 + $0x400] sm:$0xff] %v3701_v51  ;;  %v3704_v0 = vmax.f32 %v3632_v31, 0.0  ;;  %v11130_v51 = vld [vmem:[#allocation9 + $0x2e8] sm:$0xf0]  ;;  %v2712_v28 = vor.u32 %v2711_v18, %v15619_v62 }
 0x219   : > { %v3364_v17 = vpop.f32.mrf.mxu2  ;;  %v18322_v31 = vld [vmem:[#allocation26_spill] sm:$0xff]  ;;  %2897 = vst [vmem:[#allocation2 + $0xd8] sm:$0xff] %v2608_v39 }
 0x21a   : > { %3768 = vst [vmem:[%s15072_s29 + $0x428] sm:$0xff] %v3704_v0  ;;  %v3365_v60 = vadd.f32 %v3364_v17, %v15047_v14  ;;  %v3453_v15 = vpop.f32.mrf.mxu3  ;;  %v2715_v0 = vshll.u32 %v18322_v31, 16  ;;  %v2719_v29 = vshrl.u32 %v18322_v31, 16  ;;  %v11133_v17 = vor.u32 %v13032_v25, %v11130_v51  ;;  %v12918_v51 = vld [vmem:[#allocation2 + $0x9c] sm:$0xf0] }
 0x21b   : > { %v3545_v59 = vpop.f32.mrf.mxu0  ;;  %v15673_v18 = vrot.slane %v2712_v28, 4  ;;  %v10664_v28 = vld [vmem:[#allocation2 + $0x80] sm:$0xf]  ;;  %2907 = vst [vmem:[#allocation2 + $0x218] sm:$0xff] %v2708_v9  ;;  %v13014_v9 = vld [vmem:[#allocation9 + $0x254] sm:$0xf] }
 0x21c   : > { %v3454_v41 = vadd.f32 %v3453_v15, %v3365_v60  ;;  %v3546_v16 = vadd.f32 %v3545_v59, %v15024_v40  ;;  %v3634_v20 = vpop.f32.mrf.mxu1  ;;  %v2729_v60 = vshrl.u32 %v18323_v24, 16  ;;  %5189 = vmatpush.bf16.msrb.mxu1 %v11133_v17  ;;  %v2611_v59 = vrot.slane %v2609_v30, 4 }
 0x21d   : > { %v15660_v1 = vrot.slane %v2715_v0, 5  ;;  %v10674_v0 = vld [vmem:[#allocation2 + $0xa8] sm:$0xf0]  ;;  %v15687_v58 = vor.u32 %v12918_v51, %v10664_v28 }
 0x21e   : > { %v3703_v55 = vmax.f32 %v3454_v41, 0.0  ;;  %v3635_v46 = vadd.f32 %v3634_v20, %v3546_v16  ;;  %v2721_v41 = vrot.slane %v2719_v29, 4  ;;  %v2612_v7 = vor.u32 %v2611_v59, %v2607_v37 }
 0x21f   : > { %v2718_v21 = vsel %vm18225_vm6, %v15673_v18, %v15660_v1 }
 0x220   : > { %3767 = vst [vmem:[%s15072_s29 + $0x420] sm:$0xff] %v3703_v55  ;;  %v3706_v56 = vmax.f32 %v3635_v46, 0.0  ;;  %v2731_v55 = vrot.slane %v2729_v60, 4  ;;  %v2619_v46 = vshrl.u32 %v18324_v53, 16  ;;  %v2722_v29 = vor.u32 %v2721_v41, %v15660_v1 }
 0x221   : > { %4578 = vmatmul.bf16.gmra.mxu2 %v15629_v4  ;;  %4756 = vmatmul.bf16.gmra.mxu0 %v15631_v63  ;;  %v3367_v26 = vpop.f32.mrf.mxu2  ;;  %v2613_v59 = vrot.slane %v2612_v7, 4  ;;  %2908 = vst [vmem:[#allocation2 + $0x238] sm:$0xff] %v2718_v21 }
 0x222   : > { %3770 = vst [vmem:[%s15072_s29 + $0x488] sm:$0xff] %v3706_v56  ;;  %v3368_v6 = vadd.f32 %v3367_v26, %v15047_v14  ;;  %v3456_v45 = vpop.f32.mrf.mxu3  ;;  %v12919_v56 = vld [vmem:[#allocation2 + $0xa4] sm:$0xf0]  ;;  %v2732_v26 = vor.u32 %v2731_v55, %v15670_v52  ;;  %v2621_v17 = vrot.slane %v2619_v46, 4  ;;  %v15710_v57 = vrot.slane %v2722_v29, 4 }
 0x223   : > { %v3547_v15 = vpop.f32.mrf.mxu0  ;;  %v15684_v24 = vor.u32 %v12919_v56, %v10672_v33  ;;  %v2618_v55 = vsel %vm18225_vm6, %v2613_v59, %v2617_v48  ;;  %v12998_v29 = vld [vmem:[#allocation9 + $0x1d4] sm:$0xf] }
 0x224   : > { %4667 = vmatmul.bf16.gmra.mxu3 %v15635_v50  ;;  %4845 = vmatmul.bf16.gmra.mxu1 %v15638_v44  ;;  %v3457_v13 = vadd.f32 %v3456_v45, %v3368_v6  ;;  %v3548_v32 = vadd.f32 %v3547_v15, %v15024_v40  ;;  %v3636_v16 = vpop.f32.mrf.mxu1  ;;  %v12916_v45 = vld [vmem:[#allocation2 + $0x84] sm:$0xf]  ;;  %v12917_v15 = vld [vmem:[#allocation2 + $0x8c] sm:$0xf]  ;;  %v2622_v46 = vor.u32 %v2621_v17, %v2617_v48  ;;  %v15720_v51 = vrot.slane %v2732_v26, 4  ;;  %v18327_v26 = vld [vmem:[#allocation32_spill] sm:$0xff] }
 0x225   : > { %v15691_v2 = vor.u32 %v12916_v45, %v10666_v38  ;;  %2898 = vst [vmem:[#allocation2 + $0xf8] sm:$0xff] %v2618_v55  ;;  %v10994_v17 = vld [vmem:[#allocation9 + $0x1d8] sm:$0xf0]  ;;  %v2745_v45 = vshll.u32 %v18327_v26, 16 }
 0x226   : > { %v3705_v20 = vmax.f32 %v3457_v13, 0.0  ;;  %v3637_v49 = vadd.f32 %v3636_v16, %v3548_v32  ;;  %v18325_v13 = vld [vmem:[#allocation30_spill] sm:$0xff]  ;;  %v2623_v33 = vrot.slane %v2622_v46, 4  ;;  %v10997_v28 = vor.u32 %v12998_v29, %v10994_v17  ;;  %v10682_v29 = vld [vmem:[#allocation2 + $0xe0] sm:$0xf0] }
 0x227   : > { %v2735_v32 = vshll.u32 %v18325_v13, 16  ;;  %v18326_v16 = vld [vmem:[#allocation42_spill] sm:$0xff] }
 0x228   : > { %3769 = vst [vmem:[%s15072_s29 + $0x480] sm:$0xff] %v3705_v20  ;;  %v3708_v30 = vmax.f32 %v3637_v49, 0.0  ;;  %v2625_v41 = vshll.u32 %v18326_v16, 16  ;;  %v15693_v20 = vor.u32 %v12917_v15, %v10674_v0  ;;  %v2629_v35 = vshrl.u32 %v18326_v16, 16  ;;  %5012 = vmatpush.bf16.msrb.mxu3 %v10997_v28 }
 0x229   : > { %v3369_v25 = vpop.f32.mrf.mxu2  ;;  %v15715_v7 = vrot.slane %v2735_v32, 5  ;;  %v10933_v0 = vor.u32 %v12982_v23, %v10930_v34  ;;  %v10690_v23 = vld [vmem:[#allocation2 + $0xe8] sm:$0xf0] }
 0x22a   : > { %3772 = vst [vmem:[%s15072_s29 + $0x4a8] sm:$0xff] %v3708_v30  ;;  %v3370_v31 = vadd.f32 %v3369_v25, %v15047_v14  ;;  %v3458_v37 = vpop.f32.mrf.mxu3  ;;  %v2739_v30 = vshrl.u32 %v18325_v13, 16  ;;  %v2627_v56 = vrot.slane %v2625_v41, 5  ;;  %v2631_v48 = vrot.slane %v2629_v35, 4  ;;  %v18328_v13 = vld [vmem:[#allocation48_spill] sm:$0xff] }
 0x22b   : > { %v3550_v6 = vpop.f32.mrf.mxu0  ;;  %4923 = vmatpush.bf16.msrb.mxu2 %v10933_v0  ;;  %v2738_v59 = vsel %vm18225_vm6, %v15720_v51, %v15715_v7  ;;  %v2635_v32 = vshll.u32 %v18328_v13, 16  ;;  %v10688_v35 = vld [vmem:[#allocation2 + $0xc8] sm:$0xf]  ;;  %v10680_v0 = vld [vmem:[#allocation2 + $0xc0] sm:$0xf] }
 0x22c   : > { %v3459_v5 = vadd.f32 %v3458_v37, %v3370_v31  ;;  %v3551_v60 = vadd.f32 %v3550_v6, %v15024_v40  ;;  %v2632_v55 = vor.u32 %v2631_v48, %v2627_v56  ;;  %2910 = vst [vmem:[#allocation2 + $0x278] sm:$0xff] %v2738_v59 }
 0x22d   : > { %v2637_v54 = vrot.slane %v2635_v32, 5 }
 0x22e   : > { %v3707_v49 = vmax.f32 %v3459_v5, 0.0  ;;  %v2728_v5 = vsel %vm18225_vm6, %v15710_v57, %v15670_v52 }
 0x22f   : > { %2909 = vst [vmem:[#allocation2 + $0x258] sm:$0xff] %v2728_v5 }
 0x230   : > { %3771 = vst [vmem:[%s15072_s29 + $0x4a0] sm:$0xff] %v3707_v49  ;;  %v2749_v49 = vshrl.u32 %v18327_v26, 16 }
 0x231   : > { %v3639_v53 = vpop.f32.mrf.mxu1  ;;  %4583 = vmatmul.bf16.gmra.mxu2 %v15687_v58  ;;  %4761 = vmatmul.bf16.gmra.mxu0 %v15684_v24  ;;  %v3372_v25 = vpop.f32.mrf.mxu2 }
 0x232   : > { %v3640_v39 = vadd.f32 %v3639_v53, %v3551_v60  ;;  %v3373_v43 = vadd.f32 %v3372_v25, %v15047_v14  ;;  %v2741_v60 = vrot.slane %v2739_v30, 4  ;;  %v2628_v53 = vsel %vm18225_vm6, %v2623_v33, %v2627_v56  ;;  %v11058_v33 = vld [vmem:[#allocation9 + $0x258] sm:$0xf0] }
 0x233   : > { %v3552_v38 = vpop.f32.mrf.mxu0  ;;  %v15743_v30 = vrot.slane %v2745_v45, 5  ;;  %2899 = vst [vmem:[#allocation2 + $0x118] sm:$0xff] %v2628_v53  ;;  %v2633_v45 = vrot.slane %v2632_v55, 4 }
 0x234   : > { %v3710_v10 = vmax.f32 %v3640_v39, 0.0  ;;  %4672 = vmatmul.bf16.gmra.mxu3 %v15691_v2  ;;  %4850 = vmatmul.bf16.gmra.mxu1 %v15693_v20  ;;  %v3553_v6 = vadd.f32 %v3552_v38, %v15024_v40  ;;  %v2639_v39 = vshrl.u32 %v18328_v13, 16  ;;  %v2742_v34 = vor.u32 %v2741_v60, %v15715_v7  ;;  %v12921_v60 = vld [vmem:[#allocation2 + $0xcc] sm:$0xf] }
 0x236   : > { %3774 = vst [vmem:[%s15072_s29 + $0x508] sm:$0xff] %v3710_v10  ;;  %v12923_v10 = vld [vmem:[#allocation2 + $0xe4] sm:$0xf0]  ;;  %v2641_v56 = vrot.slane %v2639_v39, 4  ;;  %v15762_v55 = vrot.slane %v2742_v34, 4 }
 0x237   : > { %v3461_v31 = vpop.f32.mrf.mxu3  ;;  %v15748_v17 = vor.u32 %v12923_v10, %v10688_v35  ;;  %v18330_v35 = vld [vmem:[#allocation34_spill] sm:$0xff] }
 0x238   : > { %v3462_v37 = vadd.f32 %v3461_v31, %v3373_v43  ;;  %v12922_v43 = vld [vmem:[#allocation2 + $0xdc] sm:$0xf0]  ;;  %v2751_v31 = vrot.slane %v2749_v49, 4  ;;  %v2755_v10 = vshll.u32 %v18330_v35, 16  ;;  %v2759_v34 = vshrl.u32 %v18330_v35, 16 }
 0x239   : > { %v3641_v15 = vpop.f32.mrf.mxu1  ;;  %v3374_v25 = vpop.f32.mrf.mxu2  ;;  %v15751_v26 = vor.u32 %v12922_v43, %v10680_v0 }
 0x23a   : > { %v3709_v16 = vmax.f32 %v3462_v37, 0.0  ;;  %v3642_v41 = vadd.f32 %v3641_v15, %v3553_v6  ;;  %v3375_v62 = vadd.f32 %v3374_v25, %v15047_v14  ;;  %v11061_v37 = vor.u32 %v13014_v9, %v11058_v33  ;;  %v18329_v15 = vld [vmem:[#allocation51_spill] sm:$0xff]  ;;  %v11122_v33 = vld [vmem:[#allocation9 + $0x2d8] sm:$0xf0] }
 0x23b   : > { %v3555_v38 = vpop.f32.mrf.mxu0  ;;  %v2645_v13 = vshll.u32 %v18329_v15, 16  ;;  %v2642_v25 = vor.u32 %v2641_v56, %v2637_v54  ;;  %v2649_v43 = vshrl.u32 %v18329_v15, 16  ;;  %v13030_v9 = vld [vmem:[#allocation9 + $0x2d4] sm:$0xf]  ;;  %v15773_v56 = vrot.slane %v2755_v10, 5 }
 0x23c   : > { %3773 = vst [vmem:[%s15072_s29 + $0x500] sm:$0xff] %v3709_v16  ;;  %v3712_v46 = vmax.f32 %v3642_v41, 0.0  ;;  %v3556_v28 = vadd.f32 %v3555_v38, %v15024_v40  ;;  %v12920_v16 = vld [vmem:[#allocation2 + $0xc4] sm:$0xf]  ;;  %v15754_v41 = vor.u32 %v12921_v60, %v10690_v23  ;;  %5101 = vmatpush.bf16.msrb.mxu0 %v11061_v37  ;;  %v2752_v23 = vor.u32 %v2751_v31, %v15743_v30 }
 0x23d   : > { %v15757_v39 = vor.u32 %v12920_v16, %v10682_v29  ;;  %v11125_v38 = vor.u32 %v13030_v9, %v11122_v33  ;;  %v2647_v0 = vrot.slane %v2645_v13, 5  ;;  %v18331_v29 = vld [vmem:[#allocation41_spill] sm:$0xff]  ;;  %v2643_v37 = vrot.slane %v2642_v25, 4  ;;  %v12926_v33 = vld [vmem:[#allocation2 + $0x11c] sm:$0xf0] }
 0x23e   : > { %3776 = vst [vmem:[%s15072_s29 + $0x528] sm:$0xff] %v3712_v46  ;;  %v2638_v46 = vsel %vm18225_vm6, %v2633_v45, %v2637_v54  ;;  %v2765_v31 = vshll.u32 %v18331_v29, 16  ;;  %v2748_v13 = vsel %vm18225_vm6, %v15762_v55, %v15743_v30  ;;  %v2761_v16 = vrot.slane %v2759_v34, 4  ;;  %v10704_v34 = vld [vmem:[#allocation2 + $0x108] sm:$0xf] }
 0x23f   : > { %v3463_v48 = vpop.f32.mrf.mxu3  ;;  %2900 = vst [vmem:[#allocation2 + $0x138] sm:$0xff] %v2638_v46  ;;  %5190 = vmatpush.bf16.msrb.mxu1 %v11125_v38  ;;  %v18332_v46 = vld [vmem:[#allocation60_spill] sm:$0xff]  ;;  %v2648_v1 = vsel %vm18225_vm6, %v2643_v37, %v2647_v0  ;;  %v10706_v38 = vld [vmem:[#allocation2 + $0x128] sm:$0xf0] }
 0x240   : > { %v3464_v6 = vadd.f32 %v3463_v48, %v3375_v62  ;;  %v2655_v35 = vshll.u32 %v18332_v46, 16  ;;  %v2659_v18 = vshrl.u32 %v18332_v46, 16  ;;  %v15802_v30 = vrot.slane %v2765_v31, 5  ;;  %2901 = vst [vmem:[#allocation2 + $0x158] sm:$0xff] %v2648_v1 }
 0x241   : > { %v3644_v32 = vpop.f32.mrf.mxu1  ;;  %4588 = vmatmul.bf16.gmra.mxu2 %v15751_v26  ;;  %4766 = vmatmul.bf16.gmra.mxu0 %v15748_v17  ;;  %v3377_v48 = vpop.f32.mrf.mxu2  ;;  %v2762_v52 = vor.u32 %v2761_v16, %v15773_v56  ;;  %2911 = vst [vmem:[#allocation2 + $0x298] sm:$0xff] %v2748_v13 }
 0x242   : > { %v3711_v53 = vmax.f32 %v3464_v6, 0.0  ;;  %v3645_v49 = vadd.f32 %v3644_v32, %v3556_v28  ;;  %v3378_v54 = vadd.f32 %v3377_v48, %v15047_v14  ;;  %v2651_v6 = vrot.slane %v2649_v43, 4  ;;  %v10698_v48 = vld [vmem:[#allocation2 + $0x120] sm:$0xf0] }
 0x243   : > { %v3557_v60 = vpop.f32.mrf.mxu0  ;;  %v15786_v32 = vrot.slane %v2752_v23, 4  ;;  %v12927_v23 = vld [vmem:[#allocation2 + $0x124] sm:$0xf0]  ;;  %v2657_v57 = vrot.slane %v2655_v35, 5 }
 0x244   : > { %3775 = vst [vmem:[%s15072_s29 + $0x520] sm:$0xff] %v3711_v53  ;;  %v3714_v62 = vmax.f32 %v3645_v49, 0.0  ;;  %4677 = vmatmul.bf16.gmra.mxu3 %v15757_v39  ;;  %4855 = vmatmul.bf16.gmra.mxu1 %v15754_v41  ;;  %v3558_v15 = vadd.f32 %v3557_v60, %v15024_v40  ;;  %v2769_v53 = vshrl.u32 %v18331_v29, 16  ;;  %v2652_v55 = vor.u32 %v2651_v6, %v2647_v0  ;;  %v18333_v29 = vld [vmem:[#allocation65_spill] sm:$0xff] }
 0x245   : > { %v2758_v21 = vsel %vm18225_vm6, %v15786_v32, %v15773_v56  ;;  %v2665_v31 = vshll.u32 %v18333_v29, 16  ;;  %v2669_v0 = vshrl.u32 %v18333_v29, 16  ;;  %v15810_v60 = vor.u32 %v12927_v23, %v10704_v34  ;;  %v11050_v56 = vld [vmem:[#allocation9 + $0x248] sm:$0xf0] }
 0x246   : > { %3778 = vst [vmem:[%s15072_s29 + $0x588] sm:$0xff] %v3714_v62  ;;  %v2771_v62 = vrot.slane %v2769_v53, 4  ;;  %v12924_v53 = vld [vmem:[#allocation2 + $0x104] sm:$0xf]  ;;  %v2653_v46 = vrot.slane %v2652_v55, 4 }
 0x247   : > { %v3466_v28 = vpop.f32.mrf.mxu3  ;;  %v2671_v34 = vrot.slane %v2669_v0, 4  ;;  %2912 = vst [vmem:[#allocation2 + $0x2b8] sm:$0xff] %v2758_v21 }
 0x248   : > { %v3467_v45 = vadd.f32 %v3466_v28, %v3378_v54  ;;  %v2661_v54 = vrot.slane %v2659_v18, 4  ;;  %v10696_v28 = vld [vmem:[#allocation2 + $0x100] sm:$0xf]  ;;  %v2772_v35 = vor.u32 %v2771_v62, %v15802_v30  ;;  %v15817_v18 = vor.u32 %v12924_v53, %v10698_v48 }
 0x249   : > { %v3646_v49 = vpop.f32.mrf.mxu1  ;;  %v3379_v9 = vpop.f32.mrf.mxu2  ;;  %v15813_v16 = vor.u32 %v12926_v33, %v10696_v28  ;;  %v2658_v55 = vsel %vm18225_vm6, %v2653_v46, %v2657_v57  ;;  %v2667_v33 = vrot.slane %v2665_v31, 5 }
 0x24a   : > { %v3713_v10 = vmax.f32 %v3467_v45, 0.0  ;;  %v3647_v25 = vadd.f32 %v3646_v49, %v3558_v15  ;;  %v3380_v5 = vadd.f32 %v3379_v9, %v15047_v14  ;;  %v12925_v49 = vld [vmem:[#allocation2 + $0x10c] sm:$0xf]  ;;  %v2662_v62 = vor.u32 %v2661_v54, %v2657_v57  ;;  %2902 = vst [vmem:[#allocation2 + $0x178] sm:$0xff] %v2658_v55  ;;  %v12980_v57 = vld [vmem:[#allocation9 + $0x144] sm:$0xf] }
 0x24b   : > { %v15840_v54 = vrot.slane %v2772_v35, 4  ;;  %v2672_v0 = vor.u32 %v2671_v34, %v2667_v33 }
 0x24c   : > { %3777 = vst [vmem:[%s15072_s29 + $0x580] sm:$0xff] %v3713_v10  ;;  %v3716_v43 = vmax.f32 %v3647_v25, 0.0  ;;  %v18334_v10 = vld [vmem:[#allocation45_spill] sm:$0xff]  ;;  %v2663_v31 = vrot.slane %v2662_v62, 4 }
 0x24d   : > { %v2775_v25 = vshll.u32 %v18334_v10, 16  ;;  %v2779_v59 = vshrl.u32 %v18334_v10, 16 }
 0x24e   : > { %3780 = vst [vmem:[%s15072_s29 + $0x5a8] sm:$0xff] %v3716_v43  ;;  %v3560_v6 = vpop.f32.mrf.mxu0  ;;  %v15819_v43 = vor.u32 %v12925_v49, %v10706_v38  ;;  %v10922_v38 = vld [vmem:[#allocation9 + $0x148] sm:$0xf0]  ;;  %v2668_v55 = vsel %vm18225_vm6, %v2663_v31, %v2667_v33 }
 0x24f   : > { %v3468_v37 = vpop.f32.mrf.mxu3  ;;  %v3561_v15 = vadd.f32 %v3560_v6, %v15024_v40  ;;  %v15835_v51 = vrot.slane %v2775_v25, 5  ;;  %v10925_v28 = vor.u32 %v12980_v57, %v10922_v38  ;;  %v12930_v57 = vld [vmem:[#allocation2 + $0x15c] sm:$0xf0]  ;;  %v10722_v38 = vld [vmem:[#allocation2 + $0x168] sm:$0xf0]  ;;  %2903 = vst [vmem:[#allocation2 + $0x198] sm:$0xff] %v2668_v55 }
 0x250   : > { %v3469_v45 = vadd.f32 %v3468_v37, %v3380_v5  ;;  %v15830_v5 = vrot.slane %v2762_v52, 4  ;;  %v18335_v52 = vld [vmem:[#allocation50_spill] sm:$0xff] }
 0x251   : > { %v3649_v1 = vpop.f32.mrf.mxu1  ;;  %4593 = vmatmul.bf16.gmra.mxu2 %v15813_v16  ;;  %4771 = vmatmul.bf16.gmra.mxu0 %v15810_v60  ;;  %v2785_v29 = vshll.u32 %v18335_v52, 16  ;;  %v2789_v10 = vshrl.u32 %v18335_v52, 16  ;;  %v18336_v52 = vld [vmem:[#allocation54_spill] sm:$0xff] }
 0x252   : > { %v3715_v23 = vmax.f32 %v3469_v45, 0.0  ;;  %v3650_v9 = vadd.f32 %v3649_v1, %v3561_v15  ;;  %v12996_v45 = vld [vmem:[#allocation9 + $0x1c4] sm:$0xf]  ;;  %v10986_v15 = vld [vmem:[#allocation9 + $0x1c8] sm:$0xf0]  ;;  %v2768_v35 = vsel %vm18225_vm6, %v15830_v5, %v15802_v30  ;;  %4924 = vmatpush.bf16.msrb.mxu2 %v10925_v28  ;;  %v2778_v1 = vsel %vm18225_vm6, %v15840_v54, %v15835_v51 }
 0x253   : > { %v10989_v46 = vor.u32 %v12996_v45, %v10986_v15  ;;  %v2781_v30 = vrot.slane %v2779_v59, 4  ;;  %v15860_v62 = vrot.slane %v2785_v29, 5  ;;  %v12931_v5 = vld [vmem:[#allocation2 + $0x164] sm:$0xf0]  ;;  %v2795_v33 = vshll.u32 %v18336_v52, 16  ;;  %2913 = vst [vmem:[#allocation2 + $0x2d8] sm:$0xff] %v2768_v35 }
 0x254   : > { %3779 = vst [vmem:[%s15072_s29 + $0x5a0] sm:$0xff] %v3715_v23  ;;  %v3718_v7 = vmax.f32 %v3650_v9, 0.0  ;;  %4682 = vmatmul.bf16.gmra.mxu3 %v15817_v18  ;;  %4860 = vmatmul.bf16.gmra.mxu1 %v15819_v43  ;;  %v3382_v48 = vpop.f32.mrf.mxu2  ;;  %v10720_v28 = vld [vmem:[#allocation2 + $0x148] sm:$0xf] }
 0x255   : > { %v3383_v13 = vadd.f32 %v3382_v48, %v15047_v14  ;;  %5013 = vmatpush.bf16.msrb.mxu3 %v10989_v46  ;;  %v2791_v48 = vrot.slane %v2789_v10, 4  ;;  %v2782_v21 = vor.u32 %v2781_v30, %v15835_v51  ;;  %v15873_v46 = vor.u32 %v12931_v5, %v10720_v28  ;;  %v12929_v10 = vld [vmem:[#allocation2 + $0x14c] sm:$0xf]  ;;  %2914 = vst [vmem:[#allocation2 + $0x2f8] sm:$0xff] %v2778_v1 }
 0x256   : > { %3782 = vst [vmem:[%s15072_s29 + $0x608] sm:$0xff] %v3718_v7  ;;  %v3562_v6 = vpop.f32.mrf.mxu0  ;;  %v2673_v7 = vrot.slane %v2672_v0, 4  ;;  %v10712_v0 = vld [vmem:[#allocation2 + $0x140] sm:$0xf] }
 0x257   : > { %v3471_v37 = vpop.f32.mrf.mxu3  ;;  %v3563_v49 = vadd.f32 %v3562_v6, %v15024_v40  ;;  %v10714_v6 = vld [vmem:[#allocation2 + $0x160] sm:$0xf0]  ;;  %v2783_v5 = vrot.slane %v2782_v21, 4 }
 0x258   : > { %v3472_v53 = vadd.f32 %v3471_v37, %v3383_v13  ;;  %v13012_v37 = vld [vmem:[#allocation9 + $0x244] sm:$0xf]  ;;  %v2678_v32 = vsel %vm18225_vm6, %v2673_v7, %v15522_v27  ;;  %v2797_v7 = vrot.slane %v2795_v33, 5 }
 0x259   : > { %v3651_v25 = vpop.f32.mrf.mxu1  ;;  %v11053_v45 = vor.u32 %v13012_v37, %v11050_v56  ;;  %2904 = vst [vmem:[#allocation2 + $0x1b8] sm:$0xff] %v2678_v32  ;;  %v2799_v32 = vshrl.u32 %v18336_v52, 16 }
 0x25a   : > { %v3717_v23 = vmax.f32 %v3472_v53, 0.0  ;;  %v3652_v9 = vadd.f32 %v3651_v25, %v3563_v49  ;;  %v15871_v49 = vor.u32 %v12930_v57, %v10712_v0  ;;  %v2792_v25 = vor.u32 %v2791_v48, %v15860_v62  ;;  %v11114_v57 = vld [vmem:[#allocation9 + $0x2c8] sm:$0xf0] }
 0x25b   : > { %5102 = vmatpush.bf16.msrb.mxu0 %v11053_v45 }
 0x25c   : > { %3781 = vst [vmem:[%s15072_s29 + $0x600] sm:$0xff] %v3717_v23  ;;  %v3720_v34 = vmax.f32 %v3652_v9, 0.0  ;;  %v3384_v13 = vpop.f32.mrf.mxu2  ;;  %v12928_v23 = vld [vmem:[#allocation2 + $0x144] sm:$0xf]  ;;  %v15876_v9 = vor.u32 %v12929_v10, %v10722_v38  ;;  %v2793_v56 = vrot.slane %v2792_v25, 4  ;;  %v2801_v10 = vrot.slane %v2799_v32, 4 }
 0x25d   : > { %v3385_v31 = vadd.f32 %v3384_v13, %v15047_v14  ;;  %v13028_v13 = vld [vmem:[#allocation9 + $0x2c4] sm:$0xf] }
 0x25e   : > { %3784 = vst [vmem:[%s15072_s29 + $0x628] sm:$0xff] %v3720_v34  ;;  %v3565_v29 = vpop.f32.mrf.mxu0  ;;  %v15879_v34 = vor.u32 %v12928_v23, %v10714_v6  ;;  %v2788_v6 = vsel %vm18225_vm6, %v2783_v5, %v15860_v62  ;;  %v2798_v52 = vsel %vm18225_vm6, %v2793_v56, %v2797_v7  ;;  %v12935_v23 = vld [vmem:[#allocation2 + $0x1a4] sm:$0xf0] }
 0x25f   : > { %v3473_v59 = vpop.f32.mrf.mxu3  ;;  %v3566_v53 = vadd.f32 %v3565_v29, %v15024_v40  ;;  %2915 = vst [vmem:[#allocation2 + $0x318] sm:$0xff] %v2788_v6  ;;  %v18338_v62 = vld [vmem:[#allocation69_spill] sm:$0xff] }
 0x260   : > { %v3474_v15 = vadd.f32 %v3473_v59, %v3385_v31  ;;  %v11117_v31 = vor.u32 %v13028_v13, %v11114_v57  ;;  %v18337_v59 = vld [vmem:[#allocation61_spill] sm:$0xff]  ;;  %2916 = vst [vmem:[#allocation2 + $0x338] sm:$0xff] %v2798_v52 }
 0x261   : > { %v3654_v27 = vpop.f32.mrf.mxu1  ;;  %4598 = vmatmul.bf16.gmra.mxu2 %v15871_v49  ;;  %4776 = vmatmul.bf16.gmra.mxu0 %v15873_v46  ;;  %v2805_v35 = vshll.u32 %v18337_v59, 16  ;;  %v2809_v28 = vshrl.u32 %v18337_v59, 16  ;;  %v10736_v5 = vld [vmem:[#allocation2 + $0x188] sm:$0xf] }
 0x262   : > { %v3719_v55 = vmax.f32 %v3474_v15, 0.0  ;;  %v3655_v30 = vadd.f32 %v3654_v27, %v3566_v53  ;;  %5191 = vmatpush.bf16.msrb.mxu1 %v11117_v31  ;;  %v12934_v27 = vld [vmem:[#allocation2 + $0x19c] sm:$0xf0]  ;;  %v10730_v31 = vld [vmem:[#allocation2 + $0x1a0] sm:$0xf0] }
 0x263   : > { %v2807_v51 = vrot.slane %v2805_v35, 5  ;;  %v2811_v1 = vrot.slane %v2809_v28, 4  ;;  %v15908_v35 = vor.u32 %v12935_v23, %v10736_v5  ;;  %v10978_v23 = vld [vmem:[#allocation9 + $0x1b8] sm:$0xf0] }
 0x264   : > { %3783 = vst [vmem:[%s15072_s29 + $0x620] sm:$0xff] %v3719_v55  ;;  %v3722_v48 = vmax.f32 %v3655_v30, 0.0  ;;  %4687 = vmatmul.bf16.gmra.mxu3 %v15879_v34  ;;  %4865 = vmatmul.bf16.gmra.mxu1 %v15876_v9  ;;  %v3387_v38 = vpop.f32.mrf.mxu2  ;;  %v2815_v55 = vshll.u32 %v18338_v62, 16 }
 0x265   : > { %v3388_v37 = vadd.f32 %v3387_v38, %v15047_v14  ;;  %v10728_v38 = vld [vmem:[#allocation2 + $0x180] sm:$0xf] }
 0x266   : > { %3786 = vst [vmem:[%s15072_s29 + $0x688] sm:$0xff] %v3722_v48  ;;  %v3567_v21 = vpop.f32.mrf.mxu0  ;;  %v2802_v48 = vor.u32 %v2801_v10, %v2797_v7  ;;  %v15906_v59 = vor.u32 %v12934_v27, %v10728_v38  ;;  %v12978_v10 = vld [vmem:[#allocation9 + $0x134] sm:$0xf] }
 0x267   : > { %v3476_v33 = vpop.f32.mrf.mxu3  ;;  %v3568_v0 = vadd.f32 %v3567_v21, %v15024_v40  ;;  %v12994_v27 = vld [vmem:[#allocation9 + $0x1b4] sm:$0xf] }
 0x268   : > { %v3477_v29 = vadd.f32 %v3476_v33, %v3388_v37  ;;  %v10738_v37 = vld [vmem:[#allocation2 + $0x1a8] sm:$0xf0]  ;;  %v2812_v33 = vor.u32 %v2811_v1, %v2807_v51  ;;  %v10981_v5 = vor.u32 %v12994_v27, %v10978_v23 }
 0x269   : > { %v3656_v45 = vpop.f32.mrf.mxu1 }
 0x26a   : > { %v3721_v15 = vmax.f32 %v3477_v29, 0.0  ;;  %v3657_v53 = vadd.f32 %v3656_v45, %v3568_v0  ;;  %v12932_v29 = vld [vmem:[#allocation2 + $0x184] sm:$0xf]  ;;  %v12933_v0 = vld [vmem:[#allocation2 + $0x18c] sm:$0xf]  ;;  %v2803_v45 = vrot.slane %v2802_v48, 4  ;;  %5014 = vmatpush.bf16.msrb.mxu3 %v10981_v5 }
 0x26b   : > { %v15911_v7 = vor.u32 %v12932_v29, %v10730_v31  ;;  %v15914_v28 = vor.u32 %v12933_v0, %v10738_v37 }
 0x26c   : > { %3785 = vst [vmem:[%s15072_s29 + $0x680] sm:$0xff] %v3721_v15  ;;  %v3724_v54 = vmax.f32 %v3657_v53, 0.0  ;;  %v3389_v25 = vpop.f32.mrf.mxu2  ;;  %v15916_v15 = vrot.slane %v2815_v55, 5  ;;  %v2819_v55 = vshrl.u32 %v18338_v62, 16  ;;  %v2808_v37 = vsel %vm18225_vm6, %v2803_v45, %v2807_v51 }
 0x26d   : > { %v3390_v30 = vadd.f32 %v3389_v25, %v15047_v14  ;;  %2917 = vst [vmem:[#allocation2 + $0x358] sm:$0xff] %v2808_v37 }
 0x26e   : > { %3788 = vst [vmem:[%s15072_s29 + $0x6a8] sm:$0xff] %v3724_v54  ;;  %v3570_v57 = vpop.f32.mrf.mxu0  ;;  %v10914_v54 = vld [vmem:[#allocation9 + $0x138] sm:$0xf0] }
 0x26f   : > { %v3478_v13 = vpop.f32.mrf.mxu3  ;;  %v3571_v32 = vadd.f32 %v3570_v57, %v15024_v40  ;;  %v10917_v25 = vor.u32 %v12978_v10, %v10914_v54 }
 0x270   : > { %v3479_v56 = vadd.f32 %v3478_v13, %v3390_v30  ;;  %v2813_v13 = vrot.slane %v2812_v33, 4 }
 0x271   : > { %v3659_v21 = vpop.f32.mrf.mxu1  ;;  %4603 = vmatmul.bf16.gmra.mxu2 %v15906_v59  ;;  %4781 = vmatmul.bf16.gmra.mxu0 %v15908_v35 }
 0x272   : > { %v3723_v6 = vmax.f32 %v3479_v56, 0.0  ;;  %v3660_v52 = vadd.f32 %v3659_v21, %v3571_v32  ;;  %4925 = vmatpush.bf16.msrb.mxu2 %v10917_v25  ;;  %v2818_v56 = vsel %vm18225_vm6, %v2813_v13, %v15916_v15  ;;  %v18339_v32 = vld [vmem:[#allocation73_spill] sm:$0xff]  ;;  %v10744_v13 = vld [vmem:[#allocation2 + $0x1c0] sm:$0xf] }
 0x273   : > { %v2825_v21 = vshll.u32 %v18339_v32, 16  ;;  %v2829_v33 = vshrl.u32 %v18339_v32, 16  ;;  %2918 = vst [vmem:[#allocation2 + $0x378] sm:$0xff] %v2818_v56  ;;  %v12939_v25 = vld [vmem:[#allocation2 + $0x1e4] sm:$0xf0] }
 0x274   : > { %3787 = vst [vmem:[%s15072_s29 + $0x6a0] sm:$0xff] %v3723_v6  ;;  %v3726_v53 = vmax.f32 %v3660_v52, 0.0  ;;  %4692 = vmatmul.bf16.gmra.mxu3 %v15911_v7  ;;  %4870 = vmatmul.bf16.gmra.mxu1 %v15914_v28  ;;  %v3392_v1 = vpop.f32.mrf.mxu2  ;;  %v13563_v6 = vld [vmem:[#allocation2 + $0x468] sm:$0xff]  ;;  %v2821_v52 = vrot.slane %v2819_v55, 4  ;;  %v13010_v56 = vld [vmem:[#allocation9 + $0x234] sm:$0xf] }
 0x275   : > { %v3393_v30 = vadd.f32 %v3392_v1, %v15047_v14  ;;  %v15937_v51 = vsel %vm1966_vm8, 0, %v13563_v6  ;;  %v2831_v10 = vrot.slane %v2829_v33, 4  ;;  %v12938_v1 = vld [vmem:[#allocation2 + $0x1dc] sm:$0xf0]  ;;  %v10754_v55 = vld [vmem:[#allocation2 + $0x1e8] sm:$0xf0] }
 0x276   : > { %3790 = vst [vmem:[%s15072_s29 + $0x708] sm:$0xff] %v3726_v53  ;;  %v3572_v57 = vpop.f32.mrf.mxu0  ;;  %v2827_v53 = vrot.slane %v2825_v21, 5  ;;  %v2835_v27 = vshll.u32 %v15937_v51, 16  ;;  %v2822_v3 = vor.u32 %v2821_v52, %v15916_v15  ;;  %v11042_v32 = vld [vmem:[#allocation9 + $0x238] sm:$0xf0] }
 0x277   : > { %v3481_v48 = vpop.f32.mrf.mxu3  ;;  %v3573_v31 = vadd.f32 %v3572_v57, %v15024_v40  ;;  %18340 = vst [vmem:[#allocation40_spill] sm:$0xff] %v15937_v51  ;;  %v11045_v15 = vor.u32 %v13010_v56, %v11042_v32  ;;  %v12944_v51 = vld [vmem:[#allocation2 + $0x244] sm:$0xf] }
 0x278   : > { %v3482_v38 = vadd.f32 %v3481_v48, %v3393_v30  ;;  %v10752_v30 = vld [vmem:[#allocation2 + $0x1c8] sm:$0xf]  ;;  %v10746_v48 = vld [vmem:[#allocation2 + $0x1e0] sm:$0xf0]  ;;  %v2832_v21 = vor.u32 %v2831_v10, %v2827_v53 }
 0x279   : > { %v3661_v62 = vpop.f32.mrf.mxu1  ;;  %v15947_v37 = vor.u32 %v12939_v25, %v10752_v30  ;;  %5103 = vmatpush.bf16.msrb.mxu0 %v11045_v15  ;;  %v10760_v15 = vld [vmem:[#allocation2 + $0x200] sm:$0xf] }
 0x27a   : > { %v3725_v29 = vmax.f32 %v3482_v38, 0.0  ;;  %v3662_v0 = vadd.f32 %v3661_v62, %v3573_v31  ;;  %v15945_v31 = vor.u32 %v12938_v1, %v10744_v13  ;;  %v12936_v62 = vld [vmem:[#allocation2 + $0x1c4] sm:$0xf]  ;;  %v15955_v1 = vrot.slane %v2835_v27, 5  ;;  %v11106_v27 = vld [vmem:[#allocation9 + $0x2b8] sm:$0xf0] }
 0x27b   : > { %v15950_v52 = vor.u32 %v12936_v62, %v10746_v48  ;;  %v2833_v30 = vrot.slane %v2832_v21, 4  ;;  %v10768_v62 = vld [vmem:[#allocation2 + $0x208] sm:$0xf] }
 0x27c   : > { %3789 = vst [vmem:[%s15072_s29 + $0x700] sm:$0xff] %v3725_v29  ;;  %v3728_v45 = vmax.f32 %v3662_v0, 0.0  ;;  %v3394_v54 = vpop.f32.mrf.mxu2  ;;  %v12937_v29 = vld [vmem:[#allocation2 + $0x1cc] sm:$0xf] }
 0x27d   : > { %v3395_v23 = vadd.f32 %v3394_v54, %v15047_v14  ;;  %v2823_v54 = vrot.slane %v2822_v3, 4  ;;  %18341 = vst [vmem:[#allocation39_spill] sm:$0xff] %v15955_v1  ;;  %v13026_v3 = vld [vmem:[#allocation9 + $0x2b4] sm:$0xf] }
 0x27e   : > { %3792 = vst [vmem:[%s15072_s29 + $0x728] sm:$0xff] %v3728_v45  ;;  %v3575_v5 = vpop.f32.mrf.mxu0  ;;  %v15953_v45 = vor.u32 %v12937_v29, %v10754_v55  ;;  %v11109_v56 = vor.u32 %v13026_v3, %v11106_v27 }
 0x27f   : > { %v3483_v19 = vpop.f32.mrf.mxu3  ;;  %v3576_v38 = vadd.f32 %v3575_v5, %v15024_v40  ;;  %v2828_v55 = vsel %vm18225_vm6, %v2823_v54, %v2827_v53  ;;  %v12941_v54 = vld [vmem:[#allocation2 + $0x20c] sm:$0xf] }
 0x280   : > { %v3484_v57 = vadd.f32 %v3483_v19, %v3395_v23  ;;  %2919 = vst [vmem:[#allocation2 + $0x398] sm:$0xff] %v2828_v55  ;;  %5192 = vmatpush.bf16.msrb.mxu1 %v11109_v56 }
 0x281   : > { %v3664_v33 = vpop.f32.mrf.mxu1  ;;  %4608 = vmatmul.bf16.gmra.mxu2 %v15945_v31  ;;  %4786 = vmatmul.bf16.gmra.mxu0 %v15947_v37 }
 0x282   : > { %v3727_v0 = vmax.f32 %v3484_v57, 0.0  ;;  %v3665_v6 = vadd.f32 %v3664_v33, %v3576_v38  ;;  %v2838_v57 = vsel %vm18225_vm6, %v2833_v30, %v15955_v1  ;;  %v10762_v30 = vld [vmem:[#allocation2 + $0x220] sm:$0xf0] }
 0x283   : > { %2920 = vst [vmem:[#allocation2 + $0x3b8] sm:$0xff] %v2838_v57 }
 0x284   : > { %3791 = vst [vmem:[%s15072_s29 + $0x720] sm:$0xff] %v3727_v0  ;;  %v3730_v10 = vmax.f32 %v3665_v6, 0.0  ;;  %4697 = vmatmul.bf16.gmra.mxu3 %v15950_v52  ;;  %4875 = vmatmul.bf16.gmra.mxu1 %v15953_v45  ;;  %v3397_v25 = vpop.f32.mrf.mxu2  ;;  %v12942_v0 = vld [vmem:[#allocation2 + $0x21c] sm:$0xf0]  ;;  %v12943_v6 = vld [vmem:[#allocation2 + $0x224] sm:$0xf0] }
 0x285   : > { %v3398_v23 = vadd.f32 %v3397_v25, %v15047_v14 }
 0x286   : > { %3794 = vst [vmem:[%s15072_s29 + $0x788] sm:$0xff] %v3730_v10  ;;  %v3577_v5 = vpop.f32.mrf.mxu0 }
 0x287   : > { %v3486_v19 = vpop.f32.mrf.mxu3  ;;  %v3578_v48 = vadd.f32 %v3577_v5, %v15024_v40 }
 0x288   : > { %v3487_v13 = vadd.f32 %v3486_v19, %v3398_v23  ;;  %v12940_v23 = vld [vmem:[#allocation2 + $0x204] sm:$0xf]  ;;  %v10770_v19 = vld [vmem:[#allocation2 + $0x228] sm:$0xf0] }
 0x289   : > { %v3666_v38 = vpop.f32.mrf.mxu1  ;;  %v15976_v55 = vor.u32 %v12940_v23, %v10762_v30  ;;  %v15979_v57 = vor.u32 %v12941_v54, %v10770_v19  ;;  %v10784_v30 = vld [vmem:[#allocation2 + $0x248] sm:$0xf] }
 0x28a   : > { %v3729_v32 = vmax.f32 %v3487_v13, 0.0  ;;  %v3667_v21 = vadd.f32 %v3666_v38, %v3578_v48  ;;  %v15971_v13 = vor.u32 %v12942_v0, %v10760_v15  ;;  %v15973_v48 = vor.u32 %v12943_v6, %v10768_v62  ;;  %v12976_v62 = vld [vmem:[#allocation9 + $0x124] sm:$0xf] }
 0x28b   : > { %v12992_v15 = vld [vmem:[#allocation9 + $0x1a4] sm:$0xf] }
 0x28c   : > { %3793 = vst [vmem:[%s15072_s29 + $0x780] sm:$0xff] %v3729_v32  ;;  %v3732_v33 = vmax.f32 %v3667_v21, 0.0  ;;  %v3399_v29 = vpop.f32.mrf.mxu2 }
 0x28d   : > { %v3400_v53 = vadd.f32 %v3399_v29, %v15047_v14  ;;  %v10906_v29 = vld [vmem:[#allocation9 + $0x128] sm:$0xf0] }
 0x28e   : > { %3796 = vst [vmem:[%s15072_s29 + $0x7a8] sm:$0xff] %v3732_v33  ;;  %v4752_v25 = vpop.f32.mrf.mxu0  ;;  %v10909_v6 = vor.u32 %v12976_v62, %v10906_v29  ;;  %v10778_v62 = vld [vmem:[#allocation2 + $0x260] sm:$0xf0]  ;;  %v10786_v29 = vld [vmem:[#allocation2 + $0x268] sm:$0xf0] }
 0x28f   : > { %v3488_v10 = vpop.f32.mrf.mxu3 }
 0x290   : > { %v3489_v5 = vadd.f32 %v3488_v10, %v3400_v53  ;;  %v10970_v53 = vld [vmem:[#allocation9 + $0x1a8] sm:$0xf0]  ;;  %4926 = vmatpush.bf16.msrb.mxu2 %v10909_v6 }
 0x291   : > { %v4841_v3 = vpop.f32.mrf.mxu1  ;;  %4613 = vmatmul.bf16.gmra.mxu2 %v15971_v13  ;;  %4791 = vmatmul.bf16.gmra.mxu0 %v15973_v48  ;;  %v10973_v54 = vor.u32 %v12992_v15, %v10970_v53  ;;  %v13008_v15 = vld [vmem:[#allocation9 + $0x224] sm:$0xf]  ;;  %v11034_v6 = vld [vmem:[#allocation9 + $0x228] sm:$0xf0] }
 0x292   : > { %v3731_v27 = vmax.f32 %v3489_v5, 0.0  ;;  %v10776_v5 = vld [vmem:[#allocation2 + $0x240] sm:$0xf] }
 0x293   : > { %5015 = vmatpush.bf16.msrb.mxu3 %v10973_v54 }
 0x294   : > { %3795 = vst [vmem:[%s15072_s29 + $0x7a0] sm:$0xff] %v3731_v27  ;;  %4702 = vmatmul.bf16.gmra.mxu3 %v15976_v55  ;;  %4880 = vmatmul.bf16.gmra.mxu1 %v15979_v57  ;;  %v4574_v38 = vpop.f32.mrf.mxu2  ;;  %v12946_v27 = vld [vmem:[#allocation2 + $0x25c] sm:$0xf0] }
 0x295   : > { %v4575_v56 = vadd.f32 %v4574_v38, %v15047_v14  ;;  %v12947_v38 = vld [vmem:[#allocation2 + $0x264] sm:$0xf0] }
 0x296   : > { %v4754_v21 = vpop.f32.mrf.mxu0 }
 0x297   : > { %v4663_v32 = vpop.f32.mrf.mxu3 }
 0x298   : > { %v4664_v33 = vadd.f32 %v4663_v32, %v4575_v56  ;;  %v12945_v32 = vld [vmem:[#allocation2 + $0x24c] sm:$0xf] }
 0x299   : > { %v4843_v0 = vpop.f32.mrf.mxu1 }
 0x29a   : > { %v4753_v10 = vadd.f32 %v4752_v25, %v4664_v33  ;;  %v15987_v33 = vor.u32 %v12946_v27, %v10776_v5 }
 0x29c   : > { %v4842_v23 = vadd.f32 %v4841_v3, %v4753_v10  ;;  %v4576_v19 = vpop.f32.mrf.mxu2  ;;  %v15989_v3 = vor.u32 %v12947_v38, %v10784_v30  ;;  %v11037_v10 = vor.u32 %v13008_v15, %v11034_v6  ;;  %v10792_v6 = vld [vmem:[#allocation2 + $0x280] sm:$0xf] }
 0x29d   : > { %v4577_v56 = vadd.f32 %v4576_v19, %v15047_v14  ;;  %v15995_v19 = vor.u32 %v12945_v32, %v10786_v29  ;;  %v10800_v29 = vld [vmem:[#allocation2 + $0x288] sm:$0xf] }
 0x29e   : > { %v5277_v8 = vmax.f32 %v4842_v23, 0.0  ;;  %v4757_v1 = vpop.f32.mrf.mxu0  ;;  %v15992_v23 = vor.u32 %v12944_v51, %v10778_v62  ;;  %5104 = vmatpush.bf16.msrb.mxu0 %v11037_v10  ;;  %v13024_v51 = vld [vmem:[#allocation9 + $0x2a4] sm:$0xf]  ;;  %v12950_v10 = vld [vmem:[#allocation2 + $0x29c] sm:$0xf0] }
 0x29f   : > { %v4665_v42 = vpop.f32.mrf.mxu3  ;;  %18343 = vst [vmem:[#allocation43_spill] sm:$0xff] %v15995_v19 }
 0x2a0   : > { %5341 = vst [vmem:[%s15072_s29 + $0x10] sm:$0xff] %v5277_v8  ;;  %v4666_v25 = vadd.f32 %v4665_v42, %v4577_v56  ;;  %v11098_v56 = vld [vmem:[#allocation9 + $0x2a8] sm:$0xf0] }
 0x2a1   : > { %v4846_v53 = vpop.f32.mrf.mxu1  ;;  %4618 = vmatmul.bf16.gmra.mxu2 %v15987_v33  ;;  %18342 = vst [vmem:[#allocation44_spill] sm:$0xff] %v15992_v23  ;;  %4796 = vmatmul.bf16.gmra.mxu0 %v15989_v3 }
 0x2a2   : > { %v4755_v54 = vadd.f32 %v4754_v21, %v4666_v25  ;;  %v11101_v25 = vor.u32 %v13024_v51, %v11098_v56 }
 0x2a4   : > { %v4844_v8 = vadd.f32 %v4843_v0, %v4755_v54  ;;  %4707 = vmatmul.bf16.gmra.mxu3 %v15992_v23  ;;  %4885 = vmatmul.bf16.gmra.mxu1 %v15995_v19  ;;  %v4579_v42 = vpop.f32.mrf.mxu2  ;;  %v12951_v54 = vld [vmem:[#allocation2 + $0x2a4] sm:$0xf0]  ;;  %v10802_v19 = vld [vmem:[#allocation2 + $0x2a8] sm:$0xf0] }
 0x2a5   : > { %v4580_v5 = vadd.f32 %v4579_v42, %v15047_v14  ;;  %5193 = vmatpush.bf16.msrb.mxu1 %v11101_v25  ;;  %v10818_v23 = vld [vmem:[#allocation2 + $0x2e8] sm:$0xf0] }
 0x2a6   : > { %v5279_v30 = vmax.f32 %v4844_v8, 0.0  ;;  %v4759_v21 = vpop.f32.mrf.mxu0 }
 0x2a7   : > { %v4668_v27 = vpop.f32.mrf.mxu3 }
 0x2a8   : > { %5343 = vst [vmem:[%s15072_s29 + $0x30] sm:$0xff] %v5279_v30  ;;  %v4669_v38 = vadd.f32 %v4668_v27, %v4580_v5  ;;  %v12948_v5 = vld [vmem:[#allocation2 + $0x284] sm:$0xf] }
 0x2a9   : > { %v4848_v62 = vpop.f32.mrf.mxu1  ;;  %v10794_v27 = vld [vmem:[#allocation2 + $0x2a0] sm:$0xf0] }
 0x2aa   : > { %v4758_v32 = vadd.f32 %v4757_v1, %v4669_v38  ;;  %v16003_v1 = vor.u32 %v12950_v10, %v10792_v6  ;;  %v16008_v25 = vor.u32 %v12948_v5, %v10794_v27  ;;  %v12990_v27 = vld [vmem:[#allocation9 + $0x194] sm:$0xf] }
 0x2ac   : > { %v4847_v0 = vadd.f32 %v4846_v53, %v4758_v32  ;;  %v4581_v15 = vpop.f32.mrf.mxu2  ;;  %18344 = vst [vmem:[#allocation47_spill] sm:$0xff] %v16003_v1  ;;  %v16005_v53 = vor.u32 %v12951_v54, %v10800_v29  ;;  %v16011_v32 = vor.u32 %v12949_v47, %v10802_v19  ;;  %v12974_v54 = vld [vmem:[#allocation9 + $0x114] sm:$0xf]  ;;  %v10962_v47 = vld [vmem:[#allocation9 + $0x198] sm:$0xf0] }
 0x2ad   : > { %v4582_v42 = vadd.f32 %v4581_v15, %v15047_v14  ;;  %18346 = vst [vmem:[#allocation49_spill] sm:$0xff] %v16008_v25 }
 0x2ae   : > { %v5281_v8 = vmax.f32 %v4847_v0, 0.0  ;;  %v4762_v30 = vpop.f32.mrf.mxu0  ;;  %18345 = vst [vmem:[#allocation46_spill] sm:$0xff] %v16005_v53 }
 0x2af   : > { %v4670_v61 = vpop.f32.mrf.mxu3  ;;  %18347 = vst [vmem:[#allocation53_spill] sm:$0xff] %v16011_v32 }
 0x2b0   : > { %5345 = vst [vmem:[%s15072_s29 + $0x90] sm:$0xff] %v5281_v8  ;;  %v4671_v51 = vadd.f32 %v4670_v61, %v4582_v42  ;;  %v10898_v8 = vld [vmem:[#allocation9 + $0x118] sm:$0xf0] }
 0x2b1   : > { %v4851_v38 = vpop.f32.mrf.mxu1  ;;  %4623 = vmatmul.bf16.gmra.mxu2 %v16003_v1  ;;  %4801 = vmatmul.bf16.gmra.mxu0 %v16005_v53  ;;  %v10901_v5 = vor.u32 %v12974_v54, %v10898_v8  ;;  %v10810_v54 = vld [vmem:[#allocation2 + $0x2e0] sm:$0xf0]  ;;  %v12953_v8 = vld [vmem:[#allocation2 + $0x2cc] sm:$0xf] }
 0x2b2   : > { %v4760_v56 = vadd.f32 %v4759_v21, %v4671_v51 }
 0x2b3   : > { %4927 = vmatpush.bf16.msrb.mxu2 %v10901_v5  ;;  %v13006_v5 = vld [vmem:[#allocation9 + $0x214] sm:$0xf] }
 0x2b4   : > { %v4849_v0 = vadd.f32 %v4848_v62, %v4760_v56  ;;  %4712 = vmatmul.bf16.gmra.mxu3 %v16008_v25  ;;  %4890 = vmatmul.bf16.gmra.mxu1 %v16011_v32  ;;  %v4584_v61 = vpop.f32.mrf.mxu2  ;;  %v10965_v62 = vor.u32 %v12990_v27, %v10962_v47  ;;  %v10808_v56 = vld [vmem:[#allocation2 + $0x2c0] sm:$0xf]  ;;  %v12955_v25 = vld [vmem:[#allocation2 + $0x2e4] sm:$0xf0] }
 0x2b5   : > { %v4585_v29 = vadd.f32 %v4584_v61, %v15047_v14  ;;  %v12954_v32 = vld [vmem:[#allocation2 + $0x2dc] sm:$0xf0]  ;;  %v10816_v61 = vld [vmem:[#allocation2 + $0x2c8] sm:$0xf] }
 0x2b6   : > { %v5283_v15 = vmax.f32 %v4849_v0, 0.0  ;;  %v4764_v10 = vpop.f32.mrf.mxu0  ;;  %5016 = vmatpush.bf16.msrb.mxu3 %v10965_v62  ;;  %v11026_v27 = vld [vmem:[#allocation9 + $0x218] sm:$0xf0] }
 0x2b7   : > { %v4673_v6 = vpop.f32.mrf.mxu3 }
 0x2b8   : > { %5347 = vst [vmem:[%s15072_s29 + $0xb0] sm:$0xff] %v5283_v15  ;;  %v4674_v21 = vadd.f32 %v4673_v6, %v4585_v29  ;;  %v12952_v29 = vld [vmem:[#allocation2 + $0x2c4] sm:$0xf] }
 0x2b9   : > { %v4853_v42 = vpop.f32.mrf.mxu1 }
 0x2ba   : > { %v4763_v19 = vadd.f32 %v4762_v30, %v4674_v21  ;;  %v16019_v21 = vor.u32 %v12954_v32, %v10808_v56 }
 0x2bc   : > { %v4852_v51 = vadd.f32 %v4851_v38, %v4763_v19  ;;  %v4586_v0 = vpop.f32.mrf.mxu2  ;;  %18348 = vst [vmem:[#allocation52_spill] sm:$0xff] %v16019_v21  ;;  %v16021_v38 = vor.u32 %v12955_v25, %v10816_v61  ;;  %v11029_v19 = vor.u32 %v13006_v5, %v11026_v27  ;;  %v10824_v27 = vld [vmem:[#allocation2 + $0x300] sm:$0xf] }
 0x2bd   : > { %v4587_v15 = vadd.f32 %v4586_v0, %v15047_v14  ;;  %v16027_v0 = vor.u32 %v12953_v8, %v10818_v23  ;;  %v10832_v8 = vld [vmem:[#allocation2 + $0x308] sm:$0xf] }
 0x2be   : > { %v5285_v53 = vmax.f32 %v4852_v51, 0.0  ;;  %v4767_v1 = vpop.f32.mrf.mxu0  ;;  %18349 = vst [vmem:[#allocation56_spill] sm:$0xff] %v16021_v38  ;;  %v16024_v51 = vor.u32 %v12952_v29, %v10810_v54  ;;  %5105 = vmatpush.bf16.msrb.mxu0 %v11029_v19  ;;  %v13022_v29 = vld [vmem:[#allocation9 + $0x294] sm:$0xf]  ;;  %v12958_v19 = vld [vmem:[#allocation2 + $0x31c] sm:$0xf0] }
 0x2bf   : > { %v4675_v6 = vpop.f32.mrf.mxu3  ;;  %18351 = vst [vmem:[#allocation17_spill] sm:$0xff] %v16027_v0 }
 0x2c0   : > { %5349 = vst [vmem:[%s15072_s29 + $0x110] sm:$0xff] %v5285_v53  ;;  %v4676_v30 = vadd.f32 %v4675_v6, %v4587_v15  ;;  %v11090_v6 = vld [vmem:[#allocation9 + $0x298] sm:$0xf0] }
 0x2c1   : > { %v4856_v47 = vpop.f32.mrf.mxu1  ;;  %4628 = vmatmul.bf16.gmra.mxu2 %v16019_v21  ;;  %18350 = vst [vmem:[#allocation55_spill] sm:$0xff] %v16024_v51  ;;  %4806 = vmatmul.bf16.gmra.mxu0 %v16021_v38  ;;  %v10834_v38 = vld [vmem:[#allocation2 + $0x328] sm:$0xf0] }
 0x2c2   : > { %v4765_v62 = vadd.f32 %v4764_v10, %v4676_v30  ;;  %v11093_v30 = vor.u32 %v13022_v29, %v11090_v6  ;;  %v10850_v21 = vld [vmem:[#allocation2 + $0x368] sm:$0xf0] }
 0x2c4   : > { %v4854_v53 = vadd.f32 %v4853_v42, %v4765_v62  ;;  %4717 = vmatmul.bf16.gmra.mxu3 %v16024_v51  ;;  %4895 = vmatmul.bf16.gmra.mxu1 %v16027_v0  ;;  %v4589_v25 = vpop.f32.mrf.mxu2  ;;  %v12959_v62 = vld [vmem:[#allocation2 + $0x324] sm:$0xf0]  ;;  %v12957_v0 = vld [vmem:[#allocation2 + $0x30c] sm:$0xf] }
 0x2c5   : > { %v4590_v56 = vadd.f32 %v4589_v25, %v15047_v14  ;;  %5194 = vmatpush.bf16.msrb.mxu1 %v11093_v30 }
 0x2c6   : > { %v5287_v32 = vmax.f32 %v4854_v53, 0.0  ;;  %v4769_v10 = vpop.f32.mrf.mxu0 }
 0x2c7   : > { %v4678_v61 = vpop.f32.mrf.mxu3 }
 0x2c8   : > { %5351 = vst [vmem:[%s15072_s29 + $0x130] sm:$0xff] %v5287_v32  ;;  %v4679_v15 = vadd.f32 %v4678_v61, %v4590_v56  ;;  %v12956_v56 = vld [vmem:[#allocation2 + $0x304] sm:$0xf] }
 0x2c9   : > { %v4858_v54 = vpop.f32.mrf.mxu1  ;;  %v10826_v61 = vld [vmem:[#allocation2 + $0x320] sm:$0xf0] }
 0x2ca   : > { %v4768_v23 = vadd.f32 %v4767_v1, %v4679_v15  ;;  %v16035_v1 = vor.u32 %v12958_v19, %v10824_v27  ;;  %v16040_v30 = vor.u32 %v12956_v56, %v10826_v61  ;;  %v12988_v61 = vld [vmem:[#allocation9 + $0x184] sm:$0xf] }
 0x2cc   : > { %v4857_v42 = vadd.f32 %v4856_v47, %v4768_v23  ;;  %v4591_v5 = vpop.f32.mrf.mxu2  ;;  %18352 = vst [vmem:[#allocation58_spill] sm:$0xff] %v16035_v1  ;;  %v16037_v47 = vor.u32 %v12959_v62, %v10832_v8  ;;  %v16043_v23 = vor.u32 %v12957_v0, %v10834_v38  ;;  %v12972_v62 = vld [vmem:[#allocation9 + $0x104] sm:$0xf]  ;;  %v10954_v38 = vld [vmem:[#allocation9 + $0x188] sm:$0xf0] }
 0x2cd   : > { %v4592_v25 = vadd.f32 %v4591_v5, %v15047_v14  ;;  %18354 = vst [vmem:[#allocation18_spill] sm:$0xff] %v16040_v30 }
 0x2ce   : > { %v5289_v53 = vmax.f32 %v4857_v42, 0.0  ;;  %v4772_v32 = vpop.f32.mrf.mxu0  ;;  %18353 = vst [vmem:[#allocation57_spill] sm:$0xff] %v16037_v47 }
 0x2cf   : > { %v4680_v51 = vpop.f32.mrf.mxu3  ;;  %18355 = vst [vmem:[#allocation19_spill] sm:$0xff] %v16043_v23 }
 0x2d0   : > { %5353 = vst [vmem:[%s15072_s29 + $0x190] sm:$0xff] %v5289_v53  ;;  %v4681_v29 = vadd.f32 %v4680_v51, %v4592_v25  ;;  %v10890_v53 = vld [vmem:[#allocation9 + $0x108] sm:$0xf0] }
 0x2d1   : > { %v4861_v15 = vpop.f32.mrf.mxu1  ;;  %4633 = vmatmul.bf16.gmra.mxu2 %v16035_v1  ;;  %4811 = vmatmul.bf16.gmra.mxu0 %v16037_v47  ;;  %v10893_v56 = vor.u32 %v12972_v62, %v10890_v53  ;;  %v12960_v62 = vld [vmem:[#allocation2 + $0x344] sm:$0xf] }
 0x2d2   : > { %v4770_v6 = vadd.f32 %v4769_v10, %v4681_v29  ;;  %v10842_v53 = vld [vmem:[#allocation2 + $0x360] sm:$0xf0] }
 0x2d3   : > { %4928 = vmatpush.bf16.msrb.mxu2 %v10893_v56  ;;  %v13004_v56 = vld [vmem:[#allocation9 + $0x204] sm:$0xf] }
 0x2d4   : > { %v4859_v42 = vadd.f32 %v4858_v54, %v4770_v6  ;;  %4722 = vmatmul.bf16.gmra.mxu3 %v16040_v30  ;;  %4900 = vmatmul.bf16.gmra.mxu1 %v16043_v23  ;;  %v4594_v51 = vpop.f32.mrf.mxu2  ;;  %v10957_v54 = vor.u32 %v12988_v61, %v10954_v38  ;;  %v10848_v6 = vld [vmem:[#allocation2 + $0x348] sm:$0xf]  ;;  %v10840_v23 = vld [vmem:[#allocation2 + $0x340] sm:$0xf]  ;;  %v11018_v61 = vld [vmem:[#allocation9 + $0x208] sm:$0xf0] }
 0x2d5   : > { %v4595_v8 = vadd.f32 %v4594_v51, %v15047_v14  ;;  %v12962_v51 = vld [vmem:[#allocation2 + $0x35c] sm:$0xf0]  ;;  %v12963_v30 = vld [vmem:[#allocation2 + $0x364] sm:$0xf0] }
 0x2d6   : > { %v5291_v5 = vmax.f32 %v4859_v42, 0.0  ;;  %v4774_v19 = vpop.f32.mrf.mxu0  ;;  %5017 = vmatpush.bf16.msrb.mxu3 %v10957_v54 }
 0x2d7   : > { %v4683_v27 = vpop.f32.mrf.mxu3 }
 0x2d8   : > { %5355 = vst [vmem:[%s15072_s29 + $0x1b0] sm:$0xff] %v5291_v5  ;;  %v4684_v10 = vadd.f32 %v4683_v27, %v4595_v8  ;;  %v12961_v8 = vld [vmem:[#allocation2 + $0x34c] sm:$0xf] }
 0x2d9   : > { %v4863_v25 = vpop.f32.mrf.mxu1 }
 0x2da   : > { %v4773_v0 = vadd.f32 %v4772_v32, %v4684_v10  ;;  %v16051_v10 = vor.u32 %v12962_v51, %v10840_v23 }
 0x2dc   : > { %v4862_v29 = vadd.f32 %v4861_v15, %v4773_v0  ;;  %v4596_v42 = vpop.f32.mrf.mxu2  ;;  %18356 = vst [vmem:[#allocation63_spill] sm:$0xff] %v16051_v10  ;;  %v16053_v15 = vor.u32 %v12963_v30, %v10848_v6  ;;  %v11021_v0 = vor.u32 %v13004_v56, %v11018_v61  ;;  %v10856_v61 = vld [vmem:[#allocation2 + $0x380] sm:$0xf] }
 0x2dd   : > { %v4597_v5 = vadd.f32 %v4596_v42, %v15047_v14  ;;  %v16059_v42 = vor.u32 %v12961_v8, %v10850_v21  ;;  %v10864_v8 = vld [vmem:[#allocation2 + $0x388] sm:$0xf] }
 0x2de   : > { %v5293_v47 = vmax.f32 %v4862_v29, 0.0  ;;  %v4777_v1 = vpop.f32.mrf.mxu0  ;;  %18357 = vst [vmem:[#allocation62_spill] sm:$0xff] %v16053_v15  ;;  %v16056_v29 = vor.u32 %v12960_v62, %v10842_v53  ;;  %5106 = vmatpush.bf16.msrb.mxu0 %v11021_v0  ;;  %v11082_v62 = vld [vmem:[#allocation9 + $0x288] sm:$0xf0]  ;;  %v12966_v0 = vld [vmem:[#allocation2 + $0x39c] sm:$0xf0] }
 0x2df   : > { %v4685_v27 = vpop.f32.mrf.mxu3  ;;  %18359 = vst [vmem:[#allocation67_spill] sm:$0xff] %v16059_v42 }
 0x2e0   : > { %5357 = vst [vmem:[%s15072_s29 + $0x210] sm:$0xff] %v5293_v47  ;;  %v4686_v32 = vadd.f32 %v4685_v27, %v4597_v5  ;;  %v13020_v27 = vld [vmem:[#allocation9 + $0x284] sm:$0xf] }
 0x2e1   : > { %v4866_v38 = vpop.f32.mrf.mxu1  ;;  %4638 = vmatmul.bf16.gmra.mxu2 %v16051_v10  ;;  %18358 = vst [vmem:[#allocation68_spill] sm:$0xff] %v16056_v29  ;;  %4816 = vmatmul.bf16.gmra.mxu0 %v16053_v15  ;;  %v10866_v15 = vld [vmem:[#allocation2 + $0x3a8] sm:$0xf0] }
 0x2e2   : > { %v4775_v54 = vadd.f32 %v4774_v19, %v4686_v32  ;;  %v11085_v32 = vor.u32 %v13020_v27, %v11082_v62  ;;  %v10882_v10 = vld [vmem:[#allocation2 + $0x3e8] sm:$0xf0] }
 0x2e4   : > { %v4864_v47 = vadd.f32 %v4863_v25, %v4775_v54  ;;  %4727 = vmatmul.bf16.gmra.mxu3 %v16056_v29  ;;  %4905 = vmatmul.bf16.gmra.mxu1 %v16059_v42  ;;  %v4599_v30 = vpop.f32.mrf.mxu2  ;;  %v12967_v54 = vld [vmem:[#allocation2 + $0x3a4] sm:$0xf0]  ;;  %v12965_v42 = vld [vmem:[#allocation2 + $0x38c] sm:$0xf] }
 0x2e5   : > { %v4600_v6 = vadd.f32 %v4599_v30, %v15047_v14  ;;  %5195 = vmatpush.bf16.msrb.mxu1 %v11085_v32 }
 0x2e6   : > { %v5295_v23 = vmax.f32 %v4864_v47, 0.0  ;;  %v4779_v19 = vpop.f32.mrf.mxu0 }
 0x2e7   : > { %v4688_v51 = vpop.f32.mrf.mxu3 }
 0x2e8   : > { %5359 = vst [vmem:[%s15072_s29 + $0x230] sm:$0xff] %v5295_v23  ;;  %v4689_v5 = vadd.f32 %v4688_v51, %v4600_v6  ;;  %v12964_v6 = vld [vmem:[#allocation2 + $0x384] sm:$0xf] }
 0x2e9   : > { %v4868_v53 = vpop.f32.mrf.mxu1  ;;  %v10858_v51 = vld [vmem:[#allocation2 + $0x3a0] sm:$0xf0] }
 0x2ea   : > { %v4778_v21 = vadd.f32 %v4777_v1, %v4689_v5  ;;  %v16067_v1 = vor.u32 %v12966_v0, %v10856_v61  ;;  %v16072_v32 = vor.u32 %v12964_v6, %v10858_v51  ;;  %v11520_v51 = vld [vmem:[#allocation9 + $0x3f0] sm:$0xf] }
 0x2ec   : > { %v4867_v25 = vadd.f32 %v4866_v38, %v4778_v21  ;;  %v4601_v56 = vpop.f32.mrf.mxu2  ;;  %18360 = vst [vmem:[#allocation64_spill] sm:$0xff] %v16067_v1  ;;  %v16069_v38 = vor.u32 %v12967_v54, %v10864_v8  ;;  %v16075_v21 = vor.u32 %v12965_v42, %v10866_v15  ;;  %v11456_v54 = vld [vmem:[#allocation9 + $0x370] sm:$0xf]  ;;  %v13131_v15 = vld [vmem:[#allocation9 + $0x3f4] sm:$0xf0] }
 0x2ed   : > { %v4602_v30 = vadd.f32 %v4601_v56, %v15047_v14  ;;  %18362 = vst [vmem:[#allocation71_spill] sm:$0xff] %v16072_v32 }
 0x2ee   : > { %v5297_v47 = vmax.f32 %v4867_v25, 0.0  ;;  %v4782_v23 = vpop.f32.mrf.mxu0  ;;  %18361 = vst [vmem:[#allocation59_spill] sm:$0xff] %v16069_v38 }
 0x2ef   : > { %v4690_v29 = vpop.f32.mrf.mxu3  ;;  %18363 = vst [vmem:[#allocation70_spill] sm:$0xff] %v16075_v21 }
 0x2f0   : > { %5361 = vst [vmem:[%s15072_s29 + $0x290] sm:$0xff] %v5297_v47  ;;  %v4691_v27 = vadd.f32 %v4690_v29, %v4602_v30  ;;  %v13115_v47 = vld [vmem:[#allocation9 + $0x374] sm:$0xf0] }
 0x2f1   : > { %v4871_v5 = vpop.f32.mrf.mxu1  ;;  %4643 = vmatmul.bf16.gmra.mxu2 %v16067_v1  ;;  %4821 = vmatmul.bf16.gmra.mxu0 %v16069_v38  ;;  %v11457_v6 = vor.u32 %v13115_v47, %v11456_v54  ;;  %v12968_v54 = vld [vmem:[#allocation2 + $0x3c4] sm:$0xf] }
 0x2f2   : > { %v4780_v62 = vadd.f32 %v4779_v19, %v4691_v27  ;;  %v10874_v47 = vld [vmem:[#allocation2 + $0x3e0] sm:$0xf0] }
 0x2f3   : > { %6173 = vmatpush.bf16.msra.mxu2 %v11457_v6  ;;  %v11584_v6 = vld [vmem:[#allocation9 + $0x470] sm:$0xf] }
 0x2f4   : > { %v4869_v25 = vadd.f32 %v4868_v53, %v4780_v62  ;;  %4732 = vmatmul.bf16.gmra.mxu3 %v16072_v32  ;;  %4910 = vmatmul.bf16.gmra.mxu1 %v16075_v21  ;;  %v4604_v29 = vpop.f32.mrf.mxu2  ;;  %v11521_v53 = vor.u32 %v13131_v15, %v11520_v51  ;;  %v10880_v62 = vld [vmem:[#allocation2 + $0x3c8] sm:$0xf]  ;;  %v10872_v21 = vld [vmem:[#allocation2 + $0x3c0] sm:$0xf]  ;;  %v13147_v51 = vld [vmem:[#allocation9 + $0x474] sm:$0xf0] }
 0x2f5   : > { %v4605_v8 = vadd.f32 %v4604_v29, %v15047_v14  ;;  %v12970_v29 = vld [vmem:[#allocation2 + $0x3dc] sm:$0xf0]  ;;  %v12971_v32 = vld [vmem:[#allocation2 + $0x3e4] sm:$0xf0] }
 0x2f6   : > { %v5299_v56 = vmax.f32 %v4869_v25, 0.0  ;;  %v4784_v0 = vpop.f32.mrf.mxu0  ;;  %6262 = vmatpush.bf16.msra.mxu3 %v11521_v53 }
 0x2f7   : > { %v4693_v61 = vpop.f32.mrf.mxu3 }
 0x2f8   : > { %5363 = vst [vmem:[%s15072_s29 + $0x2b0] sm:$0xff] %v5299_v56  ;;  %v4694_v19 = vadd.f32 %v4693_v61, %v4605_v8  ;;  %v12969_v8 = vld [vmem:[#allocation2 + $0x3cc] sm:$0xf] }
 0x2f9   : > { %v4873_v30 = vpop.f32.mrf.mxu1 }
 0x2fa   : > { %v4783_v42 = vadd.f32 %v4782_v23, %v4694_v19  ;;  %v16083_v19 = vor.u32 %v12970_v29, %v10872_v21 }
 0x2fc   : > { %v4872_v27 = vadd.f32 %v4871_v5, %v4783_v42  ;;  %v4606_v25 = vpop.f32.mrf.mxu2  ;;  %v16085_v5 = vor.u32 %v12971_v32, %v10880_v62  ;;  %v11585_v42 = vor.u32 %v13147_v51, %v11584_v6 }
 0x2fd   : > { %v4607_v56 = vadd.f32 %v4606_v25, %v15047_v14  ;;  %v16091_v25 = vor.u32 %v12969_v8, %v10882_v10 }
 0x2fe   : > { %v5301_v38 = vmax.f32 %v4872_v27, 0.0  ;;  %v4787_v1 = vpop.f32.mrf.mxu0  ;;  %v16088_v27 = vor.u32 %v12968_v54, %v10874_v47  ;;  %6351 = vmatpush.bf16.msra.mxu0 %v11585_v42  ;;  %v13163_v54 = vld [vmem:[#allocation9 + $0x4f4] sm:$0xf0] }
 0x2ff   : > { %v4695_v61 = vpop.f32.mrf.mxu3  ;;  %18364 = vst [vmem:[#allocation72_spill] sm:$0xff] %v16091_v25 }
 0x300   : > { %5365 = vst [vmem:[%s15072_s29 + $0x310] sm:$0xff] %v5301_v38  ;;  %v4696_v23 = vadd.f32 %v4695_v61, %v4607_v56  ;;  %v11648_v61 = vld [vmem:[#allocation9 + $0x4f0] sm:$0xf] }
 0x301   : > { %v4876_v15 = vpop.f32.mrf.mxu1  ;;  %4648 = vmatmul.bf16.gmra.mxu2 %v16083_v19  ;;  %4826 = vmatmul.bf16.gmra.mxu0 %v16085_v5  ;;  %v11649_v10 = vor.u32 %v13163_v54, %v11648_v61  ;;  %v11448_v54 = vld [vmem:[#allocation9 + $0x360] sm:$0xf] }
 0x302   : > { %v4785_v53 = vadd.f32 %v4784_v0, %v4696_v23 }
 0x303   : > { %6440 = vmatpush.bf16.msra.mxu1 %v11649_v10 }
 0x304   : > { %v4874_v38 = vadd.f32 %v4873_v30, %v4785_v53  ;;  %4737 = vmatmul.bf16.gmra.mxu3 %v16088_v27  ;;  %4915 = vmatmul.bf16.gmra.mxu1 %v16091_v25  ;;  %v4609_v32 = vpop.f32.mrf.mxu2 }
 0x305   : > { %v4610_v62 = vadd.f32 %v4609_v32, %v15047_v14 }
 0x306   : > { %v5303_v21 = vmax.f32 %v4874_v38, 0.0  ;;  %v4789_v0 = vpop.f32.mrf.mxu0 }
 0x307   : > { %v4698_v29 = vpop.f32.mrf.mxu3 }
 0x308   : > { %5367 = vst [vmem:[%s15072_s29 + $0x330] sm:$0xff] %v5303_v21  ;;  %v4699_v56 = vadd.f32 %v4698_v29, %v4610_v62 }
 0x309   : > { %v4878_v47 = vpop.f32.mrf.mxu1 }
 0x30a   : > { %v4788_v8 = vadd.f32 %v4787_v1, %v4699_v56 }
 0x30c   : > { %v4877_v30 = vadd.f32 %v4876_v15, %v4788_v8  ;;  %v4611_v23 = vpop.f32.mrf.mxu2  ;;  %v11512_v8 = vld [vmem:[#allocation9 + $0x3e0] sm:$0xf] }
 0x30d   : > { %v4612_v51 = vadd.f32 %v4611_v23, %v15047_v14 }
 0x30e   : > { %v5305_v6 = vmax.f32 %v4877_v30, 0.0  ;;  %v4792_v53 = vpop.f32.mrf.mxu0 }
 0x30f   : > { %v4700_v42 = vpop.f32.mrf.mxu3 }
 0x310   : > { %5369 = vst [vmem:[%s15072_s29 + $0x390] sm:$0xff] %v5305_v6  ;;  %v4701_v38 = vadd.f32 %v4700_v42, %v4612_v51 }
 0x311   : > { %v4881_v32 = vpop.f32.mrf.mxu1  ;;  %4929 = vmatmul.bf16.vlgmr.msrb.gmra.mxu2 %v15568_v12  ;;  %5107 = vmatmul.bf16.vlgmr.msrb.gmra.mxu0 %v15570_v36  ;;  %v13129_v36 = vld [vmem:[#allocation9 + $0x3e4] sm:$0xf0] }
 0x312   : > { %v4790_v25 = vadd.f32 %v4789_v0, %v4701_v38  ;;  %v13113_v0 = vld [vmem:[#allocation9 + $0x364] sm:$0xf0]  ;;  %v11576_v38 = vld [vmem:[#allocation9 + $0x460] sm:$0xf] }
 0x313   : > { %v11449_v12 = vor.u32 %v13113_v0, %v11448_v54 }
 0x314   : > { %v4879_v21 = vadd.f32 %v4878_v47, %v4790_v25  ;;  %5018 = vmatmul.bf16.vlgmr.msrb.gmra.mxu3 %v15574_v11  ;;  %5196 = vmatmul.bf16.vlgmr.msrb.gmra.mxu1 %v15577_v22  ;;  %v4614_v1 = vpop.f32.mrf.mxu2  ;;  %v11513_v47 = vor.u32 %v13129_v36, %v11512_v8  ;;  %v13161_v8 = vld [vmem:[#allocation9 + $0x4e4] sm:$0xf0] }
 0x315   : > { %v4615_v62 = vadd.f32 %v4614_v1, %v15047_v14  ;;  %6174 = vmatpush.bf16.msra.mxu2 %v11449_v12 }
 0x316   : > { %v5307_v15 = vmax.f32 %v4879_v21, 0.0  ;;  %v4794_v56 = vpop.f32.mrf.mxu0  ;;  %6263 = vmatpush.bf16.msra.mxu3 %v11513_v47  ;;  %v13145_v21 = vld [vmem:[#allocation9 + $0x464] sm:$0xf0] }
 0x317   : > { %v4703_v29 = vpop.f32.mrf.mxu3 }
 0x318   : > { %5371 = vst [vmem:[%s15072_s29 + $0x3b0] sm:$0xff] %v5307_v15  ;;  %v4704_v61 = vadd.f32 %v4703_v29, %v4615_v62  ;;  %v11577_v15 = vor.u32 %v13145_v21, %v11576_v38 }
 0x319   : > { %v4883_v10 = vpop.f32.mrf.mxu1 }
 0x31a   : > { %v4793_v25 = vadd.f32 %v4792_v53, %v4704_v61  ;;  %6352 = vmatpush.bf16.msra.mxu0 %v11577_v15 }
 0x31c   : > { %v4882_v11 = vadd.f32 %v4881_v32, %v4793_v25  ;;  %v4616_v22 = vpop.f32.mrf.mxu2 }
 0x31d   : > { %v4617_v23 = vadd.f32 %v4616_v22, %v15047_v14 }
 0x31e   : > { %v5309_v30 = vmax.f32 %v4882_v11, 0.0  ;;  %v4797_v51 = vpop.f32.mrf.mxu0 }
 0x31f   : > { %v4705_v6 = vpop.f32.mrf.mxu3 }
 0x320   : > { %5373 = vst [vmem:[%s15072_s29 + $0x410] sm:$0xff] %v5309_v30  ;;  %v4706_v42 = vadd.f32 %v4705_v6, %v4617_v23 }
 0x321   : > { %v4886_v1 = vpop.f32.mrf.mxu1  ;;  %4934 = vmatmul.bf16.gmra.mxu2 %v15629_v4  ;;  %5112 = vmatmul.bf16.gmra.mxu0 %v15631_v63 }
 0x322   : > { %v4795_v62 = vadd.f32 %v4794_v56, %v4706_v42  ;;  %v11640_v56 = vld [vmem:[#allocation9 + $0x4e0] sm:$0xf] }
 0x323   : > { %v11641_v36 = vor.u32 %v13161_v8, %v11640_v56 }
 0x324   : > { %v4884_v53 = vadd.f32 %v4883_v10, %v4795_v62  ;;  %5023 = vmatmul.bf16.gmra.mxu3 %v15635_v50  ;;  %5201 = vmatmul.bf16.gmra.mxu1 %v15638_v44  ;;  %v4619_v32 = vpop.f32.mrf.mxu2  ;;  %v11440_v62 = vld [vmem:[#allocation9 + $0x350] sm:$0xf] }
 0x325   : > { %v4620_v61 = vadd.f32 %v4619_v32, %v15047_v14  ;;  %6441 = vmatpush.bf16.msra.mxu1 %v11641_v36  ;;  %v11568_v36 = vld [vmem:[#allocation9 + $0x450] sm:$0xf] }
 0x326   : > { %v5311_v29 = vmax.f32 %v4884_v53, 0.0  ;;  %v4799_v0 = vpop.f32.mrf.mxu0  ;;  %v13111_v53 = vld [vmem:[#allocation9 + $0x354] sm:$0xf0] }
 0x327   : > { %v4708_v54 = vpop.f32.mrf.mxu3 }
 0x328   : > { %5375 = vst [vmem:[%s15072_s29 + $0x430] sm:$0xff] %v5311_v29  ;;  %v4709_v12 = vadd.f32 %v4708_v54, %v4620_v61  ;;  %v11504_v29 = vld [vmem:[#allocation9 + $0x3d0] sm:$0xf] }
 0x329   : > { %v4888_v4 = vpop.f32.mrf.mxu1 }
 0x32a   : > { %v4798_v63 = vadd.f32 %v4797_v51, %v4709_v12 }
 0x32c   : > { %v4887_v10 = vadd.f32 %v4886_v1, %v4798_v63  ;;  %v4621_v25 = vpop.f32.mrf.mxu2  ;;  %v13143_v63 = vld [vmem:[#allocation9 + $0x454] sm:$0xf0] }
 0x32d   : > { %v4622_v44 = vadd.f32 %v4621_v25, %v15047_v14  ;;  %v11569_v25 = vor.u32 %v13143_v63, %v11568_v36 }
 0x32e   : > { %v5313_v50 = vmax.f32 %v4887_v10, 0.0  ;;  %v4802_v11 = vpop.f32.mrf.mxu0 }
 0x32f   : > { %v4710_v47 = vpop.f32.mrf.mxu3  ;;  %6353 = vmatpush.bf16.msra.mxu0 %v11569_v25 }
 0x330   : > { %5377 = vst [vmem:[%s15072_s29 + $0x490] sm:$0xff] %v5313_v50  ;;  %v4711_v22 = vadd.f32 %v4710_v47, %v4622_v44 }
 0x331   : > { %v4891_v30 = vpop.f32.mrf.mxu1  ;;  %4939 = vmatmul.bf16.gmra.mxu2 %v15687_v58  ;;  %5117 = vmatmul.bf16.gmra.mxu0 %v15684_v24  ;;  %v11441_v58 = vor.u32 %v13111_v53, %v11440_v62  ;;  %v13127_v24 = vld [vmem:[#allocation9 + $0x3d4] sm:$0xf0] }
 0x332   : > { %v4800_v23 = vadd.f32 %v4799_v0, %v4711_v22  ;;  %v11505_v54 = vor.u32 %v13127_v24, %v11504_v29 }
 0x333   : > { %6175 = vmatpush.bf16.msra.mxu2 %v11441_v58 }
 0x334   : > { %v4889_v6 = vadd.f32 %v4888_v4, %v4800_v23  ;;  %5028 = vmatmul.bf16.gmra.mxu3 %v15691_v2  ;;  %5206 = vmatmul.bf16.gmra.mxu1 %v15693_v20  ;;  %v4624_v51 = vpop.f32.mrf.mxu2 }
 0x335   : > { %v4625_v38 = vadd.f32 %v4624_v51, %v15047_v14  ;;  %6264 = vmatpush.bf16.msra.mxu3 %v11505_v54  ;;  %v11632_v51 = vld [vmem:[#allocation9 + $0x4d0] sm:$0xf] }
 0x336   : > { %v5315_v42 = vmax.f32 %v4889_v6, 0.0  ;;  %v4804_v1 = vpop.f32.mrf.mxu0 }
 0x337   : > { %v4713_v21 = vpop.f32.mrf.mxu3 }
 0x338   : > { %5379 = vst [vmem:[%s15072_s29 + $0x4b0] sm:$0xff] %v5315_v42  ;;  %v4714_v15 = vadd.f32 %v4713_v21, %v4625_v38  ;;  %v13159_v42 = vld [vmem:[#allocation9 + $0x4d4] sm:$0xf0] }
 0x339   : > { %v4893_v32 = vpop.f32.mrf.mxu1  ;;  %v11633_v38 = vor.u32 %v13159_v42, %v11632_v51 }
 0x33a   : > { %v4803_v61 = vadd.f32 %v4802_v11, %v4714_v15 }
 0x33b   : > { %6442 = vmatpush.bf16.msra.mxu1 %v11633_v38 }
 0x33c   : > { %v4892_v2 = vadd.f32 %v4891_v30, %v4803_v61  ;;  %v4626_v20 = vpop.f32.mrf.mxu2 }
 0x33d   : > { %v4627_v12 = vadd.f32 %v4626_v20, %v15047_v14 }
 0x33e   : > { %v5317_v0 = vmax.f32 %v4892_v2, 0.0  ;;  %v4807_v8 = vpop.f32.mrf.mxu0 }
 0x33f   : > { %v4715_v56 = vpop.f32.mrf.mxu3 }
 0x340   : > { %5381 = vst [vmem:[%s15072_s29 + $0x510] sm:$0xff] %v5317_v0  ;;  %v4716_v4 = vadd.f32 %v4715_v56, %v4627_v12  ;;  %v11432_v12 = vld [vmem:[#allocation9 + $0x340] sm:$0xf]  ;;  %v13109_v56 = vld [vmem:[#allocation9 + $0x344] sm:$0xf0] }
 0x341   : > { %v4896_v10 = vpop.f32.mrf.mxu1  ;;  %4944 = vmatmul.bf16.gmra.mxu2 %v15751_v26  ;;  %5122 = vmatmul.bf16.gmra.mxu0 %v15748_v17 }
 0x342   : > { %v4805_v50 = vadd.f32 %v4804_v1, %v4716_v4  ;;  %v11496_v4 = vld [vmem:[#allocation9 + $0x3c0] sm:$0xf] }
 0x344   : > { %v4894_v44 = vadd.f32 %v4893_v32, %v4805_v50  ;;  %5033 = vmatmul.bf16.gmra.mxu3 %v15757_v39  ;;  %5211 = vmatmul.bf16.gmra.mxu1 %v15754_v41  ;;  %v4629_v47 = vpop.f32.mrf.mxu2 }
 0x345   : > { %v4630_v22 = vadd.f32 %v4629_v47, %v15047_v14 }
 0x346   : > { %v5319_v11 = vmax.f32 %v4894_v44, 0.0  ;;  %v4809_v23 = vpop.f32.mrf.mxu0 }
 0x347   : > { %v4718_v30 = vpop.f32.mrf.mxu3 }
 0x348   : > { %5383 = vst [vmem:[%s15072_s29 + $0x530] sm:$0xff] %v5319_v11  ;;  %v4719_v6 = vadd.f32 %v4718_v30, %v4630_v22  ;;  %v11560_v11 = vld [vmem:[#allocation9 + $0x440] sm:$0xf]  ;;  %v13141_v22 = vld [vmem:[#allocation9 + $0x444] sm:$0xf0] }
 0x349   : > { %v4898_v26 = vpop.f32.mrf.mxu1 }
 0x34a   : > { %v4808_v17 = vadd.f32 %v4807_v8, %v4719_v6 }
 0x34c   : > { %v4897_v21 = vadd.f32 %v4896_v10, %v4808_v17  ;;  %v4631_v1 = vpop.f32.mrf.mxu2 }
 0x34d   : > { %v4632_v41 = vadd.f32 %v4631_v1, %v15047_v14 }
 0x34e   : > { %v5321_v39 = vmax.f32 %v4897_v21, 0.0  ;;  %v4812_v62 = vpop.f32.mrf.mxu0 }
 0x34f   : > { %v4720_v15 = vpop.f32.mrf.mxu3 }
 0x350   : > { %5385 = vst [vmem:[%s15072_s29 + $0x590] sm:$0xff] %v5321_v39  ;;  %v4721_v53 = vadd.f32 %v4720_v15, %v4632_v41  ;;  %v11624_v39 = vld [vmem:[#allocation9 + $0x4c0] sm:$0xf]  ;;  %v13157_v41 = vld [vmem:[#allocation9 + $0x4c4] sm:$0xf0] }
 0x351   : > { %v4901_v32 = vpop.f32.mrf.mxu1  ;;  %4949 = vmatmul.bf16.gmra.mxu2 %v15813_v16  ;;  %5127 = vmatmul.bf16.gmra.mxu0 %v15810_v60  ;;  %v11433_v16 = vor.u32 %v13109_v56, %v11432_v12  ;;  %v13125_v60 = vld [vmem:[#allocation9 + $0x3c4] sm:$0xf0]  ;;  %v11625_v15 = vor.u32 %v13157_v41, %v11624_v39  ;;  %v13155_v39 = vld [vmem:[#allocation9 + $0x4b4] sm:$0xf0] }
 0x352   : > { %v4810_v58 = vadd.f32 %v4809_v23, %v4721_v53  ;;  %v11497_v63 = vor.u32 %v13125_v60, %v11496_v4  ;;  %v11561_v23 = vor.u32 %v13141_v22, %v11560_v11  ;;  %v13107_v4 = vld [vmem:[#allocation9 + $0x334] sm:$0xf0] }
 0x353   : > { %6176 = vmatpush.bf16.msra.mxu2 %v11433_v16  ;;  %6443 = vmatpush.bf16.msra.mxu1 %v11625_v15  ;;  %v11424_v16 = vld [vmem:[#allocation9 + $0x330] sm:$0xf]  ;;  %v13139_v11 = vld [vmem:[#allocation9 + $0x434] sm:$0xf0] }
 0x354   : > { %v4899_v29 = vadd.f32 %v4898_v26, %v4810_v58  ;;  %5038 = vmatmul.bf16.gmra.mxu3 %v15817_v18  ;;  %5216 = vmatmul.bf16.gmra.mxu1 %v15819_v43  ;;  %v4634_v24 = vpop.f32.mrf.mxu2 }
 0x355   : > { %v4635_v54 = vadd.f32 %v4634_v24, %v15047_v14  ;;  %6265 = vmatpush.bf16.msra.mxu3 %v11497_v63  ;;  %6354 = vmatpush.bf16.msra.mxu0 %v11561_v23 }
 0x356   : > { %v5323_v61 = vmax.f32 %v4899_v29, 0.0  ;;  %v4814_v20 = vpop.f32.mrf.mxu0 }
 0x357   : > { %v4723_v2 = vpop.f32.mrf.mxu3 }
 0x358   : > { %5387 = vst [vmem:[%s15072_s29 + $0x5b0] sm:$0xff] %v5323_v61  ;;  %v4724_v0 = vadd.f32 %v4723_v2, %v4635_v54 }
 0x359   : > { %v4903_v8 = vpop.f32.mrf.mxu1 }
 0x35a   : > { %v4813_v36 = vadd.f32 %v4812_v62, %v4724_v0 }
 0x35c   : > { %v4902_v18 = vadd.f32 %v4901_v32, %v4813_v36  ;;  %v4636_v43 = vpop.f32.mrf.mxu2  ;;  %v11488_v36 = vld [vmem:[#allocation9 + $0x3b0] sm:$0xf] }
 0x35d   : > { %v4637_v25 = vadd.f32 %v4636_v43, %v15047_v14 }
 0x35e   : > { %v5325_v10 = vmax.f32 %v4902_v18, 0.0  ;;  %v4817_v44 = vpop.f32.mrf.mxu0 }
 0x35f   : > { %v4725_v50 = vpop.f32.mrf.mxu3 }
 0x360   : > { %5389 = vst [vmem:[%s15072_s29 + $0x610] sm:$0xff] %v5325_v10  ;;  %v4726_v47 = vadd.f32 %v4725_v50, %v4637_v25 }
 0x361   : > { %v4906_v30 = vpop.f32.mrf.mxu1  ;;  %4954 = vmatmul.bf16.gmra.mxu2 %v15871_v49  ;;  %5132 = vmatmul.bf16.gmra.mxu0 %v15873_v46 }
 0x362   : > { %v4815_v6 = vadd.f32 %v4814_v20, %v4726_v47  ;;  %v11552_v47 = vld [vmem:[#allocation9 + $0x430] sm:$0xf] }
 0x364   : > { %v4904_v51 = vadd.f32 %v4903_v8, %v4815_v6  ;;  %5043 = vmatmul.bf16.gmra.mxu3 %v15879_v34  ;;  %5221 = vmatmul.bf16.gmra.mxu1 %v15876_v9  ;;  %v4639_v42 = vpop.f32.mrf.mxu2 }
 0x365   : > { %v4640_v38 = vadd.f32 %v4639_v42, %v15047_v14 }
 0x366   : > { %v5327_v26 = vmax.f32 %v4904_v51, 0.0  ;;  %v4819_v21 = vpop.f32.mrf.mxu0 }
 0x367   : > { %v4728_v17 = vpop.f32.mrf.mxu3 }
 0x368   : > { %5391 = vst [vmem:[%s15072_s29 + $0x630] sm:$0xff] %v5327_v26  ;;  %v4729_v1 = vadd.f32 %v4728_v17, %v4640_v38 }
 0x369   : > { %v4908_v49 = vpop.f32.mrf.mxu1 }
 0x36a   : > { %v4818_v46 = vadd.f32 %v4817_v44, %v4729_v1  ;;  %v11616_v1 = vld [vmem:[#allocation9 + $0x4b0] sm:$0xf] }
 0x36b   : > { %v11617_v41 = vor.u32 %v13155_v39, %v11616_v1 }
 0x36c   : > { %v4907_v62 = vadd.f32 %v4906_v30, %v4818_v46  ;;  %v4641_v53 = vpop.f32.mrf.mxu2  ;;  %v11553_v30 = vor.u32 %v13139_v11, %v11552_v47 }
 0x36d   : > { %v4642_v9 = vadd.f32 %v4641_v53, %v15047_v14  ;;  %6444 = vmatpush.bf16.msra.mxu1 %v11617_v41 }
 0x36e   : > { %v5329_v34 = vmax.f32 %v4907_v62, 0.0  ;;  %v4822_v58 = vpop.f32.mrf.mxu0  ;;  %6355 = vmatpush.bf16.msra.mxu0 %v11553_v30 }
 0x36f   : > { %v4730_v32 = vpop.f32.mrf.mxu3 }
 0x370   : > { %5393 = vst [vmem:[%s15072_s29 + $0x690] sm:$0xff] %v5329_v34  ;;  %v4731_v29 = vadd.f32 %v4730_v32, %v4642_v9 }
 0x371   : > { %v4911_v24 = vpop.f32.mrf.mxu1  ;;  %4959 = vmatmul.bf16.gmra.mxu2 %v15906_v59  ;;  %5137 = vmatmul.bf16.gmra.mxu0 %v15908_v35  ;;  %v11425_v59 = vor.u32 %v13107_v4, %v11424_v16  ;;  %v13123_v35 = vld [vmem:[#allocation9 + $0x3b4] sm:$0xf0] }
 0x372   : > { %v4820_v61 = vadd.f32 %v4819_v21, %v4731_v29  ;;  %v11489_v18 = vor.u32 %v13123_v35, %v11488_v36 }
 0x373   : > { %6177 = vmatpush.bf16.msra.mxu2 %v11425_v59 }
 0x374   : > { %v4909_v54 = vadd.f32 %v4908_v49, %v4820_v61  ;;  %5048 = vmatmul.bf16.gmra.mxu3 %v15911_v7  ;;  %5226 = vmatmul.bf16.gmra.mxu1 %v15914_v28  ;;  %v4644_v2 = vpop.f32.mrf.mxu2 }
 0x375   : > { %v4645_v0 = vadd.f32 %v4644_v2, %v15047_v14  ;;  %6266 = vmatpush.bf16.msra.mxu3 %v11489_v18  ;;  %v13137_v18 = vld [vmem:[#allocation9 + $0x424] sm:$0xf0] }
 0x376   : > { %v5331_v20 = vmax.f32 %v4909_v54, 0.0  ;;  %v4824_v56 = vpop.f32.mrf.mxu0 }
 0x377   : > { %v4733_v12 = vpop.f32.mrf.mxu3 }
 0x378   : > { %5395 = vst [vmem:[%s15072_s29 + $0x6b0] sm:$0xff] %v5331_v20  ;;  %v4734_v8 = vadd.f32 %v4733_v12, %v4645_v0  ;;  %v11416_v20 = vld [vmem:[#allocation9 + $0x320] sm:$0xf]  ;;  %v13105_v0 = vld [vmem:[#allocation9 + $0x324] sm:$0xf0] }
 0x379   : > { %v4913_v60 = vpop.f32.mrf.mxu1 }
 0x37a   : > { %v4823_v63 = vadd.f32 %v4822_v58, %v4734_v8 }
 0x37c   : > { %v4912_v7 = vadd.f32 %v4911_v24, %v4823_v63  ;;  %v4646_v28 = vpop.f32.mrf.mxu2  ;;  %v11544_v63 = vld [vmem:[#allocation9 + $0x420] sm:$0xf] }
 0x37d   : > { %v4647_v10 = vadd.f32 %v4646_v28, %v15047_v14  ;;  %v11545_v28 = vor.u32 %v13137_v18, %v11544_v63  ;;  %v18371_v63 = vld [vmem:[#allocation52_spill] sm:$0xff] }
 0x37e   : > { %v5333_v43 = vmax.f32 %v4912_v7, 0.0  ;;  %v4827_v50 = vpop.f32.mrf.mxu0  ;;  %v18372_v18 = vld [vmem:[#allocation56_spill] sm:$0xff] }
 0x37f   : > { %v4735_v25 = vpop.f32.mrf.mxu3  ;;  %6356 = vmatpush.bf16.msra.mxu0 %v11545_v28  ;;  %v18373_v28 = vld [vmem:[#allocation55_spill] sm:$0xff] }
 0x380   : > { %5397 = vst [vmem:[%s15072_s29 + $0x710] sm:$0xff] %v5333_v43  ;;  %v4736_v44 = vadd.f32 %v4735_v25, %v4647_v10  ;;  %v18365_v25 = vld [vmem:[#allocation44_spill] sm:$0xff] }
 0x381   : > { %v4916_v22 = vpop.f32.mrf.mxu1  ;;  %4964 = vmatmul.bf16.gmra.mxu2 %v15945_v31  ;;  %5142 = vmatmul.bf16.gmra.mxu0 %v15947_v37 }
 0x382   : > { %v4825_v23 = vadd.f32 %v4824_v56, %v4736_v44  ;;  %v11480_v56 = vld [vmem:[#allocation9 + $0x3a0] sm:$0xf] }
 0x384   : > { %v4914_v6 = vadd.f32 %v4913_v60, %v4825_v23  ;;  %5053 = vmatmul.bf16.gmra.mxu3 %v15950_v52  ;;  %5231 = vmatmul.bf16.gmra.mxu1 %v15953_v45  ;;  %v4649_v51 = vpop.f32.mrf.mxu2 }
 0x385   : > { %v4650_v26 = vadd.f32 %v4649_v51, %v15047_v14  ;;  %v13153_v51 = vld [vmem:[#allocation9 + $0x4a4] sm:$0xf0] }
 0x386   : > { %v5335_v42 = vmax.f32 %v4914_v6, 0.0  ;;  %v4829_v17 = vpop.f32.mrf.mxu0  ;;  %v11608_v6 = vld [vmem:[#allocation9 + $0x4a0] sm:$0xf] }
 0x387   : > { %v4738_v38 = vpop.f32.mrf.mxu3 }
 0x388   : > { %5399 = vst [vmem:[%s15072_s29 + $0x730] sm:$0xff] %v5335_v42  ;;  %v4739_v21 = vadd.f32 %v4738_v38, %v4650_v26  ;;  %v11609_v42 = vor.u32 %v13153_v51, %v11608_v6 }
 0x389   : > { %v4918_v31 = vpop.f32.mrf.mxu1 }
 0x38a   : > { %v4828_v37 = vadd.f32 %v4827_v50, %v4739_v21  ;;  %v18366_v50 = vld [vmem:[#allocation43_spill] sm:$0xff]  ;;  %6445 = vmatpush.bf16.msra.mxu1 %v11609_v42 }
 0x38c   : > { %v4917_v49 = vadd.f32 %v4916_v22, %v4828_v37  ;;  %v4651_v15 = vpop.f32.mrf.mxu2 }
 0x38d   : > { %v4652_v45 = vadd.f32 %v4651_v15, %v15047_v14  ;;  %v18368_v15 = vld [vmem:[#allocation46_spill] sm:$0xff] }
 0x38e   : > { %v5337_v52 = vmax.f32 %v4917_v49, 0.0  ;;  %v5108_v62 = vpop.f32.mrf.mxu0  ;;  %v18367_v49 = vld [vmem:[#allocation47_spill] sm:$0xff] }
 0x38f   : > { %v4740_v46 = vpop.f32.mrf.mxu3 }
 0x390   : > { %5401 = vst [vmem:[%s15072_s29 + $0x790] sm:$0xff] %v5337_v52  ;;  %v4741_v53 = vadd.f32 %v4740_v46, %v4652_v45  ;;  %v18369_v45 = vld [vmem:[#allocation49_spill] sm:$0xff] }
 0x391   : > { %v5197_v34 = vpop.f32.mrf.mxu1  ;;  %4969 = vmatmul.bf16.gmra.mxu2 %v15971_v13  ;;  %5147 = vmatmul.bf16.gmra.mxu0 %v15973_v48  ;;  %v11417_v13 = vor.u32 %v13105_v0, %v11416_v20  ;;  %v13121_v48 = vld [vmem:[#allocation9 + $0x3a4] sm:$0xf0]  ;;  %v13119_v20 = vld [vmem:[#allocation9 + $0x394] sm:$0xf0] }
 0x392   : > { %v4830_v9 = vadd.f32 %v4829_v17, %v4741_v53  ;;  %v11481_v16 = vor.u32 %v13121_v48, %v11480_v56  ;;  %v18370_v46 = vld [vmem:[#allocation53_spill] sm:$0xff] }
 0x393   : > { %6178 = vmatpush.bf16.msra.mxu2 %v11417_v13 }
 0x394   : > { %v4919_v32 = vadd.f32 %v4918_v31, %v4830_v9  ;;  %5058 = vmatmul.bf16.gmra.mxu3 %v15976_v55  ;;  %5236 = vmatmul.bf16.gmra.mxu1 %v15979_v57  ;;  %v4930_v58 = vpop.f32.mrf.mxu2 }
 0x395   : > { %v4931_v24 = vadd.f32 %v4930_v58, %v15024_v40  ;;  %6267 = vmatpush.bf16.msra.mxu3 %v11481_v16 }
 0x396   : > { %v5339_v29 = vmax.f32 %v4919_v32, 0.0  ;;  %v5110_v54 = vpop.f32.mrf.mxu0 }
 0x397   : > { %v5019_v61 = vpop.f32.mrf.mxu3 }
 0x398   : > { %5403 = vst [vmem:[%s15072_s29 + $0x7b0] sm:$0xff] %v5339_v29  ;;  %v5020_v2 = vadd.f32 %v5019_v61, %v4931_v24  ;;  %v11408_v29 = vld [vmem:[#allocation9 + $0x310] sm:$0xf]  ;;  %v13103_v24 = vld [vmem:[#allocation9 + $0x314] sm:$0xf0] }
 0x399   : > { %v5199_v12 = vpop.f32.mrf.mxu1 }
 0x39a   : > { %v5109_v8 = vadd.f32 %v5108_v62, %v5020_v2  ;;  %v11472_v2 = vld [vmem:[#allocation9 + $0x390] sm:$0xf] }
 0x39c   : > { %v5198_v55 = vadd.f32 %v5197_v34, %v5109_v8  ;;  %v4932_v57 = vpop.f32.mrf.mxu2 }
 0x39d   : > { %v4933_v60 = vadd.f32 %v4932_v57, %v15024_v40 }
 0x39e   : > { %v5278_v4 = vmax.f32 %v5198_v55, 0.0  ;;  %v5113_v36 = vpop.f32.mrf.mxu0 }
 0x39f   : > { %v5021_v59 = vpop.f32.mrf.mxu3 }
 0x3a0   : > { %5342 = vst [vmem:[%s15072_s29 + $0x18] sm:$0xff] %v5278_v4  ;;  %v5022_v35 = vadd.f32 %v5021_v59, %v4933_v60  ;;  %v11536_v4 = vld [vmem:[#allocation9 + $0x410] sm:$0xf]  ;;  %v13135_v60 = vld [vmem:[#allocation9 + $0x414] sm:$0xf0] }
 0x3a1   : > { %v5202_v7 = vpop.f32.mrf.mxu1  ;;  %4974 = vmatmul.bf16.gmra.mxu2 %v15987_v33  ;;  %5152 = vmatmul.bf16.gmra.mxu0 %v15989_v3 }
 0x3a2   : > { %v5111_v43 = vadd.f32 %v5110_v54, %v5022_v35  ;;  %v11409_v54 = vor.u32 %v13103_v24, %v11408_v29  ;;  %v11464_v24 = vld [vmem:[#allocation9 + $0x380] sm:$0xf] }
 0x3a4   : > { %v5200_v10 = vadd.f32 %v5199_v12, %v5111_v43  ;;  %5063 = vmatmul.bf16.gmra.mxu3 %v18365_v25  ;;  %5241 = vmatmul.bf16.gmra.mxu1 %v18366_v50  ;;  %v4935_v44 = vpop.f32.mrf.mxu2  ;;  %v11473_v12 = vor.u32 %v13119_v20, %v11472_v2  ;;  %v18374_v43 = vld [vmem:[#allocation17_spill] sm:$0xff] }
 0x3a5   : > { %v4936_v11 = vadd.f32 %v4935_v44, %v15024_v40  ;;  %6179 = vmatpush.bf16.msra.mxu2 %v11409_v54 }
 0x3a6   : > { %v5280_v47 = vmax.f32 %v5200_v10, 0.0  ;;  %v5115_v30 = vpop.f32.mrf.mxu0  ;;  %6268 = vmatpush.bf16.msra.mxu3 %v11473_v12 }
 0x3a7   : > { %v5024_v22 = vpop.f32.mrf.mxu3 }
 0x3a8   : > { %5344 = vst [vmem:[%s15072_s29 + $0x38] sm:$0xff] %v5280_v47  ;;  %v5025_v23 = vadd.f32 %v5024_v22, %v4936_v11  ;;  %v11600_v22 = vld [vmem:[#allocation9 + $0x490] sm:$0xf] }
 0x3a9   : > { %v5204_v33 = vpop.f32.mrf.mxu1 }
 0x3aa   : > { %v5114_v3 = vadd.f32 %v5113_v36, %v5025_v23  ;;  %v11537_v36 = vor.u32 %v13135_v60, %v11536_v4 }
 0x3ac   : > { %v5203_v26 = vadd.f32 %v5202_v7, %v5114_v3  ;;  %v4937_v38 = vpop.f32.mrf.mxu2  ;;  %6357 = vmatpush.bf16.msra.mxu0 %v11537_v36  ;;  %v18380_v36 = vld [vmem:[#allocation62_spill] sm:$0xff] }
 0x3ad   : > { %v4938_v21 = vadd.f32 %v4937_v38, %v15024_v40 }
 0x3ae   : > { %v5282_v17 = vmax.f32 %v5203_v26, 0.0  ;;  %v5118_v39 = vpop.f32.mrf.mxu0 }
 0x3af   : > { %v5026_v1 = vpop.f32.mrf.mxu3 }
 0x3b0   : > { %5346 = vst [vmem:[%s15072_s29 + $0x98] sm:$0xff] %v5282_v17  ;;  %v5027_v31 = vadd.f32 %v5026_v1, %v4938_v21 }
 0x3b1   : > { %v5207_v41 = vpop.f32.mrf.mxu1  ;;  %4979 = vmatmul.bf16.gmra.mxu2 %v18367_v49  ;;  %5157 = vmatmul.bf16.gmra.mxu0 %v18368_v15  ;;  %v18377_v49 = vld [vmem:[#allocation18_spill] sm:$0xff]  ;;  %v18378_v15 = vld [vmem:[#allocation19_spill] sm:$0xff] }
 0x3b2   : > { %v5116_v37 = vadd.f32 %v5115_v30, %v5027_v31  ;;  %v13151_v30 = vld [vmem:[#allocation9 + $0x494] sm:$0xf0]  ;;  %v18375_v31 = vld [vmem:[#allocation58_spill] sm:$0xff] }
 0x3b3   : > { %v11601_v6 = vor.u32 %v13151_v30, %v11600_v22 }
 0x3b4   : > { %v5205_v52 = vadd.f32 %v5204_v33, %v5116_v37  ;;  %5068 = vmatmul.bf16.gmra.mxu3 %v18369_v45  ;;  %5246 = vmatmul.bf16.gmra.mxu1 %v18370_v46  ;;  %v4940_v62 = vpop.f32.mrf.mxu2 }
 0x3b5   : > { %v4941_v34 = vadd.f32 %v4940_v62, %v15024_v40  ;;  %6446 = vmatpush.bf16.msra.mxu1 %v11601_v6 }
 0x3b6   : > { %v5284_v53 = vmax.f32 %v5205_v52, 0.0  ;;  %v5120_v32 = vpop.f32.mrf.mxu0 }
 0x3b7   : > { %v5029_v9 = vpop.f32.mrf.mxu3 }
 0x3b8   : > { %5348 = vst [vmem:[%s15072_s29 + $0xb8] sm:$0xff] %v5284_v53  ;;  %v5030_v58 = vadd.f32 %v5029_v9, %v4941_v34  ;;  %v11400_v9 = vld [vmem:[#allocation9 + $0x300] sm:$0xf] }
 0x3b9   : > { %v5209_v61 = vpop.f32.mrf.mxu1 }
 0x3ba   : > { %v5119_v0 = vadd.f32 %v5118_v39, %v5030_v58 }
 0x3bc   : > { %v5208_v13 = vadd.f32 %v5207_v41, %v5119_v0  ;;  %v4942_v56 = vpop.f32.mrf.mxu2  ;;  %v18376_v41 = vld [vmem:[#allocation57_spill] sm:$0xff] }
 0x3bd   : > { %v4943_v8 = vadd.f32 %v4942_v56, %v15024_v40 }
 0x3be   : > { %v5286_v48 = vmax.f32 %v5208_v13, 0.0  ;;  %v5123_v55 = vpop.f32.mrf.mxu0 }
 0x3bf   : > { %v5031_v16 = vpop.f32.mrf.mxu3 }
 0x3c0   : > { %5350 = vst [vmem:[%s15072_s29 + $0x118] sm:$0xff] %v5286_v48  ;;  %v5032_v57 = vadd.f32 %v5031_v16, %v4943_v8  ;;  %v11528_v16 = vld [vmem:[#allocation9 + $0x400] sm:$0xf] }
 0x3c1   : > { %v5212_v59 = vpop.f32.mrf.mxu1  ;;  %4984 = vmatmul.bf16.gmra.mxu2 %v18371_v63  ;;  %5162 = vmatmul.bf16.gmra.mxu0 %v18372_v18  ;;  %v18381_v63 = vld [vmem:[#allocation68_spill] sm:$0xff]  ;;  %v18382_v18 = vld [vmem:[#allocation67_spill] sm:$0xff] }
 0x3c2   : > { %v5121_v35 = vadd.f32 %v5120_v32, %v5032_v57  ;;  %v13101_v32 = vld [vmem:[#allocation9 + $0x304] sm:$0xf0] }
 0x3c3   : > { %v11401_v29 = vor.u32 %v13101_v32, %v11400_v9  ;;  %v13130_v32 = vld [vmem:[#allocation9 + $0x3f4] sm:$0xf] }
 0x3c4   : > { %v5210_v7 = vadd.f32 %v5209_v61, %v5121_v35  ;;  %5073 = vmatmul.bf16.gmra.mxu3 %v18373_v28  ;;  %5251 = vmatmul.bf16.gmra.mxu1 %v18374_v43  ;;  %v4945_v10 = vpop.f32.mrf.mxu2  ;;  %v13117_v61 = vld [vmem:[#allocation9 + $0x384] sm:$0xf0] }
 0x3c5   : > { %v4946_v50 = vadd.f32 %v4945_v10, %v15024_v40  ;;  %v11465_v2 = vor.u32 %v13117_v61, %v11464_v24  ;;  %6180 = vmatpush.bf16.msra.mxu2 %v11401_v29 }
 0x3c6   : > { %v5288_v25 = vmax.f32 %v5210_v7, 0.0  ;;  %v5125_v47 = vpop.f32.mrf.mxu0 }
 0x3c7   : > { %v5034_v44 = vpop.f32.mrf.mxu3  ;;  %6269 = vmatpush.bf16.msra.mxu3 %v11465_v2 }
 0x3c8   : > { %5352 = vst [vmem:[%s15072_s29 + $0x138] sm:$0xff] %v5288_v25  ;;  %v5035_v11 = vadd.f32 %v5034_v44, %v4946_v50  ;;  %v11592_v44 = vld [vmem:[#allocation9 + $0x480] sm:$0xf] }
 0x3c9   : > { %v5214_v23 = vpop.f32.mrf.mxu1 }
 0x3ca   : > { %v5124_v51 = vadd.f32 %v5123_v55, %v5035_v11  ;;  %v13133_v55 = vld [vmem:[#allocation9 + $0x404] sm:$0xf0] }
 0x3cb   : > { %v11529_v4 = vor.u32 %v13133_v55, %v11528_v16 }
 0x3cc   : > { %v5213_v33 = vadd.f32 %v5212_v59, %v5124_v51  ;;  %v4947_v42 = vpop.f32.mrf.mxu2  ;;  %v18379_v59 = vld [vmem:[#allocation63_spill] sm:$0xff] }
 0x3cd   : > { %v4948_v26 = vadd.f32 %v4947_v42, %v15024_v40  ;;  %6358 = vmatpush.bf16.msra.mxu0 %v11529_v4  ;;  %v18387_v4 = vld [vmem:[#allocation72_spill] sm:$0xff] }
 0x3ce   : > { %v5290_v3 = vmax.f32 %v5213_v33, 0.0  ;;  %v5128_v17 = vpop.f32.mrf.mxu0 }
 0x3cf   : > { %v5036_v38 = vpop.f32.mrf.mxu3 }
 0x3d0   : > { %5354 = vst [vmem:[%s15072_s29 + $0x198] sm:$0xff] %v5290_v3  ;;  %v5037_v21 = vadd.f32 %v5036_v38, %v4948_v26 }
 0x3d1   : > { %v5217_v1 = vpop.f32.mrf.mxu1  ;;  %4989 = vmatmul.bf16.gmra.mxu2 %v18375_v31  ;;  %5167 = vmatmul.bf16.gmra.mxu0 %v18376_v41  ;;  %v18385_v31 = vld [vmem:[#allocation71_spill] sm:$0xff]  ;;  %v18386_v41 = vld [vmem:[#allocation70_spill] sm:$0xff] }
 0x3d2   : > { %v5126_v39 = vadd.f32 %v5125_v47, %v5037_v21  ;;  %v13149_v47 = vld [vmem:[#allocation9 + $0x484] sm:$0xf0]  ;;  %v18383_v21 = vld [vmem:[#allocation64_spill] sm:$0xff] }
 0x3d3   : > { %v11593_v22 = vor.u32 %v13149_v47, %v11592_v44 }
 0x3d4   : > { %v5215_v37 = vadd.f32 %v5214_v23, %v5126_v39  ;;  %5078 = vmatmul.bf16.gmra.mxu3 %v18377_v49  ;;  %5256 = vmatmul.bf16.gmra.mxu1 %v18378_v15  ;;  %v4950_v52 = vpop.f32.mrf.mxu2 }
 0x3d5   : > { %v4951_v46 = vadd.f32 %v4950_v52, %v15024_v40  ;;  %6447 = vmatpush.bf16.msra.mxu1 %v11593_v22 }
 0x3d6   : > { %v5292_v45 = vmax.f32 %v5215_v37, 0.0  ;;  %v5130_v53 = vpop.f32.mrf.mxu0 }
 0x3d7   : > { %v5039_v62 = vpop.f32.mrf.mxu3 }
 0x3d8   : > { %5356 = vst [vmem:[%s15072_s29 + $0x1b8] sm:$0xff] %v5292_v45  ;;  %v5040_v34 = vadd.f32 %v5039_v62, %v4951_v46  ;;  %v13114_v62 = vld [vmem:[#allocation9 + $0x374] sm:$0xf] }
 0x3d9   : > { %v5219_v58 = vpop.f32.mrf.mxu1 }
 0x3da   : > { %v5129_v54 = vadd.f32 %v5128_v17, %v5040_v34 }
 0x3dc   : > { %v5218_v20 = vadd.f32 %v5217_v1, %v5129_v54  ;;  %v4952_v0 = vpop.f32.mrf.mxu2  ;;  %v18384_v1 = vld [vmem:[#allocation59_spill] sm:$0xff] }
 0x3dd   : > { %v4953_v13 = vadd.f32 %v4952_v0, %v15024_v40 }
 0x3de   : > { %v5294_v12 = vmax.f32 %v5218_v20, 0.0  ;;  %v5133_v48 = vpop.f32.mrf.mxu0 }
 0x3df   : > { %v5041_v56 = vpop.f32.mrf.mxu3 }
 0x3e0   : > { %5358 = vst [vmem:[%s15072_s29 + $0x218] sm:$0xff] %v5294_v12  ;;  %v5042_v8 = vadd.f32 %v5041_v56, %v4953_v13  ;;  %v13146_v56 = vld [vmem:[#allocation9 + $0x474] sm:$0xf] }
 0x3e1   : > { %v5222_v57 = vpop.f32.mrf.mxu1  ;;  %4994 = vmatmul.bf16.gmra.mxu2 %v18379_v59  ;;  %5172 = vmatmul.bf16.gmra.mxu0 %v18380_v36 }
 0x3e2   : > { %v5131_v60 = vadd.f32 %v5130_v53, %v5042_v8  ;;  %v11458_v53 = vld [vmem:[#allocation9 + $0x378] sm:$0xf0] }
 0x3e3   : > { %v11461_v9 = vor.u32 %v13114_v62, %v11458_v53  ;;  %v11450_v62 = vld [vmem:[#allocation9 + $0x368] sm:$0xf0] }
 0x3e4   : > { %v5220_v35 = vadd.f32 %v5219_v58, %v5131_v60  ;;  %5083 = vmatmul.bf16.gmra.mxu3 %v18381_v63  ;;  %5261 = vmatmul.bf16.gmra.mxu1 %v18382_v18  ;;  %v4955_v7 = vpop.f32.mrf.mxu2  ;;  %v11522_v58 = vld [vmem:[#allocation9 + $0x3f8] sm:$0xf0] }
 0x3e5   : > { %v4956_v43 = vadd.f32 %v4955_v7, %v15024_v40  ;;  %v11525_v24 = vor.u32 %v13130_v32, %v11522_v58  ;;  %6529 = vmatpush.bf16.msrb.mxu2 %v11461_v9  ;;  %v13162_v7 = vld [vmem:[#allocation9 + $0x4f4] sm:$0xf]  ;;  %v13128_v9 = vld [vmem:[#allocation9 + $0x3e4] sm:$0xf]  ;;  %v11514_v32 = vld [vmem:[#allocation9 + $0x3e8] sm:$0xf0] }
 0x3e6   : > { %v5296_v28 = vmax.f32 %v5220_v35, 0.0  ;;  %v5135_v25 = vpop.f32.mrf.mxu0 }
 0x3e7   : > { %v5044_v10 = vpop.f32.mrf.mxu3  ;;  %6618 = vmatpush.bf16.msrb.mxu3 %v11525_v24 }
 0x3e8   : > { %5360 = vst [vmem:[%s15072_s29 + $0x238] sm:$0xff] %v5296_v28  ;;  %v5045_v50 = vadd.f32 %v5044_v10, %v4956_v43  ;;  %v11650_v28 = vld [vmem:[#allocation9 + $0x4f8] sm:$0xf0] }
 0x3e9   : > { %v5224_v11 = vpop.f32.mrf.mxu1 }
 0x3ea   : > { %v5134_v30 = vadd.f32 %v5133_v48, %v5045_v50  ;;  %v11586_v48 = vld [vmem:[#allocation9 + $0x478] sm:$0xf0]  ;;  %v13039_v50 = vld [vmem:[#allocation2 + $0x2c] sm:$0xf0] }
 0x3eb   : > { %v11589_v16 = vor.u32 %v13146_v56, %v11586_v48  ;;  %v11162_v48 = vld [vmem:[#allocation2 + $0x68] sm:$0xf0] }
 0x3ec   : > { %v5223_v23 = vadd.f32 %v5222_v57, %v5134_v30  ;;  %v4957_v6 = vpop.f32.mrf.mxu2 }
 0x3ed   : > { %v4958_v33 = vadd.f32 %v4957_v6, %v15024_v40  ;;  %6707 = vmatpush.bf16.msrb.mxu0 %v11589_v16  ;;  %v11152_v6 = vld [vmem:[#allocation2 + $0x10] sm:$0xf]  ;;  %v11170_v16 = vld [vmem:[#allocation2 + $0x70] sm:$0xf0] }
 0x3ee   : > { %v5298_v51 = vmax.f32 %v5223_v23, 0.0  ;;  %v5138_v3 = vpop.f32.mrf.mxu0  ;;  %v11146_v23 = vld [vmem:[#allocation2 + $0x28] sm:$0xf0] }
 0x3ef   : > { %v5046_v42 = vpop.f32.mrf.mxu3 }
 0x3f0   : > { %5362 = vst [vmem:[%s15072_s29 + $0x298] sm:$0xff] %v5298_v51  ;;  %v5047_v26 = vadd.f32 %v5046_v42, %v4958_v33  ;;  %v11154_v51 = vld [vmem:[#allocation2 + $0x30] sm:$0xf0] }
 0x3f1   : > { %v5227_v38 = vpop.f32.mrf.mxu1  ;;  %4999 = vmatmul.bf16.gmra.mxu2 %v18383_v21  ;;  %5177 = vmatmul.bf16.gmra.mxu0 %v18384_v1 }
 0x3f2   : > { %v5136_v17 = vadd.f32 %v5135_v25, %v5047_v26 }
 0x3f4   : > { %v5225_v39 = vadd.f32 %v5224_v11, %v5136_v17  ;;  %5088 = vmatmul.bf16.gmra.mxu3 %v18385_v31  ;;  %5266 = vmatmul.bf16.gmra.mxu1 %v18386_v41  ;;  %v4960_v37 = vpop.f32.mrf.mxu2  ;;  %v11144_v11 = vld [vmem:[#allocation2 + $0x8] sm:$0xf]  ;;  %v13037_v17 = vld [vmem:[#allocation2 + $0x14] sm:$0xf] }
 0x3f5   : > { %v4961_v15 = vadd.f32 %v4960_v37, %v15024_v40 }
 0x3f6   : > { %v5300_v49 = vmax.f32 %v5225_v39, 0.0  ;;  %v5140_v45 = vpop.f32.mrf.mxu0  ;;  %v16235_v39 = vor.u32 %v13037_v17, %v11154_v51 }
 0x3f7   : > { %v5049_v52 = vpop.f32.mrf.mxu3 }
 0x3f8   : > { %5364 = vst [vmem:[%s15072_s29 + $0x2b8] sm:$0xff] %v5300_v49  ;;  %v5050_v46 = vadd.f32 %v5049_v52, %v4961_v15 }
 0x3f9   : > { %v5229_v34 = vpop.f32.mrf.mxu1 }
 0x3fa   : > { %v5139_v29 = vadd.f32 %v5138_v3, %v5050_v46  ;;  %v16229_v3 = vor.u32 %v13039_v50, %v11152_v6  ;;  %v13112_v46 = vld [vmem:[#allocation9 + $0x364] sm:$0xf] }
 0x3fc   : > { %v5228_v61 = vadd.f32 %v5227_v38, %v5139_v29  ;;  %v4962_v54 = vpop.f32.mrf.mxu2  ;;  %v13036_v38 = vld [vmem:[#allocation2 + $0xc] sm:$0xf]  ;;  %v11517_v29 = vor.u32 %v13128_v9, %v11514_v32 }
 0x3fd   : > { %v4963_v20 = vadd.f32 %v4962_v54, %v15024_v40  ;;  %v16232_v1 = vor.u32 %v13036_v38, %v11146_v23  ;;  %v13042_v54 = vld [vmem:[#allocation2 + $0x64] sm:$0xf0] }
 0x3fe   : > { %v5302_v2 = vmax.f32 %v5228_v61, 0.0  ;;  %v5143_v12 = vpop.f32.mrf.mxu0  ;;  %6619 = vmatpush.bf16.msrb.mxu3 %v11517_v29 }
 0x3ff   : > { %v5051_v0 = vpop.f32.mrf.mxu3 }
 0x400   : > { %5366 = vst [vmem:[%s15072_s29 + $0x318] sm:$0xff] %v5302_v2  ;;  %v5052_v13 = vadd.f32 %v5051_v0, %v4963_v20  ;;  %v13043_v2 = vld [vmem:[#allocation2 + $0x6c] sm:$0xf0] }
 0x401   : > { %v5232_v8 = vpop.f32.mrf.mxu1  ;;  %5004 = vmatmul.bf16.gmra.mxu2 %v16083_v19  ;;  %5182 = vmatmul.bf16.gmra.mxu0 %v16085_v5  ;;  %v11653_v19 = vor.u32 %v13162_v7, %v11650_v28 }
 0x402   : > { %v5141_v55 = vadd.f32 %v5140_v45, %v5052_v13 }
 0x403   : > { %6796 = vmatpush.bf16.msrb.mxu1 %v11653_v19 }
 0x404   : > { %v5230_v57 = vadd.f32 %v5229_v34, %v5141_v55  ;;  %5093 = vmatmul.bf16.gmra.mxu3 %v16088_v27  ;;  %5271 = vmatmul.bf16.gmra.mxu1 %v18387_v4  ;;  %v4965_v60 = vpop.f32.mrf.mxu2  ;;  %v13038_v27 = vld [vmem:[#allocation2 + $0x24] sm:$0xf0]  ;;  %v11453_v34 = vor.u32 %v13112_v46, %v11450_v62 }
 0x405   : > { %v4966_v36 = vadd.f32 %v4965_v60, %v15024_v40  ;;  %v16227_v42 = vor.u32 %v13038_v27, %v11144_v11  ;;  %v13144_v60 = vld [vmem:[#allocation9 + $0x464] sm:$0xf]  ;;  %v11642_v11 = vld [vmem:[#allocation9 + $0x4e8] sm:$0xf0] }
 0x406   : > { %v5304_v59 = vmax.f32 %v5230_v57, 0.0  ;;  %v5145_v63 = vpop.f32.mrf.mxu0  ;;  %6530 = vmatpush.bf16.msrb.mxu2 %v11453_v34  ;;  %v13045_v34 = vld [vmem:[#allocation2 + $0x94] sm:$0xf] }
 0x407   : > { %v5054_v35 = vpop.f32.mrf.mxu3 }
 0x408   : > { %5368 = vst [vmem:[%s15072_s29 + $0x338] sm:$0xff] %v5304_v59  ;;  %v5055_v18 = vadd.f32 %v5054_v35, %v4966_v36  ;;  %v11578_v59 = vld [vmem:[#allocation9 + $0x468] sm:$0xf0] }
 0x409   : > { %v5234_v43 = vpop.f32.mrf.mxu1  ;;  %v13040_v35 = vld [vmem:[#allocation2 + $0x4c] sm:$0xf] }
 0x40a   : > { %v5144_v5 = vadd.f32 %v5143_v12, %v5055_v18  ;;  %v11160_v12 = vld [vmem:[#allocation2 + $0x48] sm:$0xf]  ;;  %v11581_v18 = vor.u32 %v13144_v60, %v11578_v59  ;;  %v16248_v28 = vor.u32 %v13040_v35, %v11162_v48 }
 0x40b   : > { %v16243_v57 = vor.u32 %v13042_v54, %v11160_v12  ;;  %v13110_v12 = vld [vmem:[#allocation9 + $0x354] sm:$0xf]  ;;  %v13050_v35 = vld [vmem:[#allocation2 + $0xe4] sm:$0xf0] }
 0x40c   : > { %v5233_v10 = vadd.f32 %v5232_v8, %v5144_v5  ;;  %v4967_v25 = vpop.f32.mrf.mxu2  ;;  %v11168_v8 = vld [vmem:[#allocation2 + $0x50] sm:$0xf]  ;;  %6708 = vmatpush.bf16.msrb.mxu0 %v11581_v18 }
 0x40d   : > { %v4968_v47 = vadd.f32 %v4967_v25, %v15024_v40  ;;  %v16245_v4 = vor.u32 %v13043_v2, %v11168_v8  ;;  %v13126_v8 = vld [vmem:[#allocation9 + $0x3d4] sm:$0xf] }
 0x40e   : > { %v5306_v44 = vmax.f32 %v5233_v10, 0.0  ;;  %v5148_v30 = vpop.f32.mrf.mxu0 }
 0x40f   : > { %v5056_v22 = vpop.f32.mrf.mxu3 }
 0x410   : > { %5370 = vst [vmem:[%s15072_s29 + $0x398] sm:$0xff] %v5306_v44  ;;  %v5057_v33 = vadd.f32 %v5056_v22, %v4968_v47  ;;  %v13160_v47 = vld [vmem:[#allocation9 + $0x4e4] sm:$0xf] }
 0x411   : > { %v5237_v26 = vpop.f32.mrf.mxu1  ;;  %6181 = vmatmul.bf16.vlgmr.msra.gmra.mxu2 %v16227_v42  ;;  %6359 = vmatmul.bf16.vlgmr.msra.gmra.mxu0 %v16229_v3 }
 0x412   : > { %v5146_v21 = vadd.f32 %v5145_v63, %v5057_v33  ;;  %v13041_v63 = vld [vmem:[#allocation2 + $0x54] sm:$0xf]  ;;  %v13046_v33 = vld [vmem:[#allocation2 + $0xa4] sm:$0xf0] }
 0x414   : > { %v5235_v31 = vadd.f32 %v5234_v43, %v5146_v21  ;;  %6270 = vmatmul.bf16.vlgmr.msra.gmra.mxu3 %v16232_v1  ;;  %6448 = vmatmul.bf16.vlgmr.msra.gmra.mxu1 %v16235_v39  ;;  %v4970_v41 = vpop.f32.mrf.mxu2  ;;  %v16251_v43 = vor.u32 %v13041_v63, %v11170_v16  ;;  %v11176_v21 = vld [vmem:[#allocation2 + $0x88] sm:$0xf]  ;;  %v11506_v16 = vld [vmem:[#allocation9 + $0x3d8] sm:$0xf0]  ;;  %v13051_v63 = vld [vmem:[#allocation2 + $0xec] sm:$0xf0] }
 0x415   : > { %v4971_v49 = vadd.f32 %v4970_v41, %v15024_v40  ;;  %v11509_v60 = vor.u32 %v13126_v8, %v11506_v16  ;;  %v11216_v8 = vld [vmem:[#allocation2 + $0x110] sm:$0xf]  ;;  %v11218_v16 = vld [vmem:[#allocation2 + $0x130] sm:$0xf0] }
 0x416   : > { %v5308_v37 = vmax.f32 %v5235_v31, 0.0  ;;  %v5150_v52 = vpop.f32.mrf.mxu0 }
 0x417   : > { %v5059_v15 = vpop.f32.mrf.mxu3  ;;  %6620 = vmatpush.bf16.msrb.mxu3 %v11509_v60 }
 0x418   : > { %5372 = vst [vmem:[%s15072_s29 + $0x3b8] sm:$0xff] %v5308_v37  ;;  %v5060_v45 = vadd.f32 %v5059_v15, %v4971_v49  ;;  %v11178_v37 = vld [vmem:[#allocation2 + $0xa8] sm:$0xf0]  ;;  %v11184_v49 = vld [vmem:[#allocation2 + $0x90] sm:$0xf] }
 0x419   : > { %v5239_v53 = vpop.f32.mrf.mxu1  ;;  %v11186_v15 = vld [vmem:[#allocation2 + $0xb0] sm:$0xf0] }
 0x41a   : > { %v5149_v58 = vadd.f32 %v5148_v30, %v5060_v45  ;;  %v11645_v30 = vor.u32 %v13160_v47, %v11642_v11  ;;  %v16259_v45 = vor.u32 %v13046_v33, %v11176_v21 }
 0x41c   : > { %v5238_v24 = vadd.f32 %v5237_v26, %v5149_v58  ;;  %v4972_v61 = vpop.f32.mrf.mxu2  ;;  %6797 = vmatpush.bf16.msrb.mxu1 %v11645_v30  ;;  %v13047_v26 = vld [vmem:[#allocation2 + $0xac] sm:$0xf0]  ;;  %v16267_v58 = vor.u32 %v13045_v34, %v11186_v15  ;;  %v11570_v30 = vld [vmem:[#allocation9 + $0x458] sm:$0xf0] }
 0x41d   : > { %v4973_v0 = vadd.f32 %v4972_v61, %v15024_v40  ;;  %v16261_v46 = vor.u32 %v13047_v26, %v11184_v49 }
 0x41e   : > { %v5310_v20 = vmax.f32 %v5238_v24, 0.0  ;;  %v5153_v56 = vpop.f32.mrf.mxu0 }
 0x41f   : > { %v5061_v13 = vpop.f32.mrf.mxu3 }
 0x420   : > { %5374 = vst [vmem:[%s15072_s29 + $0x418] sm:$0xff] %v5310_v20  ;;  %v5062_v55 = vadd.f32 %v5061_v13, %v4973_v0  ;;  %v11442_v13 = vld [vmem:[#allocation9 + $0x358] sm:$0xf0] }
 0x421   : > { %v5242_v36 = vpop.f32.mrf.mxu1  ;;  %6186 = vmatmul.bf16.gmra.mxu2 %v16243_v57  ;;  %6364 = vmatmul.bf16.gmra.mxu0 %v16245_v4  ;;  %v11445_v48 = vor.u32 %v13110_v12, %v11442_v13  ;;  %v11208_v12 = vld [vmem:[#allocation2 + $0x108] sm:$0xf] }
 0x422   : > { %v5151_v7 = vadd.f32 %v5150_v52, %v5062_v55 }
 0x423   : > { %6531 = vmatpush.bf16.msrb.mxu2 %v11445_v48  ;;  %v11210_v48 = vld [vmem:[#allocation2 + $0x128] sm:$0xf0] }
 0x424   : > { %v5240_v19 = vadd.f32 %v5239_v53, %v5151_v7  ;;  %6275 = vmatmul.bf16.gmra.mxu3 %v16248_v28  ;;  %6453 = vmatmul.bf16.gmra.mxu1 %v16251_v43  ;;  %v4975_v5 = vpop.f32.mrf.mxu2  ;;  %v13044_v53 = vld [vmem:[#allocation2 + $0x8c] sm:$0xf] }
 0x425   : > { %v4976_v25 = vadd.f32 %v4975_v5, %v15024_v40  ;;  %v16264_v32 = vor.u32 %v13044_v53, %v11178_v37  ;;  %v11634_v53 = vld [vmem:[#allocation9 + $0x4d8] sm:$0xf0] }
 0x426   : > { %v5312_v10 = vmax.f32 %v5240_v19, 0.0  ;;  %v5155_v50 = vpop.f32.mrf.mxu0  ;;  %v11192_v19 = vld [vmem:[#allocation2 + $0xc8] sm:$0xf] }
 0x427   : > { %v5064_v27 = vpop.f32.mrf.mxu3  ;;  %v16275_v47 = vor.u32 %v13050_v35, %v11192_v19  ;;  %v13052_v35 = vld [vmem:[#allocation2 + $0x10c] sm:$0xf] }
 0x428   : > { %5376 = vst [vmem:[%s15072_s29 + $0x438] sm:$0xff] %v5312_v10  ;;  %v5065_v44 = vadd.f32 %v5064_v27, %v4976_v25  ;;  %v11194_v25 = vld [vmem:[#allocation2 + $0xe8] sm:$0xf0]  ;;  %v11200_v27 = vld [vmem:[#allocation2 + $0xd0] sm:$0xf] }
 0x429   : > { %v5244_v22 = vpop.f32.mrf.mxu1  ;;  %v16277_v11 = vor.u32 %v13051_v63, %v11200_v27  ;;  %v13053_v63 = vld [vmem:[#allocation2 + $0x114] sm:$0xf] }
 0x42a   : > { %v5154_v23 = vadd.f32 %v5153_v56, %v5065_v44  ;;  %v16299_v19 = vor.u32 %v13053_v63, %v11218_v16 }
 0x42c   : > { %v5243_v6 = vadd.f32 %v5242_v36, %v5154_v23  ;;  %v4977_v51 = vpop.f32.mrf.mxu2 }
 0x42d   : > { %v4978_v17 = vadd.f32 %v4977_v51, %v15024_v40  ;;  %v13049_v51 = vld [vmem:[#allocation2 + $0xd4] sm:$0xf] }
 0x42e   : > { %v5314_v38 = vmax.f32 %v5243_v6, 0.0  ;;  %v5158_v41 = vpop.f32.mrf.mxu0  ;;  %v13048_v6 = vld [vmem:[#allocation2 + $0xcc] sm:$0xf] }
 0x42f   : > { %v5066_v31 = vpop.f32.mrf.mxu3 }
 0x430   : > { %5378 = vst [vmem:[%s15072_s29 + $0x498] sm:$0xff] %v5314_v38  ;;  %v5067_v52 = vadd.f32 %v5066_v31, %v4978_v17  ;;  %v16280_v38 = vor.u32 %v13048_v6, %v11194_v25 }
 0x431   : > { %v5247_v62 = vpop.f32.mrf.mxu1  ;;  %6191 = vmatmul.bf16.gmra.mxu2 %v16259_v45  ;;  %6369 = vmatmul.bf16.gmra.mxu0 %v16261_v46 }
 0x432   : > { %v5156_v9 = vadd.f32 %v5155_v50, %v5067_v52  ;;  %v11202_v50 = vld [vmem:[#allocation2 + $0xf0] sm:$0xf0] }
 0x433   : > { %v16283_v17 = vor.u32 %v13049_v51, %v11202_v50 }
 0x434   : > { %v5245_v29 = vadd.f32 %v5244_v22, %v5156_v9  ;;  %6280 = vmatmul.bf16.gmra.mxu3 %v16264_v32  ;;  %6458 = vmatmul.bf16.gmra.mxu1 %v16267_v58  ;;  %v4980_v24 = vpop.f32.mrf.mxu2  ;;  %v13142_v22 = vld [vmem:[#allocation9 + $0x454] sm:$0xf] }
 0x435   : > { %v4981_v54 = vadd.f32 %v4980_v24, %v15024_v40  ;;  %v11573_v33 = vor.u32 %v13142_v22, %v11570_v30  ;;  %v13108_v30 = vld [vmem:[#allocation9 + $0x344] sm:$0xf] }
 0x436   : > { %v5316_v61 = vmax.f32 %v5245_v29, 0.0  ;;  %v5160_v20 = vpop.f32.mrf.mxu0 }
 0x437   : > { %v5069_v2 = vpop.f32.mrf.mxu3  ;;  %6709 = vmatpush.bf16.msrb.mxu0 %v11573_v33  ;;  %v13124_v33 = vld [vmem:[#allocation9 + $0x3c4] sm:$0xf] }
 0x438   : > { %5380 = vst [vmem:[%s15072_s29 + $0x4b8] sm:$0xff] %v5316_v61  ;;  %v5070_v0 = vadd.f32 %v5069_v2, %v4981_v54  ;;  %v13054_v54 = vld [vmem:[#allocation2 + $0x124] sm:$0xf0]  ;;  %v13055_v2 = vld [vmem:[#allocation2 + $0x12c] sm:$0xf0] }
 0x439   : > { %v5249_v56 = vpop.f32.mrf.mxu1  ;;  %v16291_v60 = vor.u32 %v13054_v54, %v11208_v12  ;;  %v11562_v12 = vld [vmem:[#allocation9 + $0x448] sm:$0xf0] }
 0x43a   : > { %v5159_v55 = vadd.f32 %v5158_v41, %v5070_v0 }
 0x43c   : > { %v5248_v59 = vadd.f32 %v5247_v62, %v5159_v55  ;;  %v4982_v36 = vpop.f32.mrf.mxu2  ;;  %v13158_v62 = vld [vmem:[#allocation9 + $0x4d4] sm:$0xf] }
 0x43d   : > { %v4983_v7 = vadd.f32 %v4982_v36, %v15024_v40  ;;  %v11637_v9 = vor.u32 %v13158_v62, %v11634_v53  ;;  %v11224_v53 = vld [vmem:[#allocation2 + $0x148] sm:$0xf] }
 0x43e   : > { %v5318_v18 = vmax.f32 %v5248_v59, 0.0  ;;  %v5163_v10 = vpop.f32.mrf.mxu0  ;;  %v16293_v59 = vor.u32 %v13055_v2, %v11216_v8 }
 0x43f   : > { %v5071_v5 = vpop.f32.mrf.mxu3  ;;  %6798 = vmatpush.bf16.msrb.mxu1 %v11637_v9 }
 0x440   : > { %5382 = vst [vmem:[%s15072_s29 + $0x518] sm:$0xff] %v5318_v18  ;;  %v5072_v44 = vadd.f32 %v5071_v5, %v4983_v7  ;;  %v16296_v7 = vor.u32 %v13052_v35, %v11210_v48  ;;  %v13057_v48 = vld [vmem:[#allocation2 + $0x154] sm:$0xf] }
 0x441   : > { %v5252_v23 = vpop.f32.mrf.mxu1  ;;  %6196 = vmatmul.bf16.gmra.mxu2 %v16275_v47  ;;  %6374 = vmatmul.bf16.gmra.mxu0 %v16277_v11 }
 0x442   : > { %v5161_v26 = vadd.f32 %v5160_v20, %v5072_v44 }
 0x444   : > { %v5250_v21 = vadd.f32 %v5249_v56, %v5161_v26  ;;  %6285 = vmatmul.bf16.gmra.mxu3 %v16280_v38  ;;  %6463 = vmatmul.bf16.gmra.mxu1 %v16283_v17  ;;  %v4985_v31 = vpop.f32.mrf.mxu2  ;;  %v11498_v26 = vld [vmem:[#allocation9 + $0x3c8] sm:$0xf0] }
 0x445   : > { %v4986_v37 = vadd.f32 %v4985_v31, %v15024_v40  ;;  %v11501_v31 = vor.u32 %v13124_v33, %v11498_v26  ;;  %v13062_v33 = vld [vmem:[#allocation2 + $0x1a4] sm:$0xf0]  ;;  %v13063_v26 = vld [vmem:[#allocation2 + $0x1ac] sm:$0xf0] }
 0x446   : > { %v5320_v41 = vmax.f32 %v5250_v21, 0.0  ;;  %v5165_v15 = vpop.f32.mrf.mxu0 }
 0x447   : > { %v5074_v49 = vpop.f32.mrf.mxu3  ;;  %6621 = vmatpush.bf16.msrb.mxu3 %v11501_v31 }
 0x448   : > { %5384 = vst [vmem:[%s15072_s29 + $0x538] sm:$0xff] %v5320_v41  ;;  %v5075_v52 = vadd.f32 %v5074_v49, %v4986_v37  ;;  %v13058_v49 = vld [vmem:[#allocation2 + $0x164] sm:$0xf0] }
 0x449   : > { %v5254_v34 = vpop.f32.mrf.mxu1  ;;  %v16307_v2 = vor.u32 %v13058_v49, %v11224_v53 }
 0x44a   : > { %v5164_v29 = vadd.f32 %v5163_v10, %v5075_v52 }
 0x44c   : > { %v5253_v24 = vadd.f32 %v5252_v23, %v5164_v29  ;;  %v4987_v61 = vpop.f32.mrf.mxu2  ;;  %v11434_v23 = vld [vmem:[#allocation9 + $0x348] sm:$0xf0] }
 0x44d   : > { %v4988_v0 = vadd.f32 %v4987_v61, %v15024_v40  ;;  %v11437_v51 = vor.u32 %v13108_v30, %v11434_v23  ;;  %v11226_v29 = vld [vmem:[#allocation2 + $0x168] sm:$0xf0]  ;;  %v11234_v61 = vld [vmem:[#allocation2 + $0x170] sm:$0xf0] }
 0x44e   : > { %v5322_v20 = vmax.f32 %v5253_v24, 0.0  ;;  %v5168_v56 = vpop.f32.mrf.mxu0  ;;  %v11232_v24 = vld [vmem:[#allocation2 + $0x150] sm:$0xf] }
 0x44f   : > { %v5076_v13 = vpop.f32.mrf.mxu3  ;;  %6532 = vmatpush.bf16.msrb.mxu2 %v11437_v51 }
 0x450   : > { %5386 = vst [vmem:[%s15072_s29 + $0x598] sm:$0xff] %v5322_v20  ;;  %v5077_v55 = vadd.f32 %v5076_v13, %v4988_v0  ;;  %v13140_v0 = vld [vmem:[#allocation9 + $0x444] sm:$0xf] }
 0x451   : > { %v5257_v36 = vpop.f32.mrf.mxu1  ;;  %6201 = vmatmul.bf16.gmra.mxu2 %v16291_v60  ;;  %6379 = vmatmul.bf16.gmra.mxu0 %v16293_v59  ;;  %v11565_v8 = vor.u32 %v13140_v0, %v11562_v12 }
 0x452   : > { %v5166_v18 = vadd.f32 %v5165_v15, %v5077_v55  ;;  %v13059_v15 = vld [vmem:[#allocation2 + $0x16c] sm:$0xf0] }
 0x453   : > { %v16309_v20 = vor.u32 %v13059_v15, %v11232_v24  ;;  %6710 = vmatpush.bf16.msrb.mxu0 %v11565_v8  ;;  %v11242_v15 = vld [vmem:[#allocation2 + $0x1a8] sm:$0xf0] }
 0x454   : > { %v5255_v5 = vadd.f32 %v5254_v34, %v5166_v18  ;;  %6290 = vmatmul.bf16.gmra.mxu3 %v16296_v7  ;;  %6468 = vmatmul.bf16.gmra.mxu1 %v16299_v19  ;;  %v4990_v10 = vpop.f32.mrf.mxu2  ;;  %v13060_v24 = vld [vmem:[#allocation2 + $0x18c] sm:$0xf] }
 0x455   : > { %v4991_v27 = vadd.f32 %v4990_v10, %v15024_v40  ;;  %v16328_v0 = vor.u32 %v13060_v24, %v11242_v15  ;;  %v11256_v15 = vld [vmem:[#allocation2 + $0x1c8] sm:$0xf] }
 0x456   : > { %v5324_v25 = vmax.f32 %v5255_v5, 0.0  ;;  %v5170_v44 = vpop.f32.mrf.mxu0 }
 0x457   : > { %v5079_v50 = vpop.f32.mrf.mxu3 }
 0x458   : > { %5388 = vst [vmem:[%s15072_s29 + $0x5b8] sm:$0xff] %v5324_v25  ;;  %v5080_v22 = vadd.f32 %v5079_v50, %v4991_v27  ;;  %v13156_v50 = vld [vmem:[#allocation9 + $0x4c4] sm:$0xf] }
 0x459   : > { %v5259_v6 = vpop.f32.mrf.mxu1 }
 0x45a   : > { %v5169_v21 = vadd.f32 %v5168_v56, %v5080_v22  ;;  %v13056_v56 = vld [vmem:[#allocation2 + $0x14c] sm:$0xf] }
 0x45b   : > { %v16312_v55 = vor.u32 %v13056_v56, %v11226_v29 }
 0x45c   : > { %v5258_v41 = vadd.f32 %v5257_v36, %v5169_v21  ;;  %v4992_v37 = vpop.f32.mrf.mxu2  ;;  %v16315_v36 = vor.u32 %v13057_v48, %v11234_v61  ;;  %v13061_v61 = vld [vmem:[#allocation2 + $0x194] sm:$0xf] }
 0x45d   : > { %v4993_v62 = vadd.f32 %v4992_v37, %v15024_v40 }
 0x45e   : > { %v5326_v52 = vmax.f32 %v5258_v41, 0.0  ;;  %v5173_v9 = vpop.f32.mrf.mxu0  ;;  %v11240_v41 = vld [vmem:[#allocation2 + $0x188] sm:$0xf] }
 0x45f   : > { %v5081_v34 = vpop.f32.mrf.mxu3 }
 0x460   : > { %5390 = vst [vmem:[%s15072_s29 + $0x618] sm:$0xff] %v5326_v52  ;;  %v5082_v54 = vadd.f32 %v5081_v34, %v4993_v62  ;;  %v11248_v52 = vld [vmem:[#allocation2 + $0x190] sm:$0xf]  ;;  %v11250_v62 = vld [vmem:[#allocation2 + $0x1b0] sm:$0xf0]  ;;  %v16323_v34 = vor.u32 %v13062_v33, %v11240_v41 }
 0x461   : > { %v5262_v13 = vpop.f32.mrf.mxu1  ;;  %6206 = vmatmul.bf16.gmra.mxu2 %v16307_v2  ;;  %6384 = vmatmul.bf16.gmra.mxu0 %v16309_v20  ;;  %v16325_v29 = vor.u32 %v13063_v26, %v11248_v52  ;;  %v16331_v12 = vor.u32 %v13061_v61, %v11250_v62  ;;  %v13067_v33 = vld [vmem:[#allocation2 + $0x1ec] sm:$0xf0]  ;;  %v11258_v52 = vld [vmem:[#allocation2 + $0x1e8] sm:$0xf0]  ;;  %v11266_v62 = vld [vmem:[#allocation2 + $0x1f0] sm:$0xf0] }
 0x462   : > { %v5171_v16 = vadd.f32 %v5170_v44, %v5082_v54  ;;  %v11626_v44 = vld [vmem:[#allocation9 + $0x4c8] sm:$0xf0]  ;;  %v11554_v61 = vld [vmem:[#allocation9 + $0x438] sm:$0xf0] }
 0x463   : > { %v11629_v30 = vor.u32 %v13156_v50, %v11626_v44  ;;  %v11490_v50 = vld [vmem:[#allocation9 + $0x3b8] sm:$0xf0] }
 0x464   : > { %v5260_v35 = vadd.f32 %v5259_v6, %v5171_v16  ;;  %6295 = vmatmul.bf16.gmra.mxu3 %v16312_v55  ;;  %6473 = vmatmul.bf16.gmra.mxu1 %v16315_v36  ;;  %v4995_v63 = vpop.f32.mrf.mxu2 }
 0x465   : > { %v4996_v5 = vadd.f32 %v4995_v63, %v15024_v40  ;;  %6799 = vmatpush.bf16.msrb.mxu1 %v11629_v30 }
 0x466   : > { %v5328_v18 = vmax.f32 %v5260_v35, 0.0  ;;  %v5175_v25 = vpop.f32.mrf.mxu0 }
 0x467   : > { %v5084_v10 = vpop.f32.mrf.mxu3 }
 0x468   : > { %5392 = vst [vmem:[%s15072_s29 + $0x638] sm:$0xff] %v5328_v18  ;;  %v5085_v27 = vadd.f32 %v5084_v10, %v4996_v5  ;;  %v13106_v18 = vld [vmem:[#allocation9 + $0x334] sm:$0xf]  ;;  %v11426_v5 = vld [vmem:[#allocation9 + $0x338] sm:$0xf0] }
 0x469   : > { %v5264_v22 = vpop.f32.mrf.mxu1 }
 0x46a   : > { %v5174_v23 = vadd.f32 %v5173_v9, %v5085_v27  ;;  %v13122_v27 = vld [vmem:[#allocation9 + $0x3b4] sm:$0xf] }
 0x46c   : > { %v5263_v6 = vadd.f32 %v5262_v13, %v5174_v23  ;;  %v4997_v51 = vpop.f32.mrf.mxu2 }
 0x46d   : > { %v4998_v31 = vadd.f32 %v4997_v51, %v15024_v40  ;;  %v11264_v51 = vld [vmem:[#allocation2 + $0x1d0] sm:$0xf] }
 0x46e   : > { %v5330_v21 = vmax.f32 %v5263_v6, 0.0  ;;  %v5178_v49 = vpop.f32.mrf.mxu0  ;;  %v13066_v6 = vld [vmem:[#allocation2 + $0x1e4] sm:$0xf0]  ;;  %v16341_v24 = vor.u32 %v13067_v33, %v11264_v51 }
 0x46f   : > { %v5086_v37 = vpop.f32.mrf.mxu3  ;;  %v11272_v51 = vld [vmem:[#allocation2 + $0x208] sm:$0xf] }
 0x470   : > { %5394 = vst [vmem:[%s15072_s29 + $0x698] sm:$0xff] %v5330_v21  ;;  %v5087_v53 = vadd.f32 %v5086_v37, %v4998_v31  ;;  %v13065_v31 = vld [vmem:[#allocation2 + $0x1d4] sm:$0xf] }
 0x471   : > { %v5267_v9 = vpop.f32.mrf.mxu1  ;;  %6211 = vmatmul.bf16.gmra.mxu2 %v16323_v34  ;;  %6389 = vmatmul.bf16.gmra.mxu0 %v16325_v29 }
 0x472   : > { %v5176_v54 = vadd.f32 %v5175_v25, %v5087_v53  ;;  %v11429_v25 = vor.u32 %v13106_v18, %v11426_v5  ;;  %v16339_v53 = vor.u32 %v13066_v6, %v11256_v15 }
 0x474   : > { %v5265_v13 = vadd.f32 %v5264_v22, %v5176_v54  ;;  %6300 = vmatmul.bf16.gmra.mxu3 %v16328_v0  ;;  %6478 = vmatmul.bf16.gmra.mxu1 %v16331_v12  ;;  %v5000_v56 = vpop.f32.mrf.mxu2  ;;  %v11493_v22 = vor.u32 %v13122_v27, %v11490_v50 }
 0x475   : > { %v5001_v8 = vadd.f32 %v5000_v56, %v15024_v40  ;;  %6533 = vmatpush.bf16.msrb.mxu2 %v11429_v25 }
 0x476   : > { %v5332_v48 = vmax.f32 %v5265_v13, 0.0  ;;  %v5180_v35 = vpop.f32.mrf.mxu0  ;;  %6622 = vmatpush.bf16.msrb.mxu3 %v11493_v22  ;;  %v13064_v13 = vld [vmem:[#allocation2 + $0x1cc] sm:$0xf]  ;;  %v11618_v22 = vld [vmem:[#allocation9 + $0x4b8] sm:$0xf0] }
 0x477   : > { %v5089_v16 = vpop.f32.mrf.mxu3 }
 0x478   : > { %5396 = vst [vmem:[%s15072_s29 + $0x6b8] sm:$0xff] %v5332_v48  ;;  %v5090_v63 = vadd.f32 %v5089_v16, %v5001_v8  ;;  %v16344_v8 = vor.u32 %v13064_v13, %v11258_v52  ;;  %v16347_v16 = vor.u32 %v13065_v31, %v11266_v62  ;;  %v13071_v31 = vld [vmem:[#allocation2 + $0x22c] sm:$0xf0]  ;;  %v13068_v52 = vld [vmem:[#allocation2 + $0x20c] sm:$0xf] }
 0x479   : > { %v5269_v10 = vpop.f32.mrf.mxu1  ;;  %v11282_v13 = vld [vmem:[#allocation2 + $0x230] sm:$0xf0] }
 0x47a   : > { %v5179_v44 = vadd.f32 %v5178_v49, %v5090_v63 }
 0x47c   : > { %v5268_v30 = vadd.f32 %v5267_v9, %v5179_v44  ;;  %v5002_v23 = vpop.f32.mrf.mxu2  ;;  %v13138_v9 = vld [vmem:[#allocation9 + $0x434] sm:$0xf] }
 0x47d   : > { %v5003_v21 = vadd.f32 %v5002_v23, %v15024_v40  ;;  %v11557_v56 = vor.u32 %v13138_v9, %v11554_v61  ;;  %v13154_v44 = vld [vmem:[#allocation9 + $0x4b4] sm:$0xf]  ;;  %v11274_v9 = vld [vmem:[#allocation2 + $0x228] sm:$0xf0] }
 0x47e   : > { %v5334_v26 = vmax.f32 %v5268_v30, 0.0  ;;  %v5183_v37 = vpop.f32.mrf.mxu0  ;;  %v11621_v23 = vor.u32 %v13154_v44, %v11618_v22  ;;  %v13069_v61 = vld [vmem:[#allocation2 + $0x214] sm:$0xf] }
 0x47f   : > { %v5091_v41 = vpop.f32.mrf.mxu3  ;;  %6711 = vmatpush.bf16.msrb.mxu0 %v11557_v56 }
 0x480   : > { %5398 = vst [vmem:[%s15072_s29 + $0x718] sm:$0xff] %v5334_v26  ;;  %v5092_v49 = vadd.f32 %v5091_v41, %v5003_v21  ;;  %6800 = vmatpush.bf16.msrb.mxu1 %v11621_v23  ;;  %v13070_v26 = vld [vmem:[#allocation2 + $0x224] sm:$0xf0]  ;;  %v11280_v21 = vld [vmem:[#allocation2 + $0x210] sm:$0xf] }
 0x481   : > { %v5272_v54 = vpop.f32.mrf.mxu1  ;;  %6216 = vmatmul.bf16.gmra.mxu2 %v16339_v53  ;;  %6394 = vmatmul.bf16.gmra.mxu0 %v16341_v24 }
 0x482   : > { %v5181_v48 = vadd.f32 %v5180_v35, %v5092_v49 }
 0x484   : > { %v5270_v63 = vadd.f32 %v5269_v10, %v5181_v48  ;;  %6305 = vmatmul.bf16.gmra.mxu3 %v16344_v8  ;;  %6483 = vmatmul.bf16.gmra.mxu1 %v16347_v16  ;;  %v5005_v18 = vpop.f32.mrf.mxu2 }
 0x485   : > { %v5006_v25 = vadd.f32 %v5005_v18, %v15024_v40  ;;  %v16360_v18 = vor.u32 %v13068_v52, %v11274_v9  ;;  %v11296_v9 = vld [vmem:[#allocation2 + $0x250] sm:$0xf] }
 0x486   : > { %v5336_v5 = vmax.f32 %v5270_v63, 0.0  ;;  %v5185_v35 = vpop.f32.mrf.mxu0 }
 0x487   : > { %v5094_v27 = vpop.f32.mrf.mxu3 }
 0x488   : > { %5400 = vst [vmem:[%s15072_s29 + $0x738] sm:$0xff] %v5336_v5  ;;  %v5095_v50 = vadd.f32 %v5094_v27, %v5006_v25  ;;  %v16363_v5 = vor.u32 %v13069_v61, %v11282_v13  ;;  %v13075_v61 = vld [vmem:[#allocation2 + $0x26c] sm:$0xf0] }
 0x489   : > { %v5274_v30 = vpop.f32.mrf.mxu1 }
 0x48a   : > { %v5184_v6 = vadd.f32 %v5183_v37, %v5095_v50  ;;  %v16355_v37 = vor.u32 %v13070_v26, %v11272_v51  ;;  %v13120_v26 = vld [vmem:[#allocation9 + $0x3a4] sm:$0xf] }
 0x48c   : > { %v5273_v10 = vadd.f32 %v5272_v54, %v5184_v6  ;;  %v5007_v33 = vpop.f32.mrf.mxu2  ;;  %v16357_v54 = vor.u32 %v13071_v31, %v11280_v21  ;;  %v13104_v6 = vld [vmem:[#allocation9 + $0x324] sm:$0xf]  ;;  %v11482_v21 = vld [vmem:[#allocation9 + $0x3a8] sm:$0xf0] }
 0x48d   : > { %v5008_v15 = vadd.f32 %v5007_v33, %v15024_v40 }
 0x48e   : > { %v5338_v41 = vmax.f32 %v5273_v10, 0.0  ;;  %v6360_v49 = vpop.f32.mrf.mxu0  ;;  %v11418_v10 = vld [vmem:[#allocation9 + $0x328] sm:$0xf0] }
 0x48f   : > { %v5096_v62 = vpop.f32.mrf.mxu3  ;;  %v11421_v33 = vor.u32 %v13104_v6, %v11418_v10  ;;  %v13136_v6 = vld [vmem:[#allocation9 + $0x424] sm:$0xf]  ;;  %v11546_v10 = vld [vmem:[#allocation9 + $0x428] sm:$0xf0] }
 0x490   : > { %5402 = vst [vmem:[%s15072_s29 + $0x798] sm:$0xff] %v5338_v41  ;;  %v5097_v56 = vadd.f32 %v5096_v62, %v5008_v15  ;;  %v11288_v15 = vld [vmem:[#allocation2 + $0x248] sm:$0xf] }
 0x491   : > { %v6449_v48 = vpop.f32.mrf.mxu1  ;;  %6221 = vmatmul.bf16.gmra.mxu2 %v16355_v37  ;;  %6399 = vmatmul.bf16.gmra.mxu0 %v16357_v54  ;;  %v13074_v62 = vld [vmem:[#allocation2 + $0x264] sm:$0xf0] }
 0x492   : > { %v5186_v63 = vadd.f32 %v5185_v35, %v5097_v56  ;;  %6534 = vmatpush.bf16.msrb.mxu2 %v11421_v33 }
 0x494   : > { %v5275_v25 = vadd.f32 %v5274_v30, %v5186_v63  ;;  %6310 = vmatmul.bf16.gmra.mxu3 %v16360_v18  ;;  %6488 = vmatmul.bf16.gmra.mxu1 %v16363_v5  ;;  %v6182_v27 = vpop.f32.mrf.mxu2  ;;  %v11485_v30 = vor.u32 %v13120_v26, %v11482_v21  ;;  %v13072_v63 = vld [vmem:[#allocation2 + $0x24c] sm:$0xf]  ;;  %v11549_v26 = vor.u32 %v13136_v6, %v11546_v10  ;;  %v11312_v6 = vld [vmem:[#allocation2 + $0x290] sm:$0xf] }
 0x495   : > { %v6183_v44 = vadd.f32 %v6182_v27, %v15047_v14  ;;  %v13079_v10 = vld [vmem:[#allocation2 + $0x2ac] sm:$0xf0] }
 0x496   : > { %v5340_v50 = vmax.f32 %v5275_v25, 0.0  ;;  %v6362_v23 = vpop.f32.mrf.mxu0  ;;  %6623 = vmatpush.bf16.msrb.mxu3 %v11485_v30  ;;  %6712 = vmatpush.bf16.msrb.mxu0 %v11549_v26 }
 0x497   : > { %v6271_v22 = vpop.f32.mrf.mxu3 }
 0x498   : > { %5404 = vst [vmem:[%s15072_s29 + $0x7b8] sm:$0xff] %v5340_v50  ;;  %v6272_v35 = vadd.f32 %v6271_v22, %v6183_v44  ;;  %v11290_v50 = vld [vmem:[#allocation2 + $0x268] sm:$0xf0]  ;;  %v13073_v44 = vld [vmem:[#allocation2 + $0x254] sm:$0xf] }
 0x499   : > { %v6451_v51 = vpop.f32.mrf.mxu1  ;;  %v11298_v22 = vld [vmem:[#allocation2 + $0x270] sm:$0xf0] }
 0x49a   : > { %v6361_v31 = vadd.f32 %v6360_v49, %v6272_v35  ;;  %v16371_v35 = vor.u32 %v13074_v62, %v11288_v15  ;;  %v16379_v30 = vor.u32 %v13073_v44, %v11298_v22  ;;  %v11304_v44 = vld [vmem:[#allocation2 + $0x288] sm:$0xf] }
 0x49c   : > { %v6450_v41 = vadd.f32 %v6449_v48, %v6361_v31  ;;  %v6184_v52 = vpop.f32.mrf.mxu2  ;;  %v16373_v48 = vor.u32 %v13075_v61, %v11296_v9  ;;  %v16376_v31 = vor.u32 %v13072_v63, %v11290_v50  ;;  %18389 = vst [vmem:[#allocation25_spill] sm:$0xff] %v16379_v30 }
 0x49d   : > { %v6185_v56 = vadd.f32 %v6184_v52, %v15047_v14 }
 0x49e   : > { %v6885_v13 = vmax.f32 %v6450_v41, 0.0  ;;  %v6365_v27 = vpop.f32.mrf.mxu0  ;;  %18388 = vst [vmem:[#allocation66_spill] sm:$0xff] %v16376_v31 }
 0x49f   : > { %v6273_v25 = vpop.f32.mrf.mxu3 }
 0x4a0   : > { %11654 = vst [vmem:[%s15072_s29 + $0x40] sm:$0xff] %v6885_v13  ;;  %v6274_v49 = vadd.f32 %v6273_v25, %v6185_v56  ;;  %v13152_v13 = vld [vmem:[#allocation9 + $0x4a4] sm:$0xf]  ;;  %v11610_v56 = vld [vmem:[#allocation9 + $0x4a8] sm:$0xf0] }
 0x4a1   : > { %v6454_v33 = vpop.f32.mrf.mxu1  ;;  %6226 = vmatmul.bf16.gmra.mxu2 %v16371_v35  ;;  %6404 = vmatmul.bf16.gmra.mxu0 %v16373_v48  ;;  %v11613_v25 = vor.u32 %v13152_v13, %v11610_v56 }
 0x4a2   : > { %v6363_v21 = vadd.f32 %v6362_v23, %v6274_v49  ;;  %v13078_v49 = vld [vmem:[#allocation2 + $0x2a4] sm:$0xf0] }
 0x4a3   : > { %6801 = vmatpush.bf16.msrb.mxu1 %v11613_v25 }
 0x4a4   : > { %v6452_v41 = vadd.f32 %v6451_v51, %v6363_v21  ;;  %6315 = vmatmul.bf16.gmra.mxu3 %v16376_v31  ;;  %6493 = vmatmul.bf16.gmra.mxu1 %v16379_v30  ;;  %v6187_v15 = vpop.f32.mrf.mxu2  ;;  %v11314_v30 = vld [vmem:[#allocation2 + $0x2b0] sm:$0xf0] }
 0x4a5   : > { %v6188_v62 = vadd.f32 %v6187_v15, %v15047_v14  ;;  %v11330_v31 = vld [vmem:[#allocation2 + $0x2f0] sm:$0xf0] }
 0x4a6   : > { %v6887_v52 = vmax.f32 %v6452_v41, 0.0  ;;  %v6367_v23 = vpop.f32.mrf.mxu0  ;;  %v13076_v41 = vld [vmem:[#allocation2 + $0x28c] sm:$0xf] }
 0x4a7   : > { %v6276_v9 = vpop.f32.mrf.mxu3 }
 0x4a8   : > { %11656 = vst [vmem:[%s15072_s29 + $0x60] sm:$0xff] %v6887_v52  ;;  %v6277_v61 = vadd.f32 %v6276_v9, %v6188_v62  ;;  %v11306_v62 = vld [vmem:[#allocation2 + $0x2a8] sm:$0xf0]  ;;  %v13077_v9 = vld [vmem:[#allocation2 + $0x294] sm:$0xf] }
 0x4a9   : > { %v6456_v63 = vpop.f32.mrf.mxu1  ;;  %v16392_v25 = vor.u32 %v13076_v41, %v11306_v62  ;;  %v13118_v62 = vld [vmem:[#allocation9 + $0x394] sm:$0xf] }
 0x4aa   : > { %v6366_v50 = vadd.f32 %v6365_v27, %v6277_v61  ;;  %v16387_v27 = vor.u32 %v13078_v49, %v11304_v44 }
 0x4ab   : > { %18392 = vst [vmem:[#allocation27_spill] sm:$0xff] %v16392_v25 }
 0x4ac   : > { %v6455_v51 = vadd.f32 %v6454_v33, %v6366_v50  ;;  %v6189_v22 = vpop.f32.mrf.mxu2  ;;  %18390 = vst [vmem:[#allocation24_spill] sm:$0xff] %v16387_v27  ;;  %v16389_v33 = vor.u32 %v13079_v10, %v11312_v6  ;;  %v16395_v50 = vor.u32 %v13077_v9, %v11314_v30  ;;  %v11474_v30 = vld [vmem:[#allocation9 + $0x398] sm:$0xf0] }
 0x4ad   : > { %v6190_v21 = vadd.f32 %v6189_v22, %v15047_v14 }
 0x4ae   : > { %v6889_v26 = vmax.f32 %v6455_v51, 0.0  ;;  %v6370_v52 = vpop.f32.mrf.mxu0  ;;  %18391 = vst [vmem:[#allocation23_spill] sm:$0xff] %v16389_v33 }
 0x4af   : > { %v6278_v15 = vpop.f32.mrf.mxu3  ;;  %18393 = vst [vmem:[#allocation21_spill] sm:$0xff] %v16395_v50 }
 0x4b0   : > { %11658 = vst [vmem:[%s15072_s29 + $0xc0] sm:$0xff] %v6889_v26  ;;  %v6279_v13 = vadd.f32 %v6278_v15, %v6190_v21  ;;  %v13102_v26 = vld [vmem:[#allocation9 + $0x314] sm:$0xf]  ;;  %v11410_v21 = vld [vmem:[#allocation9 + $0x318] sm:$0xf0] }
 0x4b1   : > { %v6459_v61 = vpop.f32.mrf.mxu1  ;;  %6231 = vmatmul.bf16.gmra.mxu2 %v16387_v27  ;;  %6409 = vmatmul.bf16.gmra.mxu0 %v16389_v33  ;;  %v11413_v15 = vor.u32 %v13102_v26, %v11410_v21  ;;  %v11322_v26 = vld [vmem:[#allocation2 + $0x2e8] sm:$0xf0]  ;;  %v13081_v21 = vld [vmem:[#allocation2 + $0x2d4] sm:$0xf] }
 0x4b2   : > { %v6368_v56 = vadd.f32 %v6367_v23, %v6279_v13 }
 0x4b3   : > { %6535 = vmatpush.bf16.msrb.mxu2 %v11413_v15  ;;  %v13134_v15 = vld [vmem:[#allocation9 + $0x414] sm:$0xf] }
 0x4b4   : > { %v6457_v51 = vadd.f32 %v6456_v63, %v6368_v56  ;;  %6320 = vmatmul.bf16.gmra.mxu3 %v16392_v25  ;;  %6498 = vmatmul.bf16.gmra.mxu1 %v16395_v50  ;;  %v6192_v44 = vpop.f32.mrf.mxu2  ;;  %v11477_v63 = vor.u32 %v13118_v62, %v11474_v30  ;;  %v11320_v56 = vld [vmem:[#allocation2 + $0x2c8] sm:$0xf]  ;;  %v13083_v25 = vld [vmem:[#allocation2 + $0x2ec] sm:$0xf0]  ;;  %v11538_v62 = vld [vmem:[#allocation9 + $0x418] sm:$0xf0] }
 0x4b5   : > { %v6193_v49 = vadd.f32 %v6192_v44, %v15047_v14  ;;  %v13082_v50 = vld [vmem:[#allocation2 + $0x2e4] sm:$0xf0]  ;;  %v11328_v44 = vld [vmem:[#allocation2 + $0x2d0] sm:$0xf] }
 0x4b6   : > { %v6891_v22 = vmax.f32 %v6457_v51, 0.0  ;;  %v6372_v10 = vpop.f32.mrf.mxu0  ;;  %6624 = vmatpush.bf16.msrb.mxu3 %v11477_v63 }
 0x4b7   : > { %v6281_v6 = vpop.f32.mrf.mxu3 }
 0x4b8   : > { %11660 = vst [vmem:[%s15072_s29 + $0xe0] sm:$0xff] %v6891_v22  ;;  %v6282_v23 = vadd.f32 %v6281_v6, %v6193_v49  ;;  %v13080_v49 = vld [vmem:[#allocation2 + $0x2cc] sm:$0xf] }
 0x4b9   : > { %v6461_v41 = vpop.f32.mrf.mxu1 }
 0x4ba   : > { %v6371_v9 = vadd.f32 %v6370_v52, %v6282_v23  ;;  %v16403_v23 = vor.u32 %v13082_v50, %v11320_v56 }
 0x4bc   : > { %v6460_v13 = vadd.f32 %v6459_v61, %v6371_v9  ;;  %v6194_v51 = vpop.f32.mrf.mxu2  ;;  %18394 = vst [vmem:[#allocation29_spill] sm:$0xff] %v16403_v23  ;;  %v16405_v61 = vor.u32 %v13083_v25, %v11328_v44  ;;  %v11541_v9 = vor.u32 %v13134_v15, %v11538_v62  ;;  %v13086_v62 = vld [vmem:[#allocation2 + $0x324] sm:$0xf0] }
 0x4bd   : > { %v6195_v22 = vadd.f32 %v6194_v51, %v15047_v14  ;;  %v16411_v51 = vor.u32 %v13081_v21, %v11330_v31  ;;  %v11336_v21 = vld [vmem:[#allocation2 + $0x308] sm:$0xf] }
 0x4be   : > { %v6893_v33 = vmax.f32 %v6460_v13, 0.0  ;;  %v6375_v27 = vpop.f32.mrf.mxu0  ;;  %18395 = vst [vmem:[#allocation22_spill] sm:$0xff] %v16405_v61  ;;  %v16408_v13 = vor.u32 %v13080_v49, %v11322_v26  ;;  %6713 = vmatpush.bf16.msrb.mxu0 %v11541_v9  ;;  %v13150_v49 = vld [vmem:[#allocation9 + $0x494] sm:$0xf]  ;;  %v11344_v9 = vld [vmem:[#allocation2 + $0x310] sm:$0xf] }
 0x4bf   : > { %v6283_v6 = vpop.f32.mrf.mxu3  ;;  %18397 = vst [vmem:[#allocation33_spill] sm:$0xff] %v16411_v51 }
 0x4c0   : > { %11662 = vst [vmem:[%s15072_s29 + $0x140] sm:$0xff] %v6893_v33  ;;  %v6284_v52 = vadd.f32 %v6283_v6, %v6195_v22  ;;  %v11602_v6 = vld [vmem:[#allocation9 + $0x498] sm:$0xf0] }
 0x4c1   : > { %v6464_v30 = vpop.f32.mrf.mxu1  ;;  %6236 = vmatmul.bf16.gmra.mxu2 %v16403_v23  ;;  %18396 = vst [vmem:[#allocation31_spill] sm:$0xff] %v16408_v13  ;;  %6414 = vmatmul.bf16.gmra.mxu0 %v16405_v61  ;;  %v11346_v61 = vld [vmem:[#allocation2 + $0x330] sm:$0xf0] }
 0x4c2   : > { %v6373_v63 = vadd.f32 %v6372_v10, %v6284_v52  ;;  %v11605_v52 = vor.u32 %v13150_v49, %v11602_v6  ;;  %v11362_v23 = vld [vmem:[#allocation2 + $0x370] sm:$0xf0] }
 0x4c4   : > { %v6462_v33 = vadd.f32 %v6461_v41, %v6373_v63  ;;  %6325 = vmatmul.bf16.gmra.mxu3 %v16408_v13  ;;  %6503 = vmatmul.bf16.gmra.mxu1 %v16411_v51  ;;  %v6197_v25 = vpop.f32.mrf.mxu2  ;;  %v13087_v63 = vld [vmem:[#allocation2 + $0x32c] sm:$0xf0]  ;;  %v13084_v51 = vld [vmem:[#allocation2 + $0x30c] sm:$0xf] }
 0x4c5   : > { %v6198_v56 = vadd.f32 %v6197_v25, %v15047_v14  ;;  %6802 = vmatpush.bf16.msrb.mxu1 %v11605_v52 }
 0x4c6   : > { %v6895_v50 = vmax.f32 %v6462_v33, 0.0  ;;  %v6377_v10 = vpop.f32.mrf.mxu0 }
 0x4c7   : > { %v6286_v44 = vpop.f32.mrf.mxu3 }
 0x4c8   : > { %11664 = vst [vmem:[%s15072_s29 + $0x160] sm:$0xff] %v6895_v50  ;;  %v6287_v22 = vadd.f32 %v6286_v44, %v6198_v56  ;;  %v11338_v56 = vld [vmem:[#allocation2 + $0x328] sm:$0xf0]  ;;  %v13085_v44 = vld [vmem:[#allocation2 + $0x314] sm:$0xf] }
 0x4c9   : > { %v6466_v26 = vpop.f32.mrf.mxu1  ;;  %v16424_v52 = vor.u32 %v13084_v51, %v11338_v56  ;;  %v11402_v51 = vld [vmem:[#allocation9 + $0x308] sm:$0xf0]  ;;  %v13116_v56 = vld [vmem:[#allocation9 + $0x384] sm:$0xf] }
 0x4ca   : > { %v6376_v31 = vadd.f32 %v6375_v27, %v6287_v22  ;;  %v16419_v27 = vor.u32 %v13086_v62, %v11336_v21 }
 0x4cb   : > { %18400 = vst [vmem:[#allocation36_spill] sm:$0xff] %v16424_v52 }
 0x4cc   : > { %v6465_v41 = vadd.f32 %v6464_v30, %v6376_v31  ;;  %v6199_v15 = vpop.f32.mrf.mxu2  ;;  %18398 = vst [vmem:[#allocation26_spill] sm:$0xff] %v16419_v27  ;;  %v16421_v30 = vor.u32 %v13087_v63, %v11344_v9  ;;  %v16427_v31 = vor.u32 %v13085_v44, %v11346_v61  ;;  %v13100_v63 = vld [vmem:[#allocation9 + $0x304] sm:$0xf]  ;;  %v11466_v61 = vld [vmem:[#allocation9 + $0x388] sm:$0xf0] }
 0x4cd   : > { %v6200_v25 = vadd.f32 %v6199_v15, %v15047_v14 }
 0x4ce   : > { %v6897_v33 = vmax.f32 %v6465_v41, 0.0  ;;  %v6380_v50 = vpop.f32.mrf.mxu0  ;;  %18399 = vst [vmem:[#allocation28_spill] sm:$0xff] %v16421_v30 }
 0x4cf   : > { %v6288_v13 = vpop.f32.mrf.mxu3  ;;  %18401 = vst [vmem:[#allocation30_spill] sm:$0xff] %v16427_v31 }
 0x4d0   : > { %11666 = vst [vmem:[%s15072_s29 + $0x1c0] sm:$0xff] %v6897_v33  ;;  %v6289_v49 = vadd.f32 %v6288_v13, %v6200_v25  ;;  %v11405_v25 = vor.u32 %v13100_v63, %v11402_v51  ;;  %v11354_v63 = vld [vmem:[#allocation2 + $0x368] sm:$0xf0]  ;;  %v13089_v51 = vld [vmem:[#allocation2 + $0x354] sm:$0xf] }
 0x4d1   : > { %v6469_v22 = vpop.f32.mrf.mxu1  ;;  %6241 = vmatmul.bf16.gmra.mxu2 %v16419_v27  ;;  %6419 = vmatmul.bf16.gmra.mxu0 %v16421_v30 }
 0x4d2   : > { %v6378_v6 = vadd.f32 %v6377_v10, %v6289_v49  ;;  %6536 = vmatpush.bf16.msrb.mxu2 %v11405_v25  ;;  %v13132_v25 = vld [vmem:[#allocation9 + $0x404] sm:$0xf] }
 0x4d4   : > { %v6467_v41 = vadd.f32 %v6466_v26, %v6378_v6  ;;  %6330 = vmatmul.bf16.gmra.mxu3 %v16424_v52  ;;  %6508 = vmatmul.bf16.gmra.mxu1 %v16427_v31  ;;  %v6202_v13 = vpop.f32.mrf.mxu2  ;;  %v11469_v26 = vor.u32 %v13116_v56, %v11466_v61  ;;  %v11352_v6 = vld [vmem:[#allocation2 + $0x348] sm:$0xf]  ;;  %v13091_v52 = vld [vmem:[#allocation2 + $0x36c] sm:$0xf0] }
 0x4d5   : > { %v6203_v15 = vadd.f32 %v6202_v13, %v15047_v14  ;;  %v13090_v31 = vld [vmem:[#allocation2 + $0x364] sm:$0xf0]  ;;  %v11360_v13 = vld [vmem:[#allocation2 + $0x350] sm:$0xf] }
 0x4d6   : > { %v6899_v21 = vmax.f32 %v6467_v41, 0.0  ;;  %v6382_v9 = vpop.f32.mrf.mxu0  ;;  %6625 = vmatpush.bf16.msrb.mxu3 %v11469_v26  ;;  %v11530_v56 = vld [vmem:[#allocation9 + $0x408] sm:$0xf0] }
 0x4d7   : > { %v6291_v62 = vpop.f32.mrf.mxu3 }
 0x4d8   : > { %11668 = vst [vmem:[%s15072_s29 + $0x1e0] sm:$0xff] %v6899_v21  ;;  %v6292_v10 = vadd.f32 %v6291_v62, %v6203_v15  ;;  %v13088_v15 = vld [vmem:[#allocation2 + $0x34c] sm:$0xf] }
 0x4d9   : > { %v6471_v33 = vpop.f32.mrf.mxu1 }
 0x4da   : > { %v6381_v44 = vadd.f32 %v6380_v50, %v6292_v10  ;;  %v16435_v10 = vor.u32 %v13090_v31, %v11352_v6 }
 0x4dc   : > { %v6470_v49 = vadd.f32 %v6469_v22, %v6381_v44  ;;  %v6204_v41 = vpop.f32.mrf.mxu2  ;;  %18402 = vst [vmem:[#allocation42_spill] sm:$0xff] %v16435_v10  ;;  %v16437_v22 = vor.u32 %v13091_v52, %v11360_v13  ;;  %v11533_v44 = vor.u32 %v13132_v25, %v11530_v56  ;;  %v13094_v56 = vld [vmem:[#allocation2 + $0x3a4] sm:$0xf0] }
 0x4dd   : > { %v6205_v21 = vadd.f32 %v6204_v41, %v15047_v14  ;;  %v16443_v41 = vor.u32 %v13089_v51, %v11362_v23  ;;  %v11368_v51 = vld [vmem:[#allocation2 + $0x388] sm:$0xf] }
 0x4de   : > { %v6901_v30 = vmax.f32 %v6470_v49, 0.0  ;;  %v6385_v27 = vpop.f32.mrf.mxu0  ;;  %18403 = vst [vmem:[#allocation32_spill] sm:$0xff] %v16437_v22  ;;  %v16440_v49 = vor.u32 %v13088_v15, %v11354_v63  ;;  %6714 = vmatpush.bf16.msrb.mxu0 %v11533_v44  ;;  %v13148_v15 = vld [vmem:[#allocation9 + $0x484] sm:$0xf]  ;;  %v11376_v44 = vld [vmem:[#allocation2 + $0x390] sm:$0xf] }
 0x4df   : > { %v6293_v62 = vpop.f32.mrf.mxu3  ;;  %18405 = vst [vmem:[#allocation51_spill] sm:$0xff] %v16443_v41 }
 0x4e0   : > { %11670 = vst [vmem:[%s15072_s29 + $0x240] sm:$0xff] %v6901_v30  ;;  %v6294_v50 = vadd.f32 %v6293_v62, %v6205_v21  ;;  %v11594_v62 = vld [vmem:[#allocation9 + $0x488] sm:$0xf0] }
 0x4e1   : > { %v6474_v61 = vpop.f32.mrf.mxu1  ;;  %6246 = vmatmul.bf16.gmra.mxu2 %v16435_v10  ;;  %18404 = vst [vmem:[#allocation48_spill] sm:$0xff] %v16440_v49  ;;  %6424 = vmatmul.bf16.gmra.mxu0 %v16437_v22  ;;  %v11378_v22 = vld [vmem:[#allocation2 + $0x3b0] sm:$0xf0] }
 0x4e2   : > { %v6383_v26 = vadd.f32 %v6382_v9, %v6294_v50  ;;  %v11597_v50 = vor.u32 %v13148_v15, %v11594_v62 }
 0x4e4   : > { %v6472_v30 = vadd.f32 %v6471_v33, %v6383_v26  ;;  %6335 = vmatmul.bf16.gmra.mxu3 %v16440_v49  ;;  %6513 = vmatmul.bf16.gmra.mxu1 %v16443_v41  ;;  %v6207_v52 = vpop.f32.mrf.mxu2  ;;  %v13095_v26 = vld [vmem:[#allocation2 + $0x3ac] sm:$0xf0]  ;;  %v13092_v41 = vld [vmem:[#allocation2 + $0x38c] sm:$0xf] }
 0x4e5   : > { %v6208_v6 = vadd.f32 %v6207_v52, %v15047_v14  ;;  %6803 = vmatpush.bf16.msrb.mxu1 %v11597_v50 }
 0x4e6   : > { %v6903_v31 = vmax.f32 %v6472_v30, 0.0  ;;  %v6387_v9 = vpop.f32.mrf.mxu0 }
 0x4e7   : > { %v6296_v13 = vpop.f32.mrf.mxu3 }
 0x4e8   : > { %11672 = vst [vmem:[%s15072_s29 + $0x260] sm:$0xff] %v6903_v31  ;;  %v6297_v21 = vadd.f32 %v6296_v13, %v6208_v6  ;;  %v11370_v6 = vld [vmem:[#allocation2 + $0x3a8] sm:$0xf0]  ;;  %v13093_v13 = vld [vmem:[#allocation2 + $0x394] sm:$0xf] }
 0x4e9   : > { %v6476_v63 = vpop.f32.mrf.mxu1  ;;  %v16456_v50 = vor.u32 %v13092_v41, %v11370_v6  ;;  %v13307_v41 = vld [vmem:[#allocation9 + $0x574] sm:$0xf0]  ;;  %v12352_v6 = vld [vmem:[#allocation9 + $0x5f0] sm:$0xf] }
 0x4ea   : > { %v6386_v23 = vadd.f32 %v6385_v27, %v6297_v21  ;;  %v16451_v27 = vor.u32 %v13094_v56, %v11368_v51 }
 0x4eb   : > { %18408 = vst [vmem:[#allocation60_spill] sm:$0xff] %v16456_v50 }
 0x4ec   : > { %v6475_v33 = vadd.f32 %v6474_v61, %v6386_v23  ;;  %v6209_v25 = vpop.f32.mrf.mxu2  ;;  %18406 = vst [vmem:[#allocation34_spill] sm:$0xff] %v16451_v27  ;;  %v16453_v61 = vor.u32 %v13095_v26, %v11376_v44  ;;  %v16459_v23 = vor.u32 %v13093_v13, %v11378_v22  ;;  %v12288_v26 = vld [vmem:[#allocation9 + $0x570] sm:$0xf]  ;;  %v13323_v22 = vld [vmem:[#allocation9 + $0x5f4] sm:$0xf0] }
 0x4ed   : > { %v6210_v52 = vadd.f32 %v6209_v25, %v15047_v14 }
 0x4ee   : > { %v6905_v30 = vmax.f32 %v6475_v33, 0.0  ;;  %v6390_v31 = vpop.f32.mrf.mxu0  ;;  %18407 = vst [vmem:[#allocation41_spill] sm:$0xff] %v16453_v61 }
 0x4ef   : > { %v6298_v49 = vpop.f32.mrf.mxu3  ;;  %18409 = vst [vmem:[#allocation65_spill] sm:$0xff] %v16459_v23 }
 0x4f0   : > { %11674 = vst [vmem:[%s15072_s29 + $0x2c0] sm:$0xff] %v6905_v30  ;;  %v6299_v15 = vadd.f32 %v6298_v49, %v6210_v52  ;;  %v12289_v52 = vor.u32 %v13307_v41, %v12288_v26 }
 0x4f1   : > { %v6479_v21 = vpop.f32.mrf.mxu1  ;;  %6251 = vmatmul.bf16.gmra.mxu2 %v16451_v27  ;;  %6429 = vmatmul.bf16.gmra.mxu0 %v16453_v61  ;;  %v13097_v61 = vld [vmem:[#allocation2 + $0x3d4] sm:$0xf] }
 0x4f2   : > { %v6388_v62 = vadd.f32 %v6387_v9, %v6299_v15  ;;  %v11392_v15 = vld [vmem:[#allocation2 + $0x3d0] sm:$0xf]  ;;  %8550 = vmatpush.bf16.msra.mxu2 %v12289_v52 }
 0x4f3   : > { %v12416_v52 = vld [vmem:[#allocation9 + $0x670] sm:$0xf] }
 0x4f4   : > { %v6477_v33 = vadd.f32 %v6476_v63, %v6388_v62  ;;  %6340 = vmatmul.bf16.gmra.mxu3 %v16456_v50  ;;  %6518 = vmatmul.bf16.gmra.mxu1 %v16459_v23  ;;  %v6212_v49 = vpop.f32.mrf.mxu2  ;;  %v12353_v63 = vor.u32 %v13323_v22, %v12352_v6  ;;  %v13099_v62 = vld [vmem:[#allocation2 + $0x3ec] sm:$0xf0]  ;;  %v13098_v50 = vld [vmem:[#allocation2 + $0x3e4] sm:$0xf0] }
 0x4f5   : > { %v6213_v25 = vadd.f32 %v6212_v49, %v15047_v14  ;;  %v16466_v27 = vor.u32 %v13099_v62, %v11392_v15 }
 0x4f6   : > { %v6907_v51 = vmax.f32 %v6477_v33, 0.0  ;;  %v6392_v44 = vpop.f32.mrf.mxu0  ;;  %v11384_v33 = vld [vmem:[#allocation2 + $0x3c8] sm:$0xf]  ;;  %8639 = vmatpush.bf16.msra.mxu3 %v12353_v63 }
 0x4f7   : > { %v6301_v56 = vpop.f32.mrf.mxu3  ;;  %v16469_v22 = vor.u32 %v13098_v50, %v11384_v33 }
 0x4f8   : > { %11676 = vst [vmem:[%s15072_s29 + $0x2e0] sm:$0xff] %v6907_v51  ;;  %v6302_v9 = vadd.f32 %v6301_v56, %v6213_v25  ;;  %v11394_v51 = vld [vmem:[#allocation2 + $0x3f0] sm:$0xf0] }
 0x4f9   : > { %v6481_v30 = vpop.f32.mrf.mxu1 }
 0x4fa   : > { %v6391_v13 = vadd.f32 %v6390_v31, %v6302_v9  ;;  %v13096_v31 = vld [vmem:[#allocation2 + $0x3cc] sm:$0xf] }
 0x4fb   : > { %v11386_v9 = vld [vmem:[#allocation2 + $0x3e8] sm:$0xf0] }
 0x4fc   : > { %v6480_v23 = vadd.f32 %v6479_v21, %v6391_v13  ;;  %v6214_v49 = vpop.f32.mrf.mxu2  ;;  %v16471_v21 = vor.u32 %v13097_v61, %v11394_v51  ;;  %v13339_v13 = vld [vmem:[#allocation9 + $0x674] sm:$0xf0]  ;;  %v16474_v15 = vor.u32 %v13096_v31, %v11386_v9 }
 0x4fd   : > { %v6215_v56 = vadd.f32 %v6214_v49, %v15047_v14  ;;  %v12417_v10 = vor.u32 %v13339_v13, %v12416_v52 }
 0x4fe   : > { %v6909_v25 = vmax.f32 %v6480_v23, 0.0  ;;  %v6395_v41 = vpop.f32.mrf.mxu0  ;;  %18410 = vst [vmem:[#allocation45_spill] sm:$0xff] %v16471_v21 }
 0x4ff   : > { %v6303_v26 = vpop.f32.mrf.mxu3  ;;  %8728 = vmatpush.bf16.msra.mxu0 %v12417_v10 }
 0x500   : > { %11678 = vst [vmem:[%s15072_s29 + $0x340] sm:$0xff] %v6909_v25  ;;  %v6304_v6 = vadd.f32 %v6303_v26, %v6215_v56  ;;  %v12480_v25 = vld [vmem:[#allocation9 + $0x6f0] sm:$0xf]  ;;  %v13355_v56 = vld [vmem:[#allocation9 + $0x6f4] sm:$0xf0] }
 0x501   : > { %v6484_v63 = vpop.f32.mrf.mxu1  ;;  %6256 = vmatmul.bf16.gmra.mxu2 %v16469_v22  ;;  %6434 = vmatmul.bf16.gmra.mxu0 %v16466_v27  ;;  %v12481_v31 = vor.u32 %v13355_v56, %v12480_v25  ;;  %v12280_v56 = vld [vmem:[#allocation9 + $0x560] sm:$0xf] }
 0x502   : > { %v6393_v23 = vadd.f32 %v6392_v44, %v6304_v6 }
 0x503   : > { %8817 = vmatpush.bf16.msra.mxu1 %v12481_v31 }
 0x504   : > { %v6482_v62 = vadd.f32 %v6481_v30, %v6393_v23  ;;  %6345 = vmatmul.bf16.gmra.mxu3 %v16474_v15  ;;  %6523 = vmatmul.bf16.gmra.mxu1 %v16471_v21  ;;  %v6217_v61 = vpop.f32.mrf.mxu2 }
 0x505   : > { %v6218_v33 = vadd.f32 %v6217_v61, %v15047_v14 }
 0x506   : > { %v6911_v50 = vmax.f32 %v6482_v62, 0.0  ;;  %v6397_v51 = vpop.f32.mrf.mxu0 }
 0x507   : > { %v6306_v49 = vpop.f32.mrf.mxu3 }
 0x508   : > { %11680 = vst [vmem:[%s15072_s29 + $0x360] sm:$0xff] %v6911_v50  ;;  %v6307_v44 = vadd.f32 %v6306_v49, %v6218_v33 }
 0x509   : > { %v6486_v26 = vpop.f32.mrf.mxu1 }
 0x50a   : > { %v6396_v9 = vadd.f32 %v6395_v41, %v6307_v44 }
 0x50c   : > { %v6485_v10 = vadd.f32 %v6484_v63, %v6396_v9  ;;  %v6219_v30 = vpop.f32.mrf.mxu2  ;;  %v12344_v9 = vld [vmem:[#allocation9 + $0x5e0] sm:$0xf] }
 0x50d   : > { %v6220_v52 = vadd.f32 %v6219_v30, %v15047_v14 }
 0x50e   : > { %v6913_v6 = vmax.f32 %v6485_v10, 0.0  ;;  %v6400_v23 = vpop.f32.mrf.mxu0 }
 0x50f   : > { %v6308_v13 = vpop.f32.mrf.mxu3 }
 0x510   : > { %11682 = vst [vmem:[%s15072_s29 + $0x3c0] sm:$0xff] %v6913_v6  ;;  %v6309_v62 = vadd.f32 %v6308_v13, %v6220_v52 }
 0x511   : > { %v6489_v61 = vpop.f32.mrf.mxu1  ;;  %6537 = vmatmul.bf16.vlgmr.msrb.gmra.mxu2 %v16227_v42  ;;  %6715 = vmatmul.bf16.vlgmr.msrb.gmra.mxu0 %v16229_v3  ;;  %v13321_v3 = vld [vmem:[#allocation9 + $0x5e4] sm:$0xf0] }
 0x512   : > { %v6398_v21 = vadd.f32 %v6397_v51, %v6309_v62  ;;  %v13305_v51 = vld [vmem:[#allocation9 + $0x564] sm:$0xf0]  ;;  %v12408_v62 = vld [vmem:[#allocation9 + $0x660] sm:$0xf] }
 0x513   : > { %v12281_v42 = vor.u32 %v13305_v51, %v12280_v56 }
 0x514   : > { %v6487_v50 = vadd.f32 %v6486_v26, %v6398_v21  ;;  %6626 = vmatmul.bf16.vlgmr.msrb.gmra.mxu3 %v16232_v1  ;;  %6804 = vmatmul.bf16.vlgmr.msrb.gmra.mxu1 %v16235_v39  ;;  %v6222_v41 = vpop.f32.mrf.mxu2  ;;  %v12345_v26 = vor.u32 %v13321_v3, %v12344_v9  ;;  %v13353_v9 = vld [vmem:[#allocation9 + $0x6e4] sm:$0xf0] }
 0x515   : > { %v6223_v33 = vadd.f32 %v6222_v41, %v15047_v14  ;;  %8551 = vmatpush.bf16.msra.mxu2 %v12281_v42 }
 0x516   : > { %v6915_v63 = vmax.f32 %v6487_v50, 0.0  ;;  %v6402_v44 = vpop.f32.mrf.mxu0  ;;  %8640 = vmatpush.bf16.msra.mxu3 %v12345_v26  ;;  %v13337_v50 = vld [vmem:[#allocation9 + $0x664] sm:$0xf0] }
 0x517   : > { %v6311_v49 = vpop.f32.mrf.mxu3 }
 0x518   : > { %11684 = vst [vmem:[%s15072_s29 + $0x3e0] sm:$0xff] %v6915_v63  ;;  %v6312_v25 = vadd.f32 %v6311_v49, %v6223_v33  ;;  %v12409_v63 = vor.u32 %v13337_v50, %v12408_v62 }
 0x519   : > { %v6491_v31 = vpop.f32.mrf.mxu1 }
 0x51a   : > { %v6401_v21 = vadd.f32 %v6400_v23, %v6312_v25  ;;  %8729 = vmatpush.bf16.msra.mxu0 %v12409_v63 }
 0x51c   : > { %v6490_v1 = vadd.f32 %v6489_v61, %v6401_v21  ;;  %v6224_v39 = vpop.f32.mrf.mxu2 }
 0x51d   : > { %v6225_v30 = vadd.f32 %v6224_v39, %v15047_v14 }
 0x51e   : > { %v6917_v10 = vmax.f32 %v6490_v1, 0.0  ;;  %v6405_v52 = vpop.f32.mrf.mxu0 }
 0x51f   : > { %v6313_v6 = vpop.f32.mrf.mxu3 }
 0x520   : > { %11686 = vst [vmem:[%s15072_s29 + $0x440] sm:$0xff] %v6917_v10  ;;  %v6314_v13 = vadd.f32 %v6313_v6, %v6225_v30 }
 0x521   : > { %v6494_v41 = vpop.f32.mrf.mxu1  ;;  %6542 = vmatmul.bf16.gmra.mxu2 %v16243_v57  ;;  %6720 = vmatmul.bf16.gmra.mxu0 %v16245_v4 }
 0x522   : > { %v6403_v33 = vadd.f32 %v6402_v44, %v6314_v13  ;;  %v12472_v44 = vld [vmem:[#allocation9 + $0x6e0] sm:$0xf] }
 0x523   : > { %v12473_v3 = vor.u32 %v13353_v9, %v12472_v44 }
 0x524   : > { %v6492_v23 = vadd.f32 %v6491_v31, %v6403_v33  ;;  %6631 = vmatmul.bf16.gmra.mxu3 %v16248_v28  ;;  %6809 = vmatmul.bf16.gmra.mxu1 %v16251_v43  ;;  %v6227_v61 = vpop.f32.mrf.mxu2  ;;  %v12272_v33 = vld [vmem:[#allocation9 + $0x550] sm:$0xf] }
 0x525   : > { %v6228_v25 = vadd.f32 %v6227_v61, %v15047_v14  ;;  %8818 = vmatpush.bf16.msra.mxu1 %v12473_v3  ;;  %v12400_v3 = vld [vmem:[#allocation9 + $0x650] sm:$0xf] }
 0x526   : > { %v6919_v49 = vmax.f32 %v6492_v23, 0.0  ;;  %v6407_v51 = vpop.f32.mrf.mxu0  ;;  %v13303_v23 = vld [vmem:[#allocation9 + $0x554] sm:$0xf0] }
 0x527   : > { %v6316_v56 = vpop.f32.mrf.mxu3 }
 0x528   : > { %11688 = vst [vmem:[%s15072_s29 + $0x460] sm:$0xff] %v6919_v49  ;;  %v6317_v42 = vadd.f32 %v6316_v56, %v6228_v25  ;;  %v12336_v49 = vld [vmem:[#allocation9 + $0x5d0] sm:$0xf] }
 0x529   : > { %v6496_v57 = vpop.f32.mrf.mxu1 }
 0x52a   : > { %v6406_v4 = vadd.f32 %v6405_v52, %v6317_v42 }
 0x52c   : > { %v6495_v31 = vadd.f32 %v6494_v41, %v6406_v4  ;;  %v6229_v21 = vpop.f32.mrf.mxu2  ;;  %v13335_v4 = vld [vmem:[#allocation9 + $0x654] sm:$0xf0] }
 0x52d   : > { %v6230_v43 = vadd.f32 %v6229_v21, %v15047_v14  ;;  %v12401_v21 = vor.u32 %v13335_v4, %v12400_v3 }
 0x52e   : > { %v6921_v28 = vmax.f32 %v6495_v31, 0.0  ;;  %v6410_v1 = vpop.f32.mrf.mxu0 }
 0x52f   : > { %v6318_v26 = vpop.f32.mrf.mxu3  ;;  %8730 = vmatpush.bf16.msra.mxu0 %v12401_v21 }
 0x530   : > { %11690 = vst [vmem:[%s15072_s29 + $0x4c0] sm:$0xff] %v6921_v28  ;;  %v6319_v39 = vadd.f32 %v6318_v26, %v6230_v43 }
 0x531   : > { %v6499_v10 = vpop.f32.mrf.mxu1  ;;  %6547 = vmatmul.bf16.gmra.mxu2 %v16259_v45  ;;  %6725 = vmatmul.bf16.gmra.mxu0 %v16261_v46  ;;  %v12273_v45 = vor.u32 %v13303_v23, %v12272_v33  ;;  %v13319_v46 = vld [vmem:[#allocation9 + $0x5d4] sm:$0xf0] }
 0x532   : > { %v6408_v30 = vadd.f32 %v6407_v51, %v6319_v39  ;;  %v12337_v56 = vor.u32 %v13319_v46, %v12336_v49 }
 0x533   : > { %8552 = vmatpush.bf16.msra.mxu2 %v12273_v45 }
 0x534   : > { %v6497_v6 = vadd.f32 %v6496_v57, %v6408_v30  ;;  %6636 = vmatmul.bf16.gmra.mxu3 %v16264_v32  ;;  %6814 = vmatmul.bf16.gmra.mxu1 %v16267_v58  ;;  %v6232_v52 = vpop.f32.mrf.mxu2 }
 0x535   : > { %v6233_v62 = vadd.f32 %v6232_v52, %v15047_v14  ;;  %8641 = vmatpush.bf16.msra.mxu3 %v12337_v56  ;;  %v12464_v52 = vld [vmem:[#allocation9 + $0x6d0] sm:$0xf] }
 0x536   : > { %v6923_v13 = vmax.f32 %v6497_v6, 0.0  ;;  %v6412_v41 = vpop.f32.mrf.mxu0 }
 0x537   : > { %v6321_v50 = vpop.f32.mrf.mxu3 }
 0x538   : > { %11692 = vst [vmem:[%s15072_s29 + $0x4e0] sm:$0xff] %v6923_v13  ;;  %v6322_v63 = vadd.f32 %v6321_v50, %v6233_v62  ;;  %v13351_v13 = vld [vmem:[#allocation9 + $0x6d4] sm:$0xf0] }
 0x539   : > { %v6501_v61 = vpop.f32.mrf.mxu1  ;;  %v12465_v62 = vor.u32 %v13351_v13, %v12464_v52 }
 0x53a   : > { %v6411_v25 = vadd.f32 %v6410_v1, %v6322_v63 }
 0x53b   : > { %8819 = vmatpush.bf16.msra.mxu1 %v12465_v62 }
 0x53c   : > { %v6500_v32 = vadd.f32 %v6499_v10, %v6411_v25  ;;  %v6234_v58 = vpop.f32.mrf.mxu2 }
 0x53d   : > { %v6235_v42 = vadd.f32 %v6234_v58, %v15047_v14 }
 0x53e   : > { %v6925_v51 = vmax.f32 %v6500_v32, 0.0  ;;  %v6415_v9 = vpop.f32.mrf.mxu0 }
 0x53f   : > { %v6323_v44 = vpop.f32.mrf.mxu3 }
 0x540   : > { %11694 = vst [vmem:[%s15072_s29 + $0x540] sm:$0xff] %v6925_v51  ;;  %v6324_v57 = vadd.f32 %v6323_v44, %v6235_v42  ;;  %v12264_v42 = vld [vmem:[#allocation9 + $0x540] sm:$0xf]  ;;  %v13301_v44 = vld [vmem:[#allocation9 + $0x544] sm:$0xf0] }
 0x541   : > { %v6504_v31 = vpop.f32.mrf.mxu1  ;;  %6552 = vmatmul.bf16.gmra.mxu2 %v16275_v47  ;;  %6730 = vmatmul.bf16.gmra.mxu0 %v16277_v11 }
 0x542   : > { %v6413_v28 = vadd.f32 %v6412_v41, %v6324_v57  ;;  %v12328_v57 = vld [vmem:[#allocation9 + $0x5c0] sm:$0xf] }
 0x544   : > { %v6502_v43 = vadd.f32 %v6501_v61, %v6413_v28  ;;  %6641 = vmatmul.bf16.gmra.mxu3 %v16280_v38  ;;  %6819 = vmatmul.bf16.gmra.mxu1 %v16283_v17  ;;  %v6237_v26 = vpop.f32.mrf.mxu2 }
 0x545   : > { %v6238_v39 = vadd.f32 %v6237_v26, %v15047_v14 }
 0x546   : > { %v6927_v1 = vmax.f32 %v6502_v43, 0.0  ;;  %v6417_v30 = vpop.f32.mrf.mxu0 }
 0x547   : > { %v6326_v10 = vpop.f32.mrf.mxu3 }
 0x548   : > { %11696 = vst [vmem:[%s15072_s29 + $0x560] sm:$0xff] %v6927_v1  ;;  %v6327_v6 = vadd.f32 %v6326_v10, %v6238_v39  ;;  %v12392_v1 = vld [vmem:[#allocation9 + $0x640] sm:$0xf]  ;;  %v13333_v39 = vld [vmem:[#allocation9 + $0x644] sm:$0xf0] }
 0x549   : > { %v6506_v47 = vpop.f32.mrf.mxu1 }
 0x54a   : > { %v6416_v11 = vadd.f32 %v6415_v9, %v6327_v6 }
 0x54c   : > { %v6505_v50 = vadd.f32 %v6504_v31, %v6416_v11  ;;  %v6239_v41 = vpop.f32.mrf.mxu2 }
 0x54d   : > { %v6240_v17 = vadd.f32 %v6239_v41, %v15047_v14 }
 0x54e   : > { %v6929_v38 = vmax.f32 %v6505_v50, 0.0  ;;  %v6420_v33 = vpop.f32.mrf.mxu0 }
 0x54f   : > { %v6328_v63 = vpop.f32.mrf.mxu3 }
 0x550   : > { %11698 = vst [vmem:[%s15072_s29 + $0x5c0] sm:$0xff] %v6929_v38  ;;  %v6329_v23 = vadd.f32 %v6328_v63, %v6240_v17  ;;  %v12456_v38 = vld [vmem:[#allocation9 + $0x6c0] sm:$0xf]  ;;  %v13349_v17 = vld [vmem:[#allocation9 + $0x6c4] sm:$0xf0] }
 0x551   : > { %v6509_v61 = vpop.f32.mrf.mxu1  ;;  %6557 = vmatmul.bf16.gmra.mxu2 %v16291_v60  ;;  %6735 = vmatmul.bf16.gmra.mxu0 %v16293_v59  ;;  %v12265_v60 = vor.u32 %v13301_v44, %v12264_v42  ;;  %v13317_v59 = vld [vmem:[#allocation9 + $0x5c4] sm:$0xf0]  ;;  %v12457_v63 = vor.u32 %v13349_v17, %v12456_v38  ;;  %v13347_v38 = vld [vmem:[#allocation9 + $0x6b4] sm:$0xf0] }
 0x552   : > { %v6418_v45 = vadd.f32 %v6417_v30, %v6329_v23  ;;  %v12329_v4 = vor.u32 %v13317_v59, %v12328_v57  ;;  %v12393_v30 = vor.u32 %v13333_v39, %v12392_v1  ;;  %v13299_v57 = vld [vmem:[#allocation9 + $0x534] sm:$0xf0] }
 0x553   : > { %8553 = vmatpush.bf16.msra.mxu2 %v12265_v60  ;;  %8820 = vmatpush.bf16.msra.mxu1 %v12457_v63  ;;  %v12256_v60 = vld [vmem:[#allocation9 + $0x530] sm:$0xf]  ;;  %v13331_v1 = vld [vmem:[#allocation9 + $0x634] sm:$0xf0] }
 0x554   : > { %v6507_v49 = vadd.f32 %v6506_v47, %v6418_v45  ;;  %6646 = vmatmul.bf16.gmra.mxu3 %v16296_v7  ;;  %6824 = vmatmul.bf16.gmra.mxu1 %v16299_v19  ;;  %v6242_v46 = vpop.f32.mrf.mxu2 }
 0x555   : > { %v6243_v56 = vadd.f32 %v6242_v46, %v15047_v14  ;;  %8642 = vmatpush.bf16.msra.mxu3 %v12329_v4  ;;  %8731 = vmatpush.bf16.msra.mxu0 %v12393_v30 }
 0x556   : > { %v6931_v25 = vmax.f32 %v6507_v49, 0.0  ;;  %v6422_v58 = vpop.f32.mrf.mxu0 }
 0x557   : > { %v6331_v32 = vpop.f32.mrf.mxu3 }
 0x558   : > { %11700 = vst [vmem:[%s15072_s29 + $0x5e0] sm:$0xff] %v6931_v25  ;;  %v6332_v51 = vadd.f32 %v6331_v32, %v6243_v56 }
 0x559   : > { %v6511_v9 = vpop.f32.mrf.mxu1 }
 0x55a   : > { %v6421_v3 = vadd.f32 %v6420_v33, %v6332_v51 }
 0x55c   : > { %v6510_v7 = vadd.f32 %v6509_v61, %v6421_v3  ;;  %v6244_v19 = vpop.f32.mrf.mxu2  ;;  %v12320_v3 = vld [vmem:[#allocation9 + $0x5b0] sm:$0xf] }
 0x55d   : > { %v6245_v21 = vadd.f32 %v6244_v19, %v15047_v14 }
 0x55e   : > { %v6933_v31 = vmax.f32 %v6510_v7, 0.0  ;;  %v6425_v43 = vpop.f32.mrf.mxu0 }
 0x55f   : > { %v6333_v28 = vpop.f32.mrf.mxu3 }
 0x560   : > { %11702 = vst [vmem:[%s15072_s29 + $0x640] sm:$0xff] %v6933_v31  ;;  %v6334_v26 = vadd.f32 %v6333_v28, %v6245_v21 }
 0x561   : > { %v6514_v10 = vpop.f32.mrf.mxu1  ;;  %6562 = vmatmul.bf16.gmra.mxu2 %v16307_v2  ;;  %6740 = vmatmul.bf16.gmra.mxu0 %v16309_v20 }
 0x562   : > { %v6423_v6 = vadd.f32 %v6422_v58, %v6334_v26  ;;  %v12384_v26 = vld [vmem:[#allocation9 + $0x630] sm:$0xf] }
 0x564   : > { %v6512_v52 = vadd.f32 %v6511_v9, %v6423_v6  ;;  %6651 = vmatmul.bf16.gmra.mxu3 %v16312_v55  ;;  %6829 = vmatmul.bf16.gmra.mxu1 %v16315_v36  ;;  %v6247_v13 = vpop.f32.mrf.mxu2 }
 0x565   : > { %v6248_v62 = vadd.f32 %v6247_v13, %v15047_v14 }
 0x566   : > { %v6935_v47 = vmax.f32 %v6512_v52, 0.0  ;;  %v6427_v50 = vpop.f32.mrf.mxu0 }
 0x567   : > { %v6336_v11 = vpop.f32.mrf.mxu3 }
 0x568   : > { %11704 = vst [vmem:[%s15072_s29 + $0x660] sm:$0xff] %v6935_v47  ;;  %v6337_v41 = vadd.f32 %v6336_v11, %v6248_v62 }
 0x569   : > { %v6516_v2 = vpop.f32.mrf.mxu1 }
 0x56a   : > { %v6426_v20 = vadd.f32 %v6425_v43, %v6337_v41  ;;  %v12448_v41 = vld [vmem:[#allocation9 + $0x6b0] sm:$0xf] }
 0x56b   : > { %v12449_v17 = vor.u32 %v13347_v38, %v12448_v41 }
 0x56c   : > { %v6515_v33 = vadd.f32 %v6514_v10, %v6426_v20  ;;  %v6249_v23 = vpop.f32.mrf.mxu2  ;;  %v12385_v10 = vor.u32 %v13331_v1, %v12384_v26 }
 0x56d   : > { %v6250_v36 = vadd.f32 %v6249_v23, %v15047_v14  ;;  %8821 = vmatpush.bf16.msra.mxu1 %v12449_v17 }
 0x56e   : > { %v6937_v55 = vmax.f32 %v6515_v33, 0.0  ;;  %v6430_v45 = vpop.f32.mrf.mxu0  ;;  %8732 = vmatpush.bf16.msra.mxu0 %v12385_v10 }
 0x56f   : > { %v6338_v61 = vpop.f32.mrf.mxu3 }
 0x570   : > { %11706 = vst [vmem:[%s15072_s29 + $0x6c0] sm:$0xff] %v6937_v55  ;;  %v6339_v49 = vadd.f32 %v6338_v61, %v6250_v36 }
 0x571   : > { %v6519_v46 = vpop.f32.mrf.mxu1  ;;  %6567 = vmatmul.bf16.gmra.mxu2 %v16323_v34  ;;  %6745 = vmatmul.bf16.gmra.mxu0 %v16325_v29  ;;  %v12257_v34 = vor.u32 %v13299_v57, %v12256_v60  ;;  %v13315_v29 = vld [vmem:[#allocation9 + $0x5b4] sm:$0xf0] }
 0x572   : > { %v6428_v25 = vadd.f32 %v6427_v50, %v6339_v49  ;;  %v12321_v7 = vor.u32 %v13315_v29, %v12320_v3 }
 0x573   : > { %8554 = vmatpush.bf16.msra.mxu2 %v12257_v34 }
 0x574   : > { %v6517_v56 = vadd.f32 %v6516_v2, %v6428_v25  ;;  %6656 = vmatmul.bf16.gmra.mxu3 %v16328_v0  ;;  %6834 = vmatmul.bf16.gmra.mxu1 %v16331_v12  ;;  %v6252_v32 = vpop.f32.mrf.mxu2 }
 0x575   : > { %v6253_v51 = vadd.f32 %v6252_v32, %v15047_v14  ;;  %8643 = vmatpush.bf16.msra.mxu3 %v12321_v7  ;;  %v13329_v7 = vld [vmem:[#allocation9 + $0x624] sm:$0xf0] }
 0x576   : > { %v6939_v58 = vmax.f32 %v6517_v56, 0.0  ;;  %v6432_v44 = vpop.f32.mrf.mxu0 }
 0x577   : > { %v6341_v42 = vpop.f32.mrf.mxu3 }
 0x578   : > { %11708 = vst [vmem:[%s15072_s29 + $0x6e0] sm:$0xff] %v6939_v58  ;;  %v6342_v9 = vadd.f32 %v6341_v42, %v6253_v51  ;;  %v12248_v58 = vld [vmem:[#allocation9 + $0x520] sm:$0xf]  ;;  %v13297_v51 = vld [vmem:[#allocation9 + $0x524] sm:$0xf0] }
 0x579   : > { %v6521_v59 = vpop.f32.mrf.mxu1 }
 0x57a   : > { %v6431_v4 = vadd.f32 %v6430_v45, %v6342_v9 }
 0x57c   : > { %v6520_v0 = vadd.f32 %v6519_v46, %v6431_v4  ;;  %v6254_v12 = vpop.f32.mrf.mxu2  ;;  %v12376_v4 = vld [vmem:[#allocation9 + $0x620] sm:$0xf] }
 0x57d   : > { %v6255_v31 = vadd.f32 %v6254_v12, %v15047_v14  ;;  %v12377_v12 = vor.u32 %v13329_v7, %v12376_v4  ;;  %v18417_v4 = vld [vmem:[#allocation29_spill] sm:$0xff]  ;;  %v18418_v7 = vld [vmem:[#allocation22_spill] sm:$0xff] }
 0x57e   : > { %v6941_v19 = vmax.f32 %v6520_v0, 0.0  ;;  %v6435_v28 = vpop.f32.mrf.mxu0 }
 0x57f   : > { %v6343_v21 = vpop.f32.mrf.mxu3  ;;  %8733 = vmatpush.bf16.msra.mxu0 %v12377_v12  ;;  %v18419_v12 = vld [vmem:[#allocation31_spill] sm:$0xff] }
 0x580   : > { %11710 = vst [vmem:[%s15072_s29 + $0x740] sm:$0xff] %v6941_v19  ;;  %v6344_v43 = vadd.f32 %v6343_v21, %v6255_v31  ;;  %v18411_v21 = vld [vmem:[#allocation66_spill] sm:$0xff] }
 0x581   : > { %v6524_v39 = vpop.f32.mrf.mxu1  ;;  %6572 = vmatmul.bf16.gmra.mxu2 %v16339_v53  ;;  %6750 = vmatmul.bf16.gmra.mxu0 %v16341_v24 }
 0x582   : > { %v6433_v30 = vadd.f32 %v6432_v44, %v6344_v43  ;;  %v12312_v44 = vld [vmem:[#allocation9 + $0x5a0] sm:$0xf] }
 0x584   : > { %v6522_v6 = vadd.f32 %v6521_v59, %v6433_v30  ;;  %6661 = vmatmul.bf16.gmra.mxu3 %v16344_v8  ;;  %6839 = vmatmul.bf16.gmra.mxu1 %v16347_v16  ;;  %v6257_v52 = vpop.f32.mrf.mxu2 }
 0x585   : > { %v6258_v47 = vadd.f32 %v6257_v52, %v15047_v14  ;;  %v13345_v52 = vld [vmem:[#allocation9 + $0x6a4] sm:$0xf0] }
 0x586   : > { %v6943_v13 = vmax.f32 %v6522_v6, 0.0  ;;  %v6437_v11 = vpop.f32.mrf.mxu0  ;;  %v12440_v6 = vld [vmem:[#allocation9 + $0x6a0] sm:$0xf] }
 0x587   : > { %v6346_v62 = vpop.f32.mrf.mxu3 }
 0x588   : > { %11712 = vst [vmem:[%s15072_s29 + $0x760] sm:$0xff] %v6943_v13  ;;  %v6347_v50 = vadd.f32 %v6346_v62, %v6258_v47  ;;  %v12441_v13 = vor.u32 %v13345_v52, %v12440_v6 }
 0x589   : > { %v6526_v53 = vpop.f32.mrf.mxu1 }
 0x58a   : > { %v6436_v24 = vadd.f32 %v6435_v28, %v6347_v50  ;;  %v18412_v28 = vld [vmem:[#allocation25_spill] sm:$0xff]  ;;  %8822 = vmatpush.bf16.msra.mxu1 %v12441_v13 }
 0x58c   : > { %v6525_v2 = vadd.f32 %v6524_v39, %v6436_v24  ;;  %v6259_v63 = vpop.f32.mrf.mxu2 }
 0x58d   : > { %v6260_v16 = vadd.f32 %v6259_v63, %v15047_v14  ;;  %v18414_v63 = vld [vmem:[#allocation23_spill] sm:$0xff] }
 0x58e   : > { %v6945_v8 = vmax.f32 %v6525_v2, 0.0  ;;  %v6716_v33 = vpop.f32.mrf.mxu0  ;;  %v18413_v2 = vld [vmem:[#allocation24_spill] sm:$0xff] }
 0x58f   : > { %v6348_v20 = vpop.f32.mrf.mxu3 }
 0x590   : > { %11714 = vst [vmem:[%s15072_s29 + $0x7c0] sm:$0xff] %v6945_v8  ;;  %v6349_v23 = vadd.f32 %v6348_v20, %v6260_v16  ;;  %v18415_v16 = vld [vmem:[#allocation27_spill] sm:$0xff]  ;;  %v18416_v20 = vld [vmem:[#allocation21_spill] sm:$0xff] }
 0x591   : > { %v6805_v55 = vpop.f32.mrf.mxu1  ;;  %6577 = vmatmul.bf16.gmra.mxu2 %v16355_v37  ;;  %6755 = vmatmul.bf16.gmra.mxu0 %v16357_v54  ;;  %v12249_v37 = vor.u32 %v13297_v51, %v12248_v58  ;;  %v13313_v54 = vld [vmem:[#allocation9 + $0x5a4] sm:$0xf0]  ;;  %v13311_v58 = vld [vmem:[#allocation9 + $0x594] sm:$0xf0] }
 0x592   : > { %v6438_v36 = vadd.f32 %v6437_v11, %v6349_v23  ;;  %v12313_v60 = vor.u32 %v13313_v54, %v12312_v44 }
 0x593   : > { %8555 = vmatpush.bf16.msra.mxu2 %v12249_v37 }
 0x594   : > { %v6527_v61 = vadd.f32 %v6526_v53, %v6438_v36  ;;  %6666 = vmatmul.bf16.gmra.mxu3 %v16360_v18  ;;  %6844 = vmatmul.bf16.gmra.mxu1 %v16363_v5  ;;  %v6538_v45 = vpop.f32.mrf.mxu2 }
 0x595   : > { %v6539_v46 = vadd.f32 %v6538_v45, %v15024_v40  ;;  %8644 = vmatpush.bf16.msra.mxu3 %v12313_v60 }
 0x596   : > { %v6947_v49 = vmax.f32 %v6527_v61, 0.0  ;;  %v6718_v56 = vpop.f32.mrf.mxu0 }
 0x597   : > { %v6627_v25 = vpop.f32.mrf.mxu3 }
 0x598   : > { %11716 = vst [vmem:[%s15072_s29 + $0x7e0] sm:$0xff] %v6947_v49  ;;  %v6628_v32 = vadd.f32 %v6627_v25, %v6539_v46  ;;  %v12240_v49 = vld [vmem:[#allocation9 + $0x510] sm:$0xf]  ;;  %v13295_v46 = vld [vmem:[#allocation9 + $0x514] sm:$0xf0] }
 0x599   : > { %v6807_v42 = vpop.f32.mrf.mxu1 }
 0x59a   : > { %v6717_v9 = vadd.f32 %v6716_v33, %v6628_v32  ;;  %v12304_v32 = vld [vmem:[#allocation9 + $0x590] sm:$0xf] }
 0x59c   : > { %v6806_v18 = vadd.f32 %v6805_v55, %v6717_v9  ;;  %v6540_v5 = vpop.f32.mrf.mxu2 }
 0x59d   : > { %v6541_v59 = vadd.f32 %v6540_v5, %v15024_v40 }
 0x59e   : > { %v6886_v57 = vmax.f32 %v6806_v18, 0.0  ;;  %v6721_v3 = vpop.f32.mrf.mxu0 }
 0x59f   : > { %v6629_v34 = vpop.f32.mrf.mxu3 }
 0x5a0   : > { %11655 = vst [vmem:[%s15072_s29 + $0x48] sm:$0xff] %v6886_v57  ;;  %v6630_v29 = vadd.f32 %v6629_v34, %v6541_v59  ;;  %v12368_v57 = vld [vmem:[#allocation9 + $0x610] sm:$0xf]  ;;  %v13327_v59 = vld [vmem:[#allocation9 + $0x614] sm:$0xf0] }
 0x5a1   : > { %v6810_v0 = vpop.f32.mrf.mxu1  ;;  %6582 = vmatmul.bf16.gmra.mxu2 %v16371_v35  ;;  %6760 = vmatmul.bf16.gmra.mxu0 %v16373_v48 }
 0x5a2   : > { %v6719_v19 = vadd.f32 %v6718_v56, %v6630_v29  ;;  %v12241_v56 = vor.u32 %v13295_v46, %v12240_v49  ;;  %v12296_v46 = vld [vmem:[#allocation9 + $0x580] sm:$0xf] }
 0x5a4   : > { %v6808_v31 = vadd.f32 %v6807_v42, %v6719_v19  ;;  %6671 = vmatmul.bf16.gmra.mxu3 %v18411_v21  ;;  %6849 = vmatmul.bf16.gmra.mxu1 %v18412_v28  ;;  %v6543_v43 = vpop.f32.mrf.mxu2  ;;  %v12305_v42 = vor.u32 %v13311_v58, %v12304_v32  ;;  %v18420_v19 = vld [vmem:[#allocation33_spill] sm:$0xff] }
 0x5a5   : > { %v6544_v1 = vadd.f32 %v6543_v43, %v15024_v40  ;;  %8556 = vmatpush.bf16.msra.mxu2 %v12241_v56 }
 0x5a6   : > { %v6888_v26 = vmax.f32 %v6808_v31, 0.0  ;;  %v6723_v10 = vpop.f32.mrf.mxu0  ;;  %8645 = vmatpush.bf16.msra.mxu3 %v12305_v42 }
 0x5a7   : > { %v6632_v39 = vpop.f32.mrf.mxu3 }
 0x5a8   : > { %11657 = vst [vmem:[%s15072_s29 + $0x68] sm:$0xff] %v6888_v26  ;;  %v6633_v30 = vadd.f32 %v6632_v39, %v6544_v1  ;;  %v12432_v39 = vld [vmem:[#allocation9 + $0x690] sm:$0xf] }
 0x5a9   : > { %v6812_v35 = vpop.f32.mrf.mxu1 }
 0x5aa   : > { %v6722_v48 = vadd.f32 %v6721_v3, %v6633_v30  ;;  %v12369_v3 = vor.u32 %v13327_v59, %v12368_v57 }
 0x5ac   : > { %v6811_v47 = vadd.f32 %v6810_v0, %v6722_v48  ;;  %v6545_v62 = vpop.f32.mrf.mxu2  ;;  %8734 = vmatpush.bf16.msra.mxu0 %v12369_v3  ;;  %v18426_v3 = vld [vmem:[#allocation32_spill] sm:$0xff] }
 0x5ad   : > { %v6546_v50 = vadd.f32 %v6545_v62, %v15024_v40 }
 0x5ae   : > { %v6890_v11 = vmax.f32 %v6811_v47, 0.0  ;;  %v6726_v38 = vpop.f32.mrf.mxu0 }
 0x5af   : > { %v6634_v41 = vpop.f32.mrf.mxu3 }
 0x5b0   : > { %11659 = vst [vmem:[%s15072_s29 + $0xc8] sm:$0xff] %v6890_v11  ;;  %v6635_v53 = vadd.f32 %v6634_v41, %v6546_v50 }
 0x5b1   : > { %v6815_v17 = vpop.f32.mrf.mxu1  ;;  %6587 = vmatmul.bf16.gmra.mxu2 %v18413_v2  ;;  %6765 = vmatmul.bf16.gmra.mxu0 %v18414_v63  ;;  %v18423_v2 = vld [vmem:[#allocation36_spill] sm:$0xff]  ;;  %v18424_v63 = vld [vmem:[#allocation30_spill] sm:$0xff] }
 0x5b2   : > { %v6724_v24 = vadd.f32 %v6723_v10, %v6635_v53  ;;  %v13343_v10 = vld [vmem:[#allocation9 + $0x694] sm:$0xf0]  ;;  %v18421_v53 = vld [vmem:[#allocation26_spill] sm:$0xff] }
 0x5b3   : > { %v12433_v6 = vor.u32 %v13343_v10, %v12432_v39 }
 0x5b4   : > { %v6813_v8 = vadd.f32 %v6812_v35, %v6724_v24  ;;  %6676 = vmatmul.bf16.gmra.mxu3 %v18415_v16  ;;  %6854 = vmatmul.bf16.gmra.mxu1 %v18416_v20  ;;  %v6548_v33 = vpop.f32.mrf.mxu2 }
 0x5b5   : > { %v6549_v55 = vadd.f32 %v6548_v33, %v15024_v40  ;;  %8823 = vmatpush.bf16.msra.mxu1 %v12433_v6 }
 0x5b6   : > { %v6892_v23 = vmax.f32 %v6813_v8, 0.0  ;;  %v6728_v61 = vpop.f32.mrf.mxu0 }
 0x5b7   : > { %v6637_v36 = vpop.f32.mrf.mxu3 }
 0x5b8   : > { %11661 = vst [vmem:[%s15072_s29 + $0xe8] sm:$0xff] %v6892_v23  ;;  %v6638_v45 = vadd.f32 %v6637_v36, %v6549_v55  ;;  %v12232_v36 = vld [vmem:[#allocation9 + $0x500] sm:$0xf] }
 0x5b9   : > { %v6817_v25 = vpop.f32.mrf.mxu1 }
 0x5ba   : > { %v6727_v51 = vadd.f32 %v6726_v38, %v6638_v45 }
 0x5bc   : > { %v6816_v37 = vadd.f32 %v6815_v17, %v6727_v51  ;;  %v6550_v44 = vpop.f32.mrf.mxu2  ;;  %v18422_v17 = vld [vmem:[#allocation28_spill] sm:$0xff] }
 0x5bd   : > { %v6551_v9 = vadd.f32 %v6550_v44, %v15024_v40 }
 0x5be   : > { %v6894_v54 = vmax.f32 %v6816_v37, 0.0  ;;  %v6731_v18 = vpop.f32.mrf.mxu0 }
 0x5bf   : > { %v6639_v60 = vpop.f32.mrf.mxu3 }
 0x5c0   : > { %11663 = vst [vmem:[%s15072_s29 + $0x148] sm:$0xff] %v6894_v54  ;;  %v6640_v5 = vadd.f32 %v6639_v60, %v6551_v9  ;;  %v12360_v60 = vld [vmem:[#allocation9 + $0x600] sm:$0xf] }
 0x5c1   : > { %v6820_v34 = vpop.f32.mrf.mxu1  ;;  %6592 = vmatmul.bf16.gmra.mxu2 %v18417_v4  ;;  %6770 = vmatmul.bf16.gmra.mxu0 %v18418_v7  ;;  %v18427_v4 = vld [vmem:[#allocation48_spill] sm:$0xff]  ;;  %v18428_v7 = vld [vmem:[#allocation51_spill] sm:$0xff] }
 0x5c2   : > { %v6729_v29 = vadd.f32 %v6728_v61, %v6640_v5  ;;  %v13293_v61 = vld [vmem:[#allocation9 + $0x504] sm:$0xf0] }
 0x5c3   : > { %v12233_v49 = vor.u32 %v13293_v61, %v12232_v36  ;;  %v12608_v61 = vld [vmem:[#allocation9 + $0x7f0] sm:$0xf] }
 0x5c4   : > { %v6818_v0 = vadd.f32 %v6817_v25, %v6729_v29  ;;  %6681 = vmatmul.bf16.gmra.mxu3 %v18419_v12  ;;  %6859 = vmatmul.bf16.gmra.mxu1 %v18420_v19  ;;  %v6553_v31 = vpop.f32.mrf.mxu2  ;;  %v13309_v25 = vld [vmem:[#allocation9 + $0x584] sm:$0xf0] }
 0x5c5   : > { %v6554_v28 = vadd.f32 %v6553_v31, %v15024_v40  ;;  %v12297_v32 = vor.u32 %v13309_v25, %v12296_v46  ;;  %8557 = vmatpush.bf16.msra.mxu2 %v12233_v49 }
 0x5c6   : > { %v6896_v21 = vmax.f32 %v6818_v0, 0.0  ;;  %v6733_v26 = vpop.f32.mrf.mxu0 }
 0x5c7   : > { %v6642_v43 = vpop.f32.mrf.mxu3  ;;  %8646 = vmatpush.bf16.msra.mxu3 %v12297_v32 }
 0x5c8   : > { %11665 = vst [vmem:[%s15072_s29 + $0x168] sm:$0xff] %v6896_v21  ;;  %v6643_v1 = vadd.f32 %v6642_v43, %v6554_v28  ;;  %v12424_v43 = vld [vmem:[#allocation9 + $0x680] sm:$0xf] }
 0x5c9   : > { %v6822_v30 = vpop.f32.mrf.mxu1 }
 0x5ca   : > { %v6732_v52 = vadd.f32 %v6731_v18, %v6643_v1  ;;  %v13325_v18 = vld [vmem:[#allocation9 + $0x604] sm:$0xf0] }
 0x5cb   : > { %v12361_v57 = vor.u32 %v13325_v18, %v12360_v60 }
 0x5cc   : > { %v6821_v35 = vadd.f32 %v6820_v34, %v6732_v52  ;;  %v6555_v13 = vpop.f32.mrf.mxu2  ;;  %v18425_v34 = vld [vmem:[#allocation42_spill] sm:$0xff] }
 0x5cd   : > { %v6556_v47 = vadd.f32 %v6555_v13, %v15024_v40  ;;  %8735 = vmatpush.bf16.msra.mxu0 %v12361_v57  ;;  %v18433_v57 = vld [vmem:[#allocation45_spill] sm:$0xff] }
 0x5ce   : > { %v6898_v48 = vmax.f32 %v6821_v35, 0.0  ;;  %v6736_v11 = vpop.f32.mrf.mxu0 }
 0x5cf   : > { %v6644_v62 = vpop.f32.mrf.mxu3 }
 0x5d0   : > { %11667 = vst [vmem:[%s15072_s29 + $0x1c8] sm:$0xff] %v6898_v48  ;;  %v6645_v50 = vadd.f32 %v6644_v62, %v6556_v47 }
 0x5d1   : > { %v6825_v41 = vpop.f32.mrf.mxu1  ;;  %6597 = vmatmul.bf16.gmra.mxu2 %v18421_v53  ;;  %6775 = vmatmul.bf16.gmra.mxu0 %v18422_v17  ;;  %v18431_v53 = vld [vmem:[#allocation60_spill] sm:$0xff]  ;;  %v18432_v17 = vld [vmem:[#allocation65_spill] sm:$0xff] }
 0x5d2   : > { %v6734_v38 = vadd.f32 %v6733_v26, %v6645_v50  ;;  %v13341_v26 = vld [vmem:[#allocation9 + $0x684] sm:$0xf0] }
 0x5d3   : > { %v12425_v39 = vor.u32 %v13341_v26, %v12424_v43  ;;  %v18429_v50 = vld [vmem:[#allocation34_spill] sm:$0xff] }
 0x5d4   : > { %v6823_v24 = vadd.f32 %v6822_v30, %v6734_v38  ;;  %6686 = vmatmul.bf16.gmra.mxu3 %v18423_v2  ;;  %6864 = vmatmul.bf16.gmra.mxu1 %v18424_v63  ;;  %v6558_v8 = vpop.f32.mrf.mxu2 }
 0x5d5   : > { %v6559_v20 = vadd.f32 %v6558_v8, %v15024_v40  ;;  %8824 = vmatpush.bf16.msra.mxu1 %v12425_v39 }
 0x5d6   : > { %v6900_v16 = vmax.f32 %v6823_v24, 0.0  ;;  %v6738_v23 = vpop.f32.mrf.mxu0 }
 0x5d7   : > { %v6647_v33 = vpop.f32.mrf.mxu3 }
 0x5d8   : > { %11669 = vst [vmem:[%s15072_s29 + $0x1e8] sm:$0xff] %v6900_v16  ;;  %v6648_v55 = vadd.f32 %v6647_v33, %v6559_v20  ;;  %v12544_v33 = vld [vmem:[#allocation9 + $0x770] sm:$0xf] }
 0x5d9   : > { %v6827_v45 = vpop.f32.mrf.mxu1 }
 0x5da   : > { %v6737_v56 = vadd.f32 %v6736_v11, %v6648_v55 }
 0x5dc   : > { %v6826_v58 = vadd.f32 %v6825_v41, %v6737_v56  ;;  %v6560_v51 = vpop.f32.mrf.mxu2  ;;  %v18430_v41 = vld [vmem:[#allocation41_spill] sm:$0xff] }
 0x5dd   : > { %v6561_v37 = vadd.f32 %v6560_v51, %v15024_v40 }
 0x5de   : > { %v6902_v42 = vmax.f32 %v6826_v58, 0.0  ;;  %v6741_v54 = vpop.f32.mrf.mxu0 }
 0x5df   : > { %v6649_v44 = vpop.f32.mrf.mxu3 }
 0x5e0   : > { %11671 = vst [vmem:[%s15072_s29 + $0x248] sm:$0xff] %v6902_v42  ;;  %v6650_v9 = vadd.f32 %v6649_v44, %v6561_v37  ;;  %v12672_v44 = vld [vmem:[#allocation9 + $0x870] sm:$0xf] }
 0x5e1   : > { %v6830_v5 = vpop.f32.mrf.mxu1  ;;  %6602 = vmatmul.bf16.gmra.mxu2 %v18425_v34  ;;  %6780 = vmatmul.bf16.gmra.mxu0 %v18426_v3 }
 0x5e2   : > { %v6739_v59 = vadd.f32 %v6738_v23, %v6650_v9  ;;  %v13371_v23 = vld [vmem:[#allocation9 + $0x774] sm:$0xf0] }
 0x5e3   : > { %v12545_v36 = vor.u32 %v13371_v23, %v12544_v33  ;;  %v13369_v33 = vld [vmem:[#allocation9 + $0x764] sm:$0xf0] }
 0x5e4   : > { %v6828_v29 = vadd.f32 %v6827_v45, %v6739_v59  ;;  %6691 = vmatmul.bf16.gmra.mxu3 %v18427_v4  ;;  %6869 = vmatmul.bf16.gmra.mxu1 %v18428_v7  ;;  %v6563_v0 = vpop.f32.mrf.mxu2  ;;  %v13387_v45 = vld [vmem:[#allocation9 + $0x7f4] sm:$0xf0] }
 0x5e5   : > { %v6564_v19 = vadd.f32 %v6563_v0, %v15024_v40  ;;  %v12609_v46 = vor.u32 %v13387_v45, %v12608_v61  ;;  %8906 = vmatpush.bf16.msrb.mxu2 %v12545_v36  ;;  %v12736_v0 = vld [vmem:[#allocation9 + $0x8f0] sm:$0xf]  ;;  %v12600_v36 = vld [vmem:[#allocation9 + $0x7e0] sm:$0xf]  ;;  %v13385_v61 = vld [vmem:[#allocation9 + $0x7e4] sm:$0xf0] }
 0x5e6   : > { %v6904_v12 = vmax.f32 %v6828_v29, 0.0  ;;  %v6743_v21 = vpop.f32.mrf.mxu0 }
 0x5e7   : > { %v6652_v31 = vpop.f32.mrf.mxu3  ;;  %8995 = vmatpush.bf16.msrb.mxu3 %v12609_v46 }
 0x5e8   : > { %11673 = vst [vmem:[%s15072_s29 + $0x268] sm:$0xff] %v6904_v12  ;;  %v6653_v28 = vadd.f32 %v6652_v31, %v6564_v19  ;;  %v13419_v12 = vld [vmem:[#allocation9 + $0x8f4] sm:$0xf0] }
 0x5e9   : > { %v6832_v1 = vpop.f32.mrf.mxu1 }
 0x5ea   : > { %v6742_v10 = vadd.f32 %v6741_v54, %v6653_v28  ;;  %v13403_v54 = vld [vmem:[#allocation9 + $0x874] sm:$0xf0]  ;;  %v13169_v28 = vld [vmem:[#allocation2 + $0x24] sm:$0xf0] }
 0x5eb   : > { %v12673_v60 = vor.u32 %v13403_v54, %v12672_v44  ;;  %v11754_v54 = vld [vmem:[#allocation2 + $0x60] sm:$0xf0] }
 0x5ec   : > { %v6831_v30 = vadd.f32 %v6830_v5, %v6742_v10  ;;  %v6565_v6 = vpop.f32.mrf.mxu2 }
 0x5ed   : > { %v6566_v35 = vadd.f32 %v6565_v6, %v15024_v40  ;;  %9084 = vmatpush.bf16.msrb.mxu0 %v12673_v60  ;;  %v11728_v6 = vld [vmem:[#allocation2 + $0x8] sm:$0xf]  ;;  %v11762_v60 = vld [vmem:[#allocation2 + $0x68] sm:$0xf0] }
 0x5ee   : > { %v6906_v52 = vmax.f32 %v6831_v30, 0.0  ;;  %v6746_v48 = vpop.f32.mrf.mxu0  ;;  %v11722_v30 = vld [vmem:[#allocation2 + $0x20] sm:$0xf0] }
 0x5ef   : > { %v6654_v13 = vpop.f32.mrf.mxu3 }
 0x5f0   : > { %11675 = vst [vmem:[%s15072_s29 + $0x2c8] sm:$0xff] %v6906_v52  ;;  %v6655_v47 = vadd.f32 %v6654_v13, %v6566_v35  ;;  %v11730_v52 = vld [vmem:[#allocation2 + $0x28] sm:$0xf0] }
 0x5f1   : > { %v6835_v62 = vpop.f32.mrf.mxu1  ;;  %6607 = vmatmul.bf16.gmra.mxu2 %v18429_v50  ;;  %6785 = vmatmul.bf16.gmra.mxu0 %v18430_v41 }
 0x5f2   : > { %v6744_v11 = vadd.f32 %v6743_v21, %v6655_v47 }
 0x5f4   : > { %v6833_v38 = vadd.f32 %v6832_v1, %v6744_v11  ;;  %6696 = vmatmul.bf16.gmra.mxu3 %v18431_v53  ;;  %6874 = vmatmul.bf16.gmra.mxu1 %v18432_v17  ;;  %v6568_v24 = vpop.f32.mrf.mxu2  ;;  %v11720_v1 = vld [vmem:[#allocation2] sm:$0xf]  ;;  %v13165_v11 = vld [vmem:[#allocation2 + $0xc] sm:$0xf] }
 0x5f5   : > { %v6569_v63 = vadd.f32 %v6568_v24, %v15024_v40 }
 0x5f6   : > { %v6908_v2 = vmax.f32 %v6833_v38, 0.0  ;;  %v6748_v16 = vpop.f32.mrf.mxu0  ;;  %v16619_v38 = vor.u32 %v13165_v11, %v11730_v52 }
 0x5f7   : > { %v6657_v8 = vpop.f32.mrf.mxu3 }
 0x5f8   : > { %11677 = vst [vmem:[%s15072_s29 + $0x2e8] sm:$0xff] %v6908_v2  ;;  %v6658_v20 = vadd.f32 %v6657_v8, %v6569_v63 }
 0x5f9   : > { %v6837_v55 = vpop.f32.mrf.mxu1 }
 0x5fa   : > { %v6747_v49 = vadd.f32 %v6746_v48, %v6658_v20  ;;  %v16613_v48 = vor.u32 %v13169_v28, %v11728_v6  ;;  %v12536_v20 = vld [vmem:[#allocation9 + $0x760] sm:$0xf] }
 0x5fc   : > { %v6836_v25 = vadd.f32 %v6835_v62, %v6747_v49  ;;  %v6570_v56 = vpop.f32.mrf.mxu2  ;;  %v13164_v62 = vld [vmem:[#allocation2 + $0x4] sm:$0xf]  ;;  %v12601_v49 = vor.u32 %v13385_v61, %v12600_v36 }
 0x5fd   : > { %v6571_v58 = vadd.f32 %v6570_v56, %v15024_v40  ;;  %v16616_v41 = vor.u32 %v13164_v62, %v11722_v30  ;;  %v13176_v56 = vld [vmem:[#allocation2 + $0x5c] sm:$0xf0] }
 0x5fe   : > { %v6910_v32 = vmax.f32 %v6836_v25, 0.0  ;;  %v6751_v42 = vpop.f32.mrf.mxu0  ;;  %8996 = vmatpush.bf16.msrb.mxu3 %v12601_v49 }
 0x5ff   : > { %v6659_v51 = vpop.f32.mrf.mxu3 }
 0x600   : > { %11679 = vst [vmem:[%s15072_s29 + $0x348] sm:$0xff] %v6910_v32  ;;  %v6660_v37 = vadd.f32 %v6659_v51, %v6571_v58  ;;  %v13177_v32 = vld [vmem:[#allocation2 + $0x64] sm:$0xf0] }
 0x601   : > { %v6840_v9 = vpop.f32.mrf.mxu1  ;;  %6612 = vmatmul.bf16.gmra.mxu2 %v16469_v22  ;;  %6790 = vmatmul.bf16.gmra.mxu0 %v16466_v27  ;;  %v12737_v22 = vor.u32 %v13419_v12, %v12736_v0 }
 0x602   : > { %v6749_v18 = vadd.f32 %v6748_v16, %v6660_v37 }
 0x603   : > { %9173 = vmatpush.bf16.msrb.mxu1 %v12737_v22 }
 0x604   : > { %v6838_v5 = vadd.f32 %v6837_v55, %v6749_v18  ;;  %6701 = vmatmul.bf16.gmra.mxu3 %v16474_v15  ;;  %6879 = vmatmul.bf16.gmra.mxu1 %v18433_v57  ;;  %v6573_v59 = vpop.f32.mrf.mxu2  ;;  %v13168_v15 = vld [vmem:[#allocation2 + $0x1c] sm:$0xf0]  ;;  %v12537_v55 = vor.u32 %v13369_v33, %v12536_v20 }
 0x605   : > { %v6574_v3 = vadd.f32 %v6573_v59, %v15024_v40  ;;  %v16611_v13 = vor.u32 %v13168_v15, %v11720_v1  ;;  %v12664_v59 = vld [vmem:[#allocation9 + $0x860] sm:$0xf]  ;;  %v13417_v1 = vld [vmem:[#allocation9 + $0x8e4] sm:$0xf0] }
 0x606   : > { %v6912_v34 = vmax.f32 %v6838_v5, 0.0  ;;  %v6753_v4 = vpop.f32.mrf.mxu0  ;;  %8907 = vmatpush.bf16.msrb.mxu2 %v12537_v55  ;;  %v13181_v55 = vld [vmem:[#allocation2 + $0x8c] sm:$0xf] }
 0x607   : > { %v6662_v29 = vpop.f32.mrf.mxu3 }
 0x608   : > { %11681 = vst [vmem:[%s15072_s29 + $0x368] sm:$0xff] %v6912_v34  ;;  %v6663_v7 = vadd.f32 %v6662_v29, %v6574_v3  ;;  %v13401_v34 = vld [vmem:[#allocation9 + $0x864] sm:$0xf0]  ;;  %v13172_v29 = vld [vmem:[#allocation2 + $0x44] sm:$0xf] }
 0x609   : > { %v6842_v19 = vpop.f32.mrf.mxu1  ;;  %v16632_v12 = vor.u32 %v13172_v29, %v11754_v54  ;;  %v13192_v29 = vld [vmem:[#allocation2 + $0xdc] sm:$0xf0] }
 0x60a   : > { %v6752_v27 = vadd.f32 %v6751_v42, %v6663_v7  ;;  %v11752_v42 = vld [vmem:[#allocation2 + $0x40] sm:$0xf]  ;;  %v12665_v7 = vor.u32 %v13401_v34, %v12664_v59 }
 0x60b   : > { %v16627_v5 = vor.u32 %v13176_v56, %v11752_v42  ;;  %18435 = vst [vmem:[#allocation54_spill] sm:$0xff] %v16632_v12  ;;  %v12528_v42 = vld [vmem:[#allocation9 + $0x750] sm:$0xf] }
 0x60c   : > { %v6841_v31 = vadd.f32 %v6840_v9, %v6752_v27  ;;  %v6575_v21 = vpop.f32.mrf.mxu2  ;;  %v11760_v9 = vld [vmem:[#allocation2 + $0x48] sm:$0xf]  ;;  %9085 = vmatpush.bf16.msrb.mxu0 %v12665_v7 }
 0x60d   : > { %v6576_v26 = vadd.f32 %v6575_v21, %v15024_v40  ;;  %v16629_v57 = vor.u32 %v13177_v32, %v11760_v9  ;;  %v12592_v9 = vld [vmem:[#allocation9 + $0x7d0] sm:$0xf] }
 0x60e   : > { %v6914_v43 = vmax.f32 %v6841_v31, 0.0  ;;  %v6756_v10 = vpop.f32.mrf.mxu0 }
 0x60f   : > { %v6664_v39 = vpop.f32.mrf.mxu3  ;;  %18434 = vst [vmem:[#allocation50_spill] sm:$0xff] %v16629_v57 }
 0x610   : > { %11683 = vst [vmem:[%s15072_s29 + $0x3c8] sm:$0xff] %v6914_v43  ;;  %v6665_v35 = vadd.f32 %v6664_v39, %v6576_v26  ;;  %v12728_v26 = vld [vmem:[#allocation9 + $0x8e0] sm:$0xf] }
 0x611   : > { %v6845_v47 = vpop.f32.mrf.mxu1  ;;  %8558 = vmatmul.bf16.vlgmr.msra.gmra.mxu2 %v16611_v13  ;;  %8736 = vmatmul.bf16.vlgmr.msra.gmra.mxu0 %v16613_v48 }
 0x612   : > { %v6754_v50 = vadd.f32 %v6753_v4, %v6665_v35  ;;  %v13173_v4 = vld [vmem:[#allocation2 + $0x4c] sm:$0xf]  ;;  %v13184_v35 = vld [vmem:[#allocation2 + $0x9c] sm:$0xf0] }
 0x614   : > { %v6843_v53 = vadd.f32 %v6842_v19, %v6754_v50  ;;  %8647 = vmatmul.bf16.vlgmr.msra.gmra.mxu3 %v16616_v41  ;;  %8825 = vmatmul.bf16.vlgmr.msra.gmra.mxu1 %v16619_v38  ;;  %v6578_v17 = vpop.f32.mrf.mxu2  ;;  %v16635_v19 = vor.u32 %v13173_v4, %v11762_v60  ;;  %v11792_v50 = vld [vmem:[#allocation2 + $0x88] sm:$0xf]  ;;  %v13383_v60 = vld [vmem:[#allocation9 + $0x7d4] sm:$0xf0] }
 0x615   : > { %v6579_v2 = vadd.f32 %v6578_v17, %v15024_v40  ;;  %v12593_v59 = vor.u32 %v13383_v60, %v12592_v9  ;;  %v13193_v4 = vld [vmem:[#allocation2 + $0xe4] sm:$0xf0]  ;;  %v11850_v9 = vld [vmem:[#allocation2 + $0x120] sm:$0xf0]  ;;  %v11858_v60 = vld [vmem:[#allocation2 + $0x128] sm:$0xf0] }
 0x616   : > { %v6916_v24 = vmax.f32 %v6843_v53, 0.0  ;;  %v6758_v8 = vpop.f32.mrf.mxu0  ;;  %18436 = vst [vmem:[#allocation61_spill] sm:$0xff] %v16635_v19 }
 0x617   : > { %v6667_v63 = vpop.f32.mrf.mxu3  ;;  %8997 = vmatpush.bf16.msrb.mxu3 %v12593_v59 }
 0x618   : > { %11685 = vst [vmem:[%s15072_s29 + $0x3e8] sm:$0xff] %v6916_v24  ;;  %v6668_v16 = vadd.f32 %v6667_v63, %v6579_v2  ;;  %v11784_v24 = vld [vmem:[#allocation2 + $0x80] sm:$0xf]  ;;  %v11786_v2 = vld [vmem:[#allocation2 + $0xa0] sm:$0xf0] }
 0x619   : > { %v6847_v23 = vpop.f32.mrf.mxu1  ;;  %v11794_v63 = vld [vmem:[#allocation2 + $0xa8] sm:$0xf0] }
 0x61a   : > { %v6757_v45 = vadd.f32 %v6756_v10, %v6668_v16  ;;  %v12729_v10 = vor.u32 %v13417_v1, %v12728_v26  ;;  %v16643_v16 = vor.u32 %v13184_v35, %v11784_v24 }
 0x61c   : > { %v6846_v46 = vadd.f32 %v6845_v47, %v6757_v45  ;;  %v6580_v25 = vpop.f32.mrf.mxu2  ;;  %9174 = vmatpush.bf16.msrb.mxu1 %v12729_v10  ;;  %v13185_v47 = vld [vmem:[#allocation2 + $0xa4] sm:$0xf0]  ;;  %18437 = vst [vmem:[#allocation69_spill] sm:$0xff] %v16643_v16  ;;  %v16651_v45 = vor.u32 %v13181_v55, %v11794_v63  ;;  %v13399_v10 = vld [vmem:[#allocation9 + $0x854] sm:$0xf0] }
 0x61d   : > { %v6581_v51 = vadd.f32 %v6580_v25, %v15024_v40  ;;  %v16645_v20 = vor.u32 %v13185_v47, %v11792_v50 }
 0x61e   : > { %v6918_v58 = vmax.f32 %v6846_v46, 0.0  ;;  %v6761_v44 = vpop.f32.mrf.mxu0  ;;  %18440 = vst [vmem:[#allocation43_spill] sm:$0xff] %v16651_v45 }
 0x61f   : > { %v6669_v37 = vpop.f32.mrf.mxu3  ;;  %18438 = vst [vmem:[#allocation73_spill] sm:$0xff] %v16645_v20 }
 0x620   : > { %11687 = vst [vmem:[%s15072_s29 + $0x448] sm:$0xff] %v6918_v58  ;;  %v6670_v18 = vadd.f32 %v6669_v37, %v6581_v51  ;;  %v13367_v37 = vld [vmem:[#allocation9 + $0x754] sm:$0xf0] }
 0x621   : > { %v6850_v3 = vpop.f32.mrf.mxu1  ;;  %8563 = vmatmul.bf16.gmra.mxu2 %v16627_v5  ;;  %8741 = vmatmul.bf16.gmra.mxu0 %v16629_v57  ;;  %v12529_v54 = vor.u32 %v13367_v37, %v12528_v42  ;;  %v11856_v42 = vld [vmem:[#allocation2 + $0x108] sm:$0xf] }
 0x622   : > { %v6759_v0 = vadd.f32 %v6758_v8, %v6670_v18 }
 0x623   : > { %8908 = vmatpush.bf16.msrb.mxu2 %v12529_v54  ;;  %v11848_v54 = vld [vmem:[#allocation2 + $0x100] sm:$0xf] }
 0x624   : > { %v6848_v22 = vadd.f32 %v6847_v23, %v6759_v0  ;;  %8652 = vmatmul.bf16.gmra.mxu3 %v16632_v12  ;;  %8830 = vmatmul.bf16.gmra.mxu1 %v16635_v19  ;;  %v6583_v27 = vpop.f32.mrf.mxu2  ;;  %v13180_v23 = vld [vmem:[#allocation2 + $0x84] sm:$0xf]  ;;  %v11970_v12 = vld [vmem:[#allocation2 + $0x1f8] sm:$0xf0] }
 0x625   : > { %v6584_v21 = vadd.f32 %v6583_v27, %v15024_v40  ;;  %v16648_v61 = vor.u32 %v13180_v23, %v11786_v2  ;;  %v13415_v23 = vld [vmem:[#allocation9 + $0x8d4] sm:$0xf0] }
 0x626   : > { %v6920_v31 = vmax.f32 %v6848_v22, 0.0  ;;  %v6763_v28 = vpop.f32.mrf.mxu0  ;;  %v11824_v22 = vld [vmem:[#allocation2 + $0xc8] sm:$0xf] }
 0x627   : > { %v6672_v15 = vpop.f32.mrf.mxu3  ;;  %18439 = vst [vmem:[#allocation44_spill] sm:$0xff] %v16648_v61  ;;  %v16661_v1 = vor.u32 %v13193_v4, %v11824_v22  ;;  %v13197_v4 = vld [vmem:[#allocation2 + $0x10c] sm:$0xf] }
 0x628   : > { %11689 = vst [vmem:[%s15072_s29 + $0x468] sm:$0xff] %v6920_v31  ;;  %v6673_v43 = vadd.f32 %v6672_v15, %v6584_v21  ;;  %v11816_v21 = vld [vmem:[#allocation2 + $0xc0] sm:$0xf]  ;;  %v11818_v15 = vld [vmem:[#allocation2 + $0xe0] sm:$0xf0]  ;;  %v16683_v22 = vor.u32 %v13197_v4, %v11858_v60 }
 0x629   : > { %v6852_v39 = vpop.f32.mrf.mxu1  ;;  %v16659_v26 = vor.u32 %v13192_v29, %v11816_v21  ;;  %18442 = vst [vmem:[#allocation46_spill] sm:$0xff] %v16661_v1  ;;  %v13196_v29 = vld [vmem:[#allocation2 + $0x104] sm:$0xf] }
 0x62a   : > { %v6762_v30 = vadd.f32 %v6761_v44, %v6673_v43  ;;  %18448 = vst [vmem:[#allocation17_spill] sm:$0xff] %v16683_v22 }
 0x62b   : > { %18441 = vst [vmem:[#allocation47_spill] sm:$0xff] %v16659_v26 }
 0x62c   : > { %v6851_v6 = vadd.f32 %v6850_v3, %v6762_v30  ;;  %v6585_v52 = vpop.f32.mrf.mxu2 }
 0x62d   : > { %v6586_v11 = vadd.f32 %v6585_v52, %v15024_v40  ;;  %v13189_v52 = vld [vmem:[#allocation2 + $0xcc] sm:$0xf] }
 0x62e   : > { %v6922_v62 = vmax.f32 %v6851_v6, 0.0  ;;  %v6766_v17 = vpop.f32.mrf.mxu0  ;;  %v13188_v6 = vld [vmem:[#allocation2 + $0xc4] sm:$0xf] }
 0x62f   : > { %v6674_v53 = vpop.f32.mrf.mxu3 }
 0x630   : > { %11691 = vst [vmem:[%s15072_s29 + $0x4c8] sm:$0xff] %v6922_v62  ;;  %v6675_v8 = vadd.f32 %v6674_v53, %v6586_v11  ;;  %v16664_v62 = vor.u32 %v13188_v6, %v11818_v15 }
 0x631   : > { %v6855_v33 = vpop.f32.mrf.mxu1  ;;  %8568 = vmatmul.bf16.gmra.mxu2 %v16643_v16  ;;  %8746 = vmatmul.bf16.gmra.mxu0 %v16645_v20  ;;  %v13352_v16 = vld [vmem:[#allocation9 + $0x6e4] sm:$0xf] }
 0x632   : > { %v6764_v36 = vadd.f32 %v6763_v28, %v6675_v8  ;;  %v11826_v28 = vld [vmem:[#allocation2 + $0xe8] sm:$0xf0]  ;;  %18443 = vst [vmem:[#allocation49_spill] sm:$0xff] %v16664_v62 }
 0x633   : > { %v16667_v11 = vor.u32 %v13189_v52, %v11826_v28 }
 0x634   : > { %v6853_v49 = vadd.f32 %v6852_v39, %v6764_v36  ;;  %8657 = vmatmul.bf16.gmra.mxu3 %v16648_v61  ;;  %8835 = vmatmul.bf16.gmra.mxu1 %v16651_v45  ;;  %v6588_v46 = vpop.f32.mrf.mxu2  ;;  %v12656_v39 = vld [vmem:[#allocation9 + $0x850] sm:$0xf]  ;;  %v13179_v61 = vld [vmem:[#allocation2 + $0x74] sm:$0xf0] }
 0x635   : > { %v6589_v56 = vadd.f32 %v6588_v46, %v15024_v40  ;;  %v12657_v35 = vor.u32 %v13399_v10, %v12656_v39  ;;  %18444 = vst [vmem:[#allocation53_spill] sm:$0xff] %v16667_v11  ;;  %v12520_v10 = vld [vmem:[#allocation9 + $0x740] sm:$0xf]  ;;  %v13178_v45 = vld [vmem:[#allocation2 + $0x6c] sm:$0xf0] }
 0x636   : > { %v6924_v25 = vmax.f32 %v6853_v49, 0.0  ;;  %v6768_v58 = vpop.f32.mrf.mxu0 }
 0x637   : > { %v6677_v32 = vpop.f32.mrf.mxu3  ;;  %9086 = vmatpush.bf16.msrb.mxu0 %v12657_v35  ;;  %v12584_v35 = vld [vmem:[#allocation9 + $0x7c0] sm:$0xf] }
 0x638   : > { %11693 = vst [vmem:[%s15072_s29 + $0x4e8] sm:$0xff] %v6924_v25  ;;  %v6678_v51 = vadd.f32 %v6677_v32, %v6589_v56  ;;  %v13200_v56 = vld [vmem:[#allocation2 + $0x11c] sm:$0xf0]  ;;  %v13201_v32 = vld [vmem:[#allocation2 + $0x124] sm:$0xf0] }
 0x639   : > { %v6857_v44 = vpop.f32.mrf.mxu1  ;;  %v16675_v59 = vor.u32 %v13200_v56, %v11848_v54  ;;  %v13205_v54 = vld [vmem:[#allocation2 + $0x14c] sm:$0xf] }
 0x63a   : > { %v6767_v18 = vadd.f32 %v6766_v17, %v6678_v51 }
 0x63b   : > { %18445 = vst [vmem:[#allocation52_spill] sm:$0xff] %v16675_v59 }
 0x63c   : > { %v6856_v34 = vadd.f32 %v6855_v33, %v6767_v18  ;;  %v6590_v3 = vpop.f32.mrf.mxu2  ;;  %v12720_v33 = vld [vmem:[#allocation9 + $0x8d0] sm:$0xf] }
 0x63d   : > { %v6591_v0 = vadd.f32 %v6590_v3, %v15024_v40  ;;  %v12721_v36 = vor.u32 %v13415_v23, %v12720_v33  ;;  %v11888_v23 = vld [vmem:[#allocation2 + $0x148] sm:$0xf] }
 0x63e   : > { %v6926_v7 = vmax.f32 %v6856_v34, 0.0  ;;  %v6771_v31 = vpop.f32.mrf.mxu0  ;;  %v16677_v34 = vor.u32 %v13201_v32, %v11856_v42  ;;  %v13397_v42 = vld [vmem:[#allocation9 + $0x844] sm:$0xf0] }
 0x63f   : > { %v6679_v27 = vpop.f32.mrf.mxu3  ;;  %9175 = vmatpush.bf16.msrb.mxu1 %v12721_v36 }
 0x640   : > { %11695 = vst [vmem:[%s15072_s29 + $0x548] sm:$0xff] %v6926_v7  ;;  %v6680_v43 = vadd.f32 %v6679_v27, %v6591_v0  ;;  %v16680_v0 = vor.u32 %v13196_v29, %v11850_v9 }
 0x641   : > { %v6860_v30 = vpop.f32.mrf.mxu1  ;;  %8573 = vmatmul.bf16.gmra.mxu2 %v16659_v26  ;;  %8751 = vmatmul.bf16.gmra.mxu0 %v16661_v1  ;;  %18446 = vst [vmem:[#allocation56_spill] sm:$0xff] %v16677_v34 }
 0x642   : > { %v6769_v47 = vadd.f32 %v6768_v58, %v6680_v43  ;;  %18447 = vst [vmem:[#allocation55_spill] sm:$0xff] %v16680_v0 }
 0x644   : > { %v6858_v50 = vadd.f32 %v6857_v44, %v6769_v47  ;;  %8662 = vmatmul.bf16.gmra.mxu3 %v16664_v62  ;;  %8840 = vmatmul.bf16.gmra.mxu1 %v16667_v11  ;;  %v6593_v53 = vpop.f32.mrf.mxu2  ;;  %v13381_v47 = vld [vmem:[#allocation9 + $0x7c4] sm:$0xf0]  ;;  %v12482_v11 = vld [vmem:[#allocation9 + $0x6f8] sm:$0xf0] }
 0x645   : > { %v6594_v24 = vadd.f32 %v6593_v53, %v15024_v40  ;;  %v12585_v53 = vor.u32 %v13381_v47, %v12584_v35  ;;  %v13216_v35 = vld [vmem:[#allocation2 + $0x19c] sm:$0xf0]  ;;  %v13217_v47 = vld [vmem:[#allocation2 + $0x1a4] sm:$0xf0] }
 0x646   : > { %v6928_v17 = vmax.f32 %v6858_v50, 0.0  ;;  %v6773_v63 = vpop.f32.mrf.mxu0 }
 0x647   : > { %v6682_v2 = vpop.f32.mrf.mxu3  ;;  %8998 = vmatpush.bf16.msrb.mxu3 %v12585_v53 }
 0x648   : > { %11697 = vst [vmem:[%s15072_s29 + $0x568] sm:$0xff] %v6928_v17  ;;  %v6683_v8 = vadd.f32 %v6682_v2, %v6594_v24  ;;  %v13208_v2 = vld [vmem:[#allocation2 + $0x15c] sm:$0xf0] }
 0x649   : > { %v6862_v55 = vpop.f32.mrf.mxu1 }
 0x64a   : > { %v6772_v49 = vadd.f32 %v6771_v31, %v6683_v8 }
 0x64c   : > { %v6861_v46 = vadd.f32 %v6860_v30, %v6772_v49  ;;  %v6595_v25 = vpop.f32.mrf.mxu2  ;;  %v13365_v30 = vld [vmem:[#allocation9 + $0x744] sm:$0xf0]  ;;  %v11880_v49 = vld [vmem:[#allocation2 + $0x140] sm:$0xf] }
 0x64d   : > { %v6596_v51 = vadd.f32 %v6595_v25, %v15024_v40  ;;  %v12521_v52 = vor.u32 %v13365_v30, %v12520_v10  ;;  %v11890_v25 = vld [vmem:[#allocation2 + $0x168] sm:$0xf0]  ;;  %v16691_v32 = vor.u32 %v13208_v2, %v11880_v49 }
 0x64e   : > { %v6930_v58 = vmax.f32 %v6861_v46, 0.0  ;;  %v6776_v44 = vpop.f32.mrf.mxu0  ;;  %v11882_v46 = vld [vmem:[#allocation2 + $0x160] sm:$0xf0] }
 0x64f   : > { %v6684_v37 = vpop.f32.mrf.mxu3  ;;  %8909 = vmatpush.bf16.msrb.mxu2 %v12521_v52  ;;  %18449 = vst [vmem:[#allocation58_spill] sm:$0xff] %v16691_v32 }
 0x650   : > { %11699 = vst [vmem:[%s15072_s29 + $0x5c8] sm:$0xff] %v6930_v58  ;;  %v6685_v18 = vadd.f32 %v6684_v37, %v6596_v51  ;;  %v12648_v51 = vld [vmem:[#allocation9 + $0x840] sm:$0xf] }
 0x651   : > { %v6865_v3 = vpop.f32.mrf.mxu1  ;;  %8578 = vmatmul.bf16.gmra.mxu2 %v16675_v59  ;;  %8756 = vmatmul.bf16.gmra.mxu0 %v16677_v34  ;;  %v12649_v9 = vor.u32 %v13397_v42, %v12648_v51  ;;  %v13354_v59 = vld [vmem:[#allocation9 + $0x6f4] sm:$0xf] }
 0x652   : > { %v6774_v7 = vadd.f32 %v6773_v63, %v6685_v18  ;;  %v13209_v63 = vld [vmem:[#allocation2 + $0x164] sm:$0xf0]  ;;  %v12485_v62 = vor.u32 %v13354_v59, %v12482_v11  ;;  %v11736_v59 = vld [vmem:[#allocation2 + $0x10] sm:$0xf] }
 0x653   : > { %v16693_v58 = vor.u32 %v13209_v63, %v11888_v23  ;;  %9087 = vmatpush.bf16.msrb.mxu0 %v12649_v9  ;;  %v11912_v63 = vld [vmem:[#allocation2 + $0x180] sm:$0xf] }
 0x654   : > { %v6863_v27 = vadd.f32 %v6862_v55, %v6774_v7  ;;  %8667 = vmatmul.bf16.gmra.mxu3 %v16680_v0  ;;  %8845 = vmatmul.bf16.gmra.mxu1 %v16683_v22  ;;  %v6598_v31 = vpop.f32.mrf.mxu2  ;;  %v12200_v0 = vld [vmem:[#allocation2 + $0x3c0] sm:$0xf] }
 0x655   : > { %v6599_v15 = vadd.f32 %v6598_v31, %v15024_v40  ;;  %18450 = vst [vmem:[#allocation57_spill] sm:$0xff] %v16693_v58 }
 0x656   : > { %v6932_v21 = vmax.f32 %v6863_v27, 0.0  ;;  %v6778_v43 = vpop.f32.mrf.mxu0 }
 0x657   : > { %v6687_v28 = vpop.f32.mrf.mxu3 }
 0x658   : > { %11701 = vst [vmem:[%s15072_s29 + $0x5e8] sm:$0xff] %v6932_v21  ;;  %v6688_v39 = vadd.f32 %v6687_v28, %v6599_v15  ;;  %v12712_v28 = vld [vmem:[#allocation9 + $0x8c0] sm:$0xf] }
 0x659   : > { %v6867_v6 = vpop.f32.mrf.mxu1 }
 0x65a   : > { %v6777_v50 = vadd.f32 %v6776_v44, %v6688_v39  ;;  %v13204_v44 = vld [vmem:[#allocation2 + $0x144] sm:$0xf] }
 0x65b   : > { %v16696_v18 = vor.u32 %v13204_v44, %v11882_v46  ;;  %v13212_v46 = vld [vmem:[#allocation2 + $0x184] sm:$0xf] }
 0x65c   : > { %v6866_v17 = vadd.f32 %v6865_v3, %v6777_v50  ;;  %v6600_v24 = vpop.f32.mrf.mxu2  ;;  %v16699_v3 = vor.u32 %v13205_v54, %v11890_v25  ;;  %v13213_v25 = vld [vmem:[#allocation2 + $0x18c] sm:$0xf] }
 0x65d   : > { %v6601_v33 = vadd.f32 %v6600_v24, %v15024_v40  ;;  %18451 = vst [vmem:[#allocation18_spill] sm:$0xff] %v16696_v18 }
 0x65e   : > { %v6934_v8 = vmax.f32 %v6866_v17, 0.0  ;;  %v6781_v36 = vpop.f32.mrf.mxu0  ;;  %18452 = vst [vmem:[#allocation19_spill] sm:$0xff] %v16699_v3  ;;  %v11920_v17 = vld [vmem:[#allocation2 + $0x188] sm:$0xf] }
 0x65f   : > { %v6689_v55 = vpop.f32.mrf.mxu3  ;;  %v16709_v49 = vor.u32 %v13217_v47, %v11920_v17  ;;  %v13224_v47 = vld [vmem:[#allocation2 + $0x1dc] sm:$0xf0] }
 0x660   : > { %11703 = vst [vmem:[%s15072_s29 + $0x648] sm:$0xff] %v6934_v8  ;;  %v6690_v56 = vadd.f32 %v6689_v55, %v6601_v33  ;;  %v11914_v8 = vld [vmem:[#allocation2 + $0x1a0] sm:$0xf0]  ;;  %v11922_v33 = vld [vmem:[#allocation2 + $0x1a8] sm:$0xf0]  ;;  %v16707_v55 = vor.u32 %v13216_v35, %v11912_v63 }
 0x661   : > { %v6870_v37 = vpop.f32.mrf.mxu1  ;;  %8583 = vmatmul.bf16.gmra.mxu2 %v16691_v32  ;;  %8761 = vmatmul.bf16.gmra.mxu0 %v16693_v58  ;;  %18454 = vst [vmem:[#allocation62_spill] sm:$0xff] %v16709_v49  ;;  %v16712_v51 = vor.u32 %v13212_v46, %v11914_v8  ;;  %v16715_v42 = vor.u32 %v13213_v25, %v11922_v33  ;;  %v11944_v33 = vld [vmem:[#allocation2 + $0x1c0] sm:$0xf]  ;;  %v12208_v32 = vld [vmem:[#allocation2 + $0x3c8] sm:$0xf] }
 0x662   : > { %v6779_v60 = vadd.f32 %v6778_v43, %v6690_v56  ;;  %v13413_v43 = vld [vmem:[#allocation9 + $0x8c4] sm:$0xf0]  ;;  %18453 = vst [vmem:[#allocation63_spill] sm:$0xff] %v16707_v55  ;;  %v16723_v25 = vor.u32 %v13224_v47, %v11944_v33 }
 0x663   : > { %v12713_v10 = vor.u32 %v13413_v43, %v12712_v28  ;;  %18455 = vst [vmem:[#allocation68_spill] sm:$0xff] %v16712_v51  ;;  %v13379_v28 = vld [vmem:[#allocation9 + $0x7b4] sm:$0xf0] }
 0x664   : > { %v6868_v29 = vadd.f32 %v6867_v6, %v6779_v60  ;;  %8672 = vmatmul.bf16.gmra.mxu3 %v16696_v18  ;;  %8850 = vmatmul.bf16.gmra.mxu1 %v16699_v3  ;;  %v6603_v4 = vpop.f32.mrf.mxu2  ;;  %18456 = vst [vmem:[#allocation67_spill] sm:$0xff] %v16715_v42  ;;  %v13405_v3 = vld [vmem:[#allocation9 + $0x884] sm:$0xf0] }
 0x665   : > { %v6604_v27 = vadd.f32 %v6603_v4, %v15024_v40  ;;  %9176 = vmatpush.bf16.msrb.mxu1 %v12713_v10  ;;  %v12640_v10 = vld [vmem:[#allocation9 + $0x830] sm:$0xf]  ;;  %18457 = vst [vmem:[#allocation64_spill] sm:$0xff] %v16723_v25 }
 0x666   : > { %v6936_v7 = vmax.f32 %v6868_v29, 0.0  ;;  %v6783_v21 = vpop.f32.mrf.mxu0 }
 0x667   : > { %v6692_v31 = vpop.f32.mrf.mxu3 }
 0x668   : > { %11705 = vst [vmem:[%s15072_s29 + $0x668] sm:$0xff] %v6936_v7  ;;  %v6693_v15 = vadd.f32 %v6692_v31, %v6604_v27  ;;  %v12512_v7 = vld [vmem:[#allocation9 + $0x730] sm:$0xf]  ;;  %v13363_v27 = vld [vmem:[#allocation9 + $0x734] sm:$0xf0] }
 0x669   : > { %v6872_v39 = vpop.f32.mrf.mxu1 }
 0x66a   : > { %v6782_v30 = vadd.f32 %v6781_v36, %v6693_v15  ;;  %v12576_v15 = vld [vmem:[#allocation9 + $0x7b0] sm:$0xf] }
 0x66c   : > { %v6871_v6 = vadd.f32 %v6870_v37, %v6782_v30  ;;  %v6605_v52 = vpop.f32.mrf.mxu2  ;;  %v13395_v30 = vld [vmem:[#allocation9 + $0x834] sm:$0xf0] }
 0x66d   : > { %v6606_v53 = vadd.f32 %v6605_v52, %v15024_v40 }
 0x66e   : > { %v6938_v50 = vmax.f32 %v6871_v6, 0.0  ;;  %v6786_v2 = vpop.f32.mrf.mxu0  ;;  %v12641_v6 = vor.u32 %v13395_v30, %v12640_v10 }
 0x66f   : > { %v6694_v24 = vpop.f32.mrf.mxu3 }
 0x670   : > { %11707 = vst [vmem:[%s15072_s29 + $0x6c8] sm:$0xff] %v6938_v50  ;;  %v6695_v23 = vadd.f32 %v6694_v24, %v6606_v53  ;;  %v13225_v50 = vld [vmem:[#allocation2 + $0x1e4] sm:$0xf0]  ;;  %9088 = vmatpush.bf16.msrb.mxu0 %v12641_v6 }
 0x671   : > { %v6875_v36 = vpop.f32.mrf.mxu1  ;;  %8588 = vmatmul.bf16.gmra.mxu2 %v16707_v55  ;;  %8766 = vmatmul.bf16.gmra.mxu0 %v16709_v49  ;;  %v11952_v24 = vld [vmem:[#allocation2 + $0x1c8] sm:$0xf]  ;;  %v12680_v55 = vld [vmem:[#allocation9 + $0x880] sm:$0xf] }
 0x672   : > { %v6784_v56 = vadd.f32 %v6783_v21, %v6695_v23  ;;  %v12513_v21 = vor.u32 %v13363_v27, %v12512_v7  ;;  %v11954_v23 = vld [vmem:[#allocation2 + $0x1e8] sm:$0xf0]  ;;  %v13411_v7 = vld [vmem:[#allocation9 + $0x8b4] sm:$0xf0]  ;;  %v12681_v18 = vor.u32 %v13405_v3, %v12680_v55  ;;  %v13281_v3 = vld [vmem:[#allocation2 + $0x3a4] sm:$0xf0] }
 0x674   : > { %v6873_v37 = vadd.f32 %v6872_v39, %v6784_v56  ;;  %8677 = vmatmul.bf16.gmra.mxu3 %v16712_v51  ;;  %8855 = vmatmul.bf16.gmra.mxu1 %v16715_v42  ;;  %v6608_v44 = vpop.f32.mrf.mxu2  ;;  %v12577_v39 = vor.u32 %v13379_v28, %v12576_v15  ;;  %v16725_v56 = vor.u32 %v13225_v50, %v11952_v24  ;;  %v11984_v50 = vld [vmem:[#allocation2 + $0x208] sm:$0xf]  ;;  %v12136_v51 = vld [vmem:[#allocation2 + $0x340] sm:$0xf] }
 0x675   : > { %v6609_v9 = vadd.f32 %v6608_v44, %v15024_v40  ;;  %8910 = vmatpush.bf16.msrb.mxu2 %v12513_v21  ;;  %v13221_v44 = vld [vmem:[#allocation2 + $0x1cc] sm:$0xf] }
 0x676   : > { %v6940_v54 = vmax.f32 %v6873_v37, 0.0  ;;  %v6788_v29 = vpop.f32.mrf.mxu0  ;;  %8999 = vmatpush.bf16.msrb.mxu3 %v12577_v39  ;;  %18458 = vst [vmem:[#allocation59_spill] sm:$0xff] %v16725_v56  ;;  %v13220_v37 = vld [vmem:[#allocation2 + $0x1c4] sm:$0xf] }
 0x677   : > { %v6697_v60 = vpop.f32.mrf.mxu3 }
 0x678   : > { %11709 = vst [vmem:[%s15072_s29 + $0x6e8] sm:$0xff] %v6940_v54  ;;  %v6698_v4 = vadd.f32 %v6697_v60, %v6609_v9  ;;  %v16731_v60 = vor.u32 %v13221_v44, %v11954_v23  ;;  %v11978_v23 = vld [vmem:[#allocation2 + $0x220] sm:$0xf0] }
 0x679   : > { %v6877_v31 = vpop.f32.mrf.mxu1 }
 0x67a   : > { %v6787_v43 = vadd.f32 %v6786_v2, %v6698_v4  ;;  %v11946_v2 = vld [vmem:[#allocation2 + $0x1e0] sm:$0xf0]  ;;  %18460 = vst [vmem:[#allocation70_spill] sm:$0xff] %v16731_v60  ;;  %v12704_v4 = vld [vmem:[#allocation9 + $0x8b0] sm:$0xf] }
 0x67b   : > { %v16728_v9 = vor.u32 %v13220_v37, %v11946_v2  ;;  %v12705_v27 = vor.u32 %v13411_v7, %v12704_v4  ;;  %v11986_v37 = vld [vmem:[#allocation2 + $0x228] sm:$0xf0] }
 0x67c   : > { %v6876_v52 = vadd.f32 %v6875_v36, %v6787_v43  ;;  %v6610_v35 = vpop.f32.mrf.mxu2 }
 0x67d   : > { %v6611_v17 = vadd.f32 %v6610_v35, %v15024_v40  ;;  %18459 = vst [vmem:[#allocation71_spill] sm:$0xff] %v16728_v9  ;;  %9177 = vmatpush.bf16.msrb.mxu1 %v12705_v27  ;;  %v11976_v35 = vld [vmem:[#allocation2 + $0x200] sm:$0xf] }
 0x67e   : > { %v6942_v53 = vmax.f32 %v6876_v52, 0.0  ;;  %v6791_v8 = vpop.f32.mrf.mxu0 }
 0x67f   : > { %v6699_v63 = vpop.f32.mrf.mxu3 }
 0x680   : > { %11711 = vst [vmem:[%s15072_s29 + $0x748] sm:$0xff] %v6942_v53  ;;  %v6700_v46 = vadd.f32 %v6699_v63, %v6611_v17  ;;  %v13233_v53 = vld [vmem:[#allocation2 + $0x224] sm:$0xf0]  ;;  %v13228_v63 = vld [vmem:[#allocation2 + $0x204] sm:$0xf] }
 0x681   : > { %v6880_v36 = vpop.f32.mrf.mxu1  ;;  %8593 = vmatmul.bf16.gmra.mxu2 %v16723_v25  ;;  %8771 = vmatmul.bf16.gmra.mxu0 %v16725_v56  ;;  %v16746_v7 = vor.u32 %v13228_v63, %v11978_v23  ;;  %v12144_v25 = vld [vmem:[#allocation2 + $0x348] sm:$0xf] }
 0x682   : > { %v6789_v54 = vadd.f32 %v6788_v29, %v6700_v46  ;;  %v13229_v46 = vld [vmem:[#allocation2 + $0x20c] sm:$0xf] }
 0x683   : > { %18463 = vst [vmem:[#allocation25_spill] sm:$0xff] %v16746_v7  ;;  %v16749_v27 = vor.u32 %v13229_v46, %v11986_v37  ;;  %v12008_v46 = vld [vmem:[#allocation2 + $0x240] sm:$0xf] }
 0x684   : > { %v6878_v21 = vadd.f32 %v6877_v31, %v6789_v54  ;;  %8682 = vmatmul.bf16.gmra.mxu3 %v16728_v9  ;;  %8860 = vmatmul.bf16.gmra.mxu1 %v16731_v60  ;;  %v6613_v15 = vpop.f32.mrf.mxu2  ;;  %v13232_v31 = vld [vmem:[#allocation2 + $0x21c] sm:$0xf0]  ;;  %v13407_v60 = vld [vmem:[#allocation9 + $0x894] sm:$0xf0] }
 0x685   : > { %v6614_v28 = vadd.f32 %v6613_v15, %v15024_v40  ;;  %v16739_v54 = vor.u32 %v13232_v31, %v11976_v35  ;;  %18464 = vst [vmem:[#allocation24_spill] sm:$0xff] %v16749_v27  ;;  %v12504_v15 = vld [vmem:[#allocation9 + $0x720] sm:$0xf] }
 0x686   : > { %v6944_v29 = vmax.f32 %v6878_v21, 0.0  ;;  %v6793_v39 = vpop.f32.mrf.mxu0  ;;  %v13240_v37 = vld [vmem:[#allocation2 + $0x25c] sm:$0xf0] }
 0x687   : > { %v6702_v43 = vpop.f32.mrf.mxu3  ;;  %18461 = vst [vmem:[#allocation72_spill] sm:$0xff] %v16739_v54 }
 0x688   : > { %11713 = vst [vmem:[%s15072_s29 + $0x768] sm:$0xff] %v6944_v29  ;;  %v6703_v10 = vadd.f32 %v6702_v43, %v6614_v28  ;;  %v13361_v29 = vld [vmem:[#allocation9 + $0x724] sm:$0xf0]  ;;  %v12568_v28 = vld [vmem:[#allocation9 + $0x7a0] sm:$0xf] }
 0x689   : > { %v6882_v30 = vpop.f32.mrf.mxu1 }
 0x68a   : > { %v6792_v6 = vadd.f32 %v6791_v8, %v6703_v10  ;;  %v16741_v8 = vor.u32 %v13233_v53, %v11984_v50  ;;  %v12505_v10 = vor.u32 %v13361_v29, %v12504_v15 }
 0x68c   : > { %v6881_v52 = vadd.f32 %v6880_v36, %v6792_v6  ;;  %v6615_v47 = vpop.f32.mrf.mxu2  ;;  %18462 = vst [vmem:[#allocation66_spill] sm:$0xff] %v16741_v8  ;;  %8911 = vmatpush.bf16.msrb.mxu2 %v12505_v10  ;;  %v12018_v10 = vld [vmem:[#allocation2 + $0x268] sm:$0xf0] }
 0x68d   : > { %v6616_v24 = vadd.f32 %v6615_v47, %v15024_v40  ;;  %v12080_v40 = vld [vmem:[#allocation2 + $0x2c8] sm:$0xf] }
 0x68e   : > { %v6946_v17 = vmax.f32 %v6881_v52, 0.0  ;;  %v8737_v2 = vpop.f32.mrf.mxu0 }
 0x68f   : > { %v6704_v33 = vpop.f32.mrf.mxu3 }
 0x690   : > { %11715 = vst [vmem:[%s15072_s29 + $0x7c8] sm:$0xff] %v6946_v17  ;;  %v6705_v44 = vadd.f32 %v6704_v33, %v6616_v24  ;;  %v12632_v17 = vld [vmem:[#allocation9 + $0x820] sm:$0xf]  ;;  %v13393_v24 = vld [vmem:[#allocation9 + $0x824] sm:$0xf0] }
 0x691   : > { %v16743_v36 = vpop.f32.mrf.mxu1  ;;  %8598 = vmatmul.bf16.gmra.mxu2 %v16739_v54  ;;  %8776 = vmatmul.bf16.gmra.mxu0 %v16741_v8  ;;  %v12633_v63 = vor.u32 %v13393_v24, %v12632_v17  ;;  %v12016_v33 = vld [vmem:[#allocation2 + $0x248] sm:$0xf]  ;;  %v12696_v17 = vld [vmem:[#allocation9 + $0x8a0] sm:$0xf]  ;;  %v12688_v54 = vld [vmem:[#allocation9 + $0x890] sm:$0xf] }
 0x692   : > { %v6794_v4 = vadd.f32 %v6793_v39, %v6705_v44  ;;  %v13377_v39 = vld [vmem:[#allocation9 + $0x7a4] sm:$0xf0]  ;;  %v12689_v9 = vor.u32 %v13407_v60, %v12688_v54 }
 0x693   : > { %v12569_v35 = vor.u32 %v13377_v39, %v12568_v28  ;;  %v13241_v44 = vld [vmem:[#allocation2 + $0x264] sm:$0xf0]  ;;  %9089 = vmatpush.bf16.msrb.mxu0 %v12633_v63  ;;  %v13236_v28 = vld [vmem:[#allocation2 + $0x244] sm:$0xf] }
 0x694   : > { %v6883_v21 = vadd.f32 %v6882_v30, %v6794_v4  ;;  %8687 = vmatmul.bf16.gmra.mxu3 %v16746_v7  ;;  %8865 = vmatmul.bf16.gmra.mxu1 %v16749_v27  ;;  %v8559_v43 = vpop.f32.mrf.mxu2  ;;  %v13409_v24 = vld [vmem:[#allocation9 + $0x8a4] sm:$0xf0]  ;;  %v12072_v7 = vld [vmem:[#allocation2 + $0x2c0] sm:$0xf] }
 0x695   : > { %v8560_v52 = vadd.f32 %v8559_v43, %v15047_v14  ;;  %9000 = vmatpush.bf16.msrb.mxu3 %v12569_v35  ;;  %v12010_v43 = vld [vmem:[#allocation2 + $0x260] sm:$0xf0]  ;;  %v12697_v63 = vor.u32 %v13409_v24, %v12696_v17  ;;  %v13245_v17 = vld [vmem:[#allocation2 + $0x28c] sm:$0xf]  ;;  %v13265_v60 = vld [vmem:[#allocation2 + $0x324] sm:$0xf0] }
 0x696   : > { %v6948_v6 = vmax.f32 %v6883_v21, 0.0  ;;  %v8739_v31 = vpop.f32.mrf.mxu0  ;;  %v13237_v21 = vld [vmem:[#allocation2 + $0x24c] sm:$0xf] }
 0x697   : > { %v8648_v47 = vpop.f32.mrf.mxu3  ;;  %9178 = vmatpush.bf16.msrb.mxu1 %v12697_v63  ;;  %v13244_v63 = vld [vmem:[#allocation2 + $0x284] sm:$0xf] }
 0x698   : > { %11717 = vst [vmem:[%s15072_s29 + $0x7e8] sm:$0xff] %v6948_v6  ;;  %v8649_v50 = vadd.f32 %v8648_v47, %v8560_v52  ;;  %v16762_v6 = vor.u32 %v13241_v44, %v12016_v33  ;;  %v16769_v47 = vor.u32 %v13236_v28, %v12010_v43  ;;  %v12040_v28 = vld [vmem:[#allocation2 + $0x280] sm:$0xf] }
 0x699   : > { %v16755_v30 = vpop.f32.mrf.mxu1  ;;  %v13248_v43 = vld [vmem:[#allocation2 + $0x29c] sm:$0xf0] }
 0x69a   : > { %v16757_v53 = vadd.f32 %v8737_v2, %v8649_v50  ;;  %v16760_v2 = vor.u32 %v13240_v37, %v12008_v46  ;;  %18466 = vst [vmem:[#allocation27_spill] sm:$0xff] %v16762_v6  ;;  %v16772_v50 = vor.u32 %v13237_v21, %v12018_v10  ;;  %v12048_v21 = vld [vmem:[#allocation2 + $0x288] sm:$0xf] }
 0x69b   : > { %18467 = vst [vmem:[#allocation21_spill] sm:$0xff] %v16769_v47  ;;  %v13249_v10 = vld [vmem:[#allocation2 + $0x2a4] sm:$0xf0]  ;;  %9179 = vmatpush.bf16.msrb.mxu1 %v12689_v9  ;;  %v13260_v9 = vld [vmem:[#allocation2 + $0x304] sm:$0xf] }
 0x69c   : > { %v8561_v23 = vpop.f32.mrf.mxu2  ;;  %18465 = vst [vmem:[#allocation23_spill] sm:$0xff] %v16760_v2 }
 0x69d   : > { %v8562_v4 = vadd.f32 %v8561_v23, %v15047_v14  ;;  %18468 = vst [vmem:[#allocation29_spill] sm:$0xff] %v16772_v50 }
 0x69e   : > { %v8742_v29 = vpop.f32.mrf.mxu0 }
 0x69f   : > { %v8650_v15 = vpop.f32.mrf.mxu3  ;;  %9180 = vmatpush.bf16.msrb.mxu1 %v12681_v18  ;;  %v13276_v18 = vld [vmem:[#allocation2 + $0x384] sm:$0xf] }
 0x6a0   : > { %v8651_v39 = vadd.f32 %v8650_v15, %v8562_v4 }
 0x6a1   : > { %v16764_v52 = vpop.f32.mrf.mxu1  ;;  %8603 = vmatmul.bf16.gmra.mxu2 %v16760_v2  ;;  %8781 = vmatmul.bf16.gmra.mxu0 %v16762_v6  ;;  %v16782_v2 = vor.u32 %v13248_v43, %v12040_v28  ;;  %v12496_v28 = vld [vmem:[#allocation9 + $0x710] sm:$0xf]  ;;  %v13359_v43 = vld [vmem:[#allocation9 + $0x714] sm:$0xf0] }
 0x6a2   : > { %v16766_v35 = vadd.f32 %v8739_v31, %v8651_v39 }
 0x6a3   : > { %18469 = vst [vmem:[#allocation22_spill] sm:$0xff] %v16782_v2  ;;  %9529 = vmatpush.bf16.msra.mxu1 %v12485_v62  ;;  %v11746_v62 = vld [vmem:[#allocation2 + $0x38] sm:$0xf0] }
 0x6a4   : > { %8692 = vmatmul.bf16.gmra.mxu3 %v16769_v47  ;;  %8870 = vmatmul.bf16.gmra.mxu1 %v16772_v50  ;;  %v8564_v33 = vpop.f32.mrf.mxu2  ;;  %v12042_v47 = vld [vmem:[#allocation2 + $0x2a0] sm:$0xf0] }
 0x6a5   : > { %v8565_v31 = vadd.f32 %v8564_v33, %v15047_v14  ;;  %v12050_v33 = vld [vmem:[#allocation2 + $0x2a8] sm:$0xf0] }
 0x6a6   : > { %v8744_v46 = vpop.f32.mrf.mxu0 }
 0x6a7   : > { %v8653_v23 = vpop.f32.mrf.mxu3 }
 0x6a8   : > { %v8654_v37 = vadd.f32 %v8653_v23, %v8565_v31  ;;  %v16784_v31 = vor.u32 %v13249_v10, %v12048_v21  ;;  %v12560_v21 = vld [vmem:[#allocation9 + $0x790] sm:$0xf] }
 0x6a9   : > { %v16777_v44 = vpop.f32.mrf.mxu1 }
 0x6aa   : > { %v16779_v4 = vadd.f32 %v8742_v29, %v8654_v37  ;;  %18470 = vst [vmem:[#allocation31_spill] sm:$0xff] %v16784_v31  ;;  %v16791_v37 = vor.u32 %v13244_v63, %v12042_v47 }
 0x6ac   : > { %v8566_v15 = vpop.f32.mrf.mxu2  ;;  %18471 = vst [vmem:[#allocation33_spill] sm:$0xff] %v16791_v37 }
 0x6ad   : > { %v8567_v39 = vadd.f32 %v8566_v15, %v15047_v14  ;;  %v16794_v15 = vor.u32 %v13245_v17, %v12050_v33 }
 0x6ae   : > { %v8747_v50 = vpop.f32.mrf.mxu0 }
 0x6af   : > { %v8655_v24 = vpop.f32.mrf.mxu3  ;;  %18472 = vst [vmem:[#allocation26_spill] sm:$0xff] %v16794_v15 }
 0x6b0   : > { %v8656_v6 = vadd.f32 %v8655_v24, %v8567_v39  ;;  %v12497_v39 = vor.u32 %v13359_v43, %v12496_v28  ;;  %v13375_v24 = vld [vmem:[#allocation9 + $0x794] sm:$0xf0]  ;;  %v13256_v28 = vld [vmem:[#allocation2 + $0x2dc] sm:$0xf0]  ;;  %v13257_v43 = vld [vmem:[#allocation2 + $0x2e4] sm:$0xf0] }
 0x6b1   : > { %v16786_v29 = vpop.f32.mrf.mxu1  ;;  %8608 = vmatmul.bf16.gmra.mxu2 %v16782_v2  ;;  %8786 = vmatmul.bf16.gmra.mxu0 %v16784_v31 }
 0x6b2   : > { %v16788_v23 = vadd.f32 %v8744_v46, %v8656_v6  ;;  %v12561_v46 = vor.u32 %v13375_v24, %v12560_v21  ;;  %8912 = vmatpush.bf16.msrb.mxu2 %v12497_v39 }
 0x6b4   : > { %8697 = vmatmul.bf16.gmra.mxu3 %v16791_v37  ;;  %8875 = vmatmul.bf16.gmra.mxu1 %v16794_v15  ;;  %v8569_v10 = vpop.f32.mrf.mxu2  ;;  %v12624_v37 = vld [vmem:[#allocation9 + $0x810] sm:$0xf]  ;;  %v13391_v15 = vld [vmem:[#allocation9 + $0x814] sm:$0xf0] }
 0x6b5   : > { %v8570_v6 = vadd.f32 %v8569_v10, %v15047_v14  ;;  %9001 = vmatpush.bf16.msrb.mxu3 %v12561_v46  ;;  %v12625_v31 = vor.u32 %v13391_v15, %v12624_v37  ;;  %v13253_v10 = vld [vmem:[#allocation2 + $0x2cc] sm:$0xf] }
 0x6b6   : > { %v8749_v47 = vpop.f32.mrf.mxu0  ;;  %v12082_v46 = vld [vmem:[#allocation2 + $0x2e8] sm:$0xf0] }
 0x6b7   : > { %v8658_v2 = vpop.f32.mrf.mxu3  ;;  %9090 = vmatpush.bf16.msrb.mxu0 %v12625_v31 }
 0x6b8   : > { %v8659_v63 = vadd.f32 %v8658_v2, %v8570_v6  ;;  %v13252_v2 = vld [vmem:[#allocation2 + $0x2c4] sm:$0xf] }
 0x6b9   : > { %v16799_v17 = vpop.f32.mrf.mxu1  ;;  %v12074_v6 = vld [vmem:[#allocation2 + $0x2e0] sm:$0xf0] }
 0x6ba   : > { %v16801_v33 = vadd.f32 %v8747_v50, %v8659_v63  ;;  %v16804_v50 = vor.u32 %v13256_v28, %v12072_v7  ;;  %v16806_v63 = vor.u32 %v13257_v43, %v12080_v40  ;;  %v16813_v31 = vor.u32 %v13252_v2, %v12074_v6  ;;  %v12104_v2 = vld [vmem:[#allocation2 + $0x300] sm:$0xf] }
 0x6bb   : > { %v13264_v6 = vld [vmem:[#allocation2 + $0x31c] sm:$0xf0] }
 0x6bc   : > { %v8571_v27 = vpop.f32.mrf.mxu2  ;;  %18473 = vst [vmem:[#allocation28_spill] sm:$0xff] %v16804_v50  ;;  %v16826_v56 = vor.u32 %v13264_v6, %v12104_v2  ;;  %v13357_v2 = vld [vmem:[#allocation9 + $0x704] sm:$0xf0] }
 0x6bd   : > { %v8572_v21 = vadd.f32 %v8571_v27, %v15047_v14  ;;  %18474 = vst [vmem:[#allocation36_spill] sm:$0xff] %v16806_v63  ;;  %v16816_v27 = vor.u32 %v13253_v10, %v12082_v46  ;;  %v12112_v10 = vld [vmem:[#allocation2 + $0x308] sm:$0xf]  ;;  %v13261_v46 = vld [vmem:[#allocation2 + $0x30c] sm:$0xf] }
 0x6be   : > { %v8752_v39 = vpop.f32.mrf.mxu0  ;;  %18475 = vst [vmem:[#allocation30_spill] sm:$0xff] %v16813_v31 }
 0x6bf   : > { %v8660_v24 = vpop.f32.mrf.mxu3  ;;  %18476 = vst [vmem:[#allocation42_spill] sm:$0xff] %v16816_v27 }
 0x6c0   : > { %v8661_v8 = vadd.f32 %v8660_v24, %v8572_v21  ;;  %18477 = vst [vmem:[#allocation32_spill] sm:$0xff] %v16826_v56 }
 0x6c1   : > { %v16808_v37 = vpop.f32.mrf.mxu1  ;;  %8613 = vmatmul.bf16.gmra.mxu2 %v16804_v50  ;;  %8791 = vmatmul.bf16.gmra.mxu0 %v16806_v63  ;;  %v12106_v63 = vld [vmem:[#allocation2 + $0x320] sm:$0xf0] }
 0x6c2   : > { %v16810_v15 = vadd.f32 %v8749_v47, %v8661_v8 }
 0x6c4   : > { %8702 = vmatmul.bf16.gmra.mxu3 %v16813_v31  ;;  %8880 = vmatmul.bf16.gmra.mxu1 %v16816_v27  ;;  %v8574_v40 = vpop.f32.mrf.mxu2 }
 0x6c5   : > { %v8575_v8 = vadd.f32 %v8574_v40, %v15047_v14  ;;  %v12114_v40 = vld [vmem:[#allocation2 + $0x328] sm:$0xf0] }
 0x6c6   : > { %v8754_v47 = vpop.f32.mrf.mxu0 }
 0x6c7   : > { %v8663_v7 = vpop.f32.mrf.mxu3 }
 0x6c8   : > { %v8664_v28 = vadd.f32 %v8663_v7, %v8575_v8  ;;  %v16828_v8 = vor.u32 %v13265_v60, %v12112_v10  ;;  %v12552_v10 = vld [vmem:[#allocation9 + $0x780] sm:$0xf] }
 0x6c9   : > { %v16821_v43 = vpop.f32.mrf.mxu1 }
 0x6ca   : > { %v16823_v21 = vadd.f32 %v8752_v39, %v8664_v28  ;;  %18478 = vst [vmem:[#allocation48_spill] sm:$0xff] %v16828_v8  ;;  %v16835_v28 = vor.u32 %v13260_v9, %v12106_v63 }
 0x6cc   : > { %v8576_v24 = vpop.f32.mrf.mxu2  ;;  %18479 = vst [vmem:[#allocation51_spill] sm:$0xff] %v16835_v28 }
 0x6cd   : > { %v8577_v54 = vadd.f32 %v8576_v24, %v15047_v14  ;;  %v16838_v24 = vor.u32 %v13261_v46, %v12114_v40 }
 0x6ce   : > { %v8757_v31 = vpop.f32.mrf.mxu0 }
 0x6cf   : > { %v8665_v27 = vpop.f32.mrf.mxu3  ;;  %18480 = vst [vmem:[#allocation34_spill] sm:$0xff] %v16838_v24 }
 0x6d0   : > { %v8666_v50 = vadd.f32 %v8665_v27, %v8577_v54  ;;  %v12488_v27 = vld [vmem:[#allocation9 + $0x700] sm:$0xf]  ;;  %v13373_v54 = vld [vmem:[#allocation9 + $0x784] sm:$0xf0] }
 0x6d1   : > { %v16830_v39 = vpop.f32.mrf.mxu1  ;;  %8618 = vmatmul.bf16.gmra.mxu2 %v16826_v56  ;;  %8796 = vmatmul.bf16.gmra.mxu0 %v16828_v8  ;;  %v12489_v60 = vor.u32 %v13357_v2, %v12488_v27  ;;  %v13272_v27 = vld [vmem:[#allocation2 + $0x35c] sm:$0xf0]  ;;  %v13273_v2 = vld [vmem:[#allocation2 + $0x364] sm:$0xf0] }
 0x6d2   : > { %v16832_v7 = vadd.f32 %v8754_v47, %v8666_v50  ;;  %v12553_v47 = vor.u32 %v13373_v54, %v12552_v10 }
 0x6d3   : > { %8913 = vmatpush.bf16.msrb.mxu2 %v12489_v60 }
 0x6d4   : > { %8707 = vmatmul.bf16.gmra.mxu3 %v16835_v28  ;;  %8885 = vmatmul.bf16.gmra.mxu1 %v16838_v24  ;;  %v8579_v6 = vpop.f32.mrf.mxu2  ;;  %v12616_v28 = vld [vmem:[#allocation9 + $0x800] sm:$0xf]  ;;  %v13389_v24 = vld [vmem:[#allocation9 + $0x804] sm:$0xf0] }
 0x6d5   : > { %v8580_v50 = vadd.f32 %v8579_v6, %v15047_v14  ;;  %9002 = vmatpush.bf16.msrb.mxu3 %v12553_v47  ;;  %v12617_v8 = vor.u32 %v13389_v24, %v12616_v28  ;;  %v13269_v6 = vld [vmem:[#allocation2 + $0x34c] sm:$0xf] }
 0x6d6   : > { %v8759_v63 = vpop.f32.mrf.mxu0  ;;  %v12146_v47 = vld [vmem:[#allocation2 + $0x368] sm:$0xf0] }
 0x6d7   : > { %v8668_v56 = vpop.f32.mrf.mxu3  ;;  %9091 = vmatpush.bf16.msrb.mxu0 %v12617_v8 }
 0x6d8   : > { %v8669_v9 = vadd.f32 %v8668_v56, %v8580_v50  ;;  %v13268_v56 = vld [vmem:[#allocation2 + $0x344] sm:$0xf] }
 0x6d9   : > { %v16843_v46 = vpop.f32.mrf.mxu1  ;;  %v12138_v50 = vld [vmem:[#allocation2 + $0x360] sm:$0xf0] }
 0x6da   : > { %v16845_v40 = vadd.f32 %v8757_v31, %v8669_v9  ;;  %v16848_v31 = vor.u32 %v13272_v27, %v12136_v51  ;;  %v16850_v9 = vor.u32 %v13273_v2, %v12144_v25  ;;  %v16857_v8 = vor.u32 %v13268_v56, %v12138_v50  ;;  %v12168_v56 = vld [vmem:[#allocation2 + $0x380] sm:$0xf] }
 0x6db   : > { %v13280_v50 = vld [vmem:[#allocation2 + $0x39c] sm:$0xf0] }
 0x6dc   : > { %v8581_v42 = vpop.f32.mrf.mxu2  ;;  %18481 = vst [vmem:[#allocation41_spill] sm:$0xff] %v16848_v31  ;;  %v16870_v58 = vor.u32 %v13280_v50, %v12168_v56  ;;  %v12290_v56 = vld [vmem:[#allocation9 + $0x578] sm:$0xf0] }
 0x6dd   : > { %v8582_v10 = vadd.f32 %v8581_v42, %v15047_v14  ;;  %18482 = vst [vmem:[#allocation60_spill] sm:$0xff] %v16850_v9  ;;  %v16860_v42 = vor.u32 %v13269_v6, %v12146_v47  ;;  %v12176_v6 = vld [vmem:[#allocation2 + $0x388] sm:$0xf]  ;;  %v13277_v47 = vld [vmem:[#allocation2 + $0x38c] sm:$0xf] }
 0x6de   : > { %v8762_v60 = vpop.f32.mrf.mxu0  ;;  %18483 = vst [vmem:[#allocation65_spill] sm:$0xff] %v16857_v8 }
 0x6df   : > { %v8670_v54 = vpop.f32.mrf.mxu3  ;;  %18484 = vst [vmem:[#allocation45_spill] sm:$0xff] %v16860_v42 }
 0x6e0   : > { %v8671_v49 = vadd.f32 %v8670_v54, %v8582_v10  ;;  %18485 = vst [vmem:[#allocation75_spill] sm:$0xff] %v16870_v58 }
 0x6e1   : > { %v16852_v28 = vpop.f32.mrf.mxu1  ;;  %8623 = vmatmul.bf16.gmra.mxu2 %v16848_v31  ;;  %8801 = vmatmul.bf16.gmra.mxu0 %v16850_v9  ;;  %v12170_v9 = vld [vmem:[#allocation2 + $0x3a0] sm:$0xf0] }
 0x6e2   : > { %v16854_v24 = vadd.f32 %v8759_v63, %v8671_v49 }
 0x6e4   : > { %8712 = vmatmul.bf16.gmra.mxu3 %v16857_v8  ;;  %8890 = vmatmul.bf16.gmra.mxu1 %v16860_v42  ;;  %v8584_v51 = vpop.f32.mrf.mxu2 }
 0x6e5   : > { %v8585_v49 = vadd.f32 %v8584_v51, %v15047_v14  ;;  %v12178_v51 = vld [vmem:[#allocation2 + $0x3a8] sm:$0xf0] }
 0x6e6   : > { %v8764_v63 = vpop.f32.mrf.mxu0 }
 0x6e7   : > { %v8673_v25 = vpop.f32.mrf.mxu3 }
 0x6e8   : > { %v8674_v27 = vadd.f32 %v8673_v25, %v8585_v49  ;;  %v16872_v49 = vor.u32 %v13281_v3, %v12176_v6  ;;  %v13322_v6 = vld [vmem:[#allocation9 + $0x5f4] sm:$0xf] }
 0x6e9   : > { %v16865_v2 = vpop.f32.mrf.mxu1 }
 0x6ea   : > { %v16867_v10 = vadd.f32 %v8762_v60, %v8674_v27  ;;  %18486 = vst [vmem:[#allocation76_spill] sm:$0xff] %v16872_v49  ;;  %v16879_v27 = vor.u32 %v13276_v18, %v12170_v9 }
 0x6ec   : > { %v8586_v54 = vpop.f32.mrf.mxu2  ;;  %18487 = vst [vmem:[#allocation77_spill] sm:$0xff] %v16879_v27 }
 0x6ed   : > { %v8587_v55 = vadd.f32 %v8586_v54, %v15047_v14  ;;  %v16882_v54 = vor.u32 %v13277_v47, %v12178_v51 }
 0x6ee   : > { %v8767_v8 = vpop.f32.mrf.mxu0 }
 0x6ef   : > { %v8675_v42 = vpop.f32.mrf.mxu3  ;;  %18488 = vst [vmem:[#allocation78_spill] sm:$0xff] %v16882_v54 }
 0x6f0   : > { %v8676_v31 = vadd.f32 %v8675_v42, %v8587_v55  ;;  %v13306_v42 = vld [vmem:[#allocation9 + $0x574] sm:$0xf]  ;;  %v12354_v55 = vld [vmem:[#allocation9 + $0x5f8] sm:$0xf0] }
 0x6f1   : > { %v16874_v60 = vpop.f32.mrf.mxu1  ;;  %8628 = vmatmul.bf16.gmra.mxu2 %v16870_v58  ;;  %8806 = vmatmul.bf16.gmra.mxu0 %v16872_v49  ;;  %v12293_v3 = vor.u32 %v13306_v42, %v12290_v56  ;;  %v13288_v42 = vld [vmem:[#allocation2 + $0x3dc] sm:$0xf0]  ;;  %v13289_v56 = vld [vmem:[#allocation2 + $0x3e4] sm:$0xf0] }
 0x6f2   : > { %v16876_v25 = vadd.f32 %v8764_v63, %v8676_v31  ;;  %v12357_v63 = vor.u32 %v13322_v6, %v12354_v55 }
 0x6f3   : > { %9262 = vmatpush.bf16.msra.mxu2 %v12293_v3 }
 0x6f4   : > { %8717 = vmatmul.bf16.gmra.mxu3 %v16879_v27  ;;  %8895 = vmatmul.bf16.gmra.mxu1 %v16882_v54  ;;  %v8589_v50 = vpop.f32.mrf.mxu2  ;;  %v13338_v27 = vld [vmem:[#allocation9 + $0x674] sm:$0xf]  ;;  %v12418_v54 = vld [vmem:[#allocation9 + $0x678] sm:$0xf0] }
 0x6f5   : > { %v8590_v31 = vadd.f32 %v8589_v50, %v15047_v14  ;;  %9351 = vmatpush.bf16.msra.mxu3 %v12357_v63  ;;  %v12421_v49 = vor.u32 %v13338_v27, %v12418_v54  ;;  %v13285_v50 = vld [vmem:[#allocation2 + $0x3cc] sm:$0xf] }
 0x6f6   : > { %v8769_v9 = vpop.f32.mrf.mxu0  ;;  %v12210_v63 = vld [vmem:[#allocation2 + $0x3e8] sm:$0xf0] }
 0x6f7   : > { %v8678_v58 = vpop.f32.mrf.mxu3  ;;  %9440 = vmatpush.bf16.msra.mxu0 %v12421_v49 }
 0x6f8   : > { %v8679_v18 = vadd.f32 %v8678_v58, %v8590_v31  ;;  %v13284_v58 = vld [vmem:[#allocation2 + $0x3c4] sm:$0xf] }
 0x6f9   : > { %v16887_v47 = vpop.f32.mrf.mxu1  ;;  %v12202_v31 = vld [vmem:[#allocation2 + $0x3e0] sm:$0xf0] }
 0x6fa   : > { %v16889_v51 = vadd.f32 %v8767_v8, %v8679_v18  ;;  %v16892_v8 = vor.u32 %v13288_v42, %v12200_v0  ;;  %v16894_v18 = vor.u32 %v13289_v56, %v12208_v32  ;;  %v16901_v49 = vor.u32 %v13284_v58, %v12202_v31  ;;  %v13171_v58 = vld [vmem:[#allocation2 + $0x34] sm:$0xf0] }
 0x6fc   : > { %v8591_v22 = vpop.f32.mrf.mxu2  ;;  %18489 = vst [vmem:[#allocation79_spill] sm:$0xff] %v16892_v8 }
 0x6fd   : > { %v8592_v6 = vadd.f32 %v8591_v22, %v15047_v14  ;;  %18490 = vst [vmem:[#allocation80_spill] sm:$0xff] %v16894_v18  ;;  %v16904_v22 = vor.u32 %v13285_v50, %v12210_v63 }
 0x6fe   : > { %v8772_v3 = vpop.f32.mrf.mxu0  ;;  %18491 = vst [vmem:[#allocation81_spill] sm:$0xff] %v16901_v49 }
 0x6ff   : > { %v8680_v55 = vpop.f32.mrf.mxu3  ;;  %18492 = vst [vmem:[#allocation82_spill] sm:$0xff] %v16904_v22 }
 0x700   : > { %v8681_v34 = vadd.f32 %v8680_v55, %v8592_v6  ;;  %v13170_v55 = vld [vmem:[#allocation2 + $0x2c] sm:$0xf0] }
 0x701   : > { %v16896_v27 = vpop.f32.mrf.mxu1  ;;  %8633 = vmatmul.bf16.gmra.mxu2 %v16892_v8  ;;  %8811 = vmatmul.bf16.gmra.mxu0 %v16894_v18 }
 0x702   : > { %v16898_v54 = vadd.f32 %v8769_v9, %v8681_v34 }
 0x704   : > { %8722 = vmatmul.bf16.gmra.mxu3 %v16901_v49  ;;  %8900 = vmatmul.bf16.gmra.mxu1 %v16904_v22  ;;  %v8594_v0 = vpop.f32.mrf.mxu2  ;;  %v11738_v22 = vld [vmem:[#allocation2 + $0x30] sm:$0xf0]  ;;  %v11744_v49 = vld [vmem:[#allocation2 + $0x18] sm:$0xf] }
 0x705   : > { %v8595_v34 = vadd.f32 %v8594_v0, %v15047_v14  ;;  %v16914_v0 = vor.u32 %v13170_v55, %v11736_v59  ;;  %v16916_v8 = vor.u32 %v13171_v58, %v11744_v49  ;;  %v13304_v49 = vld [vmem:[#allocation9 + $0x564] sm:$0xf]  ;;  %v12282_v55 = vld [vmem:[#allocation9 + $0x568] sm:$0xf0] }
 0x706   : > { %v8774_v9 = vpop.f32.mrf.mxu0  ;;  %v13320_v58 = vld [vmem:[#allocation9 + $0x5e4] sm:$0xf]  ;;  %v12285_v59 = vor.u32 %v13304_v49, %v12282_v55  ;;  %v11768_v55 = vld [vmem:[#allocation2 + $0x50] sm:$0xf] }
 0x707   : > { %v8683_v32 = vpop.f32.mrf.mxu3  ;;  %18493 = vst [vmem:[#allocation83_spill] sm:$0xff] %v16914_v0 }
 0x708   : > { %v8684_v42 = vadd.f32 %v8683_v32, %v8595_v34  ;;  %18494 = vst [vmem:[#allocation84_spill] sm:$0xff] %v16916_v8  ;;  %v13167_v32 = vld [vmem:[#allocation2 + $0x1c] sm:$0xf]  ;;  %9263 = vmatpush.bf16.msra.mxu2 %v12285_v59  ;;  %v11776_v59 = vld [vmem:[#allocation2 + $0x58] sm:$0xf] }
 0x709   : > { %v16909_v56 = vpop.f32.mrf.mxu1  ;;  %v16926_v1 = vor.u32 %v13167_v32, %v11746_v62 }
 0x70a   : > { %v16911_v6 = vadd.f32 %v8772_v3, %v8684_v42  ;;  %v13166_v3 = vld [vmem:[#allocation2 + $0x14] sm:$0xf] }
 0x70b   : > { %18496 = vst [vmem:[#allocation86_spill] sm:$0xff] %v16926_v1 }
 0x70c   : > { %v8596_v50 = vpop.f32.mrf.mxu2 }
 0x70d   : > { %v8597_v11 = vadd.f32 %v8596_v50, %v15047_v14  ;;  %v16923_v50 = vor.u32 %v13166_v3, %v11738_v22 }
 0x70e   : > { %v8777_v63 = vpop.f32.mrf.mxu0 }
 0x70f   : > { %v8685_v31 = vpop.f32.mrf.mxu3  ;;  %18495 = vst [vmem:[#allocation85_spill] sm:$0xff] %v16923_v50 }
 0x710   : > { %v8686_v18 = vadd.f32 %v8685_v31, %v8597_v11  ;;  %v12346_v31 = vld [vmem:[#allocation9 + $0x5e8] sm:$0xf0] }
 0x711   : > { %v16918_v34 = vpop.f32.mrf.mxu1  ;;  %8914 = vmatmul.bf16.vlgmr.msrb.gmra.mxu2 %v16914_v0  ;;  %9092 = vmatmul.bf16.vlgmr.msrb.gmra.mxu0 %v16916_v8 }
 0x712   : > { %v16920_v42 = vadd.f32 %v8774_v9, %v8686_v18  ;;  %v12349_v9 = vor.u32 %v13320_v58, %v12346_v31  ;;  %v11770_v31 = vld [vmem:[#allocation2 + $0x70] sm:$0xf0] }
 0x714   : > { %9003 = vmatmul.bf16.vlgmr.msrb.gmra.mxu3 %v16923_v50  ;;  %9181 = vmatmul.bf16.vlgmr.msrb.gmra.mxu1 %v16926_v1  ;;  %v8599_v11 = vpop.f32.mrf.mxu2  ;;  %v13336_v50 = vld [vmem:[#allocation9 + $0x664] sm:$0xf]  ;;  %v12410_v1 = vld [vmem:[#allocation9 + $0x668] sm:$0xf0] }
 0x715   : > { %v8600_v18 = vadd.f32 %v8599_v11, %v15047_v14  ;;  %9352 = vmatpush.bf16.msra.mxu3 %v12349_v9  ;;  %v12413_v8 = vor.u32 %v13336_v50, %v12410_v1  ;;  %v16936_v9 = vor.u32 %v13178_v45, %v11768_v55  ;;  %v13174_v1 = vld [vmem:[#allocation2 + $0x54] sm:$0xf]  ;;  %v13175_v50 = vld [vmem:[#allocation2 + $0x5c] sm:$0xf] }
 0x716   : > { %v8779_v22 = vpop.f32.mrf.mxu0 }
 0x717   : > { %v8688_v0 = vpop.f32.mrf.mxu3  ;;  %9441 = vmatpush.bf16.msra.mxu0 %v12413_v8  ;;  %18497 = vst [vmem:[#allocation87_spill] sm:$0xff] %v16936_v9 }
 0x718   : > { %v8689_v3 = vadd.f32 %v8688_v0, %v8600_v18  ;;  %v11778_v0 = vld [vmem:[#allocation2 + $0x78] sm:$0xf0] }
 0x719   : > { %v16931_v62 = vpop.f32.mrf.mxu1  ;;  %v16948_v8 = vor.u32 %v13175_v50, %v11778_v0  ;;  %v13187_v50 = vld [vmem:[#allocation2 + $0xb4] sm:$0xf0] }
 0x71a   : > { %v16933_v32 = vadd.f32 %v8777_v63, %v8689_v3  ;;  %v16938_v63 = vor.u32 %v13179_v61, %v11776_v59 }
 0x71b   : > { %18501 = vst [vmem:[#allocation91_spill] sm:$0xff] %v16948_v8 }
 0x71c   : > { %v8601_v26 = vpop.f32.mrf.mxu2  ;;  %18498 = vst [vmem:[#allocation88_spill] sm:$0xff] %v16938_v63 }
 0x71d   : > { %v8602_v49 = vadd.f32 %v8601_v26, %v15047_v14  ;;  %v16945_v26 = vor.u32 %v13174_v1, %v11770_v31  ;;  %v13186_v1 = vld [vmem:[#allocation2 + $0xac] sm:$0xf0] }
 0x71e   : > { %v8782_v11 = vpop.f32.mrf.mxu0 }
 0x71f   : > { %v8690_v58 = vpop.f32.mrf.mxu3  ;;  %18500 = vst [vmem:[#allocation90_spill] sm:$0xff] %v16945_v26 }
 0x720   : > { %v8691_v18 = vadd.f32 %v8690_v58, %v8602_v49  ;;  %v12474_v49 = vld [vmem:[#allocation9 + $0x6e8] sm:$0xf0] }
 0x721   : > { %v16940_v3 = vpop.f32.mrf.mxu1  ;;  %8919 = vmatmul.bf16.gmra.mxu2 %v16936_v9  ;;  %9097 = vmatmul.bf16.gmra.mxu0 %v16938_v63  ;;  %v12477_v45 = vor.u32 %v13352_v16, %v12474_v49  ;;  %v11800_v49 = vld [vmem:[#allocation2 + $0x90] sm:$0xf]  ;;  %v11808_v9 = vld [vmem:[#allocation2 + $0x98] sm:$0xf] }
 0x722   : > { %18499 = vst [vmem:[#allocation89_spill] sm:$0xff] %v16940_v3  ;;  %v16942_v20 = vadd.f32 %v8779_v22, %v8691_v18  ;;  %v16960_v19 = vor.u32 %v13187_v50, %v11808_v9  ;;  %v13302_v9 = vld [vmem:[#allocation9 + $0x554] sm:$0xf] }
 0x723   : > { %9530 = vmatpush.bf16.msra.mxu1 %v12477_v45  ;;  %v11810_v45 = vld [vmem:[#allocation2 + $0xb8] sm:$0xf0] }
 0x724   : > { %9008 = vmatmul.bf16.gmra.mxu3 %v16945_v26  ;;  %9186 = vmatmul.bf16.gmra.mxu1 %v16948_v8  ;;  %v8604_v61 = vpop.f32.mrf.mxu2  ;;  %v11802_v8 = vld [vmem:[#allocation2 + $0xb0] sm:$0xf0]  ;;  %18505 = vst [vmem:[#allocation95_spill] sm:$0xff] %v16960_v19 }
 0x725   : > { %v8605_v22 = vadd.f32 %v8604_v61, %v15047_v14  ;;  %v16958_v61 = vor.u32 %v13186_v1, %v11800_v49  ;;  %v13318_v1 = vld [vmem:[#allocation9 + $0x5d4] sm:$0xf]  ;;  %v12338_v49 = vld [vmem:[#allocation9 + $0x5d8] sm:$0xf0] }
 0x726   : > { %v8784_v58 = vpop.f32.mrf.mxu0 }
 0x727   : > { %v8693_v55 = vpop.f32.mrf.mxu3  ;;  %18504 = vst [vmem:[#allocation94_spill] sm:$0xff] %v16958_v61 }
 0x728   : > { %v8694_v59 = vadd.f32 %v8693_v55, %v8605_v22  ;;  %v13183_v55 = vld [vmem:[#allocation2 + $0x9c] sm:$0xf] }
 0x729   : > { %v16953_v31 = vpop.f32.mrf.mxu1 }
 0x72a   : > { %18502 = vst [vmem:[#allocation92_spill] sm:$0xff] %v16953_v31  ;;  %v16955_v18 = vadd.f32 %v8782_v11, %v8694_v59  ;;  %v13182_v11 = vld [vmem:[#allocation2 + $0x94] sm:$0xf]  ;;  %v16970_v31 = vor.u32 %v13183_v55, %v11810_v45 }
 0x72c   : > { %18503 = vst [vmem:[#allocation93_spill] sm:$0xff] %v16955_v18  ;;  %v8606_v0 = vpop.f32.mrf.mxu2  ;;  %v13195_v18 = vld [vmem:[#allocation2 + $0xf4] sm:$0xf0] }
 0x72d   : > { %v8607_v16 = vadd.f32 %v8606_v0, %v15047_v14  ;;  %v16967_v0 = vor.u32 %v13182_v11, %v11802_v8  ;;  %18509 = vst [vmem:[#allocation99_spill] sm:$0xff] %v16970_v31 }
 0x72e   : > { %v8787_v63 = vpop.f32.mrf.mxu0 }
 0x72f   : > { %v8695_v26 = vpop.f32.mrf.mxu3  ;;  %18508 = vst [vmem:[#allocation98_spill] sm:$0xff] %v16967_v0 }
 0x730   : > { %v8696_v3 = vadd.f32 %v8695_v26, %v8607_v16  ;;  %v12274_v26 = vld [vmem:[#allocation9 + $0x558] sm:$0xf0] }
 0x731   : > { %v16962_v22 = vpop.f32.mrf.mxu1  ;;  %8924 = vmatmul.bf16.gmra.mxu2 %v16958_v61  ;;  %9102 = vmatmul.bf16.gmra.mxu0 %v16960_v19  ;;  %v12277_v16 = vor.u32 %v13302_v9, %v12274_v26  ;;  %v11832_v26 = vld [vmem:[#allocation2 + $0xd0] sm:$0xf] }
 0x732   : > { %18506 = vst [vmem:[#allocation96_spill] sm:$0xff] %v16962_v22  ;;  %v16964_v59 = vadd.f32 %v8784_v58, %v8696_v3  ;;  %v12341_v58 = vor.u32 %v13318_v1, %v12338_v49  ;;  %v11834_v49 = vld [vmem:[#allocation2 + $0xf0] sm:$0xf0] }
 0x733   : > { %9264 = vmatpush.bf16.msra.mxu2 %v12277_v16  ;;  %v11840_v16 = vld [vmem:[#allocation2 + $0xd8] sm:$0xf] }
 0x734   : > { %18507 = vst [vmem:[#allocation97_spill] sm:$0xff] %v16964_v59  ;;  %9013 = vmatmul.bf16.gmra.mxu3 %v16967_v0  ;;  %9191 = vmatmul.bf16.gmra.mxu1 %v16970_v31  ;;  %v8609_v50 = vpop.f32.mrf.mxu2  ;;  %v13334_v0 = vld [vmem:[#allocation9 + $0x654] sm:$0xf]  ;;  %v12402_v31 = vld [vmem:[#allocation9 + $0x658] sm:$0xf0] }
 0x735   : > { %v8610_v3 = vadd.f32 %v8609_v50, %v15047_v14  ;;  %9353 = vmatpush.bf16.msra.mxu3 %v12341_v58  ;;  %v12405_v19 = vor.u32 %v13334_v0, %v12402_v31  ;;  %v13194_v59 = vld [vmem:[#allocation2 + $0xec] sm:$0xf0]  ;;  %v13190_v31 = vld [vmem:[#allocation2 + $0xd4] sm:$0xf]  ;;  %v13191_v0 = vld [vmem:[#allocation2 + $0xdc] sm:$0xf] }
 0x736   : > { %v8789_v8 = vpop.f32.mrf.mxu0  ;;  %v16980_v58 = vor.u32 %v13194_v59, %v11832_v26 }
 0x737   : > { %v8698_v61 = vpop.f32.mrf.mxu3  ;;  %9442 = vmatpush.bf16.msra.mxu0 %v12405_v19  ;;  %v16989_v19 = vor.u32 %v13190_v31, %v11834_v49  ;;  %v13202_v31 = vld [vmem:[#allocation2 + $0x12c] sm:$0xf0] }
 0x738   : > { %v8699_v11 = vadd.f32 %v8698_v61, %v8610_v3  ;;  %v11842_v61 = vld [vmem:[#allocation2 + $0xf8] sm:$0xf0]  ;;  %18512 = vst [vmem:[#allocation102_spill] sm:$0xff] %v16980_v58 }
 0x739   : > { %v16975_v45 = vpop.f32.mrf.mxu1  ;;  %18516 = vst [vmem:[#allocation106_spill] sm:$0xff] %v16989_v19 }
 0x73a   : > { %18510 = vst [vmem:[#allocation100_spill] sm:$0xff] %v16975_v45  ;;  %v16977_v55 = vadd.f32 %v8787_v63, %v8699_v11  ;;  %v16982_v63 = vor.u32 %v13195_v18, %v11840_v16 }
 0x73c   : > { %18511 = vst [vmem:[#allocation101_spill] sm:$0xff] %v16977_v55  ;;  %v8611_v22 = vpop.f32.mrf.mxu2  ;;  %v13350_v55 = vld [vmem:[#allocation9 + $0x6d4] sm:$0xf] }
 0x73d   : > { %v8612_v9 = vadd.f32 %v8611_v22, %v15047_v14  ;;  %18513 = vst [vmem:[#allocation103_spill] sm:$0xff] %v16982_v63  ;;  %v16992_v22 = vor.u32 %v13191_v0, %v11842_v61  ;;  %v13203_v0 = vld [vmem:[#allocation2 + $0x134] sm:$0xf0] }
 0x73e   : > { %v8792_v50 = vpop.f32.mrf.mxu0 }
 0x73f   : > { %v8700_v1 = vpop.f32.mrf.mxu3  ;;  %18517 = vst [vmem:[#allocation107_spill] sm:$0xff] %v16992_v22 }
 0x740   : > { %v8701_v3 = vadd.f32 %v8700_v1, %v8612_v9  ;;  %v12466_v9 = vld [vmem:[#allocation9 + $0x6d8] sm:$0xf0] }
 0x741   : > { %v16984_v11 = vpop.f32.mrf.mxu1  ;;  %8929 = vmatmul.bf16.gmra.mxu2 %v16980_v58  ;;  %9107 = vmatmul.bf16.gmra.mxu0 %v16982_v63  ;;  %v12469_v59 = vor.u32 %v13350_v55, %v12466_v9  ;;  %v11864_v9 = vld [vmem:[#allocation2 + $0x110] sm:$0xf]  ;;  %v11872_v58 = vld [vmem:[#allocation2 + $0x118] sm:$0xf] }
 0x742   : > { %18514 = vst [vmem:[#allocation104_spill] sm:$0xff] %v16984_v11  ;;  %v16986_v45 = vadd.f32 %v8789_v8, %v8701_v3 }
 0x743   : > { %9531 = vmatpush.bf16.msra.mxu1 %v12469_v59  ;;  %v11874_v59 = vld [vmem:[#allocation2 + $0x138] sm:$0xf0] }
 0x744   : > { %18515 = vst [vmem:[#allocation105_spill] sm:$0xff] %v16986_v45  ;;  %9018 = vmatmul.bf16.gmra.mxu3 %v16989_v19  ;;  %9196 = vmatmul.bf16.gmra.mxu1 %v16992_v22  ;;  %v8614_v18 = vpop.f32.mrf.mxu2  ;;  %v11866_v22 = vld [vmem:[#allocation2 + $0x130] sm:$0xf0]  ;;  %v17004_v45 = vor.u32 %v13203_v0, %v11872_v58  ;;  %v13300_v58 = vld [vmem:[#allocation9 + $0x544] sm:$0xf] }
 0x745   : > { %v8615_v8 = vadd.f32 %v8614_v18, %v15047_v14  ;;  %v17002_v18 = vor.u32 %v13202_v31, %v11864_v9  ;;  %v13316_v31 = vld [vmem:[#allocation9 + $0x5c4] sm:$0xf]  ;;  %v12330_v9 = vld [vmem:[#allocation9 + $0x5c8] sm:$0xf0] }
 0x746   : > { %v8794_v1 = vpop.f32.mrf.mxu0  ;;  %18521 = vst [vmem:[#allocation111_spill] sm:$0xff] %v17004_v45 }
 0x747   : > { %v8703_v26 = vpop.f32.mrf.mxu3  ;;  %18520 = vst [vmem:[#allocation110_spill] sm:$0xff] %v17002_v18 }
 0x748   : > { %v8704_v16 = vadd.f32 %v8703_v26, %v8615_v8  ;;  %v13199_v26 = vld [vmem:[#allocation2 + $0x11c] sm:$0xf] }
 0x749   : > { %v16997_v49 = vpop.f32.mrf.mxu1 }
 0x74a   : > { %18518 = vst [vmem:[#allocation108_spill] sm:$0xff] %v16997_v49  ;;  %v16999_v3 = vadd.f32 %v8792_v50, %v8704_v16  ;;  %v13198_v50 = vld [vmem:[#allocation2 + $0x114] sm:$0xf]  ;;  %v17014_v49 = vor.u32 %v13199_v26, %v11874_v59 }
 0x74c   : > { %18519 = vst [vmem:[#allocation109_spill] sm:$0xff] %v16999_v3  ;;  %v8616_v61 = vpop.f32.mrf.mxu2  ;;  %v13211_v3 = vld [vmem:[#allocation2 + $0x174] sm:$0xf0] }
 0x74d   : > { %v8617_v55 = vadd.f32 %v8616_v61, %v15047_v14  ;;  %v17011_v61 = vor.u32 %v13198_v50, %v11866_v22  ;;  %18525 = vst [vmem:[#allocation115_spill] sm:$0xff] %v17014_v49 }
 0x74e   : > { %v8797_v63 = vpop.f32.mrf.mxu0 }
 0x74f   : > { %v8705_v19 = vpop.f32.mrf.mxu3  ;;  %18524 = vst [vmem:[#allocation114_spill] sm:$0xff] %v17011_v61 }
 0x750   : > { %v8706_v11 = vadd.f32 %v8705_v19, %v8617_v55  ;;  %v12266_v19 = vld [vmem:[#allocation9 + $0x548] sm:$0xf0] }
 0x751   : > { %v17006_v8 = vpop.f32.mrf.mxu1  ;;  %8934 = vmatmul.bf16.gmra.mxu2 %v17002_v18  ;;  %9112 = vmatmul.bf16.gmra.mxu0 %v17004_v45  ;;  %v12269_v55 = vor.u32 %v13300_v58, %v12266_v19  ;;  %v11896_v19 = vld [vmem:[#allocation2 + $0x150] sm:$0xf] }
 0x752   : > { %18522 = vst [vmem:[#allocation112_spill] sm:$0xff] %v17006_v8  ;;  %v17008_v16 = vadd.f32 %v8794_v1, %v8706_v11  ;;  %v12333_v1 = vor.u32 %v13316_v31, %v12330_v9  ;;  %v11898_v9 = vld [vmem:[#allocation2 + $0x170] sm:$0xf0] }
 0x753   : > { %9265 = vmatpush.bf16.msra.mxu2 %v12269_v55  ;;  %v11904_v55 = vld [vmem:[#allocation2 + $0x158] sm:$0xf] }
 0x754   : > { %18523 = vst [vmem:[#allocation113_spill] sm:$0xff] %v17008_v16  ;;  %9023 = vmatmul.bf16.gmra.mxu3 %v17011_v61  ;;  %9201 = vmatmul.bf16.gmra.mxu1 %v17014_v49  ;;  %v8619_v0 = vpop.f32.mrf.mxu2  ;;  %v13332_v61 = vld [vmem:[#allocation9 + $0x644] sm:$0xf]  ;;  %v12394_v49 = vld [vmem:[#allocation9 + $0x648] sm:$0xf0] }
 0x755   : > { %v8620_v11 = vadd.f32 %v8619_v0, %v15047_v14  ;;  %9354 = vmatpush.bf16.msra.mxu3 %v12333_v1  ;;  %v12397_v45 = vor.u32 %v13332_v61, %v12394_v49  ;;  %v13210_v16 = vld [vmem:[#allocation2 + $0x16c] sm:$0xf0]  ;;  %v13206_v49 = vld [vmem:[#allocation2 + $0x154] sm:$0xf]  ;;  %v13207_v61 = vld [vmem:[#allocation2 + $0x15c] sm:$0xf] }
 0x756   : > { %v8799_v22 = vpop.f32.mrf.mxu0  ;;  %v17024_v1 = vor.u32 %v13210_v16, %v11896_v19 }
 0x757   : > { %v8708_v18 = vpop.f32.mrf.mxu3  ;;  %9443 = vmatpush.bf16.msra.mxu0 %v12397_v45  ;;  %v17033_v45 = vor.u32 %v13206_v49, %v11898_v9  ;;  %v13218_v49 = vld [vmem:[#allocation2 + $0x1ac] sm:$0xf0] }
 0x758   : > { %v8709_v50 = vadd.f32 %v8708_v18, %v8620_v11  ;;  %v11906_v18 = vld [vmem:[#allocation2 + $0x178] sm:$0xf0]  ;;  %18528 = vst [vmem:[#allocation118_spill] sm:$0xff] %v17024_v1 }
 0x759   : > { %v17019_v59 = vpop.f32.mrf.mxu1  ;;  %18532 = vst [vmem:[#allocation122_spill] sm:$0xff] %v17033_v45 }
 0x75a   : > { %18526 = vst [vmem:[#allocation116_spill] sm:$0xff] %v17019_v59  ;;  %v17021_v26 = vadd.f32 %v8797_v63, %v8709_v50  ;;  %v17026_v63 = vor.u32 %v13211_v3, %v11904_v55 }
 0x75c   : > { %18527 = vst [vmem:[#allocation117_spill] sm:$0xff] %v17021_v26  ;;  %v8621_v8 = vpop.f32.mrf.mxu2  ;;  %v13348_v26 = vld [vmem:[#allocation9 + $0x6c4] sm:$0xf] }
 0x75d   : > { %v8622_v58 = vadd.f32 %v8621_v8, %v15047_v14  ;;  %18529 = vst [vmem:[#allocation119_spill] sm:$0xff] %v17026_v63  ;;  %v17036_v8 = vor.u32 %v13207_v61, %v11906_v18  ;;  %v13219_v61 = vld [vmem:[#allocation2 + $0x1b4] sm:$0xf0] }
 0x75e   : > { %v8802_v0 = vpop.f32.mrf.mxu0 }
 0x75f   : > { %v8710_v31 = vpop.f32.mrf.mxu3  ;;  %18533 = vst [vmem:[#allocation123_spill] sm:$0xff] %v17036_v8 }
 0x760   : > { %v8711_v11 = vadd.f32 %v8710_v31, %v8622_v58  ;;  %v12458_v58 = vld [vmem:[#allocation9 + $0x6c8] sm:$0xf0] }
 0x761   : > { %v17028_v50 = vpop.f32.mrf.mxu1  ;;  %8939 = vmatmul.bf16.gmra.mxu2 %v17024_v1  ;;  %9117 = vmatmul.bf16.gmra.mxu0 %v17026_v63  ;;  %v12461_v16 = vor.u32 %v13348_v26, %v12458_v58  ;;  %v11928_v58 = vld [vmem:[#allocation2 + $0x190] sm:$0xf]  ;;  %v11936_v1 = vld [vmem:[#allocation2 + $0x198] sm:$0xf] }
 0x762   : > { %18530 = vst [vmem:[#allocation120_spill] sm:$0xff] %v17028_v50  ;;  %v17030_v59 = vadd.f32 %v8799_v22, %v8711_v11 }
 0x763   : > { %9532 = vmatpush.bf16.msra.mxu1 %v12461_v16  ;;  %v11938_v16 = vld [vmem:[#allocation2 + $0x1b8] sm:$0xf0] }
 0x764   : > { %18531 = vst [vmem:[#allocation121_spill] sm:$0xff] %v17030_v59  ;;  %9028 = vmatmul.bf16.gmra.mxu3 %v17033_v45  ;;  %9206 = vmatmul.bf16.gmra.mxu1 %v17036_v8  ;;  %v8624_v3 = vpop.f32.mrf.mxu2  ;;  %v11930_v8 = vld [vmem:[#allocation2 + $0x1b0] sm:$0xf0]  ;;  %v17048_v59 = vor.u32 %v13219_v61, %v11936_v1 }
 0x765   : > { %v8625_v22 = vadd.f32 %v8624_v3, %v15047_v14  ;;  %v17046_v3 = vor.u32 %v13218_v49, %v11928_v58  ;;  %v13298_v1 = vld [vmem:[#allocation9 + $0x534] sm:$0xf]  ;;  %v12322_v58 = vld [vmem:[#allocation9 + $0x5b8] sm:$0xf0] }
 0x766   : > { %v8804_v31 = vpop.f32.mrf.mxu0  ;;  %18537 = vst [vmem:[#allocation127_spill] sm:$0xff] %v17048_v59  ;;  %v13314_v49 = vld [vmem:[#allocation9 + $0x5b4] sm:$0xf] }
 0x767   : > { %v8713_v19 = vpop.f32.mrf.mxu3  ;;  %18536 = vst [vmem:[#allocation126_spill] sm:$0xff] %v17046_v3 }
 0x768   : > { %v8714_v55 = vadd.f32 %v8713_v19, %v8625_v22  ;;  %v13215_v19 = vld [vmem:[#allocation2 + $0x19c] sm:$0xf] }
 0x769   : > { %v17041_v9 = vpop.f32.mrf.mxu1 }
 0x76a   : > { %18534 = vst [vmem:[#allocation124_spill] sm:$0xff] %v17041_v9  ;;  %v17043_v11 = vadd.f32 %v8802_v0, %v8714_v55  ;;  %v13214_v0 = vld [vmem:[#allocation2 + $0x194] sm:$0xf]  ;;  %v17058_v9 = vor.u32 %v13215_v19, %v11938_v16 }
 0x76c   : > { %18535 = vst [vmem:[#allocation125_spill] sm:$0xff] %v17043_v11  ;;  %v8626_v18 = vpop.f32.mrf.mxu2 }
 0x76d   : > { %v8627_v26 = vadd.f32 %v8626_v18, %v15047_v14  ;;  %v17055_v18 = vor.u32 %v13214_v0, %v11930_v8  ;;  %18541 = vst [vmem:[#allocation131_spill] sm:$0xff] %v17058_v9 }
 0x76e   : > { %v8807_v63 = vpop.f32.mrf.mxu0 }
 0x76f   : > { %v8715_v45 = vpop.f32.mrf.mxu3  ;;  %18540 = vst [vmem:[#allocation130_spill] sm:$0xff] %v17055_v18 }
 0x770   : > { %v8716_v50 = vadd.f32 %v8715_v45, %v8627_v26  ;;  %v12258_v45 = vld [vmem:[#allocation9 + $0x538] sm:$0xf0] }
 0x771   : > { %v17050_v22 = vpop.f32.mrf.mxu1  ;;  %8944 = vmatmul.bf16.gmra.mxu2 %v17046_v3  ;;  %9122 = vmatmul.bf16.gmra.mxu0 %v17048_v59  ;;  %v12261_v26 = vor.u32 %v13298_v1, %v12258_v45  ;;  %v13226_v59 = vld [vmem:[#allocation2 + $0x1ec] sm:$0xf0]  ;;  %v13222_v45 = vld [vmem:[#allocation2 + $0x1d4] sm:$0xf] }
 0x772   : > { %18538 = vst [vmem:[#allocation128_spill] sm:$0xff] %v17050_v22  ;;  %v17052_v55 = vadd.f32 %v8804_v31, %v8716_v50  ;;  %v12325_v31 = vor.u32 %v13314_v49, %v12322_v58  ;;  %v11968_v22 = vld [vmem:[#allocation2 + $0x1d8] sm:$0xf]  ;;  %v11962_v49 = vld [vmem:[#allocation2 + $0x1f0] sm:$0xf0] }
 0x773   : > { %9266 = vmatpush.bf16.msra.mxu2 %v12261_v26  ;;  %v13223_v58 = vld [vmem:[#allocation2 + $0x1dc] sm:$0xf] }
 0x774   : > { %18539 = vst [vmem:[#allocation129_spill] sm:$0xff] %v17052_v55  ;;  %9033 = vmatmul.bf16.gmra.mxu3 %v17055_v18  ;;  %9211 = vmatmul.bf16.gmra.mxu1 %v17058_v9  ;;  %v8629_v61 = vpop.f32.mrf.mxu2  ;;  %v11960_v18 = vld [vmem:[#allocation2 + $0x1d0] sm:$0xf]  ;;  %v13227_v55 = vld [vmem:[#allocation2 + $0x1f4] sm:$0xf0]  ;;  %v17080_v57 = vor.u32 %v13223_v58, %v11970_v12 }
 0x775   : > { %v8630_v50 = vadd.f32 %v8629_v61, %v15047_v14  ;;  %9355 = vmatpush.bf16.msra.mxu3 %v12325_v31  ;;  %v12386_v31 = vld [vmem:[#allocation9 + $0x638] sm:$0xf0]  ;;  %v11992_v12 = vld [vmem:[#allocation2 + $0x210] sm:$0xf] }
 0x776   : > { %v8809_v8 = vpop.f32.mrf.mxu0  ;;  %18549 = vst [vmem:[#allocation139_spill] sm:$0xff] %v17080_v57  ;;  %v13234_v58 = vld [vmem:[#allocation2 + $0x22c] sm:$0xf0] }
 0x777   : > { %v8718_v3 = vpop.f32.mrf.mxu3 }
 0x778   : > { %v8719_v0 = vadd.f32 %v8718_v3, %v8630_v50  ;;  %v17068_v3 = vor.u32 %v13226_v59, %v11960_v18  ;;  %v17070_v50 = vor.u32 %v13227_v55, %v11968_v22 }
 0x779   : > { %v17063_v16 = vpop.f32.mrf.mxu1 }
 0x77a   : > { %18542 = vst [vmem:[#allocation132_spill] sm:$0xff] %v17063_v16  ;;  %v17065_v19 = vadd.f32 %v8807_v63, %v8719_v0  ;;  %v13330_v63 = vld [vmem:[#allocation9 + $0x634] sm:$0xf] }
 0x77b   : > { %18544 = vst [vmem:[#allocation134_spill] sm:$0xff] %v17068_v3  ;;  %v12389_v16 = vor.u32 %v13330_v63, %v12386_v31  ;;  %v12000_v63 = vld [vmem:[#allocation2 + $0x218] sm:$0xf] }
 0x77c   : > { %18543 = vst [vmem:[#allocation133_spill] sm:$0xff] %v17065_v19  ;;  %v8631_v9 = vpop.f32.mrf.mxu2  ;;  %v13235_v31 = vld [vmem:[#allocation2 + $0x234] sm:$0xf0] }
 0x77d   : > { %v8632_v1 = vadd.f32 %v8631_v9, %v15047_v14  ;;  %18545 = vst [vmem:[#allocation135_spill] sm:$0xff] %v17070_v50  ;;  %v17077_v9 = vor.u32 %v13222_v45, %v11962_v49  ;;  %9444 = vmatpush.bf16.msra.mxu0 %v12389_v16 }
 0x77e   : > { %v8812_v61 = vpop.f32.mrf.mxu0 }
 0x77f   : > { %v8720_v11 = vpop.f32.mrf.mxu3  ;;  %18548 = vst [vmem:[#allocation138_spill] sm:$0xff] %v17077_v9 }
 0x780   : > { %v8721_v26 = vadd.f32 %v8720_v11, %v8632_v1  ;;  %v12450_v1 = vld [vmem:[#allocation9 + $0x6b8] sm:$0xf0] }
 0x781   : > { %v17072_v0 = vpop.f32.mrf.mxu1  ;;  %8949 = vmatmul.bf16.gmra.mxu2 %v17068_v3  ;;  %9127 = vmatmul.bf16.gmra.mxu0 %v17070_v50  ;;  %v11994_v3 = vld [vmem:[#allocation2 + $0x230] sm:$0xf0] }
 0x782   : > { %18546 = vst [vmem:[#allocation136_spill] sm:$0xff] %v17072_v0  ;;  %v17074_v19 = vadd.f32 %v8809_v8, %v8721_v26  ;;  %v13346_v8 = vld [vmem:[#allocation9 + $0x6b4] sm:$0xf] }
 0x783   : > { %v12453_v45 = vor.u32 %v13346_v8, %v12450_v1  ;;  %v17092_v8 = vor.u32 %v13235_v31, %v12000_v63  ;;  %v12250_v63 = vld [vmem:[#allocation9 + $0x528] sm:$0xf0] }
 0x784   : > { %18547 = vst [vmem:[#allocation137_spill] sm:$0xff] %v17074_v19  ;;  %9038 = vmatmul.bf16.gmra.mxu3 %v17077_v9  ;;  %9216 = vmatmul.bf16.gmra.mxu1 %v17080_v57  ;;  %v8634_v59 = vpop.f32.mrf.mxu2  ;;  %v13230_v9 = vld [vmem:[#allocation2 + $0x214] sm:$0xf]  ;;  %v17090_v19 = vor.u32 %v13234_v58, %v11992_v12  ;;  %v13296_v58 = vld [vmem:[#allocation9 + $0x524] sm:$0xf] }
 0x785   : > { %v8635_v11 = vadd.f32 %v8634_v59, %v15047_v14  ;;  %9533 = vmatpush.bf16.msra.mxu1 %v12453_v45  ;;  %18552 = vst [vmem:[#allocation142_spill] sm:$0xff] %v17092_v8  ;;  %v17097_v1 = vor.u32 %v13230_v9, %v11994_v3  ;;  %v13312_v3 = vld [vmem:[#allocation9 + $0x5a4] sm:$0xf]  ;;  %v12253_v31 = vor.u32 %v13296_v58, %v12250_v63  ;;  %v12026_v63 = vld [vmem:[#allocation2 + $0x270] sm:$0xf0] }
 0x786   : > { %v8814_v55 = vpop.f32.mrf.mxu0  ;;  %18551 = vst [vmem:[#allocation141_spill] sm:$0xff] %v17090_v19 }
 0x787   : > { %v8723_v22 = vpop.f32.mrf.mxu3  ;;  %18553 = vst [vmem:[#allocation143_spill] sm:$0xff] %v17097_v1  ;;  %9267 = vmatpush.bf16.msra.mxu2 %v12253_v31 }
 0x788   : > { %v8724_v18 = vadd.f32 %v8723_v22, %v8635_v11  ;;  %v13231_v11 = vld [vmem:[#allocation2 + $0x21c] sm:$0xf] }
 0x789   : > { %v17085_v26 = vpop.f32.mrf.mxu1  ;;  %v12002_v22 = vld [vmem:[#allocation2 + $0x238] sm:$0xf0] }
 0x78a   : > { %18550 = vst [vmem:[#allocation140_spill] sm:$0xff] %v17085_v26  ;;  %v17087_v49 = vadd.f32 %v8812_v61, %v8724_v18 }
 0x78c   : > { %v8636_v16 = vpop.f32.mrf.mxu2 }
 0x78d   : > { %v8637_v57 = vadd.f32 %v8636_v16, %v15047_v14  ;;  %v17100_v14 = vor.u32 %v13231_v11, %v12002_v22 }
 0x78e   : > { %v9093_v50 = vpop.f32.mrf.mxu0 }
 0x78f   : > { %v8725_v59 = vpop.f32.mrf.mxu3  ;;  %18554 = vst [vmem:[#allocation144_spill] sm:$0xff] %v17100_v14 }
 0x790   : > { %v8726_v0 = vadd.f32 %v8725_v59, %v8637_v57  ;;  %v8827_v57 = vadd.f32 %v16743_v36, %v16757_v53  ;;  %v12314_v59 = vld [vmem:[#allocation9 + $0x5a8] sm:$0xf0] }
 0x791   : > { %v9182_v61 = vpop.f32.mrf.mxu1  ;;  %8954 = vmatmul.bf16.gmra.mxu2 %v17090_v19  ;;  %9132 = vmatmul.bf16.gmra.mxu0 %v17092_v8  ;;  %v12317_v22 = vor.u32 %v13312_v3, %v12314_v59  ;;  %v12024_v36 = vld [vmem:[#allocation2 + $0x250] sm:$0xf]  ;;  %v13238_v19 = vld [vmem:[#allocation2 + $0x254] sm:$0xf] }
 0x792   : > { %v17094_v18 = vadd.f32 %v8814_v55, %v8726_v0 }
 0x793   : > { %9356 = vmatpush.bf16.msra.mxu3 %v12317_v22 }
 0x794   : > { %9043 = vmatmul.bf16.gmra.mxu3 %v17097_v1  ;;  %9221 = vmatmul.bf16.gmra.mxu1 %v17100_v14  ;;  %v8915_v45 = vpop.f32.mrf.mxu2  ;;  %v8829_v14 = vadd.f32 %v16755_v30, %v16766_v35  ;;  %v13328_v30 = vld [vmem:[#allocation9 + $0x624] sm:$0xf]  ;;  %v12378_v35 = vld [vmem:[#allocation9 + $0x628] sm:$0xf0] }
 0x795   : > { %v8916_v12 = vadd.f32 %v8915_v45, %v8827_v57  ;;  %v13242_v57 = vld [vmem:[#allocation2 + $0x26c] sm:$0xf0]  ;;  %v12032_v45 = vld [vmem:[#allocation2 + $0x258] sm:$0xf] }
 0x796   : > { %v9095_v0 = vpop.f32.mrf.mxu0  ;;  %v17109_v3 = vor.u32 %v13242_v57, %v12024_v36 }
 0x797   : > { %v9004_v16 = vpop.f32.mrf.mxu3 }
 0x798   : > { %v9005_v55 = vadd.f32 %v9004_v16, %v8916_v12  ;;  %v13243_v12 = vld [vmem:[#allocation2 + $0x274] sm:$0xf0] }
 0x799   : > { %v9184_v9 = vpop.f32.mrf.mxu1  ;;  %v17111_v31 = vor.u32 %v13243_v12, %v12032_v45  ;;  %v13344_v12 = vld [vmem:[#allocation9 + $0x6a4] sm:$0xf] }
 0x79a   : > { %v9094_v11 = vadd.f32 %v9093_v50, %v9005_v55  ;;  %v13239_v50 = vld [vmem:[#allocation2 + $0x25c] sm:$0xf] }
 0x79b   : > { %v12034_v55 = vld [vmem:[#allocation2 + $0x278] sm:$0xf0] }
 0x79c   : > { %v9183_v1 = vadd.f32 %v9182_v61, %v9094_v11  ;;  %v8917_v53 = vpop.f32.mrf.mxu2  ;;  %v12381_v11 = vor.u32 %v13328_v30, %v12378_v35  ;;  %v12056_v30 = vld [vmem:[#allocation2 + $0x290] sm:$0xf]  ;;  %v12064_v35 = vld [vmem:[#allocation2 + $0x298] sm:$0xf] }
 0x79d   : > { %v8918_v8 = vadd.f32 %v8917_v53, %v8829_v14  ;;  %v17117_v14 = vor.u32 %v13239_v50, %v12034_v55 }
 0x79e   : > { %v9974_v16 = vmax.f32 %v9183_v1, 0.0  ;;  %v9098_v58 = vpop.f32.mrf.mxu0  ;;  %v17114_v1 = vor.u32 %v13238_v19, %v12026_v63  ;;  %9445 = vmatpush.bf16.msra.mxu0 %v12381_v11  ;;  %v13251_v11 = vld [vmem:[#allocation2 + $0x2b4] sm:$0xf0] }
 0x79f   : > { %v9006_v26 = vpop.f32.mrf.mxu3 }
 0x7a0   : > { %12742 = vst [vmem:[%s15072_s29 + $0x50] sm:$0xff] %v9974_v16  ;;  %v9007_v61 = vadd.f32 %v9006_v26, %v8918_v8  ;;  %v8832_v8 = vadd.f32 %v16764_v52, %v16779_v4  ;;  %v12442_v16 = vld [vmem:[#allocation9 + $0x6a8] sm:$0xf0] }
 0x7a1   : > { %v9187_v59 = vpop.f32.mrf.mxu1  ;;  %8959 = vmatmul.bf16.gmra.mxu2 %v17109_v3  ;;  %9137 = vmatmul.bf16.gmra.mxu0 %v17111_v31  ;;  %v12445_v50 = vor.u32 %v13344_v12, %v12442_v16  ;;  %v13250_v4 = vld [vmem:[#allocation2 + $0x2ac] sm:$0xf0]  ;;  %v12066_v12 = vld [vmem:[#allocation2 + $0x2b8] sm:$0xf0] }
 0x7a2   : > { %v9096_v22 = vadd.f32 %v9095_v0, %v9007_v61  ;;  %v8834_v61 = vadd.f32 %v16777_v44, %v16788_v23 }
 0x7a3   : > { %9534 = vmatpush.bf16.msra.mxu1 %v12445_v50 }
 0x7a4   : > { %v9185_v26 = vadd.f32 %v9184_v9, %v9096_v22  ;;  %9048 = vmatmul.bf16.gmra.mxu3 %v17114_v1  ;;  %9226 = vmatmul.bf16.gmra.mxu1 %v17117_v14  ;;  %v8920_v36 = vpop.f32.mrf.mxu2 }
 0x7a5   : > { %v8921_v0 = vadd.f32 %v8920_v36, %v8832_v8  ;;  %v13246_v8 = vld [vmem:[#allocation2 + $0x294] sm:$0xf] }
 0x7a6   : > { %v9976_v53 = vmax.f32 %v9185_v26, 0.0  ;;  %v9100_v45 = vpop.f32.mrf.mxu0 }
 0x7a7   : > { %v9009_v57 = vpop.f32.mrf.mxu3 }
 0x7a8   : > { %12744 = vst [vmem:[%s15072_s29 + $0x70] sm:$0xff] %v9976_v53  ;;  %v9010_v19 = vadd.f32 %v9009_v57, %v8921_v0  ;;  %v12058_v0 = vld [vmem:[#allocation2 + $0x2b0] sm:$0xf0]  ;;  %v13247_v57 = vld [vmem:[#allocation2 + $0x29c] sm:$0xf] }
 0x7a9   : > { %v9189_v63 = vpop.f32.mrf.mxu1  ;;  %v17132_v16 = vor.u32 %v13246_v8, %v12058_v0  ;;  %v17135_v50 = vor.u32 %v13247_v57, %v12066_v12 }
 0x7aa   : > { %v9099_v55 = vadd.f32 %v9098_v58, %v9010_v19  ;;  %v17127_v19 = vor.u32 %v13250_v4, %v12056_v30 }
 0x7ac   : > { %v9188_v9 = vadd.f32 %v9187_v59, %v9099_v55  ;;  %v8922_v52 = vpop.f32.mrf.mxu2  ;;  %v17129_v59 = vor.u32 %v13251_v11, %v12064_v35  ;;  %v13294_v11 = vld [vmem:[#allocation9 + $0x514] sm:$0xf] }
 0x7ad   : > { %v8923_v26 = vadd.f32 %v8922_v52, %v8834_v61 }
 0x7ae   : > { %v9978_v22 = vmax.f32 %v9188_v9, 0.0  ;;  %v9103_v53 = vpop.f32.mrf.mxu0  ;;  %v8837_v9 = vadd.f32 %v16786_v29, %v16801_v33  ;;  %v8839_v29 = vadd.f32 %v16799_v17, %v16810_v15  ;;  %v12088_v33 = vld [vmem:[#allocation2 + $0x2d0] sm:$0xf]  ;;  %v13326_v17 = vld [vmem:[#allocation9 + $0x614] sm:$0xf] }
 0x7af   : > { %v9011_v36 = vpop.f32.mrf.mxu3  ;;  %v12370_v15 = vld [vmem:[#allocation9 + $0x618] sm:$0xf0] }
 0x7b0   : > { %12746 = vst [vmem:[%s15072_s29 + $0xd0] sm:$0xff] %v9978_v22  ;;  %v9012_v58 = vadd.f32 %v9011_v36, %v8923_v26  ;;  %v12242_v22 = vld [vmem:[#allocation9 + $0x518] sm:$0xf0]  ;;  %v13310_v36 = vld [vmem:[#allocation9 + $0x594] sm:$0xf] }
 0x7b1   : > { %v9192_v44 = vpop.f32.mrf.mxu1  ;;  %8964 = vmatmul.bf16.gmra.mxu2 %v17127_v19  ;;  %9142 = vmatmul.bf16.gmra.mxu0 %v17129_v59  ;;  %v12245_v8 = vor.u32 %v13294_v11, %v12242_v22  ;;  %v12090_v22 = vld [vmem:[#allocation2 + $0x2f0] sm:$0xf0] }
 0x7b2   : > { %v9101_v23 = vadd.f32 %v9100_v45, %v9012_v58 }
 0x7b3   : > { %9268 = vmatpush.bf16.msra.mxu2 %v12245_v8 }
 0x7b4   : > { %v9190_v55 = vadd.f32 %v9189_v63, %v9101_v23  ;;  %9053 = vmatmul.bf16.gmra.mxu3 %v17132_v16  ;;  %9231 = vmatmul.bf16.gmra.mxu1 %v17135_v50  ;;  %v8925_v61 = vpop.f32.mrf.mxu2  ;;  %v12306_v63 = vld [vmem:[#allocation9 + $0x598] sm:$0xf0]  ;;  %v13258_v23 = vld [vmem:[#allocation2 + $0x2ec] sm:$0xf0] }
 0x7b5   : > { %v8926_v52 = vadd.f32 %v8925_v61, %v8837_v9  ;;  %v12309_v57 = vor.u32 %v13310_v36, %v12306_v63  ;;  %v13259_v9 = vld [vmem:[#allocation2 + $0x2f4] sm:$0xf0]  ;;  %v17145_v8 = vor.u32 %v13258_v23, %v12088_v33  ;;  %v8842_v33 = vadd.f32 %v16808_v37, %v16823_v21  ;;  %v13266_v21 = vld [vmem:[#allocation2 + $0x32c] sm:$0xf0] }
 0x7b6   : > { %v9980_v30 = vmax.f32 %v9190_v55, 0.0  ;;  %v9105_v4 = vpop.f32.mrf.mxu0  ;;  %v12096_v55 = vld [vmem:[#allocation2 + $0x2d8] sm:$0xf] }
 0x7b7   : > { %v9014_v45 = vpop.f32.mrf.mxu3  ;;  %9357 = vmatpush.bf16.msra.mxu3 %v12309_v57  ;;  %v17147_v36 = vor.u32 %v13259_v9, %v12096_v55 }
 0x7b8   : > { %12748 = vst [vmem:[%s15072_s29 + $0xf0] sm:$0xff] %v9980_v30  ;;  %v9015_v35 = vadd.f32 %v9014_v45, %v8926_v52  ;;  %v13254_v52 = vld [vmem:[#allocation2 + $0x2d4] sm:$0xf] }
 0x7b9   : > { %v9194_v26 = vpop.f32.mrf.mxu1 }
 0x7ba   : > { %v9104_v0 = vadd.f32 %v9103_v53, %v9015_v35  ;;  %v13255_v53 = vld [vmem:[#allocation2 + $0x2dc] sm:$0xf] }
 0x7bb   : > { %v12098_v35 = vld [vmem:[#allocation2 + $0x2f8] sm:$0xf0] }
 0x7bc   : > { %v9193_v12 = vadd.f32 %v9192_v44, %v9104_v0  ;;  %v8927_v58 = vpop.f32.mrf.mxu2  ;;  %v12373_v0 = vor.u32 %v13326_v17, %v12370_v15  ;;  %v12120_v17 = vld [vmem:[#allocation2 + $0x310] sm:$0xf]  ;;  %v12128_v15 = vld [vmem:[#allocation2 + $0x318] sm:$0xf] }
 0x7bd   : > { %v8928_v30 = vadd.f32 %v8927_v58, %v8839_v29  ;;  %v17153_v29 = vor.u32 %v13255_v53, %v12098_v35 }
 0x7be   : > { %v9982_v61 = vmax.f32 %v9193_v12, 0.0  ;;  %v9108_v11 = vpop.f32.mrf.mxu0  ;;  %v17150_v12 = vor.u32 %v13254_v52, %v12090_v22  ;;  %9446 = vmatpush.bf16.msra.mxu0 %v12373_v0  ;;  %v13342_v52 = vld [vmem:[#allocation9 + $0x694] sm:$0xf] }
 0x7bf   : > { %v9016_v45 = vpop.f32.mrf.mxu3  ;;  %v13267_v0 = vld [vmem:[#allocation2 + $0x334] sm:$0xf0] }
 0x7c0   : > { %12750 = vst [vmem:[%s15072_s29 + $0x150] sm:$0xff] %v9982_v61  ;;  %v9017_v44 = vadd.f32 %v9016_v45, %v8928_v30  ;;  %v12434_v45 = vld [vmem:[#allocation9 + $0x698] sm:$0xf0] }
 0x7c1   : > { %v9197_v63 = vpop.f32.mrf.mxu1  ;;  %8969 = vmatmul.bf16.gmra.mxu2 %v17145_v8  ;;  %9147 = vmatmul.bf16.gmra.mxu0 %v17147_v36  ;;  %v12437_v53 = vor.u32 %v13342_v52, %v12434_v45  ;;  %v12130_v52 = vld [vmem:[#allocation2 + $0x338] sm:$0xf0] }
 0x7c2   : > { %v9106_v57 = vadd.f32 %v9105_v4, %v9017_v44  ;;  %v8844_v44 = vadd.f32 %v16821_v43, %v16832_v7 }
 0x7c3   : > { %9535 = vmatpush.bf16.msra.mxu1 %v12437_v53 }
 0x7c4   : > { %v9195_v58 = vadd.f32 %v9194_v26, %v9106_v57  ;;  %9058 = vmatmul.bf16.gmra.mxu3 %v17150_v12  ;;  %9236 = vmatmul.bf16.gmra.mxu1 %v17153_v29  ;;  %v8930_v23 = vpop.f32.mrf.mxu2 }
 0x7c5   : > { %v8931_v4 = vadd.f32 %v8930_v23, %v8842_v33  ;;  %v13262_v33 = vld [vmem:[#allocation2 + $0x314] sm:$0xf] }
 0x7c6   : > { %v9984_v55 = vmax.f32 %v9195_v58, 0.0  ;;  %v9110_v61 = vpop.f32.mrf.mxu0 }
 0x7c7   : > { %v9019_v9 = vpop.f32.mrf.mxu3 }
 0x7c8   : > { %12752 = vst [vmem:[%s15072_s29 + $0x170] sm:$0xff] %v9984_v55  ;;  %v9020_v30 = vadd.f32 %v9019_v9, %v8931_v4  ;;  %v12122_v4 = vld [vmem:[#allocation2 + $0x330] sm:$0xf0]  ;;  %v13263_v9 = vld [vmem:[#allocation2 + $0x31c] sm:$0xf] }
 0x7c9   : > { %v9199_v22 = vpop.f32.mrf.mxu1  ;;  %v17168_v45 = vor.u32 %v13262_v33, %v12122_v4  ;;  %v17171_v53 = vor.u32 %v13263_v9, %v12130_v52 }
 0x7ca   : > { %v9109_v35 = vadd.f32 %v9108_v11, %v9020_v30  ;;  %v17163_v30 = vor.u32 %v13266_v21, %v12120_v17 }
 0x7cb   : > { %18555 = vst [vmem:[#allocation145_spill] sm:$0xff] %v17168_v45 }
 0x7cc   : > { %v9198_v26 = vadd.f32 %v9197_v63, %v9109_v35  ;;  %v8932_v37 = vpop.f32.mrf.mxu2  ;;  %v17165_v63 = vor.u32 %v13267_v0, %v12128_v15  ;;  %18556 = vst [vmem:[#allocation146_spill] sm:$0xff] %v17171_v53  ;;  %v13292_v0 = vld [vmem:[#allocation9 + $0x504] sm:$0xf] }
 0x7cd   : > { %v8933_v58 = vadd.f32 %v8932_v37, %v8844_v44 }
 0x7ce   : > { %v9986_v57 = vmax.f32 %v9198_v26, 0.0  ;;  %v9113_v55 = vpop.f32.mrf.mxu0  ;;  %v8847_v26 = vadd.f32 %v16830_v39, %v16845_v40  ;;  %v8849_v39 = vadd.f32 %v16843_v46, %v16854_v24  ;;  %v12152_v40 = vld [vmem:[#allocation2 + $0x350] sm:$0xf]  ;;  %v12154_v46 = vld [vmem:[#allocation2 + $0x370] sm:$0xf0] }
 0x7cf   : > { %v9021_v23 = vpop.f32.mrf.mxu3  ;;  %v13271_v24 = vld [vmem:[#allocation2 + $0x35c] sm:$0xf] }
 0x7d0   : > { %12754 = vst [vmem:[%s15072_s29 + $0x1d0] sm:$0xff] %v9986_v57  ;;  %v9022_v11 = vadd.f32 %v9021_v23, %v8933_v58  ;;  %v12234_v57 = vld [vmem:[#allocation9 + $0x508] sm:$0xf0]  ;;  %v13308_v23 = vld [vmem:[#allocation9 + $0x584] sm:$0xf] }
 0x7d1   : > { %v9202_v43 = vpop.f32.mrf.mxu1  ;;  %8974 = vmatmul.bf16.gmra.mxu2 %v17163_v30  ;;  %9152 = vmatmul.bf16.gmra.mxu0 %v17165_v63  ;;  %v12237_v33 = vor.u32 %v13292_v0, %v12234_v57 }
 0x7d2   : > { %v9111_v7 = vadd.f32 %v9110_v61, %v9022_v11 }
 0x7d3   : > { %9269 = vmatpush.bf16.msra.mxu2 %v12237_v33  ;;  %v12162_v33 = vld [vmem:[#allocation2 + $0x378] sm:$0xf0] }
 0x7d4   : > { %v9200_v35 = vadd.f32 %v9199_v22, %v9111_v7  ;;  %9063 = vmatmul.bf16.gmra.mxu3 %v17168_v45  ;;  %9241 = vmatmul.bf16.gmra.mxu1 %v17171_v53  ;;  %v8935_v44 = vpop.f32.mrf.mxu2  ;;  %v12298_v22 = vld [vmem:[#allocation9 + $0x588] sm:$0xf0] }
 0x7d5   : > { %v8936_v37 = vadd.f32 %v8935_v44, %v8847_v26  ;;  %v12301_v9 = vor.u32 %v13308_v23, %v12298_v22  ;;  %v13274_v7 = vld [vmem:[#allocation2 + $0x36c] sm:$0xf0]  ;;  %v13275_v26 = vld [vmem:[#allocation2 + $0x374] sm:$0xf0]  ;;  %v13564_v44 = vld [vmem:[#allocation2 + $0x468] sm:$0xff] }
 0x7d6   : > { %v9988_v17 = vmax.f32 %v9200_v35, 0.0  ;;  %v9115_v21 = vpop.f32.mrf.mxu0  ;;  %v12160_v35 = vld [vmem:[#allocation2 + $0x358] sm:$0xf]  ;;  %v18559_v23 = vld [vmem:[#allocation40_spill] sm:$0xff] }
 0x7d7   : > { %v9024_v61 = vpop.f32.mrf.mxu3  ;;  %9358 = vmatpush.bf16.msra.mxu3 %v12301_v9  ;;  %v2839_v22 = vshrl.u32 %v18559_v23, 16  ;;  %v17187_v9 = vor.u32 %v13274_v7, %v12152_v40  ;;  %v17189_v53 = vor.u32 %v13275_v26, %v12160_v35  ;;  %v17195_v23 = vor.u32 %v13271_v24, %v12162_v33  ;;  %v13340_v33 = vld [vmem:[#allocation9 + $0x684] sm:$0xf] }
 0x7d8   : > { %12756 = vst [vmem:[%s15072_s29 + $0x1f0] sm:$0xff] %v9988_v17  ;;  %v9025_v15 = vadd.f32 %v9024_v61, %v8936_v37  ;;  %v13324_v17 = vld [vmem:[#allocation9 + $0x604] sm:$0xf]  ;;  %v12362_v37 = vld [vmem:[#allocation9 + $0x608] sm:$0xf0] }
 0x7d9   : > { %v9204_v58 = vpop.f32.mrf.mxu1  ;;  %18561 = vst [vmem:[#allocation35_spill] sm:$0xff] %v17195_v23  ;;  %v2841_v40 = vrot.slane %v2839_v22, 4  ;;  %v18562_v22 = vld [vmem:[#allocation39_spill] sm:$0xff] }
 0x7da   : > { %v9114_v4 = vadd.f32 %v9113_v55, %v9025_v15  ;;  %v2533_v55 = vsel %vm1973_vm11, 0, %v13564_v44  ;;  %v12365_v44 = vor.u32 %v13324_v17, %v12362_v37 }
 0x7db   : > { %v2845_v7 = vshll.u32 %v2533_v55, 16 }
 0x7dc   : > { %v9203_v52 = vadd.f32 %v9202_v43, %v9114_v4  ;;  %v8937_v11 = vpop.f32.mrf.mxu2  ;;  %v13270_v43 = vld [vmem:[#allocation2 + $0x354] sm:$0xf]  ;;  %9447 = vmatpush.bf16.msra.mxu0 %v12365_v44 }
 0x7dd   : > { %v8938_v15 = vadd.f32 %v8937_v11, %v8849_v39  ;;  %v17192_v11 = vor.u32 %v13270_v43, %v12154_v46 }
 0x7de   : > { %v9990_v61 = vmax.f32 %v9203_v52, 0.0  ;;  %v9118_v57 = vpop.f32.mrf.mxu0  ;;  %v2849_v52 = vshrl.u32 %v2533_v55, 16  ;;  %v2842_v55 = vor.u32 %v2841_v40, %v18562_v22 }
 0x7df   : > { %v9026_v0 = vpop.f32.mrf.mxu3  ;;  %18560 = vst [vmem:[#allocation38_spill] sm:$0xff] %v17192_v11 }
 0x7e0   : > { %12758 = vst [vmem:[%s15072_s29 + $0x250] sm:$0xff] %v9990_v61  ;;  %v9027_v4 = vadd.f32 %v9026_v0, %v8938_v15  ;;  %v2851_v61 = vrot.slane %v2849_v52, 4 }
 0x7e1   : > { %v9207_v45 = vpop.f32.mrf.mxu1  ;;  %8979 = vmatmul.bf16.gmra.mxu2 %v17187_v9  ;;  %9157 = vmatmul.bf16.gmra.mxu0 %v17189_v53 }
 0x7e2   : > { %v9116_v39 = vadd.f32 %v9115_v21, %v9027_v4  ;;  %v8852_v21 = vadd.f32 %v16852_v28, %v16867_v10  ;;  %v12426_v4 = vld [vmem:[#allocation9 + $0x688] sm:$0xf0]  ;;  %v8854_v28 = vadd.f32 %v16865_v2, %v16876_v25  ;;  %v13278_v2 = vld [vmem:[#allocation2 + $0x394] sm:$0xf] }
 0x7e3   : > { %v12429_v37 = vor.u32 %v13340_v33, %v12426_v4 }
 0x7e4   : > { %v9205_v35 = vadd.f32 %v9204_v58, %v9116_v39  ;;  %9068 = vmatmul.bf16.gmra.mxu3 %v17192_v11  ;;  %9246 = vmatmul.bf16.gmra.mxu1 %v17195_v23  ;;  %v8940_v26 = vpop.f32.mrf.mxu2  ;;  %v2847_v58 = vrot.slane %v2845_v7, 5  ;;  %v2501_v39 = vld [vmem:[#allocation2 + $0x448] sm:$0x11]  ;;  %v2843_v23 = vrot.slane %v2842_v55, 4  ;;  %v12186_v55 = vld [vmem:[#allocation2 + $0x3b0] sm:$0xf0] }
 0x7e5   : > { %v8941_v43 = vadd.f32 %v8940_v26, %v8852_v21  ;;  %9536 = vmatpush.bf16.msra.mxu1 %v12429_v37  ;;  %v2534_v52 = vsel %vm15500_vm1, 0, %v2501_v39  ;;  %v12184_v21 = vld [vmem:[#allocation2 + $0x390] sm:$0xf]  ;;  %v12194_v37 = vld [vmem:[#allocation2 + $0x3b8] sm:$0xf0]  ;;  %v17217_v10 = vor.u32 %v13278_v2, %v12186_v55 }
 0x7e6   : > { %v9992_v15 = vmax.f32 %v9205_v35, 0.0  ;;  %v9120_v46 = vpop.f32.mrf.mxu0  ;;  %v2852_v11 = vor.u32 %v2851_v61, %v2847_v58  ;;  %v13282_v26 = vld [vmem:[#allocation2 + $0x3ac] sm:$0xf0]  ;;  %v2848_v40 = vsel %vm18225_vm6, %v2843_v23, %v2847_v58 }
 0x7e7   : > { %v9029_v0 = vpop.f32.mrf.mxu3  ;;  %2921 = vst [vmem:[#allocation2 + $0x3d8] sm:$0xff] %v2848_v40  ;;  %v17210_v39 = vor.u32 %v13282_v26, %v12184_v21  ;;  %v8857_v21 = vadd.f32 %v16874_v60, %v16889_v51  ;;  %v8859_v51 = vadd.f32 %v16887_v47, %v16898_v54  ;;  %v13402_v54 = vld [vmem:[#allocation9 + $0x874] sm:$0xf] }
 0x7e8   : > { %12760 = vst [vmem:[%s15072_s29 + $0x270] sm:$0xff] %v9992_v15  ;;  %v9030_v24 = vadd.f32 %v9029_v0, %v8941_v43  ;;  %v2853_v7 = vrot.slane %v2852_v11, 4  ;;  %v2855_v43 = vshll.u32 %v2534_v52, 16  ;;  %v12192_v0 = vld [vmem:[#allocation2 + $0x398] sm:$0xf] }
 0x7e9   : > { %v9209_v17 = vpop.f32.mrf.mxu1 }
 0x7ea   : > { %v9119_v44 = vadd.f32 %v9118_v57, %v9030_v24  ;;  %v13283_v24 = vld [vmem:[#allocation2 + $0x3b4] sm:$0xf0]  ;;  %v2857_v25 = vrot.slane %v2855_v43, 5 }
 0x7eb   : > { %v17212_v23 = vor.u32 %v13283_v24, %v12192_v0  ;;  %v13370_v0 = vld [vmem:[#allocation9 + $0x774] sm:$0xf]  ;;  %v12546_v24 = vld [vmem:[#allocation9 + $0x778] sm:$0xf0] }
 0x7ec   : > { %v9208_v35 = vadd.f32 %v9207_v45, %v9119_v44  ;;  %v8942_v57 = vpop.f32.mrf.mxu2  ;;  %v13279_v45 = vld [vmem:[#allocation2 + $0x39c] sm:$0xf]  ;;  %v2858_v11 = vsel %vm18225_vm6, %v2853_v7, %v2857_v25  ;;  %v12549_v2 = vor.u32 %v13370_v0, %v12546_v24 }
 0x7ed   : > { %v8943_v33 = vadd.f32 %v8942_v57, %v8854_v28  ;;  %2922 = vst [vmem:[#allocation2 + $0x3f8] sm:$0xff] %v2858_v11  ;;  %v17220_v52 = vor.u32 %v13279_v45, %v12194_v37  ;;  %v12610_v25 = vld [vmem:[#allocation9 + $0x7f8] sm:$0xf0] }
 0x7ee   : > { %v9994_v61 = vmax.f32 %v9208_v35, 0.0  ;;  %v9123_v22 = vpop.f32.mrf.mxu0  ;;  %v12224_v55 = vld [vmem:[#allocation2 + $0x3d8] sm:$0xf]  ;;  %9618 = vmatpush.bf16.msrb.mxu2 %v12549_v2  ;;  %v12674_v24 = vld [vmem:[#allocation9 + $0x878] sm:$0xf0] }
 0x7ef   : > { %v9031_v4 = vpop.f32.mrf.mxu3 }
 0x7f0   : > { %12762 = vst [vmem:[%s15072_s29 + $0x2d0] sm:$0xff] %v9994_v61  ;;  %v9032_v44 = vadd.f32 %v9031_v4, %v8943_v33  ;;  %v13386_v61 = vld [vmem:[#allocation9 + $0x7f4] sm:$0xf]  ;;  %v13290_v4 = vld [vmem:[#allocation2 + $0x3ec] sm:$0xf0] }
 0x7f1   : > { %v9212_v58 = vpop.f32.mrf.mxu1  ;;  %8984 = vmatmul.bf16.gmra.mxu2 %v17210_v39  ;;  %9162 = vmatmul.bf16.gmra.mxu0 %v17212_v23  ;;  %v12613_v37 = vor.u32 %v13386_v61, %v12610_v25  ;;  %v8862_v25 = vadd.f32 %v16896_v27, %v16911_v6 }
 0x7f2   : > { %v9121_v28 = vadd.f32 %v9120_v46, %v9032_v44  ;;  %v13286_v44 = vld [vmem:[#allocation2 + $0x3d4] sm:$0xf] }
 0x7f3   : > { %9707 = vmatpush.bf16.msrb.mxu3 %v12613_v37 }
 0x7f4   : > { %v9210_v35 = vadd.f32 %v9209_v17, %v9121_v28  ;;  %9073 = vmatmul.bf16.gmra.mxu3 %v17217_v10  ;;  %9251 = vmatmul.bf16.gmra.mxu1 %v17220_v52  ;;  %v8945_v26 = vpop.f32.mrf.mxu2  ;;  %v12216_v17 = vld [vmem:[#allocation2 + $0x3d0] sm:$0xf]  ;;  %v13291_v45 = vld [vmem:[#allocation2 + $0x3f4] sm:$0xf0]  ;;  %v12218_v28 = vld [vmem:[#allocation2 + $0x3f0] sm:$0xf0] }
 0x7f5   : > { %v8946_v40 = vadd.f32 %v8945_v26, %v8857_v21  ;;  %v12226_v21 = vld [vmem:[#allocation2 + $0x3f8] sm:$0xf0]  ;;  %v17234_v0 = vor.u32 %v13286_v44, %v12218_v28 }
 0x7f6   : > { %v9996_v15 = vmax.f32 %v9210_v35, 0.0  ;;  %v9125_v7 = vpop.f32.mrf.mxu0  ;;  %v13287_v35 = vld [vmem:[#allocation2 + $0x3dc] sm:$0xf] }
 0x7f7   : > { %v9034_v46 = vpop.f32.mrf.mxu3  ;;  %18567 = vst [vmem:[#allocation37_spill] sm:$0xff] %v17234_v0  ;;  %v17236_v47 = vor.u32 %v13287_v35, %v12226_v21  ;;  %v12738_v44 = vld [vmem:[#allocation9 + $0x8f8] sm:$0xf0]  ;;  %v8864_v21 = vadd.f32 %v16909_v56, %v16920_v42  ;;  %v8867_v56 = vadd.f32 %v16918_v34, %v16933_v32  ;;  %v8869_v34 = vadd.f32 %v16931_v62, %v16942_v20  ;;  %v18570_v62 = vld [vmem:[#allocation54_spill] sm:$0xff] }
 0x7f8   : > { %12764 = vst [vmem:[%s15072_s29 + $0x2f0] sm:$0xff] %v9996_v15  ;;  %v9035_v43 = vadd.f32 %v9034_v46, %v8946_v40  ;;  %v17229_v15 = vor.u32 %v13290_v4, %v12216_v17  ;;  %v17231_v40 = vor.u32 %v13291_v45, %v12224_v55 }
 0x7f9   : > { %v9214_v57 = vpop.f32.mrf.mxu1  ;;  %18568 = vst [vmem:[#allocation20_spill] sm:$0xff] %v17236_v47 }
 0x7fa   : > { %v9124_v33 = vadd.f32 %v9123_v22, %v9035_v43  ;;  %18565 = vst [vmem:[#allocation40_spill] sm:$0xff] %v17229_v15 }
 0x7fb   : > { %18566 = vst [vmem:[#allocation39_spill] sm:$0xff] %v17231_v40 }
 0x7fc   : > { %v9213_v60 = vadd.f32 %v9212_v58, %v9124_v33  ;;  %v8947_v11 = vpop.f32.mrf.mxu2  ;;  %v12677_v33 = vor.u32 %v13402_v54, %v12674_v24 }
 0x7fd   : > { %v8948_v26 = vadd.f32 %v8947_v11, %v8859_v51  ;;  %v13418_v51 = vld [vmem:[#allocation9 + $0x8f4] sm:$0xf] }
 0x7fe   : > { %v9998_v22 = vmax.f32 %v9213_v60, 0.0  ;;  %v9128_v43 = vpop.f32.mrf.mxu0  ;;  %9796 = vmatpush.bf16.msrb.mxu0 %v12677_v33  ;;  %v12741_v28 = vor.u32 %v13418_v51, %v12738_v44 }
 0x7ff   : > { %v9036_v46 = vpop.f32.mrf.mxu3 }
 0x800   : > { %12766 = vst [vmem:[%s15072_s29 + $0x350] sm:$0xff] %v9998_v22  ;;  %v9037_v58 = vadd.f32 %v9036_v46, %v8948_v26  ;;  %9885 = vmatpush.bf16.msrb.mxu1 %v12741_v28 }
 0x801   : > { %v9217_v61 = vpop.f32.mrf.mxu1  ;;  %8989 = vmatmul.bf16.gmra.mxu2 %v17229_v15  ;;  %9167 = vmatmul.bf16.gmra.mxu0 %v17231_v40  ;;  %v18656_v40 = vld [vmem:[#allocation81_spill] sm:$0xff] }
 0x802   : > { %v9126_v2 = vadd.f32 %v9125_v7, %v9037_v58 }
 0x804   : > { %v9215_v17 = vadd.f32 %v9214_v57, %v9126_v2  ;;  %9078 = vmatmul.bf16.gmra.mxu3 %v17234_v0  ;;  %9256 = vmatmul.bf16.gmra.mxu1 %v17236_v47  ;;  %v8950_v4 = vpop.f32.mrf.mxu2 }
 0x805   : > { %v8951_v45 = vadd.f32 %v8950_v4, %v8862_v25  ;;  %v13368_v4 = vld [vmem:[#allocation9 + $0x764] sm:$0xf] }
 0x806   : > { %v10000_v55 = vmax.f32 %v9215_v17, 0.0  ;;  %v9130_v60 = vpop.f32.mrf.mxu0 }
 0x807   : > { %v9039_v37 = vpop.f32.mrf.mxu3 }
 0x808   : > { %12768 = vst [vmem:[%s15072_s29 + $0x370] sm:$0xff] %v10000_v55  ;;  %v9040_v7 = vadd.f32 %v9039_v37, %v8951_v45  ;;  %v12538_v55 = vld [vmem:[#allocation9 + $0x768] sm:$0xf0]  ;;  %v13384_v45 = vld [vmem:[#allocation9 + $0x7e4] sm:$0xf] }
 0x809   : > { %v9219_v11 = vpop.f32.mrf.mxu1  ;;  %v12602_v37 = vld [vmem:[#allocation9 + $0x7e8] sm:$0xf0] }
 0x80a   : > { %v9129_v57 = vadd.f32 %v9128_v43, %v9040_v7 }
 0x80c   : > { %v9218_v35 = vadd.f32 %v9217_v61, %v9129_v57  ;;  %v8952_v22 = vpop.f32.mrf.mxu2  ;;  %v13400_v57 = vld [vmem:[#allocation9 + $0x864] sm:$0xf] }
 0x80d   : > { %v8953_v6 = vadd.f32 %v8952_v22, %v8864_v21 }
 0x80e   : > { %v10002_v27 = vmax.f32 %v9218_v35, 0.0  ;;  %v9133_v46 = vpop.f32.mrf.mxu0  ;;  %v12666_v35 = vld [vmem:[#allocation9 + $0x868] sm:$0xf0] }
 0x80f   : > { %v9041_v26 = vpop.f32.mrf.mxu3  ;;  %v12669_v22 = vor.u32 %v13400_v57, %v12666_v35  ;;  %v18578_v57 = vld [vmem:[#allocation44_spill] sm:$0xff]  ;;  %v18579_v35 = vld [vmem:[#allocation43_spill] sm:$0xff] }
 0x810   : > { %12770 = vst [vmem:[%s15072_s29 + $0x3d0] sm:$0xff] %v10002_v27  ;;  %v9042_v58 = vadd.f32 %v9041_v26, %v8953_v6  ;;  %v18569_v6 = vld [vmem:[#allocation50_spill] sm:$0xff]  ;;  %v18571_v26 = vld [vmem:[#allocation61_spill] sm:$0xff] }
 0x811   : > { %v9222_v54 = vpop.f32.mrf.mxu1  ;;  %9270 = vmatmul.bf16.vlgmr.msra.gmra.mxu2 %v16611_v13  ;;  %9448 = vmatmul.bf16.vlgmr.msra.gmra.mxu0 %v16613_v48  ;;  %v12541_v48 = vor.u32 %v13368_v4, %v12538_v55 }
 0x812   : > { %v9131_v24 = vadd.f32 %v9130_v60, %v9042_v58  ;;  %v12605_v60 = vor.u32 %v13384_v45, %v12602_v37  ;;  %9797 = vmatpush.bf16.msrb.mxu0 %v12669_v22  ;;  %v18573_v58 = vld [vmem:[#allocation89_spill] sm:$0xff]  ;;  %v18581_v22 = vld [vmem:[#allocation96_spill] sm:$0xff] }
 0x813   : > { %9619 = vmatpush.bf16.msrb.mxu2 %v12541_v48  ;;  %v18575_v48 = vld [vmem:[#allocation92_spill] sm:$0xff] }
 0x814   : > { %v9220_v43 = vadd.f32 %v9219_v11, %v9131_v24  ;;  %9359 = vmatmul.bf16.vlgmr.msra.gmra.mxu3 %v16616_v41  ;;  %9537 = vmatmul.bf16.vlgmr.msra.gmra.mxu1 %v16619_v38  ;;  %v8955_v42 = vpop.f32.mrf.mxu2 }
 0x815   : > { %v8956_v33 = vadd.f32 %v8955_v42, %v8867_v56  ;;  %9708 = vmatpush.bf16.msrb.mxu3 %v12605_v60 }
 0x816   : > { %v10004_v61 = vmax.f32 %v9220_v43, 0.0  ;;  %v9135_v17 = vpop.f32.mrf.mxu0 }
 0x817   : > { %v9044_v2 = vpop.f32.mrf.mxu3 }
 0x818   : > { %12772 = vst [vmem:[%s15072_s29 + $0x3f0] sm:$0xff] %v10004_v61  ;;  %v9045_v25 = vadd.f32 %v9044_v2, %v8956_v33  ;;  %v12730_v2 = vld [vmem:[#allocation9 + $0x8e8] sm:$0xf0] }
 0x819   : > { %v9224_v13 = vpop.f32.mrf.mxu1 }
 0x81a   : > { %v9134_v41 = vadd.f32 %v9133_v46, %v9045_v25  ;;  %v18572_v46 = vld [vmem:[#allocation93_spill] sm:$0xff] }
 0x81c   : > { %v9223_v38 = vadd.f32 %v9222_v54, %v9134_v41  ;;  %v8957_v32 = vpop.f32.mrf.mxu2  ;;  %v8872_v54 = vadd.f32 %v18573_v58, %v18572_v46 }
 0x81d   : > { %v8958_v51 = vadd.f32 %v8957_v32, %v8869_v34 }
 0x81e   : > { %v10006_v7 = vmax.f32 %v9223_v38, 0.0  ;;  %v9138_v11 = vpop.f32.mrf.mxu0 }
 0x81f   : > { %v9046_v44 = vpop.f32.mrf.mxu3 }
 0x820   : > { %12774 = vst [vmem:[%s15072_s29 + $0x450] sm:$0xff] %v10006_v7  ;;  %v9047_v28 = vadd.f32 %v9046_v44, %v8958_v51  ;;  %v18576_v44 = vld [vmem:[#allocation69_spill] sm:$0xff] }
 0x821   : > { %v9227_v21 = vpop.f32.mrf.mxu1  ;;  %9275 = vmatmul.bf16.gmra.mxu2 %v16627_v5  ;;  %9453 = vmatmul.bf16.gmra.mxu0 %v18569_v6  ;;  %v13416_v5 = vld [vmem:[#allocation9 + $0x8e4] sm:$0xf] }
 0x822   : > { %v9136_v27 = vadd.f32 %v9135_v17, %v9047_v28  ;;  %v12733_v25 = vor.u32 %v13416_v5, %v12730_v2  ;;  %v18577_v28 = vld [vmem:[#allocation73_spill] sm:$0xff] }
 0x824   : > { %v9225_v20 = vadd.f32 %v9224_v13, %v9136_v27  ;;  %9364 = vmatmul.bf16.gmra.mxu3 %v18570_v62  ;;  %9542 = vmatmul.bf16.gmra.mxu1 %v18571_v26  ;;  %v8960_v24 = vpop.f32.mrf.mxu2  ;;  %v18574_v13 = vld [vmem:[#allocation97_spill] sm:$0xff] }
 0x825   : > { %v8961_v56 = vadd.f32 %v8960_v24, %v8872_v54  ;;  %9886 = vmatpush.bf16.msrb.mxu1 %v12733_v25  ;;  %v8874_v45 = vadd.f32 %v18575_v48, %v18574_v13  ;;  %v13366_v54 = vld [vmem:[#allocation9 + $0x754] sm:$0xf]  ;;  %v12530_v24 = vld [vmem:[#allocation9 + $0x758] sm:$0xf0] }
 0x826   : > { %v10008_v43 = vmax.f32 %v9225_v20, 0.0  ;;  %v9140_v61 = vpop.f32.mrf.mxu0  ;;  %v18583_v25 = vld [vmem:[#allocation100_spill] sm:$0xff] }
 0x827   : > { %v9049_v42 = vpop.f32.mrf.mxu3 }
 0x828   : > { %12776 = vst [vmem:[%s15072_s29 + $0x470] sm:$0xff] %v10008_v43  ;;  %v9050_v33 = vadd.f32 %v9049_v42, %v8961_v56  ;;  %v12533_v56 = vor.u32 %v13366_v54, %v12530_v24  ;;  %v13382_v42 = vld [vmem:[#allocation9 + $0x7d4] sm:$0xf]  ;;  %v12722_v54 = vld [vmem:[#allocation9 + $0x8d8] sm:$0xf0] }
 0x829   : > { %v9229_v17 = vpop.f32.mrf.mxu1 }
 0x82a   : > { %v9139_v4 = vadd.f32 %v9138_v11, %v9050_v33  ;;  %9620 = vmatpush.bf16.msrb.mxu2 %v12533_v56 }
 0x82c   : > { %v9228_v55 = vadd.f32 %v9227_v21, %v9139_v4  ;;  %v8962_v37 = vpop.f32.mrf.mxu2  ;;  %v18580_v21 = vld [vmem:[#allocation101_spill] sm:$0xff] }
 0x82d   : > { %v8963_v60 = vadd.f32 %v8962_v37, %v8874_v45  ;;  %v8877_v27 = vadd.f32 %v18581_v22, %v18580_v21  ;;  %v18589_v21 = vld [vmem:[#allocation104_spill] sm:$0xff] }
 0x82e   : > { %v10010_v41 = vmax.f32 %v9228_v55, 0.0  ;;  %v9143_v34 = vpop.f32.mrf.mxu0 }
 0x82f   : > { %v9051_v38 = vpop.f32.mrf.mxu3 }
 0x830   : > { %12778 = vst [vmem:[%s15072_s29 + $0x4d0] sm:$0xff] %v10010_v41  ;;  %v9052_v32 = vadd.f32 %v9051_v38, %v8963_v60  ;;  %v13398_v60 = vld [vmem:[#allocation9 + $0x854] sm:$0xf]  ;;  %v12658_v38 = vld [vmem:[#allocation9 + $0x858] sm:$0xf0] }
 0x831   : > { %v9232_v7 = vpop.f32.mrf.mxu1  ;;  %9280 = vmatmul.bf16.gmra.mxu2 %v18576_v44  ;;  %9458 = vmatmul.bf16.gmra.mxu0 %v18577_v28  ;;  %v18584_v44 = vld [vmem:[#allocation47_spill] sm:$0xff] }
 0x832   : > { %v9141_v51 = vadd.f32 %v9140_v61, %v9052_v32  ;;  %v12594_v61 = vld [vmem:[#allocation9 + $0x7d8] sm:$0xf0] }
 0x833   : > { %v12597_v5 = vor.u32 %v13382_v42, %v12594_v61  ;;  %v18590_v61 = vld [vmem:[#allocation113_spill] sm:$0xff] }
 0x834   : > { %v9230_v11 = vadd.f32 %v9229_v17, %v9141_v51  ;;  %9369 = vmatmul.bf16.gmra.mxu3 %v18578_v57  ;;  %9547 = vmatmul.bf16.gmra.mxu1 %v18579_v35  ;;  %v8965_v6 = vpop.f32.mrf.mxu2  ;;  %v18582_v17 = vld [vmem:[#allocation105_spill] sm:$0xff]  ;;  %v12661_v51 = vor.u32 %v13398_v60, %v12658_v38  ;;  %v18593_v60 = vld [vmem:[#allocation56_spill] sm:$0xff]  ;;  %v18594_v38 = vld [vmem:[#allocation55_spill] sm:$0xff] }
 0x835   : > { %v8966_v62 = vadd.f32 %v8965_v6, %v8877_v27  ;;  %v8879_v4 = vadd.f32 %v18583_v25, %v18582_v17  ;;  %9709 = vmatpush.bf16.msrb.mxu3 %v12597_v5  ;;  %v18587_v57 = vld [vmem:[#allocation53_spill] sm:$0xff] }
 0x836   : > { %v10012_v20 = vmax.f32 %v9230_v11, 0.0  ;;  %v9145_v46 = vpop.f32.mrf.mxu0  ;;  %9798 = vmatpush.bf16.msrb.mxu0 %v12661_v51  ;;  %v18586_v11 = vld [vmem:[#allocation49_spill] sm:$0xff] }
 0x837   : > { %v9054_v26 = vpop.f32.mrf.mxu3  ;;  %v18588_v35 = vld [vmem:[#allocation109_spill] sm:$0xff] }
 0x838   : > { %12780 = vst [vmem:[%s15072_s29 + $0x4f0] sm:$0xff] %v10012_v20  ;;  %v9055_v58 = vadd.f32 %v9054_v26, %v8966_v62  ;;  %v8882_v22 = vadd.f32 %v18589_v21, %v18588_v35  ;;  %v18596_v51 = vld [vmem:[#allocation117_spill] sm:$0xff] }
 0x839   : > { %v9234_v43 = vpop.f32.mrf.mxu1 }
 0x83a   : > { %v9144_v33 = vadd.f32 %v9143_v34, %v9055_v58  ;;  %v13414_v58 = vld [vmem:[#allocation9 + $0x8d4] sm:$0xf] }
 0x83b   : > { %v12725_v56 = vor.u32 %v13414_v58, %v12722_v54 }
 0x83c   : > { %v9233_v2 = vadd.f32 %v9232_v7, %v9144_v33  ;;  %v8967_v55 = vpop.f32.mrf.mxu2  ;;  %v18585_v7 = vld [vmem:[#allocation46_spill] sm:$0xff]  ;;  %v18591_v33 = vld [vmem:[#allocation108_spill] sm:$0xff] }
 0x83d   : > { %v8968_v48 = vadd.f32 %v8967_v55, %v8879_v4  ;;  %9887 = vmatpush.bf16.msrb.mxu1 %v12725_v56  ;;  %v8884_v5 = vadd.f32 %v18591_v33, %v18590_v61  ;;  %v18599_v56 = vld [vmem:[#allocation116_spill] sm:$0xff] }
 0x83e   : > { %v10014_v13 = vmax.f32 %v9233_v2, 0.0  ;;  %v9148_v37 = vpop.f32.mrf.mxu0 }
 0x83f   : > { %v9056_v45 = vpop.f32.mrf.mxu3 }
 0x840   : > { %12782 = vst [vmem:[%s15072_s29 + $0x550] sm:$0xff] %v10014_v13  ;;  %v9057_v41 = vadd.f32 %v9056_v45, %v8968_v48 }
 0x841   : > { %v9237_v32 = vpop.f32.mrf.mxu1  ;;  %9285 = vmatmul.bf16.gmra.mxu2 %v18584_v44  ;;  %9463 = vmatmul.bf16.gmra.mxu0 %v18585_v7 }
 0x842   : > { %v9146_v34 = vadd.f32 %v9145_v46, %v9057_v41  ;;  %v18592_v41 = vld [vmem:[#allocation52_spill] sm:$0xff] }
 0x844   : > { %v9235_v28 = vadd.f32 %v9234_v43, %v9146_v34  ;;  %9374 = vmatmul.bf16.gmra.mxu3 %v18586_v11  ;;  %9552 = vmatmul.bf16.gmra.mxu1 %v18587_v57  ;;  %v8970_v27 = vpop.f32.mrf.mxu2  ;;  %v18597_v34 = vld [vmem:[#allocation112_spill] sm:$0xff] }
 0x845   : > { %v8971_v20 = vadd.f32 %v8970_v27, %v8882_v22  ;;  %v8887_v44 = vadd.f32 %v18597_v34, %v18596_v51  ;;  %v13364_v22 = vld [vmem:[#allocation9 + $0x744] sm:$0xf]  ;;  %v12522_v27 = vld [vmem:[#allocation9 + $0x748] sm:$0xf0]  ;;  %v18605_v51 = vld [vmem:[#allocation120_spill] sm:$0xff] }
 0x846   : > { %v10016_v6 = vmax.f32 %v9235_v28, 0.0  ;;  %v9150_v26 = vpop.f32.mrf.mxu0 }
 0x847   : > { %v9059_v62 = vpop.f32.mrf.mxu3 }
 0x848   : > { %12784 = vst [vmem:[%s15072_s29 + $0x570] sm:$0xff] %v10016_v6  ;;  %v9060_v46 = vadd.f32 %v9059_v62, %v8971_v20  ;;  %v12525_v20 = vor.u32 %v13364_v22, %v12522_v27  ;;  %v13380_v62 = vld [vmem:[#allocation9 + $0x7c4] sm:$0xf]  ;;  %v12714_v22 = vld [vmem:[#allocation9 + $0x8c8] sm:$0xf0] }
 0x849   : > { %v9239_v24 = vpop.f32.mrf.mxu1 }
 0x84a   : > { %v9149_v43 = vadd.f32 %v9148_v37, %v9060_v46  ;;  %9621 = vmatpush.bf16.msrb.mxu2 %v12525_v20 }
 0x84c   : > { %v9238_v42 = vadd.f32 %v9237_v32, %v9149_v43  ;;  %v8972_v2 = vpop.f32.mrf.mxu2  ;;  %v18595_v32 = vld [vmem:[#allocation17_spill] sm:$0xff] }
 0x84d   : > { %v8973_v25 = vadd.f32 %v8972_v2, %v8884_v5 }
 0x84e   : > { %v10018_v17 = vmax.f32 %v9238_v42, 0.0  ;;  %v9153_v55 = vpop.f32.mrf.mxu0 }
 0x84f   : > { %v9061_v4 = vpop.f32.mrf.mxu3 }
 0x850   : > { %12786 = vst [vmem:[%s15072_s29 + $0x5d0] sm:$0xff] %v10018_v17  ;;  %v9062_v13 = vadd.f32 %v9061_v4, %v8973_v25  ;;  %v13396_v25 = vld [vmem:[#allocation9 + $0x844] sm:$0xf]  ;;  %v12650_v4 = vld [vmem:[#allocation9 + $0x848] sm:$0xf0] }
 0x851   : > { %v9242_v48 = vpop.f32.mrf.mxu1  ;;  %9290 = vmatmul.bf16.gmra.mxu2 %v18592_v41  ;;  %9468 = vmatmul.bf16.gmra.mxu0 %v18593_v60  ;;  %v18600_v41 = vld [vmem:[#allocation58_spill] sm:$0xff] }
 0x852   : > { %v9151_v45 = vadd.f32 %v9150_v26, %v9062_v13  ;;  %v12586_v26 = vld [vmem:[#allocation9 + $0x7c8] sm:$0xf0] }
 0x853   : > { %v12589_v58 = vor.u32 %v13380_v62, %v12586_v26  ;;  %v18606_v26 = vld [vmem:[#allocation129_spill] sm:$0xff] }
 0x854   : > { %v9240_v37 = vadd.f32 %v9239_v24, %v9151_v45  ;;  %9379 = vmatmul.bf16.gmra.mxu3 %v18594_v38  ;;  %9557 = vmatmul.bf16.gmra.mxu1 %v18595_v32  ;;  %v8975_v7 = vpop.f32.mrf.mxu2  ;;  %v18598_v24 = vld [vmem:[#allocation121_spill] sm:$0xff]  ;;  %v12653_v45 = vor.u32 %v13396_v25, %v12650_v4  ;;  %v18603_v38 = vld [vmem:[#allocation19_spill] sm:$0xff]  ;;  %v18609_v25 = vld [vmem:[#allocation62_spill] sm:$0xff] }
 0x855   : > { %v8976_v11 = vadd.f32 %v8975_v7, %v8887_v44  ;;  %v8889_v43 = vadd.f32 %v18599_v56, %v18598_v24  ;;  %9710 = vmatpush.bf16.msrb.mxu3 %v12589_v58  ;;  %v18604_v32 = vld [vmem:[#allocation125_spill] sm:$0xff]  ;;  %v18610_v4 = vld [vmem:[#allocation68_spill] sm:$0xff] }
 0x856   : > { %v10020_v28 = vmax.f32 %v9240_v37, 0.0  ;;  %v9155_v35 = vpop.f32.mrf.mxu0  ;;  %9799 = vmatpush.bf16.msrb.mxu0 %v12653_v45  ;;  %v18602_v37 = vld [vmem:[#allocation18_spill] sm:$0xff]  ;;  %v8892_v34 = vadd.f32 %v18605_v51, %v18604_v32  ;;  %v18612_v45 = vld [vmem:[#allocation133_spill] sm:$0xff] }
 0x857   : > { %v9064_v57 = vpop.f32.mrf.mxu3 }
 0x858   : > { %12788 = vst [vmem:[%s15072_s29 + $0x5f0] sm:$0xff] %v10020_v28  ;;  %v9065_v21 = vadd.f32 %v9064_v57, %v8976_v11 }
 0x859   : > { %v9244_v6 = vpop.f32.mrf.mxu1 }
 0x85a   : > { %v9154_v46 = vadd.f32 %v9153_v55, %v9065_v21  ;;  %v13412_v21 = vld [vmem:[#allocation9 + $0x8c4] sm:$0xf] }
 0x85b   : > { %v12717_v20 = vor.u32 %v13412_v21, %v12714_v22  ;;  %v13394_v22 = vld [vmem:[#allocation9 + $0x834] sm:$0xf] }
 0x85c   : > { %v9243_v54 = vadd.f32 %v9242_v48, %v9154_v46  ;;  %v8977_v42 = vpop.f32.mrf.mxu2  ;;  %v18601_v48 = vld [vmem:[#allocation57_spill] sm:$0xff]  ;;  %v18607_v46 = vld [vmem:[#allocation124_spill] sm:$0xff] }
 0x85d   : > { %v8978_v33 = vadd.f32 %v8977_v42, %v8889_v43  ;;  %9888 = vmatpush.bf16.msrb.mxu1 %v12717_v20  ;;  %v8894_v58 = vadd.f32 %v18607_v46, %v18606_v26  ;;  %v18615_v26 = vld [vmem:[#allocation132_spill] sm:$0xff] }
 0x85e   : > { %v10022_v61 = vmax.f32 %v9243_v54, 0.0  ;;  %v9158_v2 = vpop.f32.mrf.mxu0 }
 0x85f   : > { %v9066_v5 = vpop.f32.mrf.mxu3 }
 0x860   : > { %12790 = vst [vmem:[%s15072_s29 + $0x650] sm:$0xff] %v10022_v61  ;;  %v9067_v17 = vadd.f32 %v9066_v5, %v8978_v33 }
 0x861   : > { %v9247_v13 = vpop.f32.mrf.mxu1  ;;  %9295 = vmatmul.bf16.gmra.mxu2 %v18600_v41  ;;  %9473 = vmatmul.bf16.gmra.mxu0 %v18601_v48 }
 0x862   : > { %v9156_v55 = vadd.f32 %v9155_v35, %v9067_v17  ;;  %v18608_v17 = vld [vmem:[#allocation63_spill] sm:$0xff] }
 0x864   : > { %v9245_v60 = vadd.f32 %v9244_v6, %v9156_v55  ;;  %9384 = vmatmul.bf16.gmra.mxu3 %v18602_v37  ;;  %9562 = vmatmul.bf16.gmra.mxu1 %v18603_v38  ;;  %v8980_v44 = vpop.f32.mrf.mxu2  ;;  %v18613_v55 = vld [vmem:[#allocation128_spill] sm:$0xff] }
 0x865   : > { %v8981_v28 = vadd.f32 %v8980_v44, %v8892_v34  ;;  %v8897_v41 = vadd.f32 %v18613_v55, %v18612_v45  ;;  %v13362_v34 = vld [vmem:[#allocation9 + $0x734] sm:$0xf]  ;;  %v12514_v44 = vld [vmem:[#allocation9 + $0x738] sm:$0xf0]  ;;  %v18619_v55 = vld [vmem:[#allocation70_spill] sm:$0xff] }
 0x866   : > { %v10024_v7 = vmax.f32 %v9245_v60, 0.0  ;;  %v9160_v57 = vpop.f32.mrf.mxu0  ;;  %v18618_v45 = vld [vmem:[#allocation71_spill] sm:$0xff] }
 0x867   : > { %v9069_v11 = vpop.f32.mrf.mxu3 }
 0x868   : > { %12792 = vst [vmem:[%s15072_s29 + $0x670] sm:$0xff] %v10024_v7  ;;  %v9070_v35 = vadd.f32 %v9069_v11, %v8981_v28  ;;  %v12517_v28 = vor.u32 %v13362_v34, %v12514_v44  ;;  %v13378_v11 = vld [vmem:[#allocation9 + $0x7b4] sm:$0xf] }
 0x869   : > { %v9249_v27 = vpop.f32.mrf.mxu1 }
 0x86a   : > { %v9159_v6 = vadd.f32 %v9158_v2, %v9070_v35  ;;  %9622 = vmatpush.bf16.msrb.mxu2 %v12517_v28 }
 0x86c   : > { %v9248_v62 = vadd.f32 %v9247_v13, %v9159_v6  ;;  %v8982_v54 = vpop.f32.mrf.mxu2  ;;  %v18611_v13 = vld [vmem:[#allocation67_spill] sm:$0xff] }
 0x86d   : > { %v8983_v56 = vadd.f32 %v8982_v54, %v8894_v58 }
 0x86e   : > { %v10026_v24 = vmax.f32 %v9248_v62, 0.0  ;;  %v9163_v42 = vpop.f32.mrf.mxu0  ;;  %v18614_v62 = vld [vmem:[#allocation137_spill] sm:$0xff] }
 0x86f   : > { %v9071_v43 = vpop.f32.mrf.mxu3  ;;  %v8899_v46 = vadd.f32 %v18615_v26, %v18614_v62  ;;  %v18622_v26 = vld [vmem:[#allocation72_spill] sm:$0xff] }
 0x870   : > { %12794 = vst [vmem:[%s15072_s29 + $0x6d0] sm:$0xff] %v10026_v24  ;;  %v9072_v61 = vadd.f32 %v9071_v43, %v8983_v56 }
 0x871   : > { %v9252_v33 = vpop.f32.mrf.mxu1  ;;  %9300 = vmatmul.bf16.gmra.mxu2 %v18608_v17  ;;  %9478 = vmatmul.bf16.gmra.mxu0 %v18609_v25  ;;  %v18616_v17 = vld [vmem:[#allocation64_spill] sm:$0xff]  ;;  %v18617_v25 = vld [vmem:[#allocation59_spill] sm:$0xff] }
 0x872   : > { %v9161_v5 = vadd.f32 %v9160_v57, %v9072_v61  ;;  %v12578_v57 = vld [vmem:[#allocation9 + $0x7b8] sm:$0xf0] }
 0x873   : > { %v12581_v21 = vor.u32 %v13378_v11, %v12578_v57 }
 0x874   : > { %v9250_v2 = vadd.f32 %v9249_v27, %v9161_v5  ;;  %9389 = vmatmul.bf16.gmra.mxu3 %v18610_v4  ;;  %9567 = vmatmul.bf16.gmra.mxu1 %v18611_v13  ;;  %v8985_v48 = vpop.f32.mrf.mxu2  ;;  %v12642_v27 = vld [vmem:[#allocation9 + $0x838] sm:$0xf0] }
 0x875   : > { %v8986_v37 = vadd.f32 %v8985_v48, %v8897_v41  ;;  %v12645_v20 = vor.u32 %v13394_v22, %v12642_v27  ;;  %9711 = vmatpush.bf16.msrb.mxu3 %v12581_v21  ;;  %v18620_v41 = vld [vmem:[#allocation136_spill] sm:$0xff] }
 0x876   : > { %v10028_v60 = vmax.f32 %v9250_v2, 0.0  ;;  %v9165_v32 = vpop.f32.mrf.mxu0  ;;  %v12706_v2 = vld [vmem:[#allocation9 + $0x8b8] sm:$0xf0]  ;;  %v8902_v48 = vadd.f32 %v18620_v41, %v17087_v49 }
 0x877   : > { %v9074_v38 = vpop.f32.mrf.mxu3  ;;  %9800 = vmatpush.bf16.msrb.mxu0 %v12645_v20 }
 0x878   : > { %12796 = vst [vmem:[%s15072_s29 + $0x6f0] sm:$0xff] %v10028_v60  ;;  %v9075_v51 = vadd.f32 %v9074_v38, %v8986_v37 }
 0x879   : > { %v9254_v7 = vpop.f32.mrf.mxu1 }
 0x87a   : > { %v9164_v35 = vadd.f32 %v9163_v42, %v9075_v51 }
 0x87c   : > { %v9253_v6 = vadd.f32 %v9252_v33, %v9164_v35  ;;  %v8987_v58 = vpop.f32.mrf.mxu2  ;;  %v13410_v33 = vld [vmem:[#allocation9 + $0x8b4] sm:$0xf] }
 0x87d   : > { %v8988_v24 = vadd.f32 %v8987_v58, %v8899_v46  ;;  %v12709_v4 = vor.u32 %v13410_v33, %v12706_v2  ;;  %v18623_v46 = vld [vmem:[#allocation66_spill] sm:$0xff] }
 0x87e   : > { %v10030_v54 = vmax.f32 %v9253_v6, 0.0  ;;  %v9168_v43 = vpop.f32.mrf.mxu0 }
 0x87f   : > { %v9076_v56 = vpop.f32.mrf.mxu3  ;;  %9889 = vmatpush.bf16.msrb.mxu1 %v12709_v4 }
 0x880   : > { %12798 = vst [vmem:[%s15072_s29 + $0x750] sm:$0xff] %v10030_v54  ;;  %v9077_v61 = vadd.f32 %v9076_v56, %v8988_v24  ;;  %v18624_v54 = vld [vmem:[#allocation25_spill] sm:$0xff]  ;;  %v18625_v24 = vld [vmem:[#allocation24_spill] sm:$0xff]  ;;  %v12506_v56 = vld [vmem:[#allocation9 + $0x728] sm:$0xf0] }
 0x881   : > { %v9257_v5 = vpop.f32.mrf.mxu1  ;;  %9305 = vmatmul.bf16.gmra.mxu2 %v18616_v17  ;;  %9483 = vmatmul.bf16.gmra.mxu0 %v18617_v25  ;;  %v18626_v25 = vld [vmem:[#allocation74_spill] sm:$0xff] }
 0x882   : > { %v9166_v42 = vadd.f32 %v9165_v32, %v9077_v61 }
 0x884   : > { %v9255_v13 = vadd.f32 %v9254_v7, %v9166_v42  ;;  %9394 = vmatmul.bf16.gmra.mxu3 %v18618_v45  ;;  %9572 = vmatmul.bf16.gmra.mxu1 %v18619_v55  ;;  %v8990_v60 = vpop.f32.mrf.mxu2  ;;  %v18621_v7 = vld [vmem:[#allocation140_spill] sm:$0xff]  ;;  %v12570_v42 = vld [vmem:[#allocation9 + $0x7a8] sm:$0xf0] }
 0x885   : > { %v8991_v38 = vadd.f32 %v8990_v60, %v8902_v48  ;;  %v8904_v57 = vadd.f32 %v18621_v7, %v17094_v18  ;;  %v13360_v18 = vld [vmem:[#allocation9 + $0x724] sm:$0xf]  ;;  %v12634_v60 = vld [vmem:[#allocation9 + $0x828] sm:$0xf0]  ;;  %v18627_v7 = vld [vmem:[#allocation23_spill] sm:$0xff] }
 0x886   : > { %v10032_v37 = vmax.f32 %v9255_v13, 0.0  ;;  %v9170_v51 = vpop.f32.mrf.mxu0  ;;  %v13392_v48 = vld [vmem:[#allocation9 + $0x824] sm:$0xf] }
 0x887   : > { %v9079_v32 = vpop.f32.mrf.mxu3 }
 0x888   : > { %12800 = vst [vmem:[%s15072_s29 + $0x770] sm:$0xff] %v10032_v37  ;;  %v9080_v34 = vadd.f32 %v9079_v32, %v8991_v38  ;;  %v12637_v37 = vor.u32 %v13392_v48, %v12634_v60  ;;  %v12498_v48 = vld [vmem:[#allocation9 + $0x718] sm:$0xf0]  ;;  %v13374_v60 = vld [vmem:[#allocation9 + $0x794] sm:$0xf] }
 0x889   : > { %v9259_v44 = vpop.f32.mrf.mxu1 }
 0x88a   : > { %v9169_v28 = vadd.f32 %v9168_v43, %v9080_v34  ;;  %v13376_v43 = vld [vmem:[#allocation9 + $0x7a4] sm:$0xf]  ;;  %9801 = vmatpush.bf16.msrb.mxu0 %v12637_v37 }
 0x88b   : > { %v12573_v2 = vor.u32 %v13376_v43, %v12570_v42 }
 0x88c   : > { %v9258_v11 = vadd.f32 %v9257_v5, %v9169_v28  ;;  %v8992_v35 = vpop.f32.mrf.mxu2  ;;  %v12509_v5 = vor.u32 %v13360_v18, %v12506_v56 }
 0x88d   : > { %v8993_v22 = vadd.f32 %v8992_v35, %v8904_v57  ;;  %9712 = vmatpush.bf16.msrb.mxu3 %v12573_v2  ;;  %v18628_v57 = vld [vmem:[#allocation27_spill] sm:$0xff]  ;;  %v13408_v35 = vld [vmem:[#allocation9 + $0x8a4] sm:$0xf] }
 0x88e   : > { %v10034_v21 = vmax.f32 %v9258_v11, 0.0  ;;  %v9449_v49 = vpop.f32.mrf.mxu0  ;;  %9623 = vmatpush.bf16.msrb.mxu2 %v12509_v5  ;;  %v18632_v2 = vld [vmem:[#allocation31_spill] sm:$0xff] }
 0x88f   : > { %v9081_v27 = vpop.f32.mrf.mxu3 }
 0x890   : > { %12802 = vst [vmem:[%s15072_s29 + $0x7d0] sm:$0xff] %v10034_v21  ;;  %v9082_v20 = vadd.f32 %v9081_v27, %v8993_v22  ;;  %v12698_v21 = vld [vmem:[#allocation9 + $0x8a8] sm:$0xf0]  ;;  %v18629_v27 = vld [vmem:[#allocation21_spill] sm:$0xff] }
 0x891   : > { %v17328_v6 = vpop.f32.mrf.mxu1  ;;  %9310 = vmatmul.bf16.gmra.mxu2 %v18622_v26  ;;  %9488 = vmatmul.bf16.gmra.mxu0 %v18623_v46  ;;  %v12701_v22 = vor.u32 %v13408_v35, %v12698_v21 }
 0x892   : > { %v9171_v62 = vadd.f32 %v9170_v51, %v9082_v20 }
 0x893   : > { %9890 = vmatpush.bf16.msrb.mxu1 %v12701_v22  ;;  %v13390_v22 = vld [vmem:[#allocation9 + $0x814] sm:$0xf] }
 0x894   : > { %v9260_v58 = vadd.f32 %v9259_v44, %v9171_v62  ;;  %9399 = vmatmul.bf16.gmra.mxu3 %v18624_v54  ;;  %9577 = vmatmul.bf16.gmra.mxu1 %v18625_v24  ;;  %v9271_v61 = vpop.f32.mrf.mxu2 }
 0x895   : > { %v9272_v33 = vadd.f32 %v9271_v61, %v18626_v25 }
 0x896   : > { %v10036_v17 = vmax.f32 %v9260_v58, 0.0  ;;  %v9451_v13 = vpop.f32.mrf.mxu0 }
 0x897   : > { %v9360_v4 = vpop.f32.mrf.mxu3 }
 0x898   : > { %12804 = vst [vmem:[%s15072_s29 + $0x7f0] sm:$0xff] %v10036_v17  ;;  %v9361_v45 = vadd.f32 %v9360_v4, %v9272_v33  ;;  %v18631_v33 = vld [vmem:[#allocation22_spill] sm:$0xff]  ;;  %v18633_v4 = vld [vmem:[#allocation33_spill] sm:$0xff] }
 0x899   : > { %v17336_v55 = vpop.f32.mrf.mxu1 }
 0x89a   : > { %v17338_v41 = vadd.f32 %v9449_v49, %v9361_v45  ;;  %v18630_v49 = vld [vmem:[#allocation29_spill] sm:$0xff]  ;;  %v13358_v45 = vld [vmem:[#allocation9 + $0x714] sm:$0xf] }
 0x89c   : > { %v9273_v38 = vpop.f32.mrf.mxu2 }
 0x89d   : > { %v9274_v32 = vadd.f32 %v9273_v38, %v18626_v25  ;;  %v12501_v38 = vor.u32 %v13358_v45, %v12498_v48 }
 0x89e   : > { %v9454_v34 = vpop.f32.mrf.mxu0 }
 0x89f   : > { %v9362_v51 = vpop.f32.mrf.mxu3  ;;  %9624 = vmatpush.bf16.msrb.mxu2 %v12501_v38 }
 0x8a0   : > { %v9363_v44 = vadd.f32 %v9362_v51, %v9274_v32  ;;  %v12562_v32 = vld [vmem:[#allocation9 + $0x798] sm:$0xf0] }
 0x8a1   : > { %v17341_v28 = vpop.f32.mrf.mxu1  ;;  %9315 = vmatmul.bf16.gmra.mxu2 %v18627_v7  ;;  %9493 = vmatmul.bf16.gmra.mxu0 %v18628_v57 }
 0x8a2   : > { %v17343_v11 = vadd.f32 %v9451_v13, %v9363_v44  ;;  %v18634_v13 = vld [vmem:[#allocation26_spill] sm:$0xff] }
 0x8a4   : > { %9404 = vmatmul.bf16.gmra.mxu3 %v18629_v27  ;;  %9582 = vmatmul.bf16.gmra.mxu1 %v18630_v49  ;;  %v9276_v20 = vpop.f32.mrf.mxu2  ;;  %v12626_v27 = vld [vmem:[#allocation9 + $0x818] sm:$0xf0] }
 0x8a5   : > { %v9277_v62 = vadd.f32 %v9276_v20, %v18626_v25  ;;  %v12629_v49 = vor.u32 %v13390_v22, %v12626_v27 }
 0x8a6   : > { %v9456_v46 = vpop.f32.mrf.mxu0 }
 0x8a7   : > { %v9365_v26 = vpop.f32.mrf.mxu3  ;;  %9802 = vmatpush.bf16.msrb.mxu0 %v12629_v49 }
 0x8a8   : > { %v9366_v58 = vadd.f32 %v9365_v26, %v9277_v62 }
 0x8a9   : > { %v17350_v54 = vpop.f32.mrf.mxu1 }
 0x8aa   : > { %v17352_v24 = vadd.f32 %v9454_v34, %v9366_v58  ;;  %v12565_v34 = vor.u32 %v13374_v60, %v12562_v32 }
 0x8ac   : > { %v9278_v18 = vpop.f32.mrf.mxu2  ;;  %9713 = vmatpush.bf16.msrb.mxu3 %v12565_v34 }
 0x8ad   : > { %v9279_v56 = vadd.f32 %v9278_v18, %v18626_v25 }
 0x8ae   : > { %v9459_v61 = vpop.f32.mrf.mxu0 }
 0x8af   : > { %v9367_v43 = vpop.f32.mrf.mxu3 }
 0x8b0   : > { %v9368_v5 = vadd.f32 %v9367_v43, %v9279_v56  ;;  %v18635_v43 = vld [vmem:[#allocation28_spill] sm:$0xff] }
 0x8b1   : > { %v17355_v42 = vpop.f32.mrf.mxu1  ;;  %9320 = vmatmul.bf16.gmra.mxu2 %v18631_v33  ;;  %9498 = vmatmul.bf16.gmra.mxu0 %v18632_v2  ;;  %v12690_v33 = vld [vmem:[#allocation9 + $0x898] sm:$0xf0] }
 0x8b2   : > { %v17357_v17 = vadd.f32 %v9456_v46, %v9368_v5  ;;  %v18636_v5 = vld [vmem:[#allocation36_spill] sm:$0xff] }
 0x8b4   : > { %9409 = vmatmul.bf16.gmra.mxu3 %v18633_v4  ;;  %9587 = vmatmul.bf16.gmra.mxu1 %v18634_v13  ;;  %v9281_v37 = vpop.f32.mrf.mxu2  ;;  %v18637_v4 = vld [vmem:[#allocation30_spill] sm:$0xff] }
 0x8b5   : > { %v9282_v51 = vadd.f32 %v9281_v37, %v18626_v25  ;;  %v18638_v13 = vld [vmem:[#allocation42_spill] sm:$0xff] }
 0x8b6   : > { %v9461_v7 = vpop.f32.mrf.mxu0 }
 0x8b7   : > { %v9370_v44 = vpop.f32.mrf.mxu3 }
 0x8b8   : > { %v9371_v57 = vadd.f32 %v9370_v44, %v9282_v51 }
 0x8b9   : > { %v17364_v35 = vpop.f32.mrf.mxu1 }
 0x8ba   : > { %v17366_v21 = vadd.f32 %v9459_v61, %v9371_v57  ;;  %v13406_v61 = vld [vmem:[#allocation9 + $0x894] sm:$0xf] }
 0x8bb   : > { %v12693_v2 = vor.u32 %v13406_v61, %v12690_v33 }
 0x8bc   : > { %v9283_v20 = vpop.f32.mrf.mxu2 }
 0x8bd   : > { %v9284_v62 = vadd.f32 %v9283_v20, %v18626_v25  ;;  %9891 = vmatpush.bf16.msrb.mxu1 %v12693_v2  ;;  %v18639_v20 = vld [vmem:[#allocation32_spill] sm:$0xff]  ;;  %v12554_v2 = vld [vmem:[#allocation9 + $0x788] sm:$0xf0] }
 0x8be   : > { %v9464_v46 = vpop.f32.mrf.mxu0 }
 0x8bf   : > { %v9372_v26 = vpop.f32.mrf.mxu3 }
 0x8c0   : > { %v9373_v58 = vadd.f32 %v9372_v26, %v9284_v62  ;;  %v18640_v62 = vld [vmem:[#allocation48_spill] sm:$0xff]  ;;  %v18641_v26 = vld [vmem:[#allocation51_spill] sm:$0xff] }
 0x8c1   : > { %v17369_v18 = vpop.f32.mrf.mxu1  ;;  %9325 = vmatmul.bf16.gmra.mxu2 %v18635_v43  ;;  %9503 = vmatmul.bf16.gmra.mxu0 %v18636_v5  ;;  %v12490_v43 = vld [vmem:[#allocation9 + $0x708] sm:$0xf0]  ;;  %v13372_v5 = vld [vmem:[#allocation9 + $0x784] sm:$0xf] }
 0x8c2   : > { %v17371_v56 = vadd.f32 %v9461_v7, %v9373_v58  ;;  %v18642_v58 = vld [vmem:[#allocation34_spill] sm:$0xff] }
 0x8c4   : > { %9414 = vmatmul.bf16.gmra.mxu3 %v18637_v4  ;;  %9592 = vmatmul.bf16.gmra.mxu1 %v18638_v13  ;;  %v9286_v45 = vpop.f32.mrf.mxu2  ;;  %v12557_v13 = vor.u32 %v13372_v5, %v12554_v2  ;;  %v18643_v5 = vld [vmem:[#allocation41_spill] sm:$0xff] }
 0x8c5   : > { %v9287_v48 = vadd.f32 %v9286_v45, %v18626_v25 }
 0x8c6   : > { %v9466_v37 = vpop.f32.mrf.mxu0  ;;  %9714 = vmatpush.bf16.msrb.mxu3 %v12557_v13  ;;  %v18646_v13 = vld [vmem:[#allocation45_spill] sm:$0xff] }
 0x8c7   : > { %v9375_v60 = vpop.f32.mrf.mxu3 }
 0x8c8   : > { %v9376_v38 = vadd.f32 %v9375_v60, %v9287_v48 }
 0x8c9   : > { %v17378_v32 = vpop.f32.mrf.mxu1 }
 0x8ca   : > { %v17380_v51 = vadd.f32 %v9464_v46, %v9376_v38  ;;  %v13356_v46 = vld [vmem:[#allocation9 + $0x704] sm:$0xf] }
 0x8cb   : > { %v12493_v33 = vor.u32 %v13356_v46, %v12490_v43 }
 0x8cc   : > { %v9288_v34 = vpop.f32.mrf.mxu2 }
 0x8cd   : > { %v9289_v44 = vadd.f32 %v9288_v34, %v18626_v25  ;;  %9625 = vmatpush.bf16.msrb.mxu2 %v12493_v33  ;;  %v13388_v34 = vld [vmem:[#allocation9 + $0x804] sm:$0xf]  ;;  %v12682_v33 = vld [vmem:[#allocation9 + $0x888] sm:$0xf0] }
 0x8ce   : > { %v9469_v57 = vpop.f32.mrf.mxu0 }
 0x8cf   : > { %v9377_v7 = vpop.f32.mrf.mxu3 }
 0x8d0   : > { %v9378_v22 = vadd.f32 %v9377_v7, %v9289_v44  ;;  %v12618_v44 = vld [vmem:[#allocation9 + $0x808] sm:$0xf0] }
 0x8d1   : > { %v17383_v27 = vpop.f32.mrf.mxu1  ;;  %9330 = vmatmul.bf16.gmra.mxu2 %v18639_v20  ;;  %9508 = vmatmul.bf16.gmra.mxu0 %v18640_v62  ;;  %v12621_v7 = vor.u32 %v13388_v34, %v12618_v44 }
 0x8d2   : > { %v17385_v49 = vadd.f32 %v9466_v37, %v9378_v22 }
 0x8d3   : > { %9803 = vmatpush.bf16.msrb.mxu0 %v12621_v7 }
 0x8d4   : > { %9419 = vmatmul.bf16.gmra.mxu3 %v18641_v26  ;;  %9597 = vmatmul.bf16.gmra.mxu1 %v18642_v58  ;;  %v9291_v61 = vpop.f32.mrf.mxu2 }
 0x8d5   : > { %v9292_v4 = vadd.f32 %v9291_v61, %v18626_v25  ;;  %v18644_v61 = vld [vmem:[#allocation60_spill] sm:$0xff] }
 0x8d6   : > { %v9471_v48 = vpop.f32.mrf.mxu0 }
 0x8d7   : > { %v9380_v45 = vpop.f32.mrf.mxu3 }
 0x8d8   : > { %v9381_v60 = vadd.f32 %v9380_v45, %v9292_v4  ;;  %v18645_v4 = vld [vmem:[#allocation65_spill] sm:$0xff] }
 0x8d9   : > { %v17392_v37 = vpop.f32.mrf.mxu1 }
 0x8da   : > { %v17394_v38 = vadd.f32 %v9469_v57, %v9381_v60  ;;  %v13404_v57 = vld [vmem:[#allocation9 + $0x884] sm:$0xf] }
 0x8db   : > { %v12685_v2 = vor.u32 %v13404_v57, %v12682_v33 }
 0x8dc   : > { %v9293_v22 = vpop.f32.mrf.mxu2 }
 0x8dd   : > { %v9294_v20 = vadd.f32 %v9293_v22, %v18626_v25  ;;  %9892 = vmatpush.bf16.msrb.mxu1 %v12685_v2  ;;  %v18647_v2 = vld [vmem:[#allocation75_spill] sm:$0xff] }
 0x8de   : > { %v9474_v26 = vpop.f32.mrf.mxu0 }
 0x8df   : > { %v9382_v62 = vpop.f32.mrf.mxu3 }
 0x8e0   : > { %v9383_v58 = vadd.f32 %v9382_v62, %v9294_v20 }
 0x8e1   : > { %v17397_v46 = vpop.f32.mrf.mxu1  ;;  %9335 = vmatmul.bf16.gmra.mxu2 %v18643_v5  ;;  %9513 = vmatmul.bf16.gmra.mxu0 %v18644_v61 }
 0x8e2   : > { %v17399_v43 = vadd.f32 %v9471_v48, %v9383_v58 }
 0x8e4   : > { %9424 = vmatmul.bf16.gmra.mxu3 %v18645_v4  ;;  %9602 = vmatmul.bf16.gmra.mxu1 %v18646_v13  ;;  %v9296_v45 = vpop.f32.mrf.mxu2  ;;  %v18648_v4 = vld [vmem:[#allocation76_spill] sm:$0xff]  ;;  %v18649_v13 = vld [vmem:[#allocation77_spill] sm:$0xff] }
 0x8e5   : > { %v9297_v60 = vadd.f32 %v9296_v45, %v18626_v25  ;;  %v18650_v45 = vld [vmem:[#allocation78_spill] sm:$0xff] }
 0x8e6   : > { %v9476_v44 = vpop.f32.mrf.mxu0 }
 0x8e7   : > { %v9385_v34 = vpop.f32.mrf.mxu3 }
 0x8e8   : > { %v9386_v7 = vadd.f32 %v9385_v34, %v9297_v60 }
 0x8e9   : > { %v17406_v48 = vpop.f32.mrf.mxu1 }
 0x8ea   : > { %v17408_v22 = vadd.f32 %v9474_v26, %v9386_v7 }
 0x8ec   : > { %v9298_v20 = vpop.f32.mrf.mxu2 }
 0x8ed   : > { %v9299_v62 = vadd.f32 %v9298_v20, %v18626_v25 }
 0x8ee   : > { %v9479_v5 = vpop.f32.mrf.mxu0 }
 0x8ef   : > { %v9387_v58 = vpop.f32.mrf.mxu3 }
 0x8f0   : > { %v9388_v61 = vadd.f32 %v9387_v58, %v9299_v62 }
 0x8f1   : > { %v17411_v57 = vpop.f32.mrf.mxu1  ;;  %9340 = vmatmul.bf16.gmra.mxu2 %v18647_v2  ;;  %9518 = vmatmul.bf16.gmra.mxu0 %v18648_v4 }
 0x8f2   : > { %v17413_v33 = vadd.f32 %v9476_v44, %v9388_v61 }
 0x8f4   : > { %9429 = vmatmul.bf16.gmra.mxu3 %v18649_v13  ;;  %9607 = vmatmul.bf16.gmra.mxu1 %v18650_v45  ;;  %v9301_v26 = vpop.f32.mrf.mxu2  ;;  %v18654_v45 = vld [vmem:[#allocation79_spill] sm:$0xff] }
 0x8f5   : > { %v9302_v60 = vadd.f32 %v9301_v26, %v18626_v25  ;;  %v18655_v26 = vld [vmem:[#allocation80_spill] sm:$0xff] }
 0x8f6   : > { %v9481_v7 = vpop.f32.mrf.mxu0 }
 0x8f7   : > { %v9390_v34 = vpop.f32.mrf.mxu3 }
 0x8f8   : > { %v9391_v20 = vadd.f32 %v9390_v34, %v9302_v60  ;;  %v18657_v60 = vld [vmem:[#allocation82_spill] sm:$0xff] }
 0x8f9   : > { %v17420_v47 = vpop.f32.mrf.mxu1 }
 0x8fa   : > { %18651 = vst [vmem:[#allocation50_spill] sm:$0xff] %v17420_v47  ;;  %v17422_v62 = vadd.f32 %v9479_v5, %v9391_v20 }
 0x8fc   : > { %v9303_v44 = vpop.f32.mrf.mxu2 }
 0x8fd   : > { %v9304_v58 = vadd.f32 %v9303_v44, %v18626_v25 }
 0x8fe   : > { %v9484_v2 = vpop.f32.mrf.mxu0 }
 0x8ff   : > { %v9392_v61 = vpop.f32.mrf.mxu3 }
 0x900   : > { %v9393_v4 = vadd.f32 %v9392_v61, %v9304_v58 }
 0x901   : > { %v17425_v0 = vpop.f32.mrf.mxu1  ;;  %9345 = vmatmul.bf16.gmra.mxu2 %v18654_v45  ;;  %9523 = vmatmul.bf16.gmra.mxu0 %v18655_v26 }
 0x902   : > { %18652 = vst [vmem:[#allocation54_spill] sm:$0xff] %v17425_v0  ;;  %v17427_v13 = vadd.f32 %v9481_v7, %v9393_v4 }
 0x904   : > { %18653 = vst [vmem:[#allocation61_spill] sm:$0xff] %v17427_v13  ;;  %9434 = vmatmul.bf16.gmra.mxu3 %v18656_v40  ;;  %9612 = vmatmul.bf16.gmra.mxu1 %v18657_v60  ;;  %v9306_v5 = vpop.f32.mrf.mxu2  ;;  %v18662_v60 = vld [vmem:[#allocation83_spill] sm:$0xff]  ;;  %v18664_v13 = vld [vmem:[#allocation85_spill] sm:$0xff] }
 0x905   : > { %v9307_v34 = vadd.f32 %v9306_v5, %v18626_v25  ;;  %v18663_v5 = vld [vmem:[#allocation84_spill] sm:$0xff] }
 0x906   : > { %v9486_v44 = vpop.f32.mrf.mxu0 }
 0x907   : > { %v9395_v20 = vpop.f32.mrf.mxu3 }
 0x908   : > { %v9396_v15 = vadd.f32 %v9395_v20, %v9307_v34  ;;  %v18665_v34 = vld [vmem:[#allocation86_spill] sm:$0xff] }
 0x909   : > { %v17434_v47 = vpop.f32.mrf.mxu1 }
 0x90a   : > { %18658 = vst [vmem:[#allocation93_spill] sm:$0xff] %v17434_v47  ;;  %v17436_v58 = vadd.f32 %v9484_v2, %v9396_v15 }
 0x90c   : > { %18659 = vst [vmem:[#allocation89_spill] sm:$0xff] %v17436_v58  ;;  %v9308_v7 = vpop.f32.mrf.mxu2 }
 0x90d   : > { %v9309_v61 = vadd.f32 %v9308_v7, %v18626_v25 }
 0x90e   : > { %v9489_v45 = vpop.f32.mrf.mxu0 }
 0x90f   : > { %v9397_v4 = vpop.f32.mrf.mxu3 }
 0x910   : > { %v9398_v26 = vadd.f32 %v9397_v4, %v9309_v61 }
 0x911   : > { %v17439_v0 = vpop.f32.mrf.mxu1  ;;  %9626 = vmatmul.bf16.vlgmr.msrb.gmra.mxu2 %v18662_v60  ;;  %9804 = vmatmul.bf16.vlgmr.msrb.gmra.mxu0 %v18663_v5 }
 0x912   : > { %18660 = vst [vmem:[#allocation97_spill] sm:$0xff] %v17439_v0  ;;  %v17441_v40 = vadd.f32 %v9486_v44, %v9398_v26 }
 0x914   : > { %18661 = vst [vmem:[#allocation92_spill] sm:$0xff] %v17441_v40  ;;  %9715 = vmatmul.bf16.vlgmr.msrb.gmra.mxu3 %v18664_v13  ;;  %9893 = vmatmul.bf16.vlgmr.msrb.gmra.mxu1 %v18665_v34  ;;  %v9311_v15 = vpop.f32.mrf.mxu2  ;;  %v18670_v34 = vld [vmem:[#allocation87_spill] sm:$0xff]  ;;  %v18672_v40 = vld [vmem:[#allocation90_spill] sm:$0xff] }
 0x915   : > { %v9312_v2 = vadd.f32 %v9311_v15, %v18626_v25  ;;  %v18671_v15 = vld [vmem:[#allocation88_spill] sm:$0xff] }
 0x916   : > { %v9491_v7 = vpop.f32.mrf.mxu0 }
 0x917   : > { %v9400_v20 = vpop.f32.mrf.mxu3 }
 0x918   : > { %v9401_v47 = vadd.f32 %v9400_v20, %v9312_v2  ;;  %v18673_v2 = vld [vmem:[#allocation91_spill] sm:$0xff] }
 0x919   : > { %v17448_v58 = vpop.f32.mrf.mxu1 }
 0x91a   : > { %18666 = vst [vmem:[#allocation69_spill] sm:$0xff] %v17448_v58  ;;  %v17450_v61 = vadd.f32 %v9489_v45, %v9401_v47 }
 0x91c   : > { %18667 = vst [vmem:[#allocation73_spill] sm:$0xff] %v17450_v61  ;;  %v9313_v44 = vpop.f32.mrf.mxu2 }
 0x91d   : > { %v9314_v4 = vadd.f32 %v9313_v44, %v18626_v25 }
 0x91e   : > { %v9494_v60 = vpop.f32.mrf.mxu0 }
 0x91f   : > { %v9402_v26 = vpop.f32.mrf.mxu3 }
 0x920   : > { %v9403_v5 = vadd.f32 %v9402_v26, %v9314_v4 }
 0x921   : > { %v17453_v0 = vpop.f32.mrf.mxu1  ;;  %9631 = vmatmul.bf16.gmra.mxu2 %v18670_v34  ;;  %9809 = vmatmul.bf16.gmra.mxu0 %v18671_v15 }
 0x922   : > { %18668 = vst [vmem:[#allocation44_spill] sm:$0xff] %v17453_v0  ;;  %v17455_v13 = vadd.f32 %v9491_v7, %v9403_v5 }
 0x924   : > { %18669 = vst [vmem:[#allocation43_spill] sm:$0xff] %v17455_v13  ;;  %9720 = vmatmul.bf16.gmra.mxu3 %v18672_v40  ;;  %9898 = vmatmul.bf16.gmra.mxu1 %v18673_v2  ;;  %v9316_v47 = vpop.f32.mrf.mxu2  ;;  %v18678_v2 = vld [vmem:[#allocation94_spill] sm:$0xff] }
 0x925   : > { %v9317_v45 = vadd.f32 %v9316_v47, %v18626_v25  ;;  %v18679_v47 = vld [vmem:[#allocation95_spill] sm:$0xff]  ;;  %v18680_v13 = vld [vmem:[#allocation98_spill] sm:$0xff] }
 0x926   : > { %v9496_v44 = vpop.f32.mrf.mxu0 }
 0x927   : > { %v9405_v20 = vpop.f32.mrf.mxu3 }
 0x928   : > { %v9406_v58 = vadd.f32 %v9405_v20, %v9317_v45  ;;  %v18681_v45 = vld [vmem:[#allocation99_spill] sm:$0xff] }
 0x929   : > { %v17462_v61 = vpop.f32.mrf.mxu1 }
 0x92a   : > { %18674 = vst [vmem:[#allocation101_spill] sm:$0xff] %v17462_v61  ;;  %v17464_v4 = vadd.f32 %v9494_v60, %v9406_v58 }
 0x92c   : > { %18675 = vst [vmem:[#allocation96_spill] sm:$0xff] %v17464_v4  ;;  %v9318_v7 = vpop.f32.mrf.mxu2 }
 0x92d   : > { %v9319_v26 = vadd.f32 %v9318_v7, %v18626_v25 }
 0x92e   : > { %v9499_v34 = vpop.f32.mrf.mxu0 }
 0x92f   : > { %v9407_v5 = vpop.f32.mrf.mxu3 }
 0x930   : > { %v9408_v15 = vadd.f32 %v9407_v5, %v9319_v26 }
 0x931   : > { %v17467_v0 = vpop.f32.mrf.mxu1  ;;  %9636 = vmatmul.bf16.gmra.mxu2 %v18678_v2  ;;  %9814 = vmatmul.bf16.gmra.mxu0 %v18679_v47 }
 0x932   : > { %18676 = vst [vmem:[#allocation105_spill] sm:$0xff] %v17467_v0  ;;  %v17469_v40 = vadd.f32 %v9496_v44, %v9408_v15 }
 0x934   : > { %18677 = vst [vmem:[#allocation100_spill] sm:$0xff] %v17469_v40  ;;  %9725 = vmatmul.bf16.gmra.mxu3 %v18680_v13  ;;  %9903 = vmatmul.bf16.gmra.mxu1 %v18681_v45  ;;  %v9321_v58 = vpop.f32.mrf.mxu2  ;;  %v18686_v45 = vld [vmem:[#allocation102_spill] sm:$0xff] }
 0x935   : > { %v9322_v60 = vadd.f32 %v9321_v58, %v18626_v25  ;;  %v18687_v58 = vld [vmem:[#allocation103_spill] sm:$0xff]  ;;  %v18688_v40 = vld [vmem:[#allocation106_spill] sm:$0xff] }
 0x936   : > { %v9501_v7 = vpop.f32.mrf.mxu0 }
 0x937   : > { %v9410_v20 = vpop.f32.mrf.mxu3 }
 0x938   : > { %v9411_v61 = vadd.f32 %v9410_v20, %v9322_v60  ;;  %v18689_v60 = vld [vmem:[#allocation107_spill] sm:$0xff] }
 0x939   : > { %v17476_v4 = vpop.f32.mrf.mxu1 }
 0x93a   : > { %18682 = vst [vmem:[#allocation47_spill] sm:$0xff] %v17476_v4  ;;  %v17478_v26 = vadd.f32 %v9499_v34, %v9411_v61 }
 0x93c   : > { %18683 = vst [vmem:[#allocation46_spill] sm:$0xff] %v17478_v26  ;;  %v9323_v44 = vpop.f32.mrf.mxu2 }
 0x93d   : > { %v9324_v5 = vadd.f32 %v9323_v44, %v18626_v25 }
 0x93e   : > { %v9504_v2 = vpop.f32.mrf.mxu0 }
 0x93f   : > { %v9412_v15 = vpop.f32.mrf.mxu3 }
 0x940   : > { %v9413_v47 = vadd.f32 %v9412_v15, %v9324_v5 }
 0x941   : > { %v17481_v0 = vpop.f32.mrf.mxu1  ;;  %9641 = vmatmul.bf16.gmra.mxu2 %v18686_v45  ;;  %9819 = vmatmul.bf16.gmra.mxu0 %v18687_v58 }
 0x942   : > { %18684 = vst [vmem:[#allocation49_spill] sm:$0xff] %v17481_v0  ;;  %v17483_v13 = vadd.f32 %v9501_v7, %v9413_v47 }
 0x944   : > { %18685 = vst [vmem:[#allocation53_spill] sm:$0xff] %v17483_v13  ;;  %9730 = vmatmul.bf16.gmra.mxu3 %v18688_v40  ;;  %9908 = vmatmul.bf16.gmra.mxu1 %v18689_v60  ;;  %v9326_v61 = vpop.f32.mrf.mxu2  ;;  %v18694_v60 = vld [vmem:[#allocation110_spill] sm:$0xff] }
 0x945   : > { %v9327_v34 = vadd.f32 %v9326_v61, %v18626_v25  ;;  %v18695_v61 = vld [vmem:[#allocation111_spill] sm:$0xff]  ;;  %v18696_v13 = vld [vmem:[#allocation114_spill] sm:$0xff] }
 0x946   : > { %v9506_v44 = vpop.f32.mrf.mxu0 }
 0x947   : > { %v9415_v20 = vpop.f32.mrf.mxu3 }
 0x948   : > { %v9416_v4 = vadd.f32 %v9415_v20, %v9327_v34  ;;  %v18697_v34 = vld [vmem:[#allocation115_spill] sm:$0xff] }
 0x949   : > { %v17490_v26 = vpop.f32.mrf.mxu1 }
 0x94a   : > { %18690 = vst [vmem:[#allocation109_spill] sm:$0xff] %v17490_v26  ;;  %v17492_v5 = vadd.f32 %v9504_v2, %v9416_v4 }
 0x94c   : > { %18691 = vst [vmem:[#allocation104_spill] sm:$0xff] %v17492_v5  ;;  %v9328_v7 = vpop.f32.mrf.mxu2 }
 0x94d   : > { %v9329_v15 = vadd.f32 %v9328_v7, %v18626_v25 }
 0x94e   : > { %v9509_v45 = vpop.f32.mrf.mxu0 }
 0x94f   : > { %v9417_v47 = vpop.f32.mrf.mxu3 }
 0x950   : > { %v9418_v58 = vadd.f32 %v9417_v47, %v9329_v15 }
 0x951   : > { %v17495_v0 = vpop.f32.mrf.mxu1  ;;  %9646 = vmatmul.bf16.gmra.mxu2 %v18694_v60  ;;  %9824 = vmatmul.bf16.gmra.mxu0 %v18695_v61 }
 0x952   : > { %18692 = vst [vmem:[#allocation113_spill] sm:$0xff] %v17495_v0  ;;  %v17497_v40 = vadd.f32 %v9506_v44, %v9418_v58 }
 0x954   : > { %18693 = vst [vmem:[#allocation108_spill] sm:$0xff] %v17497_v40  ;;  %9735 = vmatmul.bf16.gmra.mxu3 %v18696_v13  ;;  %9913 = vmatmul.bf16.gmra.mxu1 %v18697_v34  ;;  %v9331_v4 = vpop.f32.mrf.mxu2  ;;  %v18702_v34 = vld [vmem:[#allocation118_spill] sm:$0xff] }
 0x955   : > { %v9332_v2 = vadd.f32 %v9331_v4, %v18626_v25  ;;  %v18703_v4 = vld [vmem:[#allocation119_spill] sm:$0xff]  ;;  %v18704_v40 = vld [vmem:[#allocation122_spill] sm:$0xff] }
 0x956   : > { %v9511_v7 = vpop.f32.mrf.mxu0 }
 0x957   : > { %v9420_v20 = vpop.f32.mrf.mxu3 }
 0x958   : > { %v9421_v26 = vadd.f32 %v9420_v20, %v9332_v2  ;;  %v18705_v2 = vld [vmem:[#allocation123_spill] sm:$0xff] }
 0x959   : > { %v17504_v5 = vpop.f32.mrf.mxu1 }
 0x95a   : > { %18698 = vst [vmem:[#allocation52_spill] sm:$0xff] %v17504_v5  ;;  %v17506_v15 = vadd.f32 %v9509_v45, %v9421_v26 }
 0x95c   : > { %18699 = vst [vmem:[#allocation56_spill] sm:$0xff] %v17506_v15  ;;  %v9333_v44 = vpop.f32.mrf.mxu2 }
 0x95d   : > { %v9334_v47 = vadd.f32 %v9333_v44, %v18626_v25 }
 0x95e   : > { %v9514_v60 = vpop.f32.mrf.mxu0 }
 0x95f   : > { %v9422_v58 = vpop.f32.mrf.mxu3 }
 0x960   : > { %v9423_v61 = vadd.f32 %v9422_v58, %v9334_v47 }
 0x961   : > { %v17509_v0 = vpop.f32.mrf.mxu1  ;;  %9651 = vmatmul.bf16.gmra.mxu2 %v18702_v34  ;;  %9829 = vmatmul.bf16.gmra.mxu0 %v18703_v4 }
 0x962   : > { %18700 = vst [vmem:[#allocation55_spill] sm:$0xff] %v17509_v0  ;;  %v17511_v13 = vadd.f32 %v9511_v7, %v9423_v61 }
 0x964   : > { %18701 = vst [vmem:[#allocation17_spill] sm:$0xff] %v17511_v13  ;;  %9740 = vmatmul.bf16.gmra.mxu3 %v18704_v40  ;;  %9918 = vmatmul.bf16.gmra.mxu1 %v18705_v2  ;;  %v9336_v26 = vpop.f32.mrf.mxu2  ;;  %v18710_v2 = vld [vmem:[#allocation126_spill] sm:$0xff] }
 0x965   : > { %v9337_v45 = vadd.f32 %v9336_v26, %v18626_v25  ;;  %v18711_v26 = vld [vmem:[#allocation127_spill] sm:$0xff]  ;;  %v18712_v13 = vld [vmem:[#allocation130_spill] sm:$0xff] }
 0x966   : > { %v9516_v44 = vpop.f32.mrf.mxu0 }
 0x967   : > { %v9425_v20 = vpop.f32.mrf.mxu3 }
 0x968   : > { %v9426_v5 = vadd.f32 %v9425_v20, %v9337_v45  ;;  %v18713_v45 = vld [vmem:[#allocation131_spill] sm:$0xff] }
 0x969   : > { %v17518_v15 = vpop.f32.mrf.mxu1 }
 0x96a   : > { %18706 = vst [vmem:[#allocation117_spill] sm:$0xff] %v17518_v15  ;;  %v17520_v47 = vadd.f32 %v9514_v60, %v9426_v5 }
 0x96c   : > { %18707 = vst [vmem:[#allocation112_spill] sm:$0xff] %v17520_v47  ;;  %v9338_v7 = vpop.f32.mrf.mxu2 }
 0x96d   : > { %v9339_v58 = vadd.f32 %v9338_v7, %v18626_v25 }
 0x96e   : > { %v9519_v34 = vpop.f32.mrf.mxu0 }
 0x96f   : > { %v9427_v61 = vpop.f32.mrf.mxu3 }
 0x970   : > { %v9428_v4 = vadd.f32 %v9427_v61, %v9339_v58 }
 0x971   : > { %v17523_v0 = vpop.f32.mrf.mxu1  ;;  %9656 = vmatmul.bf16.gmra.mxu2 %v18710_v2  ;;  %9834 = vmatmul.bf16.gmra.mxu0 %v18711_v26 }
 0x972   : > { %18708 = vst [vmem:[#allocation121_spill] sm:$0xff] %v17523_v0  ;;  %v17525_v40 = vadd.f32 %v9516_v44, %v9428_v4 }
 0x974   : > { %18709 = vst [vmem:[#allocation116_spill] sm:$0xff] %v17525_v40  ;;  %9745 = vmatmul.bf16.gmra.mxu3 %v18712_v13  ;;  %9923 = vmatmul.bf16.gmra.mxu1 %v18713_v45  ;;  %v9341_v5 = vpop.f32.mrf.mxu2  ;;  %v18718_v45 = vld [vmem:[#allocation134_spill] sm:$0xff] }
 0x975   : > { %v9342_v60 = vadd.f32 %v9341_v5, %v18626_v25  ;;  %v18719_v5 = vld [vmem:[#allocation135_spill] sm:$0xff]  ;;  %v18720_v40 = vld [vmem:[#allocation138_spill] sm:$0xff] }
 0x976   : > { %v9521_v7 = vpop.f32.mrf.mxu0 }
 0x977   : > { %v9430_v20 = vpop.f32.mrf.mxu3 }
 0x978   : > { %v9431_v15 = vadd.f32 %v9430_v20, %v9342_v60  ;;  %v18721_v60 = vld [vmem:[#allocation139_spill] sm:$0xff] }
 0x979   : > { %v17532_v47 = vpop.f32.mrf.mxu1 }
 0x97a   : > { %18714 = vst [vmem:[#allocation58_spill] sm:$0xff] %v17532_v47  ;;  %v17534_v58 = vadd.f32 %v9519_v34, %v9431_v15 }
 0x97c   : > { %18715 = vst [vmem:[#allocation57_spill] sm:$0xff] %v17534_v58  ;;  %v9343_v44 = vpop.f32.mrf.mxu2 }
 0x97d   : > { %v9344_v61 = vadd.f32 %v9343_v44, %v18626_v25 }
 0x97e   : > { %v9524_v2 = vpop.f32.mrf.mxu0 }
 0x97f   : > { %v9432_v4 = vpop.f32.mrf.mxu3 }
 0x980   : > { %v9433_v26 = vadd.f32 %v9432_v4, %v9344_v61 }
 0x981   : > { %v17537_v0 = vpop.f32.mrf.mxu1  ;;  %9661 = vmatmul.bf16.gmra.mxu2 %v18718_v45  ;;  %9839 = vmatmul.bf16.gmra.mxu0 %v18719_v5 }
 0x982   : > { %18716 = vst [vmem:[#allocation18_spill] sm:$0xff] %v17537_v0  ;;  %v17539_v13 = vadd.f32 %v9521_v7, %v9433_v26 }
 0x984   : > { %18717 = vst [vmem:[#allocation19_spill] sm:$0xff] %v17539_v13  ;;  %9750 = vmatmul.bf16.gmra.mxu3 %v18720_v40  ;;  %9928 = vmatmul.bf16.gmra.mxu1 %v18721_v60  ;;  %v9346_v15 = vpop.f32.mrf.mxu2  ;;  %v18725_v60 = vld [vmem:[#allocation141_spill] sm:$0xff]  ;;  %v18726_v13 = vld [vmem:[#allocation142_spill] sm:$0xff] }
 0x985   : > { %v9347_v34 = vadd.f32 %v9346_v15, %v18626_v25  ;;  %v18727_v15 = vld [vmem:[#allocation143_spill] sm:$0xff] }
 0x986   : > { %v9526_v44 = vpop.f32.mrf.mxu0 }
 0x987   : > { %v9435_v20 = vpop.f32.mrf.mxu3 }
 0x988   : > { %v9436_v47 = vadd.f32 %v9435_v20, %v9347_v34  ;;  %v18728_v34 = vld [vmem:[#allocation144_spill] sm:$0xff] }
 0x989   : > { %v17546_v58 = vpop.f32.mrf.mxu1 }
 0x98a   : > { %18722 = vst [vmem:[#allocation125_spill] sm:$0xff] %v17546_v58  ;;  %v17548_v61 = vadd.f32 %v9524_v2, %v9436_v47  ;;  %v9539_v47 = vadd.f32 %v17328_v6, %v17338_v41 }
 0x98c   : > { %18723 = vst [vmem:[#allocation120_spill] sm:$0xff] %v17548_v61  ;;  %v9348_v7 = vpop.f32.mrf.mxu2 }
 0x98d   : > { %v9349_v4 = vadd.f32 %v9348_v7, %v18626_v25 }
 0x98e   : > { %v9805_v45 = vpop.f32.mrf.mxu0 }
 0x98f   : > { %v9437_v26 = vpop.f32.mrf.mxu3 }
 0x990   : > { %v9438_v5 = vadd.f32 %v9437_v26, %v9349_v4 }
 0x991   : > { %v9894_v0 = vpop.f32.mrf.mxu1  ;;  %9666 = vmatmul.bf16.gmra.mxu2 %v18725_v60  ;;  %9844 = vmatmul.bf16.gmra.mxu0 %v18726_v13  ;;  %v9541_v60 = vadd.f32 %v17336_v55, %v17343_v11 }
 0x992   : > { %v17551_v40 = vadd.f32 %v9526_v44, %v9438_v5 }
 0x994   : > { %18724 = vst [vmem:[#allocation129_spill] sm:$0xff] %v17551_v40  ;;  %9755 = vmatmul.bf16.gmra.mxu3 %v18727_v15  ;;  %9933 = vmatmul.bf16.gmra.mxu1 %v18728_v34  ;;  %v9627_v2 = vpop.f32.mrf.mxu2 }
 0x995   : > { %v9628_v25 = vadd.f32 %v9627_v2, %v9539_v47 }
 0x996   : > { %v9807_v7 = vpop.f32.mrf.mxu0 }
 0x997   : > { %v9716_v20 = vpop.f32.mrf.mxu3 }
 0x998   : > { %v9717_v4 = vadd.f32 %v9716_v20, %v9628_v25 }
 0x999   : > { %v9896_v26 = vpop.f32.mrf.mxu1 }
 0x99a   : > { %v9806_v44 = vadd.f32 %v9805_v45, %v9717_v4 }
 0x99c   : > { %v9895_v5 = vadd.f32 %v9894_v0, %v9806_v44  ;;  %v9629_v13 = vpop.f32.mrf.mxu2  ;;  %v9544_v0 = vadd.f32 %v17341_v28, %v17352_v24 }
 0x99d   : > { %v9630_v15 = vadd.f32 %v9629_v13, %v9541_v60 }
 0x99e   : > { %v9975_v58 = vmax.f32 %v9895_v5, 0.0  ;;  %v9810_v34 = vpop.f32.mrf.mxu0 }
 0x99f   : > { %v9718_v40 = vpop.f32.mrf.mxu3 }
 0x9a0   : > { %12743 = vst [vmem:[%s15072_s29 + $0x58] sm:$0xff] %v9975_v58  ;;  %v9719_v61 = vadd.f32 %v9718_v40, %v9630_v15 }
 0x9a1   : > { %v9899_v6 = vpop.f32.mrf.mxu1  ;;  %9671 = vmatmul.bf16.gmra.mxu2 %v17109_v3  ;;  %9849 = vmatmul.bf16.gmra.mxu0 %v17111_v31  ;;  %v9546_v31 = vadd.f32 %v17350_v54, %v17357_v17  ;;  %v9549_v54 = vadd.f32 %v17355_v42, %v17366_v21 }
 0x9a2   : > { %v9808_v41 = vadd.f32 %v9807_v7, %v9719_v61 }
 0x9a4   : > { %v9897_v47 = vadd.f32 %v9896_v26, %v9808_v41  ;;  %9760 = vmatmul.bf16.gmra.mxu3 %v17114_v1  ;;  %9938 = vmatmul.bf16.gmra.mxu1 %v17117_v14  ;;  %v9632_v55 = vpop.f32.mrf.mxu2 }
 0x9a5   : > { %v9633_v45 = vadd.f32 %v9632_v55, %v9544_v0 }
 0x9a6   : > { %v9977_v11 = vmax.f32 %v9897_v47, 0.0  ;;  %v9812_v40 = vpop.f32.mrf.mxu0 }
 0x9a7   : > { %v9721_v58 = vpop.f32.mrf.mxu3 }
 0x9a8   : > { %12745 = vst [vmem:[%s15072_s29 + $0x78] sm:$0xff] %v9977_v11  ;;  %v9722_v61 = vadd.f32 %v9721_v58, %v9633_v45 }
 0x9a9   : > { %v9901_v2 = vpop.f32.mrf.mxu1 }
 0x9aa   : > { %v9811_v3 = vadd.f32 %v9810_v34, %v9722_v61 }
 0x9ac   : > { %v9900_v25 = vadd.f32 %v9899_v6, %v9811_v3  ;;  %v9634_v1 = vpop.f32.mrf.mxu2 }
 0x9ad   : > { %v9635_v14 = vadd.f32 %v9634_v1, %v9546_v31 }
 0x9ae   : > { %v9979_v20 = vmax.f32 %v9900_v25, 0.0  ;;  %v9815_v4 = vpop.f32.mrf.mxu0 }
 0x9af   : > { %v9723_v7 = vpop.f32.mrf.mxu3 }
 0x9b0   : > { %12747 = vst [vmem:[%s15072_s29 + $0xd8] sm:$0xff] %v9979_v20  ;;  %v9724_v28 = vadd.f32 %v9723_v7, %v9635_v14 }
 0x9b1   : > { %v9904_v24 = vpop.f32.mrf.mxu1  ;;  %9676 = vmatmul.bf16.gmra.mxu2 %v17127_v19  ;;  %9854 = vmatmul.bf16.gmra.mxu0 %v17129_v59  ;;  %v9551_v59 = vadd.f32 %v17364_v35, %v17371_v56  ;;  %v9554_v35 = vadd.f32 %v17369_v18, %v17380_v51 }
 0x9b2   : > { %v9813_v26 = vadd.f32 %v9812_v40, %v9724_v28  ;;  %v18729_v28 = vld [vmem:[#allocation145_spill] sm:$0xff] }
 0x9b4   : > { %v9902_v44 = vadd.f32 %v9901_v2, %v9813_v26  ;;  %9765 = vmatmul.bf16.gmra.mxu3 %v17132_v16  ;;  %9943 = vmatmul.bf16.gmra.mxu1 %v17135_v50  ;;  %v9637_v17 = vpop.f32.mrf.mxu2 }
 0x9b5   : > { %v9638_v60 = vadd.f32 %v9637_v17, %v9549_v54 }
 0x9b6   : > { %v9981_v5 = vmax.f32 %v9902_v44, 0.0  ;;  %v9817_v15 = vpop.f32.mrf.mxu0 }
 0x9b7   : > { %v9726_v13 = vpop.f32.mrf.mxu3 }
 0x9b8   : > { %12749 = vst [vmem:[%s15072_s29 + $0xf8] sm:$0xff] %v9981_v5  ;;  %v9727_v34 = vadd.f32 %v9726_v13, %v9638_v60 }
 0x9b9   : > { %v9906_v6 = vpop.f32.mrf.mxu1 }
 0x9ba   : > { %v9816_v19 = vadd.f32 %v9815_v4, %v9727_v34 }
 0x9bc   : > { %v9905_v41 = vadd.f32 %v9904_v24, %v9816_v19  ;;  %v9639_v16 = vpop.f32.mrf.mxu2  ;;  %v18730_v24 = vld [vmem:[#allocation146_spill] sm:$0xff] }
 0x9bd   : > { %v9640_v50 = vadd.f32 %v9639_v16, %v9551_v59 }
 0x9be   : > { %v9983_v47 = vmax.f32 %v9905_v41, 0.0  ;;  %v9820_v55 = vpop.f32.mrf.mxu0 }
 0x9bf   : > { %v9728_v0 = vpop.f32.mrf.mxu3 }
 0x9c0   : > { %12751 = vst [vmem:[%s15072_s29 + $0x158] sm:$0xff] %v9983_v47  ;;  %v9729_v42 = vadd.f32 %v9728_v0, %v9640_v50  ;;  %v18731_v47 = vld [vmem:[#allocation38_spill] sm:$0xff]  ;;  %v18732_v50 = vld [vmem:[#allocation35_spill] sm:$0xff] }
 0x9c1   : > { %v9909_v21 = vpop.f32.mrf.mxu1  ;;  %9681 = vmatmul.bf16.gmra.mxu2 %v17145_v8  ;;  %9859 = vmatmul.bf16.gmra.mxu0 %v17147_v36  ;;  %v9556_v36 = vadd.f32 %v17378_v32, %v17385_v49  ;;  %v9559_v32 = vadd.f32 %v17383_v27, %v17394_v38 }
 0x9c2   : > { %v9818_v11 = vadd.f32 %v9817_v15, %v9729_v42 }
 0x9c4   : > { %v9907_v45 = vadd.f32 %v9906_v6, %v9818_v11  ;;  %9770 = vmatmul.bf16.gmra.mxu3 %v17150_v12  ;;  %9948 = vmatmul.bf16.gmra.mxu1 %v17153_v29  ;;  %v9642_v56 = vpop.f32.mrf.mxu2 }
 0x9c5   : > { %v9643_v40 = vadd.f32 %v9642_v56, %v9554_v35 }
 0x9c6   : > { %v9985_v58 = vmax.f32 %v9907_v45, 0.0  ;;  %v9822_v2 = vpop.f32.mrf.mxu0 }
 0x9c7   : > { %v9731_v61 = vpop.f32.mrf.mxu3 }
 0x9c8   : > { %12753 = vst [vmem:[%s15072_s29 + $0x178] sm:$0xff] %v9985_v58  ;;  %v9732_v3 = vadd.f32 %v9731_v61, %v9643_v40 }
 0x9c9   : > { %v9911_v25 = vpop.f32.mrf.mxu1 }
 0x9ca   : > { %v9821_v8 = vadd.f32 %v9820_v55, %v9732_v3 }
 0x9cc   : > { %v9910_v31 = vadd.f32 %v9909_v21, %v9821_v8  ;;  %v9644_v12 = vpop.f32.mrf.mxu2 }
 0x9cd   : > { %v9645_v29 = vadd.f32 %v9644_v12, %v9556_v36 }
 0x9ce   : > { %v9987_v1 = vmax.f32 %v9910_v31, 0.0  ;;  %v9825_v14 = vpop.f32.mrf.mxu0 }
 0x9cf   : > { %v9733_v20 = vpop.f32.mrf.mxu3 }
 0x9d0   : > { %12755 = vst [vmem:[%s15072_s29 + $0x1d8] sm:$0xff] %v9987_v1  ;;  %v9734_v18 = vadd.f32 %v9733_v20, %v9645_v29 }
 0x9d1   : > { %v9914_v51 = vpop.f32.mrf.mxu1  ;;  %9686 = vmatmul.bf16.gmra.mxu2 %v17163_v30  ;;  %9864 = vmatmul.bf16.gmra.mxu0 %v17165_v63  ;;  %v9561_v63 = vadd.f32 %v17392_v37, %v17399_v43  ;;  %v9564_v37 = vadd.f32 %v17397_v46, %v17408_v22 }
 0x9d2   : > { %v9823_v7 = vadd.f32 %v9822_v2, %v9734_v18 }
 0x9d4   : > { %v9912_v4 = vadd.f32 %v9911_v25, %v9823_v7  ;;  %9775 = vmatmul.bf16.gmra.mxu3 %v18729_v28  ;;  %9953 = vmatmul.bf16.gmra.mxu1 %v18730_v24  ;;  %v9647_v49 = vpop.f32.mrf.mxu2  ;;  %v18735_v24 = vld [vmem:[#allocation40_spill] sm:$0xff] }
 0x9d5   : > { %v9648_v44 = vadd.f32 %v9647_v49, %v9559_v32  ;;  %v18736_v32 = vld [vmem:[#allocation39_spill] sm:$0xff] }
 0x9d6   : > { %v9989_v26 = vmax.f32 %v9912_v4, 0.0  ;;  %v9827_v17 = vpop.f32.mrf.mxu0 }
 0x9d7   : > { %v9736_v54 = vpop.f32.mrf.mxu3 }
 0x9d8   : > { %12757 = vst [vmem:[%s15072_s29 + $0x1f8] sm:$0xff] %v9989_v26  ;;  %v9737_v5 = vadd.f32 %v9736_v54, %v9648_v44  ;;  %v18737_v26 = vld [vmem:[#allocation37_spill] sm:$0xff]  ;;  %v18739_v54 = vld [vmem:[#allocation54_spill] sm:$0xff] }
 0x9d9   : > { %v9916_v60 = vpop.f32.mrf.mxu1  ;;  %v18738_v44 = vld [vmem:[#allocation89_spill] sm:$0xff] }
 0x9da   : > { %v9826_v30 = vadd.f32 %v9825_v14, %v9737_v5  ;;  %v18734_v14 = vld [vmem:[#allocation50_spill] sm:$0xff]  ;;  %v18740_v5 = vld [vmem:[#allocation20_spill] sm:$0xff] }
 0x9dc   : > { %v9915_v13 = vadd.f32 %v9914_v51, %v9826_v30  ;;  %v9649_v15 = vpop.f32.mrf.mxu2 }
 0x9dd   : > { %v9650_v6 = vadd.f32 %v9649_v15, %v9561_v63 }
 0x9de   : > { %v9991_v34 = vmax.f32 %v9915_v13, 0.0  ;;  %v9830_v41 = vpop.f32.mrf.mxu0 }
 0x9df   : > { %v9738_v19 = vpop.f32.mrf.mxu3 }
 0x9e0   : > { %12759 = vst [vmem:[%s15072_s29 + $0x258] sm:$0xff] %v9991_v34  ;;  %v9739_v27 = vadd.f32 %v9738_v19, %v9650_v6 }
 0x9e1   : > { %v9919_v38 = vpop.f32.mrf.mxu1  ;;  %9691 = vmatmul.bf16.gmra.mxu2 %v17187_v9  ;;  %9869 = vmatmul.bf16.gmra.mxu0 %v17189_v53  ;;  %v9566_v53 = vadd.f32 %v17406_v48, %v17413_v33  ;;  %v9569_v48 = vadd.f32 %v17411_v57, %v17422_v62 }
 0x9e2   : > { %v9828_v59 = vadd.f32 %v9827_v17, %v9739_v27  ;;  %v9574_v17 = vadd.f32 %v18739_v54, %v18738_v44  ;;  %v18741_v27 = vld [vmem:[#allocation92_spill] sm:$0xff] }
 0x9e4   : > { %v9917_v16 = vadd.f32 %v9916_v60, %v9828_v59  ;;  %9780 = vmatmul.bf16.gmra.mxu3 %v18731_v47  ;;  %9958 = vmatmul.bf16.gmra.mxu1 %v18732_v50  ;;  %v9652_v43 = vpop.f32.mrf.mxu2 }
 0x9e5   : > { %v9653_v55 = vadd.f32 %v9652_v43, %v9564_v37 }
 0x9e6   : > { %v9993_v0 = vmax.f32 %v9917_v16, 0.0  ;;  %v9832_v21 = vpop.f32.mrf.mxu0 }
 0x9e7   : > { %v9741_v42 = vpop.f32.mrf.mxu3 }
 0x9e8   : > { %12761 = vst [vmem:[%s15072_s29 + $0x278] sm:$0xff] %v9993_v0  ;;  %v9742_v11 = vadd.f32 %v9741_v42, %v9653_v55 }
 0x9e9   : > { %v9921_v45 = vpop.f32.mrf.mxu1 }
 0x9ea   : > { %v9831_v9 = vadd.f32 %v9830_v41, %v9742_v11  ;;  %v18743_v11 = vld [vmem:[#allocation73_spill] sm:$0xff] }
 0x9ec   : > { %v9920_v35 = vadd.f32 %v9919_v38, %v9831_v9  ;;  %v9654_v56 = vpop.f32.mrf.mxu2  ;;  %v18742_v38 = vld [vmem:[#allocation93_spill] sm:$0xff] }
 0x9ed   : > { %v9655_v40 = vadd.f32 %v9654_v56, %v9566_v53  ;;  %v9576_v59 = vadd.f32 %v18742_v38, %v18741_v27 }
 0x9ee   : > { %v9995_v58 = vmax.f32 %v9920_v35, 0.0  ;;  %v9835_v2 = vpop.f32.mrf.mxu0 }
 0x9ef   : > { %v9743_v61 = vpop.f32.mrf.mxu3 }
 0x9f0   : > { %12763 = vst [vmem:[%s15072_s29 + $0x2d8] sm:$0xff] %v9995_v58  ;;  %v9744_v46 = vadd.f32 %v9743_v61, %v9655_v40 }
 0x9f1   : > { %v9924_v22 = vpop.f32.mrf.mxu1  ;;  %9696 = vmatmul.bf16.gmra.mxu2 %v17210_v39  ;;  %9874 = vmatmul.bf16.gmra.mxu0 %v17212_v23  ;;  %v18733_v23 = vld [vmem:[#allocation61_spill] sm:$0xff] }
 0x9f2   : > { %v9833_v3 = vadd.f32 %v9832_v21, %v9744_v46  ;;  %v9571_v18 = vadd.f32 %v18734_v14, %v18733_v23  ;;  %v18747_v23 = vld [vmem:[#allocation96_spill] sm:$0xff] }
 0x9f3   : > { %v18748_v14 = vld [vmem:[#allocation44_spill] sm:$0xff] }
 0x9f4   : > { %v9922_v25 = vadd.f32 %v9921_v45, %v9833_v3  ;;  %9785 = vmatmul.bf16.gmra.mxu3 %v17217_v10  ;;  %9963 = vmatmul.bf16.gmra.mxu1 %v17220_v52  ;;  %v9657_v33 = vpop.f32.mrf.mxu2  ;;  %v18744_v45 = vld [vmem:[#allocation97_spill] sm:$0xff]  ;;  %v18745_v3 = vld [vmem:[#allocation43_spill] sm:$0xff] }
 0x9f5   : > { %v9658_v31 = vadd.f32 %v9657_v33, %v9569_v48  ;;  %v9579_v9 = vadd.f32 %v18744_v45, %v18743_v11 }
 0x9f6   : > { %v9997_v8 = vmax.f32 %v9922_v25, 0.0  ;;  %v9837_v12 = vpop.f32.mrf.mxu0  ;;  %v18746_v25 = vld [vmem:[#allocation69_spill] sm:$0xff] }
 0x9f7   : > { %v9746_v36 = vpop.f32.mrf.mxu3  ;;  %v9581_v48 = vadd.f32 %v18746_v25, %v18745_v3 }
 0x9f8   : > { %12765 = vst [vmem:[%s15072_s29 + $0x2f8] sm:$0xff] %v9997_v8  ;;  %v9747_v1 = vadd.f32 %v9746_v36, %v9658_v31 }
 0x9f9   : > { %v9926_v29 = vpop.f32.mrf.mxu1 }
 0x9fa   : > { %v9836_v39 = vadd.f32 %v9835_v2, %v9747_v1 }
 0x9fc   : > { %v9925_v20 = vadd.f32 %v9924_v22, %v9836_v39  ;;  %v9659_v10 = vpop.f32.mrf.mxu2 }
 0x9fd   : > { %v9660_v52 = vadd.f32 %v9659_v10, %v9571_v18  ;;  %v9584_v18 = vadd.f32 %v18748_v14, %v18747_v23 }
 0x9fe   : > { %v9999_v51 = vmax.f32 %v9925_v20, 0.0  ;;  %v9840_v4 = vpop.f32.mrf.mxu0 }
 0x9ff   : > { %v9748_v7 = vpop.f32.mrf.mxu3 }
 0xa00   : > { %12767 = vst [vmem:[%s15072_s29 + $0x358] sm:$0xff] %v9999_v51  ;;  %v9749_v57 = vadd.f32 %v9748_v7, %v9660_v52 }
 0xa01   : > { %v9929_v62 = vpop.f32.mrf.mxu1  ;;  %9701 = vmatmul.bf16.gmra.mxu2 %v18735_v24  ;;  %9879 = vmatmul.bf16.gmra.mxu0 %v18736_v32  ;;  %v18749_v32 = vld [vmem:[#allocation100_spill] sm:$0xff] }
 0xa02   : > { %v9838_v28 = vadd.f32 %v9837_v12, %v9749_v57 }
 0xa04   : > { %v9927_v49 = vadd.f32 %v9926_v29, %v9838_v28  ;;  %9790 = vmatmul.bf16.gmra.mxu3 %v18737_v26  ;;  %9968 = vmatmul.bf16.gmra.mxu1 %v18740_v5  ;;  %v9662_v60 = vpop.f32.mrf.mxu2 }
 0xa05   : > { %v9663_v13 = vadd.f32 %v9662_v60, %v9574_v17 }
 0xa06   : > { %v10001_v30 = vmax.f32 %v9927_v49, 0.0  ;;  %v9842_v15 = vpop.f32.mrf.mxu0  ;;  %v18750_v49 = vld [vmem:[#allocation101_spill] sm:$0xff] }
 0xa07   : > { %v9751_v63 = vpop.f32.mrf.mxu3  ;;  %v9586_v26 = vadd.f32 %v18750_v49, %v18749_v32 }
 0xa08   : > { %12769 = vst [vmem:[%s15072_s29 + $0x378] sm:$0xff] %v10001_v30  ;;  %v9752_v34 = vadd.f32 %v9751_v63, %v9663_v13 }
 0xa09   : > { %v9931_v6 = vpop.f32.mrf.mxu1 }
 0xa0a   : > { %v9841_v19 = vadd.f32 %v9840_v4, %v9752_v34  ;;  %v18751_v34 = vld [vmem:[#allocation46_spill] sm:$0xff] }
 0xa0c   : > { %v9930_v41 = vadd.f32 %v9929_v62, %v9841_v19  ;;  %v9664_v16 = vpop.f32.mrf.mxu2 }
 0xa0d   : > { %v9665_v50 = vadd.f32 %v9664_v16, %v9576_v59 }
 0xa0e   : > { %v10003_v47 = vmax.f32 %v9930_v41, 0.0  ;;  %v9845_v43 = vpop.f32.mrf.mxu0 }
 0xa0f   : > { %v9753_v37 = vpop.f32.mrf.mxu3 }
 0xa10   : > { %12771 = vst [vmem:[%s15072_s29 + $0x3d8] sm:$0xff] %v10003_v47  ;;  %v9754_v0 = vadd.f32 %v9753_v37, %v9665_v50 }
 0xa11   : > { %v9934_v55 = vpop.f32.mrf.mxu1 }
 0xa12   : > { %v9843_v42 = vadd.f32 %v9842_v15, %v9754_v0  ;;  %v18753_v0 = vld [vmem:[#allocation53_spill] sm:$0xff] }
 0xa14   : > { %v9932_v21 = vadd.f32 %v9931_v6, %v9843_v42  ;;  %v9667_v35 = vpop.f32.mrf.mxu2  ;;  %v18752_v6 = vld [vmem:[#allocation105_spill] sm:$0xff] }
 0xa15   : > { %v9668_v56 = vadd.f32 %v9667_v35, %v9579_v9  ;;  %v9589_v19 = vadd.f32 %v18752_v6, %v18751_v34 }
 0xa16   : > { %v10005_v53 = vmax.f32 %v9932_v21, 0.0  ;;  %v9847_v40 = vpop.f32.mrf.mxu0 }
 0xa17   : > { %v9756_v58 = vpop.f32.mrf.mxu3 }
 0xa18   : > { %12773 = vst [vmem:[%s15072_s29 + $0x3f8] sm:$0xff] %v10005_v53  ;;  %v9757_v61 = vadd.f32 %v9756_v58, %v9668_v56 }
 0xa19   : > { %v9936_v2 = vpop.f32.mrf.mxu1 }
 0xa1a   : > { %v9846_v46 = vadd.f32 %v9845_v43, %v9757_v61  ;;  %v18755_v61 = vld [vmem:[#allocation104_spill] sm:$0xff] }
 0xa1c   : > { %v9935_v22 = vadd.f32 %v9934_v55, %v9846_v46  ;;  %v9669_v33 = vpop.f32.mrf.mxu2  ;;  %v18754_v55 = vld [vmem:[#allocation47_spill] sm:$0xff] }
 0xa1d   : > { %v9670_v31 = vadd.f32 %v9669_v33, %v9581_v48  ;;  %v9591_v42 = vadd.f32 %v18754_v55, %v18753_v0 }
 0xa1e   : > { %v10007_v8 = vmax.f32 %v9935_v22, 0.0  ;;  %v9850_v12 = vpop.f32.mrf.mxu0 }
 0xa1f   : > { %v9758_v36 = vpop.f32.mrf.mxu3 }
 0xa20   : > { %12775 = vst [vmem:[%s15072_s29 + $0x458] sm:$0xff] %v10007_v8  ;;  %v9759_v1 = vadd.f32 %v9758_v36, %v9670_v31 }
 0xa21   : > { %v9939_v29 = vpop.f32.mrf.mxu1 }
 0xa22   : > { %v9848_v39 = vadd.f32 %v9847_v40, %v9759_v1  ;;  %v18757_v1 = vld [vmem:[#allocation108_spill] sm:$0xff] }
 0xa24   : > { %v9937_v20 = vadd.f32 %v9936_v2, %v9848_v39  ;;  %v9672_v10 = vpop.f32.mrf.mxu2  ;;  %v18756_v2 = vld [vmem:[#allocation49_spill] sm:$0xff] }
 0xa25   : > { %v9673_v52 = vadd.f32 %v9672_v10, %v9584_v18  ;;  %v9594_v46 = vadd.f32 %v18756_v2, %v18755_v61 }
 0xa26   : > { %v10009_v51 = vmax.f32 %v9937_v20, 0.0  ;;  %v9852_v4 = vpop.f32.mrf.mxu0 }
 0xa27   : > { %v9761_v7 = vpop.f32.mrf.mxu3 }
 0xa28   : > { %12777 = vst [vmem:[%s15072_s29 + $0x478] sm:$0xff] %v10009_v51  ;;  %v9762_v57 = vadd.f32 %v9761_v7, %v9673_v52 }
 0xa29   : > { %v9941_v62 = vpop.f32.mrf.mxu1 }
 0xa2a   : > { %v9851_v28 = vadd.f32 %v9850_v12, %v9762_v57  ;;  %v18759_v57 = vld [vmem:[#allocation56_spill] sm:$0xff] }
 0xa2c   : > { %v9940_v24 = vadd.f32 %v9939_v29, %v9851_v28  ;;  %v9674_v44 = vpop.f32.mrf.mxu2  ;;  %v18758_v29 = vld [vmem:[#allocation109_spill] sm:$0xff] }
 0xa2d   : > { %v9675_v17 = vadd.f32 %v9674_v44, %v9586_v26  ;;  %v9596_v39 = vadd.f32 %v18758_v29, %v18757_v1 }
 0xa2e   : > { %v10011_v54 = vmax.f32 %v9940_v24, 0.0  ;;  %v9855_v60 = vpop.f32.mrf.mxu0 }
 0xa2f   : > { %v9763_v5 = vpop.f32.mrf.mxu3 }
 0xa30   : > { %12779 = vst [vmem:[%s15072_s29 + $0x4d8] sm:$0xff] %v10011_v54  ;;  %v9764_v30 = vadd.f32 %v9763_v5, %v9675_v17 }
 0xa31   : > { %v9944_v13 = vpop.f32.mrf.mxu1 }
 0xa32   : > { %v9853_v63 = vadd.f32 %v9852_v4, %v9764_v30  ;;  %v18761_v30 = vld [vmem:[#allocation17_spill] sm:$0xff] }
 0xa34   : > { %v9942_v15 = vadd.f32 %v9941_v62, %v9853_v63  ;;  %v9677_v41 = vpop.f32.mrf.mxu2  ;;  %v18760_v62 = vld [vmem:[#allocation113_spill] sm:$0xff] }
 0xa35   : > { %v9678_v38 = vadd.f32 %v9677_v41, %v9589_v19  ;;  %v9599_v28 = vadd.f32 %v18760_v62, %v18759_v57 }
 0xa36   : > { %v10013_v27 = vmax.f32 %v9942_v15, 0.0  ;;  %v9857_v16 = vpop.f32.mrf.mxu0 }
 0xa37   : > { %v9766_v59 = vpop.f32.mrf.mxu3 }
 0xa38   : > { %12781 = vst [vmem:[%s15072_s29 + $0x4f8] sm:$0xff] %v10013_v27  ;;  %v9767_v47 = vadd.f32 %v9766_v59, %v9678_v38 }
 0xa39   : > { %v9946_v50 = vpop.f32.mrf.mxu1 }
 0xa3a   : > { %v9856_v37 = vadd.f32 %v9855_v60, %v9767_v47  ;;  %v18763_v47 = vld [vmem:[#allocation112_spill] sm:$0xff] }
 0xa3c   : > { %v9945_v43 = vadd.f32 %v9944_v13, %v9856_v37  ;;  %v9679_v21 = vpop.f32.mrf.mxu2  ;;  %v18762_v13 = vld [vmem:[#allocation52_spill] sm:$0xff] }
 0xa3d   : > { %v9680_v45 = vadd.f32 %v9679_v21, %v9591_v42  ;;  %v9601_v63 = vadd.f32 %v18762_v13, %v18761_v30 }
 0xa3e   : > { %v10015_v11 = vmax.f32 %v9945_v43, 0.0  ;;  %v9860_v35 = vpop.f32.mrf.mxu0 }
 0xa3f   : > { %v9768_v9 = vpop.f32.mrf.mxu3 }
 0xa40   : > { %12783 = vst [vmem:[%s15072_s29 + $0x558] sm:$0xff] %v10015_v11  ;;  %v9769_v53 = vadd.f32 %v9768_v9, %v9680_v45 }
 0xa41   : > { %v9949_v56 = vpop.f32.mrf.mxu1 }
 0xa42   : > { %v9858_v58 = vadd.f32 %v9857_v16, %v9769_v53  ;;  %v18766_v53 = vld [vmem:[#allocation117_spill] sm:$0xff] }
 0xa44   : > { %v9947_v40 = vadd.f32 %v9946_v50, %v9858_v58  ;;  %v9682_v22 = vpop.f32.mrf.mxu2  ;;  %v18764_v50 = vld [vmem:[#allocation55_spill] sm:$0xff] }
 0xa45   : > { %v9683_v25 = vadd.f32 %v9682_v22, %v9594_v46  ;;  %v9604_v37 = vadd.f32 %v18764_v50, %v18763_v47 }
 0xa46   : > { %v10017_v3 = vmax.f32 %v9947_v40, 0.0  ;;  %v9862_v33 = vpop.f32.mrf.mxu0 }
 0xa47   : > { %v9771_v48 = vpop.f32.mrf.mxu3 }
 0xa48   : > { %12785 = vst [vmem:[%s15072_s29 + $0x578] sm:$0xff] %v10017_v3  ;;  %v9772_v8 = vadd.f32 %v9771_v48, %v9683_v25  ;;  %v18767_v48 = vld [vmem:[#allocation57_spill] sm:$0xff] }
 0xa49   : > { %v9951_v31 = vpop.f32.mrf.mxu1 }
 0xa4a   : > { %v9861_v36 = vadd.f32 %v9860_v35, %v9772_v8  ;;  %v18765_v35 = vld [vmem:[#allocation116_spill] sm:$0xff] }
 0xa4c   : > { %v9950_v12 = vadd.f32 %v9949_v56, %v9861_v36  ;;  %v9684_v20 = vpop.f32.mrf.mxu2  ;;  %v9606_v56 = vadd.f32 %v18766_v53, %v18765_v35 }
 0xa4d   : > { %v9685_v14 = vadd.f32 %v9684_v20, %v9596_v39 }
 0xa4e   : > { %v10019_v23 = vmax.f32 %v9950_v12, 0.0  ;;  %v9865_v10 = vpop.f32.mrf.mxu0 }
 0xa4f   : > { %v9773_v18 = vpop.f32.mrf.mxu3 }
 0xa50   : > { %12787 = vst [vmem:[%s15072_s29 + $0x5d8] sm:$0xff] %v10019_v23  ;;  %v9774_v51 = vadd.f32 %v9773_v18, %v9685_v14  ;;  %v18769_v18 = vld [vmem:[#allocation19_spill] sm:$0xff] }
 0xa51   : > { %v9954_v52 = vpop.f32.mrf.mxu1 }
 0xa52   : > { %v9863_v7 = vadd.f32 %v9862_v33, %v9774_v51  ;;  %v18768_v33 = vld [vmem:[#allocation121_spill] sm:$0xff] }
 0xa53   : > { %v9609_v8 = vadd.f32 %v18768_v33, %v18767_v48 }
 0xa54   : > { %v9952_v4 = vadd.f32 %v9951_v31, %v9863_v7  ;;  %v9687_v24 = vpop.f32.mrf.mxu2 }
 0xa55   : > { %v9688_v49 = vadd.f32 %v9687_v24, %v9599_v28 }
 0xa56   : > { %v10021_v32 = vmax.f32 %v9952_v4, 0.0  ;;  %v9867_v44 = vpop.f32.mrf.mxu0 }
 0xa57   : > { %v9776_v26 = vpop.f32.mrf.mxu3 }
 0xa58   : > { %12789 = vst [vmem:[%s15072_s29 + $0x5f8] sm:$0xff] %v10021_v32  ;;  %v9777_v54 = vadd.f32 %v9776_v26, %v9688_v49  ;;  %v18771_v26 = vld [vmem:[#allocation120_spill] sm:$0xff] }
 0xa59   : > { %v9956_v17 = vpop.f32.mrf.mxu1 }
 0xa5a   : > { %v9866_v5 = vadd.f32 %v9865_v10, %v9777_v54  ;;  %v18770_v10 = vld [vmem:[#allocation58_spill] sm:$0xff] }
 0xa5b   : > { %v9611_v51 = vadd.f32 %v18770_v10, %v18769_v18 }
 0xa5c   : > { %v9955_v60 = vadd.f32 %v9954_v52, %v9866_v5  ;;  %v9689_v15 = vpop.f32.mrf.mxu2 }
 0xa5d   : > { %v9690_v6 = vadd.f32 %v9689_v15, %v9601_v63 }
 0xa5e   : > { %v10023_v34 = vmax.f32 %v9955_v60, 0.0  ;;  %v9870_v27 = vpop.f32.mrf.mxu0 }
 0xa5f   : > { %v9778_v19 = vpop.f32.mrf.mxu3 }
 0xa60   : > { %12791 = vst [vmem:[%s15072_s29 + $0x658] sm:$0xff] %v10023_v34  ;;  %v9779_v41 = vadd.f32 %v9778_v19, %v9690_v6  ;;  %v18773_v19 = vld [vmem:[#allocation129_spill] sm:$0xff] }
 0xa61   : > { %v9959_v59 = vpop.f32.mrf.mxu1 }
 0xa62   : > { %v9868_v38 = vadd.f32 %v9867_v44, %v9779_v41  ;;  %v18772_v44 = vld [vmem:[#allocation18_spill] sm:$0xff]  ;;  %v18774_v41 = vld [vmem:[#allocation125_spill] sm:$0xff] }
 0xa63   : > { %v9614_v54 = vadd.f32 %v18772_v44, %v18771_v26 }
 0xa64   : > { %v9957_v16 = vadd.f32 %v9956_v17, %v9868_v38  ;;  %v9692_v43 = vpop.f32.mrf.mxu2 }
 0xa65   : > { %v9693_v55 = vadd.f32 %v9692_v43, %v9604_v37 }
 0xa66   : > { %v10025_v0 = vmax.f32 %v9957_v16, 0.0  ;;  %v9872_v45 = vpop.f32.mrf.mxu0 }
 0xa67   : > { %v9781_v42 = vpop.f32.mrf.mxu3 }
 0xa68   : > { %12793 = vst [vmem:[%s15072_s29 + $0x678] sm:$0xff] %v10025_v0  ;;  %v9782_v21 = vadd.f32 %v9781_v42, %v9693_v55 }
 0xa69   : > { %v9961_v58 = vpop.f32.mrf.mxu1 }
 0xa6a   : > { %v9871_v11 = vadd.f32 %v9870_v27, %v9782_v21  ;;  %v9616_v27 = vadd.f32 %v18774_v41, %v18773_v19 }
 0xa6c   : > { %v9960_v9 = vadd.f32 %v9959_v59, %v9871_v11  ;;  %v9694_v40 = vpop.f32.mrf.mxu2 }
 0xa6d   : > { %v9695_v2 = vadd.f32 %v9694_v40, %v9606_v56 }
 0xa6e   : > { %v10027_v61 = vmax.f32 %v9960_v9, 0.0  ;;  %v9875_v31 = vpop.f32.mrf.mxu0 }
 0xa6f   : > { %v9783_v46 = vpop.f32.mrf.mxu3 }
 0xa70   : > { %12795 = vst [vmem:[%s15072_s29 + $0x6d8] sm:$0xff] %v10027_v61  ;;  %v9784_v22 = vadd.f32 %v9783_v46, %v9695_v2 }
 0xa71   : > { %v9964_v29 = vpop.f32.mrf.mxu1 }
 0xa72   : > { %v9873_v3 = vadd.f32 %v9872_v45, %v9784_v22 }
 0xa74   : > { %v9962_v25 = vadd.f32 %v9961_v58, %v9873_v3  ;;  %v9697_v36 = vpop.f32.mrf.mxu2 }
 0xa75   : > { %v9698_v1 = vadd.f32 %v9697_v36, %v9609_v8 }
 0xa76   : > { %v10029_v12 = vmax.f32 %v9962_v25, 0.0  ;;  %v9877_v57 = vpop.f32.mrf.mxu0 }
 0xa77   : > { %v9786_v39 = vpop.f32.mrf.mxu3 }
 0xa78   : > { %12797 = vst [vmem:[%s15072_s29 + $0x6f8] sm:$0xff] %v10029_v12  ;;  %v9787_v20 = vadd.f32 %v9786_v39, %v9698_v1 }
 0xa79   : > { %v9966_v24 = vpop.f32.mrf.mxu1 }
 0xa7a   : > { %v9876_v23 = vadd.f32 %v9875_v31, %v9787_v20 }
 0xa7c   : > { %v9965_v14 = vadd.f32 %v9964_v29, %v9876_v23  ;;  %v9699_v52 = vpop.f32.mrf.mxu2 }
 0xa7d   : > { %v9700_v4 = vadd.f32 %v9699_v52, %v9611_v51 }
 0xa7e   : > { %v10031_v7 = vmax.f32 %v9965_v14, 0.0  ;;  %v9880_v30 = vpop.f32.mrf.mxu0 }
 0xa7f   : > { %v9788_v62 = vpop.f32.mrf.mxu3 }
 0xa80   : > { %12799 = vst [vmem:[%s15072_s29 + $0x758] sm:$0xff] %v10031_v7  ;;  %v9789_v28 = vadd.f32 %v9788_v62, %v9700_v4 }
 0xa81   : > { %v9969_v15 = vpop.f32.mrf.mxu1 }
 0xa82   : > { %v9878_v32 = vadd.f32 %v9877_v57, %v9789_v28 }
 0xa84   : > { %v9967_v49 = vadd.f32 %v9966_v24, %v9878_v32  ;;  %v9702_v17 = vpop.f32.mrf.mxu2 }
 0xa85   : > { %v9703_v60 = vadd.f32 %v9702_v17, %v9614_v54 }
 0xa86   : > { %v10033_v5 = vmax.f32 %v9967_v49, 0.0  ;;  %v9882_v37 = vpop.f32.mrf.mxu0 }
 0xa87   : > { %v9791_v13 = vpop.f32.mrf.mxu3 }
 0xa88   : > { %12801 = vst [vmem:[%s15072_s29 + $0x778] sm:$0xff] %v10033_v5  ;;  %v9792_v63 = vadd.f32 %v9791_v13, %v9703_v60 }
 0xa89   : > { %v9971_v0 = vpop.f32.mrf.mxu1 }
 0xa8a   : > { %v9881_v34 = vadd.f32 %v9880_v30, %v9792_v63 }
 0xa8c   : > { %v9970_v6 = vadd.f32 %v9969_v15, %v9881_v34  ;;  %v9704_v38 = vpop.f32.mrf.mxu2 }
 0xa8d   : > { %v9705_v16 = vadd.f32 %v9704_v38, %v9616_v27 }
 0xa8e   : > { %v10035_v59 = vmax.f32 %v9970_v6, 0.0 }
 0xa8f   : > { %v9793_v47 = vpop.f32.mrf.mxu3 }
 0xa90   : > { %12803 = vst [vmem:[%s15072_s29 + $0x7d8] sm:$0xff] %v10035_v59  ;;  %v9794_v50 = vadd.f32 %v9793_v47, %v9705_v16 }
 0xa92   : > { %v9883_v43 = vadd.f32 %v9882_v37, %v9794_v50 }
 0xa94   : > { %v9972_v55 = vadd.f32 %v9971_v0, %v9883_v43 }
 0xa96   : > { %v10037_v42 = vmax.f32 %v9972_v55, 0.0 }
 0xa98   : > { %12805 = vst [vmem:[%s15072_s29 + $0x7f8] sm:$0xff] %v10037_v42 }
 0xa99   : > { %13742 = shalt.err (!%p13739_p10)
}
 0xa9a   : > { %s13801_s26 = smov 512   ;;  %s13802_s24 = smov 32  }
 0xa9b   : > { %13455 = dma.vmem_to_hbm [thread:$0]  (%p13917_p3), %s10116_s7, 32768, %s10118_s15, %s10103_s22, %s13801_s26, %s13801_s26, %s13802_s24  }
 0xa9c PF: > { %s10132_s29 = sand.u32 1, %s13777_s18   ;;  %p18775_p12 = scmp.ge.s32.totalorder %s13789_s21, 2 }
 0xa9d   : > { %s10133_s27 = scalar_lea.sflag [#allocation5], %s10132_s29 }
 0xa9e   : > { %p13475_p13 = pnand %p18775_p12, %p13868_p6 }
 0xaa0   : > { %p13476_p0 = pneg %p13475_p13 }
 0xaa2   : > { %13772 = dma.done.wait (%p13476_p0), %s10133_s27, 32768  }
 0xaa3   : > { %13774 = vsyncadd (%p13476_p0), %s10133_s27, 4294934528  ;;  %p20_p5 = scmp.ge.s32.totalorder %s13907_s9, 4   ;;  %s18776_s18 = smov %s13781_s19 }
 0xaa4   : > { %s18777_s19 = smov %s13785_s20  ;;  %s18778_s20 = smov %s13923_s13 }
 0xaa5   : > { %s18779_s21 = smov %s13907_s9  ;;  %22 = sbr.rel (!%p20_p5) target bundleno = 7 (0x7), region = 102 }
 0xaaa   :  { %10139 = vsyncpa [#allocation4], 1 }
 0xaab   :  { %10141 = vsyncpa [#allocation4 + $0x1], 1 }
 0xaac   :  { %10142 = vsyncpa [#allocation7], 1 }
 0xaad   :  { %10143 = vsyncpa [#allocation10], 1 }
 0xaae   :  { %10144 = vsyncpa [#allocation5], 1 }
 0xaaf   :  { %10146 = vsyncpa [#allocation5 + $0x1], 1 }

</bundles_post_ra>
